<compile_context>
chip_gen: v6e
topology: v6e:2x2x1
jax: 0.10.0
libtpu: 0.0.40
codegen_flags: <defaults>
</compile_context>

<pallas_src>
import functools

import jax
import jax.numpy as jnp
from jax import lax
from jax.experimental import pallas as pl
from jax.experimental.pallas import tpu as pltpu

BN_EPS = 1e-5
VMEM_LIMIT = 48 * 1024 * 1024  # <= v7x 64 MiB VMEM per TensorCore


# ----------------------------------------------------------------------------
# Pallas kernels
# ----------------------------------------------------------------------------
def _mm_kernel(a_ref, b_ref, s_ref, bi_ref, o_ref, acc_ref, *, relu, nk):
    # fused: (A @ B) * scale + bias  [+ ReLU], K tiled with f32 accumulator.
    k = pl.program_id(2)

    @pl.when(k == 0)
    def _():
        acc_ref[...] = jnp.zeros_like(acc_ref)

    acc_ref[...] += jnp.dot(a_ref[...], b_ref[...],
                            preferred_element_type=jnp.float32)

    @pl.when(k == nk - 1)
    def _():
        y = acc_ref[...] * s_ref[...] + bi_ref[...]
        if relu:
            y = jnp.maximum(y, 0.0)
        o_ref[...] = y.astype(o_ref.dtype)


def _mm_res_kernel(a_ref, b_ref, s_ref, bi_ref, r_ref, o_ref, acc_ref, *, relu, nk):
    # fused: (A @ B) * scale + bias + residual  [+ ReLU], K tiled.
    k = pl.program_id(2)

    @pl.when(k == 0)
    def _():
        acc_ref[...] = jnp.zeros_like(acc_ref)

    acc_ref[...] += jnp.dot(a_ref[...], b_ref[...],
                            preferred_element_type=jnp.float32)

    @pl.when(k == nk - 1)
    def _():
        y = acc_ref[...] * s_ref[...] + bi_ref[...] + r_ref[...].astype(jnp.float32)
        if relu:
            y = jnp.maximum(y, 0.0)
        o_ref[...] = y.astype(o_ref.dtype)


def _maxpool_kernel(x_ref, o_ref):
    # x_ref: (9, tm, C) -> max over the 9 taps
    o_ref[...] = jnp.max(x_ref[...], axis=0)


def _avgpool_kernel(x_ref, o_ref):
    # x_ref: (tb, HW, C) -> f32 mean over spatial
    o_ref[...] = jnp.mean(x_ref[...].astype(jnp.float32), axis=1).astype(o_ref.dtype)


def _heads_kernel(f_ref, w1_ref, b1_ref, w2_ref, b2_ref, w3_ref, b3_ref,
                  pen_ref, logit_ref):
    # One head per grid step: Linear+ReLU, Linear+ReLU, Linear (padded-lane logits).
    f = f_ref[...].astype(jnp.bfloat16)                       # (B, 512)
    h1 = jnp.dot(f, w1_ref[0], preferred_element_type=jnp.float32) + b1_ref[0]
    h1 = jnp.maximum(h1, 0.0)
    h2 = jnp.dot(h1.astype(jnp.bfloat16), w2_ref[0],
                 preferred_element_type=jnp.float32) + b2_ref[0]
    h2 = jnp.maximum(h2, 0.0)
    pen_ref[0] = h2.astype(pen_ref.dtype)                     # input to last Linear
    lg = jnp.dot(h2.astype(jnp.bfloat16), w3_ref[0],
                 preferred_element_type=jnp.float32) + b3_ref[0]
    logit_ref[0] = lg.astype(logit_ref.dtype)


# ----------------------------------------------------------------------------
# Pallas wrappers
# ----------------------------------------------------------------------------
def _pick_dim(dim, align, cap):
    """Largest tile <= cap that is a multiple of `align` and divides `dim`,
    else the full dim (allowed: block equal to array dim)."""
    if dim <= cap:
        return dim
    for t in range(cap, align - 1, -align):
        if dim % t == 0:
            return t
    return dim


def _pick_tiles(M, K, N):
    tm = _pick_dim(M, 8, 512)
    tn = _pick_dim(N, 128, 256)
    tk = _pick_dim(K, 128, 512)
    return tm, tn, tk


def fused_matmul(a, b, scale, bias, residual=None, relu=False,
                 out_dtype=jnp.float32):
    """out = relu_opt((a @ b) * scale + bias [+ residual]).  a:(M,K) b:(K,N).
    bf16 MXU inputs, f32 accumulate, tiled over (M, N, K)."""
    M, K = a.shape
    _, N = b.shape
    tm, tn, tk = _pick_tiles(M, K, N)
    nk = K // tk
    grid = (M // tm, N // tn, nk)

    scale2 = scale.reshape(1, N).astype(jnp.float32)
    bias2 = bias.reshape(1, N).astype(jnp.float32)

    in_specs = [
        pl.BlockSpec((tm, tk), lambda i, j, k: (i, k)),
        pl.BlockSpec((tk, tn), lambda i, j, k: (k, j)),
        pl.BlockSpec((1, tn), lambda i, j, k: (0, j)),
        pl.BlockSpec((1, tn), lambda i, j, k: (0, j)),
    ]
    args = [a.astype(jnp.bfloat16), b.astype(jnp.bfloat16), scale2, bias2]
    if residual is not None:
        in_specs.append(pl.BlockSpec((tm, tn), lambda i, j, k: (i, j)))
        args.append(residual.astype(jnp.bfloat16))
        kernel = functools.partial(_mm_res_kernel, relu=relu, nk=nk)
    else:
        kernel = functools.partial(_mm_kernel, relu=relu, nk=nk)

    return pl.pallas_call(
        kernel,
        out_shape=jax.ShapeDtypeStruct((M, N), out_dtype),
        grid=grid,
        in_specs=in_specs,
        out_specs=pl.BlockSpec((tm, tn), lambda i, j, k: (i, j)),
        scratch_shapes=[pltpu.VMEM((tm, tn), jnp.float32)],
        compiler_params=pltpu.CompilerParams(
            dimension_semantics=("parallel", "parallel", "arbitrary"),
            vmem_limit_bytes=VMEM_LIMIT,
        ),
    )(*args)


def _im2col(x, kh, kw, stride, pad):
    """x: (B,H,W,C) NHWC bf16 -> patches (B*OH*OW, KH*KW*C) in (kh,kw,cin) order."""
    B, H, W, C = x.shape
    xp = jnp.pad(x, ((0, 0), (pad, pad), (pad, pad), (0, 0)), constant_values=0.0)
    Hp, Wp = H + 2 * pad, W + 2 * pad
    oh = (Hp - kh) // stride + 1
    ow = (Wp - kw) // stride + 1
    cols = []
    for i in range(kh):
        for j in range(kw):
            patch = lax.slice(
                xp,
                (0, i, j, 0),
                (B, i + stride * (oh - 1) + 1, j + stride * (ow - 1) + 1, C),
                (1, stride, stride, 1),
            )  # (B, oh, ow, C)
            cols.append(patch)
    patches = jnp.stack(cols, axis=3)  # (B, oh, ow, kh*kw, C)
    return patches.reshape(B * oh * ow, kh * kw * C), oh, ow


def conv_bn(x, w, bn, stride, pad, relu=True, residual=None,
            out_dtype=jnp.bfloat16):
    """Conv (no bias) + eval-mode BN folded into the matmul epilogue [+res][+ReLU]."""
    kh, kw, cin, cout = w.shape
    patches, oh, ow = _im2col(x.astype(jnp.bfloat16), kh, kw, stride, pad)
    scale = bn["gamma"] / jnp.sqrt(bn["var"] + BN_EPS)
    shift = bn["beta"] - bn["mean"] * scale
    res_flat = None if residual is None else residual.reshape(-1, cout)
    out = fused_matmul(patches, w.reshape(kh * kw * cin, cout),
                       scale, shift, residual=res_flat, relu=relu,
                       out_dtype=out_dtype)
    return out.reshape(x.shape[0], oh, ow, cout)


def maxpool3x3_s2_p1(x):
    """MaxPool2d(kernel=3, stride=2, padding=1), NHWC, tiled over rows."""
    B, H, W, C = x.shape
    neg = float(jnp.finfo(x.dtype).min)
    xp = jnp.pad(x, ((0, 0), (1, 1), (1, 1), (0, 0)), constant_values=neg)
    oh = (H + 2 - 3) // 2 + 1
    ow = (W + 2 - 3) // 2 + 1
    cols = []
    for i in range(3):
        for j in range(3):
            cols.append(lax.slice(
                xp, (0, i, j, 0),
                (B, i + 2 * (oh - 1) + 1, j + 2 * (ow - 1) + 1, C),
                (1, 2, 2, 1)))
    nrows = B * oh * ow
    stacked = jnp.stack(cols, axis=0).reshape(9, nrows, C)
    tm = _pick_dim(nrows, 8, 1024)
    out = pl.pallas_call(
        _maxpool_kernel,
        out_shape=jax.ShapeDtypeStruct((nrows, C), x.dtype),
        grid=(nrows // tm,),
        in_specs=[pl.BlockSpec((9, tm, C), lambda i: (0, i, 0))],
        out_specs=pl.BlockSpec((tm, C), lambda i: (i, 0)),
        compiler_params=pltpu.CompilerParams(
            dimension_semantics=("parallel",)),
    )(stacked)
    return out.reshape(B, oh, ow, C)


def global_avgpool(x):
    """AdaptiveAvgPool2d((1,1)) + flatten, NHWC -> (B, C) f32, tiled over batch."""
    B, H, W, C = x.shape
    xr = x.reshape(B, H * W, C)
    tb = 8 if (B % 8 == 0) else B
    return pl.pallas_call(
        _avgpool_kernel,
        out_shape=jax.ShapeDtypeStruct((B, C), jnp.float32),
        grid=(B // tb,),
        in_specs=[pl.BlockSpec((tb, H * W, C), lambda i: (i, 0, 0))],
        out_specs=pl.BlockSpec((tb, C), lambda i: (i, 0)),
        compiler_params=pltpu.CompilerParams(
            dimension_semantics=("parallel",)),
    )(xr)


def heads_forward(feats, heads):
    """All MLP heads in one pallas_call: grid over heads, 3 fused stages in-kernel."""
    nheads = len(heads)
    B, F = feats.shape
    dh = heads[0]["w1"].shape[1]                      # 128
    nc = heads[0]["w3"].shape[1]
    npad = max(128, ((nc + 127) // 128) * 128)        # lane-dense logits

    w1s = jnp.stack([h["w1"] for h in heads]).astype(jnp.bfloat16)           # (H,512,128)
    b1s = jnp.stack([h["b1"].reshape(1, -1) for h in heads]).astype(jnp.float32)
    w2s = jnp.stack([h["w2"] for h in heads]).astype(jnp.bfloat16)           # (H,128,128)
    b2s = jnp.stack([h["b2"].reshape(1, -1) for h in heads]).astype(jnp.float32)
    w3s = jnp.stack([jnp.pad(h["w3"], ((0, 0), (0, npad - nc)))
                     for h in heads]).astype(jnp.bfloat16)                   # (H,128,npad)
    b3s = jnp.stack([jnp.pad(h["b3"], (0, npad - nc)).reshape(1, -1)
                     for h in heads]).astype(jnp.float32)

    pen, logits = pl.pallas_call(
        _heads_kernel,
        out_shape=(jax.ShapeDtypeStruct((nheads, B, dh), jnp.float32),
                   jax.ShapeDtypeStruct((nheads, B, npad), jnp.float32)),
        grid=(nheads,),
        in_specs=[
            pl.BlockSpec((B, F), lambda h: (0, 0)),
            pl.BlockSpec((1, F, dh), lambda h: (h, 0, 0)),
            pl.BlockSpec((1, 1, dh), lambda h: (h, 0, 0)),
            pl.BlockSpec((1, dh, dh), lambda h: (h, 0, 0)),
            pl.BlockSpec((1, 1, dh), lambda h: (h, 0, 0)),
            pl.BlockSpec((1, dh, npad), lambda h: (h, 0, 0)),
            pl.BlockSpec((1, 1, npad), lambda h: (h, 0, 0)),
        ],
        out_specs=(pl.BlockSpec((1, B, dh), lambda h: (h, 0, 0)),
                   pl.BlockSpec((1, B, npad), lambda h: (h, 0, 0))),
        compiler_params=pltpu.CompilerParams(
            dimension_semantics=("parallel",)),
    )(feats, w1s, b1s, w2s, b2s, w3s, b3s)

    outs = [logits[h, :, :nc] for h in range(nheads)]
    penults = [pen[h] for h in range(nheads)]
    return outs, penults


# ----------------------------------------------------------------------------
# ResNet-18 backbone + heads
# ----------------------------------------------------------------------------
def _basic_block(x, p, stride):
    if "down_w" in p:
        identity = conv_bn(x, p["down_w"], p["down_bn"], stride, 0, relu=False)
    else:
        identity = x
    out = conv_bn(x, p["w1"], p["bn1"], stride, 1, relu=True)
    # bn2(conv2(out)) + identity, then ReLU -- all fused in one Pallas matmul
    out = conv_bn(out, p["w2"], p["bn2"], 1, 1, relu=True, residual=identity)
    return out


def resnet18_features(x_nchw, params):
    x = jnp.transpose(x_nchw, (0, 2, 3, 1)).astype(jnp.bfloat16)  # NCHW -> NHWC bf16
    x = conv_bn(x, params["conv1_w"], params["bn1"], stride=2, pad=3, relu=True)
    x = maxpool3x3_s2_p1(x)
    for li, layer in enumerate(params["layers"]):
        for bi, block in enumerate(layer):
            stride = 2 if (li > 0 and bi == 0) else 1
            x = _basic_block(x, block, stride)
    return global_avgpool(x)  # (B, 512) f32


@jax.jit
def _forward(params, x_nchw):
    feats = resnet18_features(x_nchw, params)
    outs, penults = heads_forward(feats, params["heads"])
    return outs, penults


# ----------------------------------------------------------------------------
# Deterministic parameter init (synthetic; shapes match torchvision resnet18)
# ----------------------------------------------------------------------------
def init_params(key, n_classes, n_heads):
    keys = iter(jax.random.split(key, 64))

    def conv_w(kh, kw, cin, cout):
        std = (2.0 / (kh * kw * cin)) ** 0.5
        return jax.random.normal(next(keys), (kh, kw, cin, cout), jnp.float32) * std

    def lin_w(fin, fout):
        std = (2.0 / fin) ** 0.5
        return jax.random.normal(next(keys), (fin, fout), jnp.float32) * std

    def bn(c):
        return dict(gamma=jnp.ones((c,), jnp.float32),
                    beta=jnp.zeros((c,), jnp.float32),
                    mean=jnp.zeros((c,), jnp.float32),
                    var=jnp.ones((c,), jnp.float32))

    params = {"conv1_w": conv_w(7, 7, 3, 64), "bn1": bn(64)}
    layers, cin = [], 64
    for cout, nblocks in ((64, 2), (128, 2), (256, 2), (512, 2)):
        blocks = []
        for b in range(nblocks):
            stride = 2 if (cout != 64 and b == 0) else 1
            bp = {"w1": conv_w(3, 3, cin, cout), "bn1": bn(cout),
                  "w2": conv_w(3, 3, cout, cout), "bn2": bn(cout)}
            if stride != 1 or cin != cout:
                bp["down_w"] = conv_w(1, 1, cin, cout)
                bp["down_bn"] = bn(cout)
            blocks.append(bp)
            cin = cout
        layers.append(blocks)
    params["layers"] = layers

    heads = []
    for _ in range(n_heads):
        heads.append({"w1": lin_w(512, 128), "b1": jnp.zeros((128,), jnp.float32),
                      "w2": lin_w(128, 128), "b2": jnp.zeros((128,), jnp.float32),
                      "w3": lin_w(128, n_classes),
                      "b3": jnp.zeros((n_classes,), jnp.float32)})
    params["heads"] = heads
    return params


class MultiheadResNet18Pallas:
    """JAX/Pallas counterpart of the PyTorch MultiheadResNet18 module."""

    def __init__(self, n_classes, n_heads=1, key=None):
        key = jax.random.PRNGKey(0) if key is None else key
        self.n_classes = n_classes
        self.n_heads = n_heads
        self.params = init_params(key, n_classes, n_heads)
        self.penultimate_features = {}

    def __call__(self, x_nchw):
        outs, penults = _forward(self.params, x_nchw)
        for idx, p in enumerate(penults):
            self.penultimate_features[idx] = p
        return outs

    def get_features(self):
        return self.penultimate_features


# ----------------------------------------------------------------------------
if __name__ == "__main__":
    key = jax.random.PRNGKey(0)
    model = MultiheadResNet18Pallas(n_classes=10, n_heads=2, key=key)

    # Small deterministic input, NCHW like PyTorch: batch=2, 3 channels, 32x32.
    x = jax.random.normal(jax.random.fold_in(key, 1), (2, 3, 32, 32), jnp.float32)

    outs = model(x)
    for o in outs:
        jax.block_until_ready(o)

    assert len(outs) == 2
    assert all(o.shape == (2, 10) for o in outs)
    assert all(v.shape == (2, 128) for v in model.get_features().values())
    assert all(bool(jnp.all(jnp.isfinite(o))) for o in outs)
    print("KERNEL_OK")
</pallas_src>

<mosaic_0001>
module attributes {stable_mosaic.version = 11 : i64} {
  func.func @_mm_kernel(%arg0: i32, %arg1: i32, %arg2: i32, %arg3: memref<512x147xbf16, #tpu.memory_space<vmem>>, %arg4: memref<147x64xbf16, #tpu.memory_space<vmem>>, %arg5: memref<1x64xf32, #tpu.memory_space<vmem>>, %arg6: memref<1x64xf32, #tpu.memory_space<vmem>>, %arg7: memref<512x64xbf16, #tpu.memory_space<vmem>>, %arg8: memref<512x64xf32, #tpu.memory_space<vmem>>) attributes {dimension_semantics = [#tpu.dimension_semantics<parallel>, #tpu.dimension_semantics<parallel>, #tpu.dimension_semantics<arbitrary>], iteration_bounds = array<i64: 1, 1, 1>, scalar_prefetch = 0 : i64, scratch_operands = 1 : i64, tpu.core_type = #tpu.core_type<tc>, window_params = [{transform_indices = @transform_0, window_bounds = array<i64: 512, 147>}, {transform_indices = @transform_1, window_bounds = array<i64: 147, 64>}, {transform_indices = @transform_2, window_bounds = array<i64: 1, 64>}, {transform_indices = @transform_3, window_bounds = array<i64: 1, 64>}, {transform_indices = @transform_4, window_bounds = array<i64: 512, 64>}]} {
    %c0_i32 = arith.constant 0 : i32
    %0 = arith.cmpi eq, %arg2, %c0_i32 : i32
    %1 = arith.extui %0 : i1 to i32
    %c0_i32_0 = arith.constant 0 : i32
    %2 = arith.cmpi ne, %1, %c0_i32_0 : i32
    scf.if %2 {
      %cst_10 = arith.constant 0.000000e+00 : f32
      %12 = vector.broadcast %cst_10 : f32 to vector<512x64xf32>
      %c0_11 = arith.constant 0 : index
      %c0_12 = arith.constant 0 : index
      %13 = vector.load %arg8[%c0_11, %c0_12] : memref<512x64xf32, #tpu.memory_space<vmem>>, vector<512x64xf32>
      tpu.vector_store %arg8[%c0_11, %c0_12], %12 {strides = array<i32>} : memref<512x64xf32, #tpu.memory_space<vmem>>, vector<512x64xf32>,
    } else {
    }
    %c0 = arith.constant 0 : index
    %c0_1 = arith.constant 0 : index
    %3 = vector.load %arg8[%c0, %c0_1] : memref<512x64xf32, #tpu.memory_space<vmem>>, vector<512x64xf32>
    %c0_2 = arith.constant 0 : index
    %c0_3 = arith.constant 0 : index
    %4 = vector.load %arg3[%c0_2, %c0_3] : memref<512x147xbf16, #tpu.memory_space<vmem>>, vector<512x147xbf16>
    %c0_4 = arith.constant 0 : index
    %c0_5 = arith.constant 0 : index
    %5 = vector.load %arg4[%c0_4, %c0_5] : memref<147x64xbf16, #tpu.memory_space<vmem>>, vector<147x64xbf16>
    %cst = arith.constant dense<0.000000e+00> : vector<512x64xf32>
    %6 = tpu.matmul %4, %5, %cst {dimension_numbers = #tpu.dot_dimension_numbers<[1], [0], [0], [1], [0, 0, 1, 1], [], []>} : vector<512x147xbf16>, vector<147x64xbf16>, vector<512x64xf32> -> vector<512x64xf32>
    %7 = arith.addf %3, %6 : vector<512x64xf32>
    %c0_6 = arith.constant 0 : index
    %c0_7 = arith.constant 0 : index
    %8 = vector.load %arg8[%c0_6, %c0_7] : memref<512x64xf32, #tpu.memory_space<vmem>>, vector<512x64xf32>
    tpu.vector_store %arg8[%c0_6, %c0_7], %7 {strides = array<i32>} : memref<512x64xf32, #tpu.memory_space<vmem>>, vector<512x64xf32>,
    %c0_i32_8 = arith.constant 0 : i32
    %9 = arith.cmpi eq, %arg2, %c0_i32_8 : i32
    %10 = arith.extui %9 : i1 to i32
    %c0_i32_9 = arith.constant 0 : i32
    %11 = arith.cmpi ne, %10, %c0_i32_9 : i32
    scf.if %11 {
      %c0_10 = arith.constant 0 : index
      %c0_11 = arith.constant 0 : index
      %12 = vector.load %arg8[%c0_10, %c0_11] : memref<512x64xf32, #tpu.memory_space<vmem>>, vector<512x64xf32>
      %c0_12 = arith.constant 0 : index
      %c0_13 = arith.constant 0 : index
      %13 = vector.load %arg5[%c0_12, %c0_13] : memref<1x64xf32, #tpu.memory_space<vmem>>, vector<1x64xf32>
      %14 = vector.broadcast %13 : vector<1x64xf32> to vector<512x64xf32>
      %15 = arith.mulf %12, %14 : vector<512x64xf32>
      %c0_14 = arith.constant 0 : index
      %c0_15 = arith.constant 0 : index
      %16 = vector.load %arg6[%c0_14, %c0_15] : memref<1x64xf32, #tpu.memory_space<vmem>>, vector<1x64xf32>
      %17 = vector.broadcast %16 : vector<1x64xf32> to vector<512x64xf32>
      %18 = arith.addf %15, %17 : vector<512x64xf32>
      %cst_16 = arith.constant 0.000000e+00 : f32
      %19 = vector.broadcast %cst_16 : f32 to vector<512x64xf32>
      %20 = arith.maximumf %18, %19 : vector<512x64xf32>
      %21 = arith.truncf %20 : vector<512x64xf32> to vector<512x64xbf16>
      %c0_17 = arith.constant 0 : index
      %c0_18 = arith.constant 0 : index
      %22 = vector.load %arg7[%c0_17, %c0_18] : memref<512x64xbf16, #tpu.memory_space<vmem>>, vector<512x64xbf16>
      tpu.vector_store %arg7[%c0_17, %c0_18], %21 {strides = array<i32>} : memref<512x64xbf16, #tpu.memory_space<vmem>>, vector<512x64xbf16>,
    } else {
    }
    return
  }
  func.func @transform_0(%arg0: i32, %arg1: i32, %arg2: i32) -> (i32, i32) {
    %c0_i32 = arith.constant 0 : i32
    return %arg0, %arg2 : i32, i32
  }
  func.func @transform_1(%arg0: i32, %arg1: i32, %arg2: i32) -> (i32, i32) {
    %c0_i32 = arith.constant 0 : i32
    return %arg2, %arg1 : i32, i32
  }
  func.func @transform_2(%arg0: i32, %arg1: i32, %arg2: i32) -> (i32, i32) {
    %c0_i32 = arith.constant 0 : i32
    %c0_i32_0 = arith.constant 0 : i32
    return %c0_i32, %arg1 : i32, i32
  }
  func.func @transform_3(%arg0: i32, %arg1: i32, %arg2: i32) -> (i32, i32) {
    %c0_i32 = arith.constant 0 : i32
    %c0_i32_0 = arith.constant 0 : i32
    return %c0_i32, %arg1 : i32, i32
  }
  func.func @transform_4(%arg0: i32, %arg1: i32, %arg2: i32) -> (i32, i32) {
    %c0_i32 = arith.constant 0 : i32
    return %arg0, %arg1 : i32, i32
  }
}

module attributes {stable_mosaic.version = 11 : i64} {
  func.func @_maxpool_kernel(%arg0: i32, %arg1: memref<9x128x64xbf16, #tpu.memory_space<vmem>>, %arg2: memref<128x64xbf16, #tpu.memory_space<vmem>>) attributes {dimension_semantics = [#tpu.dimension_semantics<parallel>], iteration_bounds = array<i64: 1>, scalar_prefetch = 0 : i64, scratch_operands = 0 : i64, tpu.core_type = #tpu.core_type<tc>, window_params = [{transform_indices = @transform_0, window_bounds = array<i64: 9, 128, 64>}, {transform_indices = @transform_1, window_bounds = array<i64: 128, 64>}]} {
    %c0 = arith.constant 0 : index
    %c0_0 = arith.constant 0 : index
    %c0_1 = arith.constant 0 : index
    %0 = vector.load %arg1[%c0, %c0_0, %c0_1] : memref<9x128x64xbf16, #tpu.memory_space<vmem>>, vector<9x128x64xbf16>
    %cst = arith.constant dense<0xFF80> : vector<128x64xbf16>
    %1 = vector.multi_reduction <maximumf>, %0, %cst [0] : vector<9x128x64xbf16> to vector<128x64xbf16>
    %c0_2 = arith.constant 0 : index
    %c0_3 = arith.constant 0 : index
    %2 = vector.load %arg2[%c0_2, %c0_3] : memref<128x64xbf16, #tpu.memory_space<vmem>>, vector<128x64xbf16>
    tpu.vector_store %arg2[%c0_2, %c0_3], %1 {strides = array<i32>} : memref<128x64xbf16, #tpu.memory_space<vmem>>, vector<128x64xbf16>,
    return
  }
  func.func @transform_0(%arg0: i32) -> (i32, i32, i32) {
    %c0_i32 = arith.constant 0 : i32
    %c0_i32_0 = arith.constant 0 : i32
    %c0_i32_1 = arith.constant 0 : i32
    return %c0_i32, %arg0, %c0_i32_0 : i32, i32, i32
  }
  func.func @transform_1(%arg0: i32) -> (i32, i32) {
    %c0_i32 = arith.constant 0 : i32
    %c0_i32_0 = arith.constant 0 : i32
    return %arg0, %c0_i32 : i32, i32
  }
}

module attributes {stable_mosaic.version = 11 : i64} {
  func.func @_mm_kernel(%arg0: i32, %arg1: i32, %arg2: i32, %arg3: memref<128x576xbf16, #tpu.memory_space<vmem>>, %arg4: memref<576x64xbf16, #tpu.memory_space<vmem>>, %arg5: memref<1x64xf32, #tpu.memory_space<vmem>>, %arg6: memref<1x64xf32, #tpu.memory_space<vmem>>, %arg7: memref<128x64xbf16, #tpu.memory_space<vmem>>, %arg8: memref<128x64xf32, #tpu.memory_space<vmem>>) attributes {dimension_semantics = [#tpu.dimension_semantics<parallel>, #tpu.dimension_semantics<parallel>, #tpu.dimension_semantics<arbitrary>], iteration_bounds = array<i64: 1, 1, 1>, scalar_prefetch = 0 : i64, scratch_operands = 1 : i64, tpu.core_type = #tpu.core_type<tc>, window_params = [{transform_indices = @transform_0, window_bounds = array<i64: 128, 576>}, {transform_indices = @transform_1, window_bounds = array<i64: 576, 64>}, {transform_indices = @transform_2, window_bounds = array<i64: 1, 64>}, {transform_indices = @transform_3, window_bounds = array<i64: 1, 64>}, {transform_indices = @transform_4, window_bounds = array<i64: 128, 64>}]} {
    %c0_i32 = arith.constant 0 : i32
    %0 = arith.cmpi eq, %arg2, %c0_i32 : i32
    %1 = arith.extui %0 : i1 to i32
    %c0_i32_0 = arith.constant 0 : i32
    %2 = arith.cmpi ne, %1, %c0_i32_0 : i32
    scf.if %2 {
      %cst_10 = arith.constant 0.000000e+00 : f32
      %12 = vector.broadcast %cst_10 : f32 to vector<128x64xf32>
      %c0_11 = arith.constant 0 : index
      %c0_12 = arith.constant 0 : index
      %13 = vector.load %arg8[%c0_11, %c0_12] : memref<128x64xf32, #tpu.memory_space<vmem>>, vector<128x64xf32>
      tpu.vector_store %arg8[%c0_11, %c0_12], %12 {strides = array<i32>} : memref<128x64xf32, #tpu.memory_space<vmem>>, vector<128x64xf32>,
    } else {
    }
    %c0 = arith.constant 0 : index
    %c0_1 = arith.constant 0 : index
    %3 = vector.load %arg8[%c0, %c0_1] : memref<128x64xf32, #tpu.memory_space<vmem>>, vector<128x64xf32>
    %c0_2 = arith.constant 0 : index
    %c0_3 = arith.constant 0 : index
    %4 = vector.load %arg3[%c0_2, %c0_3] : memref<128x576xbf16, #tpu.memory_space<vmem>>, vector<128x576xbf16>
    %c0_4 = arith.constant 0 : index
    %c0_5 = arith.constant 0 : index
    %5 = vector.load %arg4[%c0_4, %c0_5] : memref<576x64xbf16, #tpu.memory_space<vmem>>, vector<576x64xbf16>
    %cst = arith.constant dense<0.000000e+00> : vector<128x64xf32>
    %6 = tpu.matmul %4, %5, %cst {dimension_numbers = #tpu.dot_dimension_numbers<[1], [0], [0], [1], [0, 0, 1, 1], [], []>} : vector<128x576xbf16>, vector<576x64xbf16>, vector<128x64xf32> -> vector<128x64xf32>
    %7 = arith.addf %3, %6 : vector<128x64xf32>
    %c0_6 = arith.constant 0 : index
    %c0_7 = arith.constant 0 : index
    %8 = vector.load %arg8[%c0_6, %c0_7] : memref<128x64xf32, #tpu.memory_space<vmem>>, vector<128x64xf32>
    tpu.vector_store %arg8[%c0_6, %c0_7], %7 {strides = array<i32>} : memref<128x64xf32, #tpu.memory_space<vmem>>, vector<128x64xf32>,
    %c0_i32_8 = arith.constant 0 : i32
    %9 = arith.cmpi eq, %arg2, %c0_i32_8 : i32
    %10 = arith.extui %9 : i1 to i32
    %c0_i32_9 = arith.constant 0 : i32
    %11 = arith.cmpi ne, %10, %c0_i32_9 : i32
    scf.if %11 {
      %c0_10 = arith.constant 0 : index
      %c0_11 = arith.constant 0 : index
      %12 = vector.load %arg8[%c0_10, %c0_11] : memref<128x64xf32, #tpu.memory_space<vmem>>, vector<128x64xf32>
      %c0_12 = arith.constant 0 : index
      %c0_13 = arith.constant 0 : index
      %13 = vector.load %arg5[%c0_12, %c0_13] : memref<1x64xf32, #tpu.memory_space<vmem>>, vector<1x64xf32>
      %14 = vector.broadcast %13 : vector<1x64xf32> to vector<128x64xf32>
      %15 = arith.mulf %12, %14 : vector<128x64xf32>
      %c0_14 = arith.constant 0 : index
      %c0_15 = arith.constant 0 : index
      %16 = vector.load %arg6[%c0_14, %c0_15] : memref<1x64xf32, #tpu.memory_space<vmem>>, vector<1x64xf32>
      %17 = vector.broadcast %16 : vector<1x64xf32> to vector<128x64xf32>
      %18 = arith.addf %15, %17 : vector<128x64xf32>
      %cst_16 = arith.constant 0.000000e+00 : f32
      %19 = vector.broadcast %cst_16 : f32 to vector<128x64xf32>
      %20 = arith.maximumf %18, %19 : vector<128x64xf32>
      %21 = arith.truncf %20 : vector<128x64xf32> to vector<128x64xbf16>
      %c0_17 = arith.constant 0 : index
      %c0_18 = arith.constant 0 : index
      %22 = vector.load %arg7[%c0_17, %c0_18] : memref<128x64xbf16, #tpu.memory_space<vmem>>, vector<128x64xbf16>
      tpu.vector_store %arg7[%c0_17, %c0_18], %21 {strides = array<i32>} : memref<128x64xbf16, #tpu.memory_space<vmem>>, vector<128x64xbf16>,
    } else {
    }
    return
  }
  func.func @transform_0(%arg0: i32, %arg1: i32, %arg2: i32) -> (i32, i32) {
    %c0_i32 = arith.constant 0 : i32
    return %arg0, %arg2 : i32, i32
  }
  func.func @transform_1(%arg0: i32, %arg1: i32, %arg2: i32) -> (i32, i32) {
    %c0_i32 = arith.constant 0 : i32
    return %arg2, %arg1 : i32, i32
  }
  func.func @transform_2(%arg0: i32, %arg1: i32, %arg2: i32) -> (i32, i32) {
    %c0_i32 = arith.constant 0 : i32
    %c0_i32_0 = arith.constant 0 : i32
    return %c0_i32, %arg1 : i32, i32
  }
  func.func @transform_3(%arg0: i32, %arg1: i32, %arg2: i32) -> (i32, i32) {
    %c0_i32 = arith.constant 0 : i32
    %c0_i32_0 = arith.constant 0 : i32
    return %c0_i32, %arg1 : i32, i32
  }
  func.func @transform_4(%arg0: i32, %arg1: i32, %arg2: i32) -> (i32, i32) {
    %c0_i32 = arith.constant 0 : i32
    return %arg0, %arg1 : i32, i32
  }
}

module attributes {stable_mosaic.version = 11 : i64} {
  func.func @_mm_res_kernel(%arg0: i32, %arg1: i32, %arg2: i32, %arg3: memref<128x576xbf16, #tpu.memory_space<vmem>>, %arg4: memref<576x64xbf16, #tpu.memory_space<vmem>>, %arg5: memref<1x64xf32, #tpu.memory_space<vmem>>, %arg6: memref<1x64xf32, #tpu.memory_space<vmem>>, %arg7: memref<128x64xbf16, #tpu.memory_space<vmem>>, %arg8: memref<128x64xbf16, #tpu.memory_space<vmem>>, %arg9: memref<128x64xf32, #tpu.memory_space<vmem>>) attributes {dimension_semantics = [#tpu.dimension_semantics<parallel>, #tpu.dimension_semantics<parallel>, #tpu.dimension_semantics<arbitrary>], iteration_bounds = array<i64: 1, 1, 1>, scalar_prefetch = 0 : i64, scratch_operands = 1 : i64, tpu.core_type = #tpu.core_type<tc>, window_params = [{transform_indices = @transform_0, window_bounds = array<i64: 128, 576>}, {transform_indices = @transform_1, window_bounds = array<i64: 576, 64>}, {transform_indices = @transform_2, window_bounds = array<i64: 1, 64>}, {transform_indices = @transform_3, window_bounds = array<i64: 1, 64>}, {transform_indices = @transform_4, window_bounds = array<i64: 128, 64>}, {transform_indices = @transform_5, window_bounds = array<i64: 128, 64>}]} {
    %c0_i32 = arith.constant 0 : i32
    %0 = arith.cmpi eq, %arg2, %c0_i32 : i32
    %1 = arith.extui %0 : i1 to i32
    %c0_i32_0 = arith.constant 0 : i32
    %2 = arith.cmpi ne, %1, %c0_i32_0 : i32
    scf.if %2 {
      %cst_10 = arith.constant 0.000000e+00 : f32
      %12 = vector.broadcast %cst_10 : f32 to vector<128x64xf32>
      %c0_11 = arith.constant 0 : index
      %c0_12 = arith.constant 0 : index
      %13 = vector.load %arg9[%c0_11, %c0_12] : memref<128x64xf32, #tpu.memory_space<vmem>>, vector<128x64xf32>
      tpu.vector_store %arg9[%c0_11, %c0_12], %12 {strides = array<i32>} : memref<128x64xf32, #tpu.memory_space<vmem>>, vector<128x64xf32>,
    } else {
    }
    %c0 = arith.constant 0 : index
    %c0_1 = arith.constant 0 : index
    %3 = vector.load %arg9[%c0, %c0_1] : memref<128x64xf32, #tpu.memory_space<vmem>>, vector<128x64xf32>
    %c0_2 = arith.constant 0 : index
    %c0_3 = arith.constant 0 : index
    %4 = vector.load %arg3[%c0_2, %c0_3] : memref<128x576xbf16, #tpu.memory_space<vmem>>, vector<128x576xbf16>
    %c0_4 = arith.constant 0 : index
    %c0_5 = arith.constant 0 : index
    %5 = vector.load %arg4[%c0_4, %c0_5] : memref<576x64xbf16, #tpu.memory_space<vmem>>, vector<576x64xbf16>
    %cst = arith.constant dense<0.000000e+00> : vector<128x64xf32>
    %6 = tpu.matmul %4, %5, %cst {dimension_numbers = #tpu.dot_dimension_numbers<[1], [0], [0], [1], [0, 0, 1, 1], [], []>} : vector<128x576xbf16>, vector<576x64xbf16>, vector<128x64xf32> -> vector<128x64xf32>
    %7 = arith.addf %3, %6 : vector<128x64xf32>
    %c0_6 = arith.constant 0 : index
    %c0_7 = arith.constant 0 : index
    %8 = vector.load %arg9[%c0_6, %c0_7] : memref<128x64xf32, #tpu.memory_space<vmem>>, vector<128x64xf32>
    tpu.vector_store %arg9[%c0_6, %c0_7], %7 {strides = array<i32>} : memref<128x64xf32, #tpu.memory_space<vmem>>, vector<128x64xf32>,
    %c0_i32_8 = arith.constant 0 : i32
    %9 = arith.cmpi eq, %arg2, %c0_i32_8 : i32
    %10 = arith.extui %9 : i1 to i32
    %c0_i32_9 = arith.constant 0 : i32
    %11 = arith.cmpi ne, %10, %c0_i32_9 : i32
    scf.if %11 {
      %c0_10 = arith.constant 0 : index
      %c0_11 = arith.constant 0 : index
      %12 = vector.load %arg9[%c0_10, %c0_11] : memref<128x64xf32, #tpu.memory_space<vmem>>, vector<128x64xf32>
      %c0_12 = arith.constant 0 : index
      %c0_13 = arith.constant 0 : index
      %13 = vector.load %arg5[%c0_12, %c0_13] : memref<1x64xf32, #tpu.memory_space<vmem>>, vector<1x64xf32>
      %14 = vector.broadcast %13 : vector<1x64xf32> to vector<128x64xf32>
      %15 = arith.mulf %12, %14 : vector<128x64xf32>
      %c0_14 = arith.constant 0 : index
      %c0_15 = arith.constant 0 : index
      %16 = vector.load %arg6[%c0_14, %c0_15] : memref<1x64xf32, #tpu.memory_space<vmem>>, vector<1x64xf32>
      %17 = vector.broadcast %16 : vector<1x64xf32> to vector<128x64xf32>
      %18 = arith.addf %15, %17 : vector<128x64xf32>
      %c0_16 = arith.constant 0 : index
      %c0_17 = arith.constant 0 : index
      %19 = vector.load %arg7[%c0_16, %c0_17] : memref<128x64xbf16, #tpu.memory_space<vmem>>, vector<128x64xbf16>
      %20 = arith.extf %19 : vector<128x64xbf16> to vector<128x64xf32>
      %21 = arith.addf %18, %20 : vector<128x64xf32>
      %cst_18 = arith.constant 0.000000e+00 : f32
      %22 = vector.broadcast %cst_18 : f32 to vector<128x64xf32>
      %23 = arith.maximumf %21, %22 : vector<128x64xf32>
      %24 = arith.truncf %23 : vector<128x64xf32> to vector<128x64xbf16>
      %c0_19 = arith.constant 0 : index
      %c0_20 = arith.constant 0 : index
      %25 = vector.load %arg8[%c0_19, %c0_20] : memref<128x64xbf16, #tpu.memory_space<vmem>>, vector<128x64xbf16>
      tpu.vector_store %arg8[%c0_19, %c0_20], %24 {strides = array<i32>} : memref<128x64xbf16, #tpu.memory_space<vmem>>, vector<128x64xbf16>,
    } else {
    }
    return
  }
  func.func @transform_0(%arg0: i32, %arg1: i32, %arg2: i32) -> (i32, i32) {
    %c0_i32 = arith.constant 0 : i32
    return %arg0, %arg2 : i32, i32
  }
  func.func @transform_1(%arg0: i32, %arg1: i32, %arg2: i32) -> (i32, i32) {
    %c0_i32 = arith.constant 0 : i32
    return %arg2, %arg1 : i32, i32
  }
  func.func @transform_2(%arg0: i32, %arg1: i32, %arg2: i32) -> (i32, i32) {
    %c0_i32 = arith.constant 0 : i32
    %c0_i32_0 = arith.constant 0 : i32
    return %c0_i32, %arg1 : i32, i32
  }
  func.func @transform_3(%arg0: i32, %arg1: i32, %arg2: i32) -> (i32, i32) {
    %c0_i32 = arith.constant 0 : i32
    %c0_i32_0 = arith.constant 0 : i32
    return %c0_i32, %arg1 : i32, i32
  }
  func.func @transform_4(%arg0: i32, %arg1: i32, %arg2: i32) -> (i32, i32) {
    %c0_i32 = arith.constant 0 : i32
    return %arg0, %arg1 : i32, i32
  }
  func.func @transform_5(%arg0: i32, %arg1: i32, %arg2: i32) -> (i32, i32) {
    %c0_i32 = arith.constant 0 : i32
    return %arg0, %arg1 : i32, i32
  }
}

module attributes {stable_mosaic.version = 11 : i64} {
  func.func @_mm_kernel(%arg0: i32, %arg1: i32, %arg2: i32, %arg3: memref<32x576xbf16, #tpu.memory_space<vmem>>, %arg4: memref<576x128xbf16, #tpu.memory_space<vmem>>, %arg5: memref<1x128xf32, #tpu.memory_space<vmem>>, %arg6: memref<1x128xf32, #tpu.memory_space<vmem>>, %arg7: memref<32x128xbf16, #tpu.memory_space<vmem>>, %arg8: memref<32x128xf32, #tpu.memory_space<vmem>>) attributes {dimension_semantics = [#tpu.dimension_semantics<parallel>, #tpu.dimension_semantics<parallel>, #tpu.dimension_semantics<arbitrary>], iteration_bounds = array<i64: 1, 1, 1>, scalar_prefetch = 0 : i64, scratch_operands = 1 : i64, tpu.core_type = #tpu.core_type<tc>, window_params = [{transform_indices = @transform_0, window_bounds = array<i64: 32, 576>}, {transform_indices = @transform_1, window_bounds = array<i64: 576, 128>}, {transform_indices = @transform_2, window_bounds = array<i64: 1, 128>}, {transform_indices = @transform_3, window_bounds = array<i64: 1, 128>}, {transform_indices = @transform_4, window_bounds = array<i64: 32, 128>}]} {
    %c0_i32 = arith.constant 0 : i32
    %0 = arith.cmpi eq, %arg2, %c0_i32 : i32
    %1 = arith.extui %0 : i1 to i32
    %c0_i32_0 = arith.constant 0 : i32
    %2 = arith.cmpi ne, %1, %c0_i32_0 : i32
    scf.if %2 {
      %cst_10 = arith.constant 0.000000e+00 : f32
      %12 = vector.broadcast %cst_10 : f32 to vector<32x128xf32>
      %c0_11 = arith.constant 0 : index
      %c0_12 = arith.constant 0 : index
      %13 = vector.load %arg8[%c0_11, %c0_12] : memref<32x128xf32, #tpu.memory_space<vmem>>, vector<32x128xf32>
      tpu.vector_store %arg8[%c0_11, %c0_12], %12 {strides = array<i32>} : memref<32x128xf32, #tpu.memory_space<vmem>>, vector<32x128xf32>,
    } else {
    }
    %c0 = arith.constant 0 : index
    %c0_1 = arith.constant 0 : index
    %3 = vector.load %arg8[%c0, %c0_1] : memref<32x128xf32, #tpu.memory_space<vmem>>, vector<32x128xf32>
    %c0_2 = arith.constant 0 : index
    %c0_3 = arith.constant 0 : index
    %4 = vector.load %arg3[%c0_2, %c0_3] : memref<32x576xbf16, #tpu.memory_space<vmem>>, vector<32x576xbf16>
    %c0_4 = arith.constant 0 : index
    %c0_5 = arith.constant 0 : index
    %5 = vector.load %arg4[%c0_4, %c0_5] : memref<576x128xbf16, #tpu.memory_space<vmem>>, vector<576x128xbf16>
    %cst = arith.constant dense<0.000000e+00> : vector<32x128xf32>
    %6 = tpu.matmul %4, %5, %cst {dimension_numbers = #tpu.dot_dimension_numbers<[1], [0], [0], [1], [0, 0, 1, 1], [], []>} : vector<32x576xbf16>, vector<576x128xbf16>, vector<32x128xf32> -> vector<32x128xf32>
    %7 = arith.addf %3, %6 : vector<32x128xf32>
    %c0_6 = arith.constant 0 : index
    %c0_7 = arith.constant 0 : index
    %8 = vector.load %arg8[%c0_6, %c0_7] : memref<32x128xf32, #tpu.memory_space<vmem>>, vector<32x128xf32>
    tpu.vector_store %arg8[%c0_6, %c0_7], %7 {strides = array<i32>} : memref<32x128xf32, #tpu.memory_space<vmem>>, vector<32x128xf32>,
    %c0_i32_8 = arith.constant 0 : i32
    %9 = arith.cmpi eq, %arg2, %c0_i32_8 : i32
    %10 = arith.extui %9 : i1 to i32
    %c0_i32_9 = arith.constant 0 : i32
    %11 = arith.cmpi ne, %10, %c0_i32_9 : i32
    scf.if %11 {
      %c0_10 = arith.constant 0 : index
      %c0_11 = arith.constant 0 : index
      %12 = vector.load %arg8[%c0_10, %c0_11] : memref<32x128xf32, #tpu.memory_space<vmem>>, vector<32x128xf32>
      %c0_12 = arith.constant 0 : index
      %c0_13 = arith.constant 0 : index
      %13 = vector.load %arg5[%c0_12, %c0_13] : memref<1x128xf32, #tpu.memory_space<vmem>>, vector<1x128xf32>
      %14 = vector.broadcast %13 : vector<1x128xf32> to vector<32x128xf32>
      %15 = arith.mulf %12, %14 : vector<32x128xf32>
      %c0_14 = arith.constant 0 : index
      %c0_15 = arith.constant 0 : index
      %16 = vector.load %arg6[%c0_14, %c0_15] : memref<1x128xf32, #tpu.memory_space<vmem>>, vector<1x128xf32>
      %17 = vector.broadcast %16 : vector<1x128xf32> to vector<32x128xf32>
      %18 = arith.addf %15, %17 : vector<32x128xf32>
      %cst_16 = arith.constant 0.000000e+00 : f32
      %19 = vector.broadcast %cst_16 : f32 to vector<32x128xf32>
      %20 = arith.maximumf %18, %19 : vector<32x128xf32>
      %21 = arith.truncf %20 : vector<32x128xf32> to vector<32x128xbf16>
      %c0_17 = arith.constant 0 : index
      %c0_18 = arith.constant 0 : index
      %22 = vector.load %arg7[%c0_17, %c0_18] : memref<32x128xbf16, #tpu.memory_space<vmem>>, vector<32x128xbf16>
      tpu.vector_store %arg7[%c0_17, %c0_18], %21 {strides = array<i32>} : memref<32x128xbf16, #tpu.memory_space<vmem>>, vector<32x128xbf16>,
    } else {
    }
    return
  }
  func.func @transform_0(%arg0: i32, %arg1: i32, %arg2: i32) -> (i32, i32) {
    %c0_i32 = arith.constant 0 : i32
    return %arg0, %arg2 : i32, i32
  }
  func.func @transform_1(%arg0: i32, %arg1: i32, %arg2: i32) -> (i32, i32) {
    %c0_i32 = arith.constant 0 : i32
    return %arg2, %arg1 : i32, i32
  }
  func.func @transform_2(%arg0: i32, %arg1: i32, %arg2: i32) -> (i32, i32) {
    %c0_i32 = arith.constant 0 : i32
    %c0_i32_0 = arith.constant 0 : i32
    return %c0_i32, %arg1 : i32, i32
  }
  func.func @transform_3(%arg0: i32, %arg1: i32, %arg2: i32) -> (i32, i32) {
    %c0_i32 = arith.constant 0 : i32
    %c0_i32_0 = arith.constant 0 : i32
    return %c0_i32, %arg1 : i32, i32
  }
  func.func @transform_4(%arg0: i32, %arg1: i32, %arg2: i32) -> (i32, i32) {
    %c0_i32 = arith.constant 0 : i32
    return %arg0, %arg1 : i32, i32
  }
}

module attributes {stable_mosaic.version = 11 : i64} {
  func.func @_mm_kernel(%arg0: i32, %arg1: i32, %arg2: i32, %arg3: memref<32x64xbf16, #tpu.memory_space<vmem>>, %arg4: memref<64x128xbf16, #tpu.memory_space<vmem>>, %arg5: memref<1x128xf32, #tpu.memory_space<vmem>>, %arg6: memref<1x128xf32, #tpu.memory_space<vmem>>, %arg7: memref<32x128xbf16, #tpu.memory_space<vmem>>, %arg8: memref<32x128xf32, #tpu.memory_space<vmem>>) attributes {dimension_semantics = [#tpu.dimension_semantics<parallel>, #tpu.dimension_semantics<parallel>, #tpu.dimension_semantics<arbitrary>], iteration_bounds = array<i64: 1, 1, 1>, scalar_prefetch = 0 : i64, scratch_operands = 1 : i64, tpu.core_type = #tpu.core_type<tc>, window_params = [{transform_indices = @transform_0, window_bounds = array<i64: 32, 64>}, {transform_indices = @transform_1, window_bounds = array<i64: 64, 128>}, {transform_indices = @transform_2, window_bounds = array<i64: 1, 128>}, {transform_indices = @transform_3, window_bounds = array<i64: 1, 128>}, {transform_indices = @transform_4, window_bounds = array<i64: 32, 128>}]} {
    %c0_i32 = arith.constant 0 : i32
    %0 = arith.cmpi eq, %arg2, %c0_i32 : i32
    %1 = arith.extui %0 : i1 to i32
    %c0_i32_0 = arith.constant 0 : i32
    %2 = arith.cmpi ne, %1, %c0_i32_0 : i32
    scf.if %2 {
      %cst_10 = arith.constant 0.000000e+00 : f32
      %12 = vector.broadcast %cst_10 : f32 to vector<32x128xf32>
      %c0_11 = arith.constant 0 : index
      %c0_12 = arith.constant 0 : index
      %13 = vector.load %arg8[%c0_11, %c0_12] : memref<32x128xf32, #tpu.memory_space<vmem>>, vector<32x128xf32>
      tpu.vector_store %arg8[%c0_11, %c0_12], %12 {strides = array<i32>} : memref<32x128xf32, #tpu.memory_space<vmem>>, vector<32x128xf32>,
    } else {
    }
    %c0 = arith.constant 0 : index
    %c0_1 = arith.constant 0 : index
    %3 = vector.load %arg8[%c0, %c0_1] : memref<32x128xf32, #tpu.memory_space<vmem>>, vector<32x128xf32>
    %c0_2 = arith.constant 0 : index
    %c0_3 = arith.constant 0 : index
    %4 = vector.load %arg3[%c0_2, %c0_3] : memref<32x64xbf16, #tpu.memory_space<vmem>>, vector<32x64xbf16>
    %c0_4 = arith.constant 0 : index
    %c0_5 = arith.constant 0 : index
    %5 = vector.load %arg4[%c0_4, %c0_5] : memref<64x128xbf16, #tpu.memory_space<vmem>>, vector<64x128xbf16>
    %cst = arith.constant dense<0.000000e+00> : vector<32x128xf32>
    %6 = tpu.matmul %4, %5, %cst {dimension_numbers = #tpu.dot_dimension_numbers<[1], [0], [0], [1], [0, 0, 1, 1], [], []>} : vector<32x64xbf16>, vector<64x128xbf16>, vector<32x128xf32> -> vector<32x128xf32>
    %7 = arith.addf %3, %6 : vector<32x128xf32>
    %c0_6 = arith.constant 0 : index
    %c0_7 = arith.constant 0 : index
    %8 = vector.load %arg8[%c0_6, %c0_7] : memref<32x128xf32, #tpu.memory_space<vmem>>, vector<32x128xf32>
    tpu.vector_store %arg8[%c0_6, %c0_7], %7 {strides = array<i32>} : memref<32x128xf32, #tpu.memory_space<vmem>>, vector<32x128xf32>,
    %c0_i32_8 = arith.constant 0 : i32
    %9 = arith.cmpi eq, %arg2, %c0_i32_8 : i32
    %10 = arith.extui %9 : i1 to i32
    %c0_i32_9 = arith.constant 0 : i32
    %11 = arith.cmpi ne, %10, %c0_i32_9 : i32
    scf.if %11 {
      %c0_10 = arith.constant 0 : index
      %c0_11 = arith.constant 0 : index
      %12 = vector.load %arg8[%c0_10, %c0_11] : memref<32x128xf32, #tpu.memory_space<vmem>>, vector<32x128xf32>
      %c0_12 = arith.constant 0 : index
      %c0_13 = arith.constant 0 : index
      %13 = vector.load %arg5[%c0_12, %c0_13] : memref<1x128xf32, #tpu.memory_space<vmem>>, vector<1x128xf32>
      %14 = vector.broadcast %13 : vector<1x128xf32> to vector<32x128xf32>
      %15 = arith.mulf %12, %14 : vector<32x128xf32>
      %c0_14 = arith.constant 0 : index
      %c0_15 = arith.constant 0 : index
      %16 = vector.load %arg6[%c0_14, %c0_15] : memref<1x128xf32, #tpu.memory_space<vmem>>, vector<1x128xf32>
      %17 = vector.broadcast %16 : vector<1x128xf32> to vector<32x128xf32>
      %18 = arith.addf %15, %17 : vector<32x128xf32>
      %19 = arith.truncf %18 : vector<32x128xf32> to vector<32x128xbf16>
      %c0_16 = arith.constant 0 : index
      %c0_17 = arith.constant 0 : index
      %20 = vector.load %arg7[%c0_16, %c0_17] : memref<32x128xbf16, #tpu.memory_space<vmem>>, vector<32x128xbf16>
      tpu.vector_store %arg7[%c0_16, %c0_17], %19 {strides = array<i32>} : memref<32x128xbf16, #tpu.memory_space<vmem>>, vector<32x128xbf16>,
    } else {
    }
    return
  }
  func.func @transform_0(%arg0: i32, %arg1: i32, %arg2: i32) -> (i32, i32) {
    %c0_i32 = arith.constant 0 : i32
    return %arg0, %arg2 : i32, i32
  }
  func.func @transform_1(%arg0: i32, %arg1: i32, %arg2: i32) -> (i32, i32) {
    %c0_i32 = arith.constant 0 : i32
    return %arg2, %arg1 : i32, i32
  }
  func.func @transform_2(%arg0: i32, %arg1: i32, %arg2: i32) -> (i32, i32) {
    %c0_i32 = arith.constant 0 : i32
    %c0_i32_0 = arith.constant 0 : i32
    return %c0_i32, %arg1 : i32, i32
  }
  func.func @transform_3(%arg0: i32, %arg1: i32, %arg2: i32) -> (i32, i32) {
    %c0_i32 = arith.constant 0 : i32
    %c0_i32_0 = arith.constant 0 : i32
    return %c0_i32, %arg1 : i32, i32
  }
  func.func @transform_4(%arg0: i32, %arg1: i32, %arg2: i32) -> (i32, i32) {
    %c0_i32 = arith.constant 0 : i32
    return %arg0, %arg1 : i32, i32
  }
}

module attributes {stable_mosaic.version = 11 : i64} {
  func.func @_mm_res_kernel(%arg0: i32, %arg1: i32, %arg2: i32, %arg3: memref<32x384xbf16, #tpu.memory_space<vmem>>, %arg4: memref<384x128xbf16, #tpu.memory_space<vmem>>, %arg5: memref<1x128xf32, #tpu.memory_space<vmem>>, %arg6: memref<1x128xf32, #tpu.memory_space<vmem>>, %arg7: memref<32x128xbf16, #tpu.memory_space<vmem>>, %arg8: memref<32x128xbf16, #tpu.memory_space<vmem>>, %arg9: memref<32x128xf32, #tpu.memory_space<vmem>>) attributes {dimension_semantics = [#tpu.dimension_semantics<parallel>, #tpu.dimension_semantics<parallel>, #tpu.dimension_semantics<arbitrary>], iteration_bounds = array<i64: 1, 1, 3>, scalar_prefetch = 0 : i64, scratch_operands = 1 : i64, tpu.core_type = #tpu.core_type<tc>, window_params = [{transform_indices = @transform_0, window_bounds = array<i64: 32, 384>}, {transform_indices = @transform_1, window_bounds = array<i64: 384, 128>}, {transform_indices = @transform_2, window_bounds = array<i64: 1, 128>}, {transform_indices = @transform_3, window_bounds = array<i64: 1, 128>}, {transform_indices = @transform_4, window_bounds = array<i64: 32, 128>}, {transform_indices = @transform_5, window_bounds = array<i64: 32, 128>}]} {
    %c0_i32 = arith.constant 0 : i32
    %0 = arith.cmpi eq, %arg2, %c0_i32 : i32
    %1 = arith.extui %0 : i1 to i32
    %c0_i32_0 = arith.constant 0 : i32
    %2 = arith.cmpi ne, %1, %c0_i32_0 : i32
    scf.if %2 {
      %cst_9 = arith.constant 0.000000e+00 : f32
      %12 = vector.broadcast %cst_9 : f32 to vector<32x128xf32>
      %c0_10 = arith.constant 0 : index
      %c0_11 = arith.constant 0 : index
      %13 = vector.load %arg9[%c0_10, %c0_11] : memref<32x128xf32, #tpu.memory_space<vmem>>, vector<32x128xf32>
      tpu.vector_store %arg9[%c0_10, %c0_11], %12 {strides = array<i32>} : memref<32x128xf32, #tpu.memory_space<vmem>>, vector<32x128xf32>,
    } else {
    }
    %c0 = arith.constant 0 : index
    %c0_1 = arith.constant 0 : index
    %3 = vector.load %arg9[%c0, %c0_1] : memref<32x128xf32, #tpu.memory_space<vmem>>, vector<32x128xf32>
    %c0_2 = arith.constant 0 : index
    %c0_3 = arith.constant 0 : index
    %4 = vector.load %arg3[%c0_2, %c0_3] : memref<32x384xbf16, #tpu.memory_space<vmem>>, vector<32x384xbf16>
    %c0_4 = arith.constant 0 : index
    %c0_5 = arith.constant 0 : index
    %5 = vector.load %arg4[%c0_4, %c0_5] : memref<384x128xbf16, #tpu.memory_space<vmem>>, vector<384x128xbf16>
    %cst = arith.constant dense<0.000000e+00> : vector<32x128xf32>
    %6 = tpu.matmul %4, %5, %cst {dimension_numbers = #tpu.dot_dimension_numbers<[1], [0], [0], [1], [0, 0, 1, 1], [], []>} : vector<32x384xbf16>, vector<384x128xbf16>, vector<32x128xf32> -> vector<32x128xf32>
    %7 = arith.addf %3, %6 : vector<32x128xf32>
    %c0_6 = arith.constant 0 : index
    %c0_7 = arith.constant 0 : index
    %8 = vector.load %arg9[%c0_6, %c0_7] : memref<32x128xf32, #tpu.memory_space<vmem>>, vector<32x128xf32>
    tpu.vector_store %arg9[%c0_6, %c0_7], %7 {strides = array<i32>} : memref<32x128xf32, #tpu.memory_space<vmem>>, vector<32x128xf32>,
    %c2_i32 = arith.constant 2 : i32
    %9 = arith.cmpi eq, %arg2, %c2_i32 : i32
    %10 = arith.extui %9 : i1 to i32
    %c0_i32_8 = arith.constant 0 : i32
    %11 = arith.cmpi ne, %10, %c0_i32_8 : i32
    scf.if %11 {
      %c0_9 = arith.constant 0 : index
      %c0_10 = arith.constant 0 : index
      %12 = vector.load %arg9[%c0_9, %c0_10] : memref<32x128xf32, #tpu.memory_space<vmem>>, vector<32x128xf32>
      %c0_11 = arith.constant 0 : index
      %c0_12 = arith.constant 0 : index
      %13 = vector.load %arg5[%c0_11, %c0_12] : memref<1x128xf32, #tpu.memory_space<vmem>>, vector<1x128xf32>
      %14 = vector.broadcast %13 : vector<1x128xf32> to vector<32x128xf32>
      %15 = arith.mulf %12, %14 : vector<32x128xf32>
      %c0_13 = arith.constant 0 : index
      %c0_14 = arith.constant 0 : index
      %16 = vector.load %arg6[%c0_13, %c0_14] : memref<1x128xf32, #tpu.memory_space<vmem>>, vector<1x128xf32>
      %17 = vector.broadcast %16 : vector<1x128xf32> to vector<32x128xf32>
      %18 = arith.addf %15, %17 : vector<32x128xf32>
      %c0_15 = arith.constant 0 : index
      %c0_16 = arith.constant 0 : index
      %19 = vector.load %arg7[%c0_15, %c0_16] : memref<32x128xbf16, #tpu.memory_space<vmem>>, vector<32x128xbf16>
      %20 = arith.extf %19 : vector<32x128xbf16> to vector<32x128xf32>
      %21 = arith.addf %18, %20 : vector<32x128xf32>
      %cst_17 = arith.constant 0.000000e+00 : f32
      %22 = vector.broadcast %cst_17 : f32 to vector<32x128xf32>
      %23 = arith.maximumf %21, %22 : vector<32x128xf32>
      %24 = arith.truncf %23 : vector<32x128xf32> to vector<32x128xbf16>
      %c0_18 = arith.constant 0 : index
      %c0_19 = arith.constant 0 : index
      %25 = vector.load %arg8[%c0_18, %c0_19] : memref<32x128xbf16, #tpu.memory_space<vmem>>, vector<32x128xbf16>
      tpu.vector_store %arg8[%c0_18, %c0_19], %24 {strides = array<i32>} : memref<32x128xbf16, #tpu.memory_space<vmem>>, vector<32x128xbf16>,
    } else {
    }
    return
  }
  func.func @transform_0(%arg0: i32, %arg1: i32, %arg2: i32) -> (i32, i32) {
    %c0_i32 = arith.constant 0 : i32
    return %arg0, %arg2 : i32, i32
  }
  func.func @transform_1(%arg0: i32, %arg1: i32, %arg2: i32) -> (i32, i32) {
    %c0_i32 = arith.constant 0 : i32
    return %arg2, %arg1 : i32, i32
  }
  func.func @transform_2(%arg0: i32, %arg1: i32, %arg2: i32) -> (i32, i32) {
    %c0_i32 = arith.constant 0 : i32
    %c0_i32_0 = arith.constant 0 : i32
    return %c0_i32, %arg1 : i32, i32
  }
  func.func @transform_3(%arg0: i32, %arg1: i32, %arg2: i32) -> (i32, i32) {
    %c0_i32 = arith.constant 0 : i32
    %c0_i32_0 = arith.constant 0 : i32
    return %c0_i32, %arg1 : i32, i32
  }
  func.func @transform_4(%arg0: i32, %arg1: i32, %arg2: i32) -> (i32, i32) {
    %c0_i32 = arith.constant 0 : i32
    return %arg0, %arg1 : i32, i32
  }
  func.func @transform_5(%arg0: i32, %arg1: i32, %arg2: i32) -> (i32, i32) {
    %c0_i32 = arith.constant 0 : i32
    return %arg0, %arg1 : i32, i32
  }
}

module attributes {stable_mosaic.version = 11 : i64} {
  func.func @_mm_kernel(%arg0: i32, %arg1: i32, %arg2: i32, %arg3: memref<32x384xbf16, #tpu.memory_space<vmem>>, %arg4: memref<384x128xbf16, #tpu.memory_space<vmem>>, %arg5: memref<1x128xf32, #tpu.memory_space<vmem>>, %arg6: memref<1x128xf32, #tpu.memory_space<vmem>>, %arg7: memref<32x128xbf16, #tpu.memory_space<vmem>>, %arg8: memref<32x128xf32, #tpu.memory_space<vmem>>) attributes {dimension_semantics = [#tpu.dimension_semantics<parallel>, #tpu.dimension_semantics<parallel>, #tpu.dimension_semantics<arbitrary>], iteration_bounds = array<i64: 1, 1, 3>, scalar_prefetch = 0 : i64, scratch_operands = 1 : i64, tpu.core_type = #tpu.core_type<tc>, window_params = [{transform_indices = @transform_0, window_bounds = array<i64: 32, 384>}, {transform_indices = @transform_1, window_bounds = array<i64: 384, 128>}, {transform_indices = @transform_2, window_bounds = array<i64: 1, 128>}, {transform_indices = @transform_3, window_bounds = array<i64: 1, 128>}, {transform_indices = @transform_4, window_bounds = array<i64: 32, 128>}]} {
    %c0_i32 = arith.constant 0 : i32
    %0 = arith.cmpi eq, %arg2, %c0_i32 : i32
    %1 = arith.extui %0 : i1 to i32
    %c0_i32_0 = arith.constant 0 : i32
    %2 = arith.cmpi ne, %1, %c0_i32_0 : i32
    scf.if %2 {
      %cst_9 = arith.constant 0.000000e+00 : f32
      %12 = vector.broadcast %cst_9 : f32 to vector<32x128xf32>
      %c0_10 = arith.constant 0 : index
      %c0_11 = arith.constant 0 : index
      %13 = vector.load %arg8[%c0_10, %c0_11] : memref<32x128xf32, #tpu.memory_space<vmem>>, vector<32x128xf32>
      tpu.vector_store %arg8[%c0_10, %c0_11], %12 {strides = array<i32>} : memref<32x128xf32, #tpu.memory_space<vmem>>, vector<32x128xf32>,
    } else {
    }
    %c0 = arith.constant 0 : index
    %c0_1 = arith.constant 0 : index
    %3 = vector.load %arg8[%c0, %c0_1] : memref<32x128xf32, #tpu.memory_space<vmem>>, vector<32x128xf32>
    %c0_2 = arith.constant 0 : index
    %c0_3 = arith.constant 0 : index
    %4 = vector.load %arg3[%c0_2, %c0_3] : memref<32x384xbf16, #tpu.memory_space<vmem>>, vector<32x384xbf16>
    %c0_4 = arith.constant 0 : index
    %c0_5 = arith.constant 0 : index
    %5 = vector.load %arg4[%c0_4, %c0_5] : memref<384x128xbf16, #tpu.memory_space<vmem>>, vector<384x128xbf16>
    %cst = arith.constant dense<0.000000e+00> : vector<32x128xf32>
    %6 = tpu.matmul %4, %5, %cst {dimension_numbers = #tpu.dot_dimension_numbers<[1], [0], [0], [1], [0, 0, 1, 1], [], []>} : vector<32x384xbf16>, vector<384x128xbf16>, vector<32x128xf32> -> vector<32x128xf32>
    %7 = arith.addf %3, %6 : vector<32x128xf32>
    %c0_6 = arith.constant 0 : index
    %c0_7 = arith.constant 0 : index
    %8 = vector.load %arg8[%c0_6, %c0_7] : memref<32x128xf32, #tpu.memory_space<vmem>>, vector<32x128xf32>
    tpu.vector_store %arg8[%c0_6, %c0_7], %7 {strides = array<i32>} : memref<32x128xf32, #tpu.memory_space<vmem>>, vector<32x128xf32>,
    %c2_i32 = arith.constant 2 : i32
    %9 = arith.cmpi eq, %arg2, %c2_i32 : i32
    %10 = arith.extui %9 : i1 to i32
    %c0_i32_8 = arith.constant 0 : i32
    %11 = arith.cmpi ne, %10, %c0_i32_8 : i32
    scf.if %11 {
      %c0_9 = arith.constant 0 : index
      %c0_10 = arith.constant 0 : index
      %12 = vector.load %arg8[%c0_9, %c0_10] : memref<32x128xf32, #tpu.memory_space<vmem>>, vector<32x128xf32>
      %c0_11 = arith.constant 0 : index
      %c0_12 = arith.constant 0 : index
      %13 = vector.load %arg5[%c0_11, %c0_12] : memref<1x128xf32, #tpu.memory_space<vmem>>, vector<1x128xf32>
      %14 = vector.broadcast %13 : vector<1x128xf32> to vector<32x128xf32>
      %15 = arith.mulf %12, %14 : vector<32x128xf32>
      %c0_13 = arith.constant 0 : index
      %c0_14 = arith.constant 0 : index
      %16 = vector.load %arg6[%c0_13, %c0_14] : memref<1x128xf32, #tpu.memory_space<vmem>>, vector<1x128xf32>
      %17 = vector.broadcast %16 : vector<1x128xf32> to vector<32x128xf32>
      %18 = arith.addf %15, %17 : vector<32x128xf32>
      %cst_15 = arith.constant 0.000000e+00 : f32
      %19 = vector.broadcast %cst_15 : f32 to vector<32x128xf32>
      %20 = arith.maximumf %18, %19 : vector<32x128xf32>
      %21 = arith.truncf %20 : vector<32x128xf32> to vector<32x128xbf16>
      %c0_16 = arith.constant 0 : index
      %c0_17 = arith.constant 0 : index
      %22 = vector.load %arg7[%c0_16, %c0_17] : memref<32x128xbf16, #tpu.memory_space<vmem>>, vector<32x128xbf16>
      tpu.vector_store %arg7[%c0_16, %c0_17], %21 {strides = array<i32>} : memref<32x128xbf16, #tpu.memory_space<vmem>>, vector<32x128xbf16>,
    } else {
    }
    return
  }
  func.func @transform_0(%arg0: i32, %arg1: i32, %arg2: i32) -> (i32, i32) {
    %c0_i32 = arith.constant 0 : i32
    return %arg0, %arg2 : i32, i32
  }
  func.func @transform_1(%arg0: i32, %arg1: i32, %arg2: i32) -> (i32, i32) {
    %c0_i32 = arith.constant 0 : i32
    return %arg2, %arg1 : i32, i32
  }
  func.func @transform_2(%arg0: i32, %arg1: i32, %arg2: i32) -> (i32, i32) {
    %c0_i32 = arith.constant 0 : i32
    %c0_i32_0 = arith.constant 0 : i32
    return %c0_i32, %arg1 : i32, i32
  }
  func.func @transform_3(%arg0: i32, %arg1: i32, %arg2: i32) -> (i32, i32) {
    %c0_i32 = arith.constant 0 : i32
    %c0_i32_0 = arith.constant 0 : i32
    return %c0_i32, %arg1 : i32, i32
  }
  func.func @transform_4(%arg0: i32, %arg1: i32, %arg2: i32) -> (i32, i32) {
    %c0_i32 = arith.constant 0 : i32
    return %arg0, %arg1 : i32, i32
  }
}

module attributes {stable_mosaic.version = 11 : i64} {
  func.func @_mm_kernel(%arg0: i32, %arg1: i32, %arg2: i32, %arg3: memref<8x384xbf16, #tpu.memory_space<vmem>>, %arg4: memref<384x256xbf16, #tpu.memory_space<vmem>>, %arg5: memref<1x256xf32, #tpu.memory_space<vmem>>, %arg6: memref<1x256xf32, #tpu.memory_space<vmem>>, %arg7: memref<8x256xbf16, #tpu.memory_space<vmem>>, %arg8: memref<8x256xf32, #tpu.memory_space<vmem>>) attributes {dimension_semantics = [#tpu.dimension_semantics<parallel>, #tpu.dimension_semantics<parallel>, #tpu.dimension_semantics<arbitrary>], iteration_bounds = array<i64: 1, 1, 3>, scalar_prefetch = 0 : i64, scratch_operands = 1 : i64, tpu.core_type = #tpu.core_type<tc>, window_params = [{transform_indices = @transform_0, window_bounds = array<i64: 8, 384>}, {transform_indices = @transform_1, window_bounds = array<i64: 384, 256>}, {transform_indices = @transform_2, window_bounds = array<i64: 1, 256>}, {transform_indices = @transform_3, window_bounds = array<i64: 1, 256>}, {transform_indices = @transform_4, window_bounds = array<i64: 8, 256>}]} {
    %c0_i32 = arith.constant 0 : i32
    %0 = arith.cmpi eq, %arg2, %c0_i32 : i32
    %1 = arith.extui %0 : i1 to i32
    %c0_i32_0 = arith.constant 0 : i32
    %2 = arith.cmpi ne, %1, %c0_i32_0 : i32
    scf.if %2 {
      %cst_9 = arith.constant 0.000000e+00 : f32
      %12 = vector.broadcast %cst_9 : f32 to vector<8x256xf32>
      %c0_10 = arith.constant 0 : index
      %c0_11 = arith.constant 0 : index
      %13 = vector.load %arg8[%c0_10, %c0_11] : memref<8x256xf32, #tpu.memory_space<vmem>>, vector<8x256xf32>
      tpu.vector_store %arg8[%c0_10, %c0_11], %12 {strides = array<i32>} : memref<8x256xf32, #tpu.memory_space<vmem>>, vector<8x256xf32>,
    } else {
    }
    %c0 = arith.constant 0 : index
    %c0_1 = arith.constant 0 : index
    %3 = vector.load %arg8[%c0, %c0_1] : memref<8x256xf32, #tpu.memory_space<vmem>>, vector<8x256xf32>
    %c0_2 = arith.constant 0 : index
    %c0_3 = arith.constant 0 : index
    %4 = vector.load %arg3[%c0_2, %c0_3] : memref<8x384xbf16, #tpu.memory_space<vmem>>, vector<8x384xbf16>
    %c0_4 = arith.constant 0 : index
    %c0_5 = arith.constant 0 : index
    %5 = vector.load %arg4[%c0_4, %c0_5] : memref<384x256xbf16, #tpu.memory_space<vmem>>, vector<384x256xbf16>
    %cst = arith.constant dense<0.000000e+00> : vector<8x256xf32>
    %6 = tpu.matmul %4, %5, %cst {dimension_numbers = #tpu.dot_dimension_numbers<[1], [0], [0], [1], [0, 0, 1, 1], [], []>} : vector<8x384xbf16>, vector<384x256xbf16>, vector<8x256xf32> -> vector<8x256xf32>
    %7 = arith.addf %3, %6 : vector<8x256xf32>
    %c0_6 = arith.constant 0 : index
    %c0_7 = arith.constant 0 : index
    %8 = vector.load %arg8[%c0_6, %c0_7] : memref<8x256xf32, #tpu.memory_space<vmem>>, vector<8x256xf32>
    tpu.vector_store %arg8[%c0_6, %c0_7], %7 {strides = array<i32>} : memref<8x256xf32, #tpu.memory_space<vmem>>, vector<8x256xf32>,
    %c2_i32 = arith.constant 2 : i32
    %9 = arith.cmpi eq, %arg2, %c2_i32 : i32
    %10 = arith.extui %9 : i1 to i32
    %c0_i32_8 = arith.constant 0 : i32
    %11 = arith.cmpi ne, %10, %c0_i32_8 : i32
    scf.if %11 {
      %c0_9 = arith.constant 0 : index
      %c0_10 = arith.constant 0 : index
      %12 = vector.load %arg8[%c0_9, %c0_10] : memref<8x256xf32, #tpu.memory_space<vmem>>, vector<8x256xf32>
      %c0_11 = arith.constant 0 : index
      %c0_12 = arith.constant 0 : index
      %13 = vector.load %arg5[%c0_11, %c0_12] : memref<1x256xf32, #tpu.memory_space<vmem>>, vector<1x256xf32>
      %14 = vector.broadcast %13 : vector<1x256xf32> to vector<8x256xf32>
      %15 = arith.mulf %12, %14 : vector<8x256xf32>
      %c0_13 = arith.constant 0 : index
      %c0_14 = arith.constant 0 : index
      %16 = vector.load %arg6[%c0_13, %c0_14] : memref<1x256xf32, #tpu.memory_space<vmem>>, vector<1x256xf32>
      %17 = vector.broadcast %16 : vector<1x256xf32> to vector<8x256xf32>
      %18 = arith.addf %15, %17 : vector<8x256xf32>
      %cst_15 = arith.constant 0.000000e+00 : f32
      %19 = vector.broadcast %cst_15 : f32 to vector<8x256xf32>
      %20 = arith.maximumf %18, %19 : vector<8x256xf32>
      %21 = arith.truncf %20 : vector<8x256xf32> to vector<8x256xbf16>
      %c0_16 = arith.constant 0 : index
      %c0_17 = arith.constant 0 : index
      %22 = vector.load %arg7[%c0_16, %c0_17] : memref<8x256xbf16, #tpu.memory_space<vmem>>, vector<8x256xbf16>
      tpu.vector_store %arg7[%c0_16, %c0_17], %21 {strides = array<i32>} : memref<8x256xbf16, #tpu.memory_space<vmem>>, vector<8x256xbf16>,
    } else {
    }
    return
  }
  func.func @transform_0(%arg0: i32, %arg1: i32, %arg2: i32) -> (i32, i32) {
    %c0_i32 = arith.constant 0 : i32
    return %arg0, %arg2 : i32, i32
  }
  func.func @transform_1(%arg0: i32, %arg1: i32, %arg2: i32) -> (i32, i32) {
    %c0_i32 = arith.constant 0 : i32
    return %arg2, %arg1 : i32, i32
  }
  func.func @transform_2(%arg0: i32, %arg1: i32, %arg2: i32) -> (i32, i32) {
    %c0_i32 = arith.constant 0 : i32
    %c0_i32_0 = arith.constant 0 : i32
    return %c0_i32, %arg1 : i32, i32
  }
  func.func @transform_3(%arg0: i32, %arg1: i32, %arg2: i32) -> (i32, i32) {
    %c0_i32 = arith.constant 0 : i32
    %c0_i32_0 = arith.constant 0 : i32
    return %c0_i32, %arg1 : i32, i32
  }
  func.func @transform_4(%arg0: i32, %arg1: i32, %arg2: i32) -> (i32, i32) {
    %c0_i32 = arith.constant 0 : i32
    return %arg0, %arg1 : i32, i32
  }
}

module attributes {stable_mosaic.version = 11 : i64} {
  func.func @_mm_kernel(%arg0: i32, %arg1: i32, %arg2: i32, %arg3: memref<8x128xbf16, #tpu.memory_space<vmem>>, %arg4: memref<128x256xbf16, #tpu.memory_space<vmem>>, %arg5: memref<1x256xf32, #tpu.memory_space<vmem>>, %arg6: memref<1x256xf32, #tpu.memory_space<vmem>>, %arg7: memref<8x256xbf16, #tpu.memory_space<vmem>>, %arg8: memref<8x256xf32, #tpu.memory_space<vmem>>) attributes {dimension_semantics = [#tpu.dimension_semantics<parallel>, #tpu.dimension_semantics<parallel>, #tpu.dimension_semantics<arbitrary>], iteration_bounds = array<i64: 1, 1, 1>, scalar_prefetch = 0 : i64, scratch_operands = 1 : i64, tpu.core_type = #tpu.core_type<tc>, window_params = [{transform_indices = @transform_0, window_bounds = array<i64: 8, 128>}, {transform_indices = @transform_1, window_bounds = array<i64: 128, 256>}, {transform_indices = @transform_2, window_bounds = array<i64: 1, 256>}, {transform_indices = @transform_3, window_bounds = array<i64: 1, 256>}, {transform_indices = @transform_4, window_bounds = array<i64: 8, 256>}]} {
    %c0_i32 = arith.constant 0 : i32
    %0 = arith.cmpi eq, %arg2, %c0_i32 : i32
    %1 = arith.extui %0 : i1 to i32
    %c0_i32_0 = arith.constant 0 : i32
    %2 = arith.cmpi ne, %1, %c0_i32_0 : i32
    scf.if %2 {
      %cst_10 = arith.constant 0.000000e+00 : f32
      %12 = vector.broadcast %cst_10 : f32 to vector<8x256xf32>
      %c0_11 = arith.constant 0 : index
      %c0_12 = arith.constant 0 : index
      %13 = vector.load %arg8[%c0_11, %c0_12] : memref<8x256xf32, #tpu.memory_space<vmem>>, vector<8x256xf32>
      tpu.vector_store %arg8[%c0_11, %c0_12], %12 {strides = array<i32>} : memref<8x256xf32, #tpu.memory_space<vmem>>, vector<8x256xf32>,
    } else {
    }
    %c0 = arith.constant 0 : index
    %c0_1 = arith.constant 0 : index
    %3 = vector.load %arg8[%c0, %c0_1] : memref<8x256xf32, #tpu.memory_space<vmem>>, vector<8x256xf32>
    %c0_2 = arith.constant 0 : index
    %c0_3 = arith.constant 0 : index
    %4 = vector.load %arg3[%c0_2, %c0_3] : memref<8x128xbf16, #tpu.memory_space<vmem>>, vector<8x128xbf16>
    %c0_4 = arith.constant 0 : index
    %c0_5 = arith.constant 0 : index
    %5 = vector.load %arg4[%c0_4, %c0_5] : memref<128x256xbf16, #tpu.memory_space<vmem>>, vector<128x256xbf16>
    %cst = arith.constant dense<0.000000e+00> : vector<8x256xf32>
    %6 = tpu.matmul %4, %5, %cst {dimension_numbers = #tpu.dot_dimension_numbers<[1], [0], [0], [1], [0, 0, 1, 1], [], []>} : vector<8x128xbf16>, vector<128x256xbf16>, vector<8x256xf32> -> vector<8x256xf32>
    %7 = arith.addf %3, %6 : vector<8x256xf32>
    %c0_6 = arith.constant 0 : index
    %c0_7 = arith.constant 0 : index
    %8 = vector.load %arg8[%c0_6, %c0_7] : memref<8x256xf32, #tpu.memory_space<vmem>>, vector<8x256xf32>
    tpu.vector_store %arg8[%c0_6, %c0_7], %7 {strides = array<i32>} : memref<8x256xf32, #tpu.memory_space<vmem>>, vector<8x256xf32>,
    %c0_i32_8 = arith.constant 0 : i32
    %9 = arith.cmpi eq, %arg2, %c0_i32_8 : i32
    %10 = arith.extui %9 : i1 to i32
    %c0_i32_9 = arith.constant 0 : i32
    %11 = arith.cmpi ne, %10, %c0_i32_9 : i32
    scf.if %11 {
      %c0_10 = arith.constant 0 : index
      %c0_11 = arith.constant 0 : index
      %12 = vector.load %arg8[%c0_10, %c0_11] : memref<8x256xf32, #tpu.memory_space<vmem>>, vector<8x256xf32>
      %c0_12 = arith.constant 0 : index
      %c0_13 = arith.constant 0 : index
      %13 = vector.load %arg5[%c0_12, %c0_13] : memref<1x256xf32, #tpu.memory_space<vmem>>, vector<1x256xf32>
      %14 = vector.broadcast %13 : vector<1x256xf32> to vector<8x256xf32>
      %15 = arith.mulf %12, %14 : vector<8x256xf32>
      %c0_14 = arith.constant 0 : index
      %c0_15 = arith.constant 0 : index
      %16 = vector.load %arg6[%c0_14, %c0_15] : memref<1x256xf32, #tpu.memory_space<vmem>>, vector<1x256xf32>
      %17 = vector.broadcast %16 : vector<1x256xf32> to vector<8x256xf32>
      %18 = arith.addf %15, %17 : vector<8x256xf32>
      %19 = arith.truncf %18 : vector<8x256xf32> to vector<8x256xbf16>
      %c0_16 = arith.constant 0 : index
      %c0_17 = arith.constant 0 : index
      %20 = vector.load %arg7[%c0_16, %c0_17] : memref<8x256xbf16, #tpu.memory_space<vmem>>, vector<8x256xbf16>
      tpu.vector_store %arg7[%c0_16, %c0_17], %19 {strides = array<i32>} : memref<8x256xbf16, #tpu.memory_space<vmem>>, vector<8x256xbf16>,
    } else {
    }
    return
  }
  func.func @transform_0(%arg0: i32, %arg1: i32, %arg2: i32) -> (i32, i32) {
    %c0_i32 = arith.constant 0 : i32
    return %arg0, %arg2 : i32, i32
  }
  func.func @transform_1(%arg0: i32, %arg1: i32, %arg2: i32) -> (i32, i32) {
    %c0_i32 = arith.constant 0 : i32
    return %arg2, %arg1 : i32, i32
  }
  func.func @transform_2(%arg0: i32, %arg1: i32, %arg2: i32) -> (i32, i32) {
    %c0_i32 = arith.constant 0 : i32
    %c0_i32_0 = arith.constant 0 : i32
    return %c0_i32, %arg1 : i32, i32
  }
  func.func @transform_3(%arg0: i32, %arg1: i32, %arg2: i32) -> (i32, i32) {
    %c0_i32 = arith.constant 0 : i32
    %c0_i32_0 = arith.constant 0 : i32
    return %c0_i32, %arg1 : i32, i32
  }
  func.func @transform_4(%arg0: i32, %arg1: i32, %arg2: i32) -> (i32, i32) {
    %c0_i32 = arith.constant 0 : i32
    return %arg0, %arg1 : i32, i32
  }
}

module attributes {stable_mosaic.version = 11 : i64} {
  func.func @_mm_res_kernel(%arg0: i32, %arg1: i32, %arg2: i32, %arg3: memref<8x384xbf16, #tpu.memory_space<vmem>>, %arg4: memref<384x256xbf16, #tpu.memory_space<vmem>>, %arg5: memref<1x256xf32, #tpu.memory_space<vmem>>, %arg6: memref<1x256xf32, #tpu.memory_space<vmem>>, %arg7: memref<8x256xbf16, #tpu.memory_space<vmem>>, %arg8: memref<8x256xbf16, #tpu.memory_space<vmem>>, %arg9: memref<8x256xf32, #tpu.memory_space<vmem>>) attributes {dimension_semantics = [#tpu.dimension_semantics<parallel>, #tpu.dimension_semantics<parallel>, #tpu.dimension_semantics<arbitrary>], iteration_bounds = array<i64: 1, 1, 6>, scalar_prefetch = 0 : i64, scratch_operands = 1 : i64, tpu.core_type = #tpu.core_type<tc>, window_params = [{transform_indices = @transform_0, window_bounds = array<i64: 8, 384>}, {transform_indices = @transform_1, window_bounds = array<i64: 384, 256>}, {transform_indices = @transform_2, window_bounds = array<i64: 1, 256>}, {transform_indices = @transform_3, window_bounds = array<i64: 1, 256>}, {transform_indices = @transform_4, window_bounds = array<i64: 8, 256>}, {transform_indices = @transform_5, window_bounds = array<i64: 8, 256>}]} {
    %c0_i32 = arith.constant 0 : i32
    %0 = arith.cmpi eq, %arg2, %c0_i32 : i32
    %1 = arith.extui %0 : i1 to i32
    %c0_i32_0 = arith.constant 0 : i32
    %2 = arith.cmpi ne, %1, %c0_i32_0 : i32
    scf.if %2 {
      %cst_9 = arith.constant 0.000000e+00 : f32
      %12 = vector.broadcast %cst_9 : f32 to vector<8x256xf32>
      %c0_10 = arith.constant 0 : index
      %c0_11 = arith.constant 0 : index
      %13 = vector.load %arg9[%c0_10, %c0_11] : memref<8x256xf32, #tpu.memory_space<vmem>>, vector<8x256xf32>
      tpu.vector_store %arg9[%c0_10, %c0_11], %12 {strides = array<i32>} : memref<8x256xf32, #tpu.memory_space<vmem>>, vector<8x256xf32>,
    } else {
    }
    %c0 = arith.constant 0 : index
    %c0_1 = arith.constant 0 : index
    %3 = vector.load %arg9[%c0, %c0_1] : memref<8x256xf32, #tpu.memory_space<vmem>>, vector<8x256xf32>
    %c0_2 = arith.constant 0 : index
    %c0_3 = arith.constant 0 : index
    %4 = vector.load %arg3[%c0_2, %c0_3] : memref<8x384xbf16, #tpu.memory_space<vmem>>, vector<8x384xbf16>
    %c0_4 = arith.constant 0 : index
    %c0_5 = arith.constant 0 : index
    %5 = vector.load %arg4[%c0_4, %c0_5] : memref<384x256xbf16, #tpu.memory_space<vmem>>, vector<384x256xbf16>
    %cst = arith.constant dense<0.000000e+00> : vector<8x256xf32>
    %6 = tpu.matmul %4, %5, %cst {dimension_numbers = #tpu.dot_dimension_numbers<[1], [0], [0], [1], [0, 0, 1, 1], [], []>} : vector<8x384xbf16>, vector<384x256xbf16>, vector<8x256xf32> -> vector<8x256xf32>
    %7 = arith.addf %3, %6 : vector<8x256xf32>
    %c0_6 = arith.constant 0 : index
    %c0_7 = arith.constant 0 : index
    %8 = vector.load %arg9[%c0_6, %c0_7] : memref<8x256xf32, #tpu.memory_space<vmem>>, vector<8x256xf32>
    tpu.vector_store %arg9[%c0_6, %c0_7], %7 {strides = array<i32>} : memref<8x256xf32, #tpu.memory_space<vmem>>, vector<8x256xf32>,
    %c5_i32 = arith.constant 5 : i32
    %9 = arith.cmpi eq, %arg2, %c5_i32 : i32
    %10 = arith.extui %9 : i1 to i32
    %c0_i32_8 = arith.constant 0 : i32
    %11 = arith.cmpi ne, %10, %c0_i32_8 : i32
    scf.if %11 {
      %c0_9 = arith.constant 0 : index
      %c0_10 = arith.constant 0 : index
      %12 = vector.load %arg9[%c0_9, %c0_10] : memref<8x256xf32, #tpu.memory_space<vmem>>, vector<8x256xf32>
      %c0_11 = arith.constant 0 : index
      %c0_12 = arith.constant 0 : index
      %13 = vector.load %arg5[%c0_11, %c0_12] : memref<1x256xf32, #tpu.memory_space<vmem>>, vector<1x256xf32>
      %14 = vector.broadcast %13 : vector<1x256xf32> to vector<8x256xf32>
      %15 = arith.mulf %12, %14 : vector<8x256xf32>
      %c0_13 = arith.constant 0 : index
      %c0_14 = arith.constant 0 : index
      %16 = vector.load %arg6[%c0_13, %c0_14] : memref<1x256xf32, #tpu.memory_space<vmem>>, vector<1x256xf32>
      %17 = vector.broadcast %16 : vector<1x256xf32> to vector<8x256xf32>
      %18 = arith.addf %15, %17 : vector<8x256xf32>
      %c0_15 = arith.constant 0 : index
      %c0_16 = arith.constant 0 : index
      %19 = vector.load %arg7[%c0_15, %c0_16] : memref<8x256xbf16, #tpu.memory_space<vmem>>, vector<8x256xbf16>
      %20 = arith.extf %19 : vector<8x256xbf16> to vector<8x256xf32>
      %21 = arith.addf %18, %20 : vector<8x256xf32>
      %cst_17 = arith.constant 0.000000e+00 : f32
      %22 = vector.broadcast %cst_17 : f32 to vector<8x256xf32>
      %23 = arith.maximumf %21, %22 : vector<8x256xf32>
      %24 = arith.truncf %23 : vector<8x256xf32> to vector<8x256xbf16>
      %c0_18 = arith.constant 0 : index
      %c0_19 = arith.constant 0 : index
      %25 = vector.load %arg8[%c0_18, %c0_19] : memref<8x256xbf16, #tpu.memory_space<vmem>>, vector<8x256xbf16>
      tpu.vector_store %arg8[%c0_18, %c0_19], %24 {strides = array<i32>} : memref<8x256xbf16, #tpu.memory_space<vmem>>, vector<8x256xbf16>,
    } else {
    }
    return
  }
  func.func @transform_0(%arg0: i32, %arg1: i32, %arg2: i32) -> (i32, i32) {
    %c0_i32 = arith.constant 0 : i32
    return %arg0, %arg2 : i32, i32
  }
  func.func @transform_1(%arg0: i32, %arg1: i32, %arg2: i32) -> (i32, i32) {
    %c0_i32 = arith.constant 0 : i32
    return %arg2, %arg1 : i32, i32
  }
  func.func @transform_2(%arg0: i32, %arg1: i32, %arg2: i32) -> (i32, i32) {
    %c0_i32 = arith.constant 0 : i32
    %c0_i32_0 = arith.constant 0 : i32
    return %c0_i32, %arg1 : i32, i32
  }
  func.func @transform_3(%arg0: i32, %arg1: i32, %arg2: i32) -> (i32, i32) {
    %c0_i32 = arith.constant 0 : i32
    %c0_i32_0 = arith.constant 0 : i32
    return %c0_i32, %arg1 : i32, i32
  }
  func.func @transform_4(%arg0: i32, %arg1: i32, %arg2: i32) -> (i32, i32) {
    %c0_i32 = arith.constant 0 : i32
    return %arg0, %arg1 : i32, i32
  }
  func.func @transform_5(%arg0: i32, %arg1: i32, %arg2: i32) -> (i32, i32) {
    %c0_i32 = arith.constant 0 : i32
    return %arg0, %arg1 : i32, i32
  }
}

module attributes {stable_mosaic.version = 11 : i64} {
  func.func @_mm_kernel(%arg0: i32, %arg1: i32, %arg2: i32, %arg3: memref<8x384xbf16, #tpu.memory_space<vmem>>, %arg4: memref<384x256xbf16, #tpu.memory_space<vmem>>, %arg5: memref<1x256xf32, #tpu.memory_space<vmem>>, %arg6: memref<1x256xf32, #tpu.memory_space<vmem>>, %arg7: memref<8x256xbf16, #tpu.memory_space<vmem>>, %arg8: memref<8x256xf32, #tpu.memory_space<vmem>>) attributes {dimension_semantics = [#tpu.dimension_semantics<parallel>, #tpu.dimension_semantics<parallel>, #tpu.dimension_semantics<arbitrary>], iteration_bounds = array<i64: 1, 1, 6>, scalar_prefetch = 0 : i64, scratch_operands = 1 : i64, tpu.core_type = #tpu.core_type<tc>, window_params = [{transform_indices = @transform_0, window_bounds = array<i64: 8, 384>}, {transform_indices = @transform_1, window_bounds = array<i64: 384, 256>}, {transform_indices = @transform_2, window_bounds = array<i64: 1, 256>}, {transform_indices = @transform_3, window_bounds = array<i64: 1, 256>}, {transform_indices = @transform_4, window_bounds = array<i64: 8, 256>}]} {
    %c0_i32 = arith.constant 0 : i32
    %0 = arith.cmpi eq, %arg2, %c0_i32 : i32
    %1 = arith.extui %0 : i1 to i32
    %c0_i32_0 = arith.constant 0 : i32
    %2 = arith.cmpi ne, %1, %c0_i32_0 : i32
    scf.if %2 {
      %cst_9 = arith.constant 0.000000e+00 : f32
      %12 = vector.broadcast %cst_9 : f32 to vector<8x256xf32>
      %c0_10 = arith.constant 0 : index
      %c0_11 = arith.constant 0 : index
      %13 = vector.load %arg8[%c0_10, %c0_11] : memref<8x256xf32, #tpu.memory_space<vmem>>, vector<8x256xf32>
      tpu.vector_store %arg8[%c0_10, %c0_11], %12 {strides = array<i32>} : memref<8x256xf32, #tpu.memory_space<vmem>>, vector<8x256xf32>,
    } else {
    }
    %c0 = arith.constant 0 : index
    %c0_1 = arith.constant 0 : index
    %3 = vector.load %arg8[%c0, %c0_1] : memref<8x256xf32, #tpu.memory_space<vmem>>, vector<8x256xf32>
    %c0_2 = arith.constant 0 : index
    %c0_3 = arith.constant 0 : index
    %4 = vector.load %arg3[%c0_2, %c0_3] : memref<8x384xbf16, #tpu.memory_space<vmem>>, vector<8x384xbf16>
    %c0_4 = arith.constant 0 : index
    %c0_5 = arith.constant 0 : index
    %5 = vector.load %arg4[%c0_4, %c0_5] : memref<384x256xbf16, #tpu.memory_space<vmem>>, vector<384x256xbf16>
    %cst = arith.constant dense<0.000000e+00> : vector<8x256xf32>
    %6 = tpu.matmul %4, %5, %cst {dimension_numbers = #tpu.dot_dimension_numbers<[1], [0], [0], [1], [0, 0, 1, 1], [], []>} : vector<8x384xbf16>, vector<384x256xbf16>, vector<8x256xf32> -> vector<8x256xf32>
    %7 = arith.addf %3, %6 : vector<8x256xf32>
    %c0_6 = arith.constant 0 : index
    %c0_7 = arith.constant 0 : index
    %8 = vector.load %arg8[%c0_6, %c0_7] : memref<8x256xf32, #tpu.memory_space<vmem>>, vector<8x256xf32>
    tpu.vector_store %arg8[%c0_6, %c0_7], %7 {strides = array<i32>} : memref<8x256xf32, #tpu.memory_space<vmem>>, vector<8x256xf32>,
    %c5_i32 = arith.constant 5 : i32
    %9 = arith.cmpi eq, %arg2, %c5_i32 : i32
    %10 = arith.extui %9 : i1 to i32
    %c0_i32_8 = arith.constant 0 : i32
    %11 = arith.cmpi ne, %10, %c0_i32_8 : i32
    scf.if %11 {
      %c0_9 = arith.constant 0 : index
      %c0_10 = arith.constant 0 : index
      %12 = vector.load %arg8[%c0_9, %c0_10] : memref<8x256xf32, #tpu.memory_space<vmem>>, vector<8x256xf32>
      %c0_11 = arith.constant 0 : index
      %c0_12 = arith.constant 0 : index
      %13 = vector.load %arg5[%c0_11, %c0_12] : memref<1x256xf32, #tpu.memory_space<vmem>>, vector<1x256xf32>
      %14 = vector.broadcast %13 : vector<1x256xf32> to vector<8x256xf32>
      %15 = arith.mulf %12, %14 : vector<8x256xf32>
      %c0_13 = arith.constant 0 : index
      %c0_14 = arith.constant 0 : index
      %16 = vector.load %arg6[%c0_13, %c0_14] : memref<1x256xf32, #tpu.memory_space<vmem>>, vector<1x256xf32>
      %17 = vector.broadcast %16 : vector<1x256xf32> to vector<8x256xf32>
      %18 = arith.addf %15, %17 : vector<8x256xf32>
      %cst_15 = arith.constant 0.000000e+00 : f32
      %19 = vector.broadcast %cst_15 : f32 to vector<8x256xf32>
      %20 = arith.maximumf %18, %19 : vector<8x256xf32>
      %21 = arith.truncf %20 : vector<8x256xf32> to vector<8x256xbf16>
      %c0_16 = arith.constant 0 : index
      %c0_17 = arith.constant 0 : index
      %22 = vector.load %arg7[%c0_16, %c0_17] : memref<8x256xbf16, #tpu.memory_space<vmem>>, vector<8x256xbf16>
      tpu.vector_store %arg7[%c0_16, %c0_17], %21 {strides = array<i32>} : memref<8x256xbf16, #tpu.memory_space<vmem>>, vector<8x256xbf16>,
    } else {
    }
    return
  }
  func.func @transform_0(%arg0: i32, %arg1: i32, %arg2: i32) -> (i32, i32) {
    %c0_i32 = arith.constant 0 : i32
    return %arg0, %arg2 : i32, i32
  }
  func.func @transform_1(%arg0: i32, %arg1: i32, %arg2: i32) -> (i32, i32) {
    %c0_i32 = arith.constant 0 : i32
    return %arg2, %arg1 : i32, i32
  }
  func.func @transform_2(%arg0: i32, %arg1: i32, %arg2: i32) -> (i32, i32) {
    %c0_i32 = arith.constant 0 : i32
    %c0_i32_0 = arith.constant 0 : i32
    return %c0_i32, %arg1 : i32, i32
  }
  func.func @transform_3(%arg0: i32, %arg1: i32, %arg2: i32) -> (i32, i32) {
    %c0_i32 = arith.constant 0 : i32
    %c0_i32_0 = arith.constant 0 : i32
    return %c0_i32, %arg1 : i32, i32
  }
  func.func @transform_4(%arg0: i32, %arg1: i32, %arg2: i32) -> (i32, i32) {
    %c0_i32 = arith.constant 0 : i32
    return %arg0, %arg1 : i32, i32
  }
}

module attributes {stable_mosaic.version = 11 : i64} {
  func.func @_mm_kernel(%arg0: i32, %arg1: i32, %arg2: i32, %arg3: memref<2x384xbf16, #tpu.memory_space<vmem>>, %arg4: memref<384x256xbf16, #tpu.memory_space<vmem>>, %arg5: memref<1x256xf32, #tpu.memory_space<vmem>>, %arg6: memref<1x256xf32, #tpu.memory_space<vmem>>, %arg7: memref<2x256xbf16, #tpu.memory_space<vmem>>, %arg8: memref<2x256xf32, #tpu.memory_space<vmem>>) attributes {dimension_semantics = [#tpu.dimension_semantics<parallel>, #tpu.dimension_semantics<parallel>, #tpu.dimension_semantics<arbitrary>], iteration_bounds = array<i64: 1, 2, 6>, scalar_prefetch = 0 : i64, scratch_operands = 1 : i64, tpu.core_type = #tpu.core_type<tc>, window_params = [{transform_indices = @transform_0, window_bounds = array<i64: 2, 384>}, {transform_indices = @transform_1, window_bounds = array<i64: 384, 256>}, {transform_indices = @transform_2, window_bounds = array<i64: 1, 256>}, {transform_indices = @transform_3, window_bounds = array<i64: 1, 256>}, {transform_indices = @transform_4, window_bounds = array<i64: 2, 256>}]} {
    %c0_i32 = arith.constant 0 : i32
    %0 = arith.cmpi eq, %arg2, %c0_i32 : i32
    %1 = arith.extui %0 : i1 to i32
    %c0_i32_0 = arith.constant 0 : i32
    %2 = arith.cmpi ne, %1, %c0_i32_0 : i32
    scf.if %2 {
      %cst_9 = arith.constant 0.000000e+00 : f32
      %12 = vector.broadcast %cst_9 : f32 to vector<2x256xf32>
      %c0_10 = arith.constant 0 : index
      %c0_11 = arith.constant 0 : index
      %13 = vector.load %arg8[%c0_10, %c0_11] : memref<2x256xf32, #tpu.memory_space<vmem>>, vector<2x256xf32>
      tpu.vector_store %arg8[%c0_10, %c0_11], %12 {strides = array<i32>} : memref<2x256xf32, #tpu.memory_space<vmem>>, vector<2x256xf32>,
    } else {
    }
    %c0 = arith.constant 0 : index
    %c0_1 = arith.constant 0 : index
    %3 = vector.load %arg8[%c0, %c0_1] : memref<2x256xf32, #tpu.memory_space<vmem>>, vector<2x256xf32>
    %c0_2 = arith.constant 0 : index
    %c0_3 = arith.constant 0 : index
    %4 = vector.load %arg3[%c0_2, %c0_3] : memref<2x384xbf16, #tpu.memory_space<vmem>>, vector<2x384xbf16>
    %c0_4 = arith.constant 0 : index
    %c0_5 = arith.constant 0 : index
    %5 = vector.load %arg4[%c0_4, %c0_5] : memref<384x256xbf16, #tpu.memory_space<vmem>>, vector<384x256xbf16>
    %cst = arith.constant dense<0.000000e+00> : vector<2x256xf32>
    %6 = tpu.matmul %4, %5, %cst {dimension_numbers = #tpu.dot_dimension_numbers<[1], [0], [0], [1], [0, 0, 1, 1], [], []>} : vector<2x384xbf16>, vector<384x256xbf16>, vector<2x256xf32> -> vector<2x256xf32>
    %7 = arith.addf %3, %6 : vector<2x256xf32>
    %c0_6 = arith.constant 0 : index
    %c0_7 = arith.constant 0 : index
    %8 = vector.load %arg8[%c0_6, %c0_7] : memref<2x256xf32, #tpu.memory_space<vmem>>, vector<2x256xf32>
    tpu.vector_store %arg8[%c0_6, %c0_7], %7 {strides = array<i32>} : memref<2x256xf32, #tpu.memory_space<vmem>>, vector<2x256xf32>,
    %c5_i32 = arith.constant 5 : i32
    %9 = arith.cmpi eq, %arg2, %c5_i32 : i32
    %10 = arith.extui %9 : i1 to i32
    %c0_i32_8 = arith.constant 0 : i32
    %11 = arith.cmpi ne, %10, %c0_i32_8 : i32
    scf.if %11 {
      %c0_9 = arith.constant 0 : index
      %c0_10 = arith.constant 0 : index
      %12 = vector.load %arg8[%c0_9, %c0_10] : memref<2x256xf32, #tpu.memory_space<vmem>>, vector<2x256xf32>
      %c0_11 = arith.constant 0 : index
      %c0_12 = arith.constant 0 : index
      %13 = vector.load %arg5[%c0_11, %c0_12] : memref<1x256xf32, #tpu.memory_space<vmem>>, vector<1x256xf32>
      %14 = vector.broadcast %13 : vector<1x256xf32> to vector<2x256xf32>
      %15 = arith.mulf %12, %14 : vector<2x256xf32>
      %c0_13 = arith.constant 0 : index
      %c0_14 = arith.constant 0 : index
      %16 = vector.load %arg6[%c0_13, %c0_14] : memref<1x256xf32, #tpu.memory_space<vmem>>, vector<1x256xf32>
      %17 = vector.broadcast %16 : vector<1x256xf32> to vector<2x256xf32>
      %18 = arith.addf %15, %17 : vector<2x256xf32>
      %cst_15 = arith.constant 0.000000e+00 : f32
      %19 = vector.broadcast %cst_15 : f32 to vector<2x256xf32>
      %20 = arith.maximumf %18, %19 : vector<2x256xf32>
      %21 = arith.truncf %20 : vector<2x256xf32> to vector<2x256xbf16>
      %c0_16 = arith.constant 0 : index
      %c0_17 = arith.constant 0 : index
      %22 = vector.load %arg7[%c0_16, %c0_17] : memref<2x256xbf16, #tpu.memory_space<vmem>>, vector<2x256xbf16>
      tpu.vector_store %arg7[%c0_16, %c0_17], %21 {strides = array<i32>} : memref<2x256xbf16, #tpu.memory_space<vmem>>, vector<2x256xbf16>,
    } else {
    }
    return
  }
  func.func @transform_0(%arg0: i32, %arg1: i32, %arg2: i32) -> (i32, i32) {
    %c0_i32 = arith.constant 0 : i32
    return %arg0, %arg2 : i32, i32
  }
  func.func @transform_1(%arg0: i32, %arg1: i32, %arg2: i32) -> (i32, i32) {
    %c0_i32 = arith.constant 0 : i32
    return %arg2, %arg1 : i32, i32
  }
  func.func @transform_2(%arg0: i32, %arg1: i32, %arg2: i32) -> (i32, i32) {
    %c0_i32 = arith.constant 0 : i32
    %c0_i32_0 = arith.constant 0 : i32
    return %c0_i32, %arg1 : i32, i32
  }
  func.func @transform_3(%arg0: i32, %arg1: i32, %arg2: i32) -> (i32, i32) {
    %c0_i32 = arith.constant 0 : i32
    %c0_i32_0 = arith.constant 0 : i32
    return %c0_i32, %arg1 : i32, i32
  }
  func.func @transform_4(%arg0: i32, %arg1: i32, %arg2: i32) -> (i32, i32) {
    %c0_i32 = arith.constant 0 : i32
    return %arg0, %arg1 : i32, i32
  }
}

module attributes {stable_mosaic.version = 11 : i64} {
  func.func @_mm_kernel(%arg0: i32, %arg1: i32, %arg2: i32, %arg3: memref<2x256xbf16, #tpu.memory_space<vmem>>, %arg4: memref<256x256xbf16, #tpu.memory_space<vmem>>, %arg5: memref<1x256xf32, #tpu.memory_space<vmem>>, %arg6: memref<1x256xf32, #tpu.memory_space<vmem>>, %arg7: memref<2x256xbf16, #tpu.memory_space<vmem>>, %arg8: memref<2x256xf32, #tpu.memory_space<vmem>>) attributes {dimension_semantics = [#tpu.dimension_semantics<parallel>, #tpu.dimension_semantics<parallel>, #tpu.dimension_semantics<arbitrary>], iteration_bounds = array<i64: 1, 2, 1>, scalar_prefetch = 0 : i64, scratch_operands = 1 : i64, tpu.core_type = #tpu.core_type<tc>, window_params = [{transform_indices = @transform_0, window_bounds = array<i64: 2, 256>}, {transform_indices = @transform_1, window_bounds = array<i64: 256, 256>}, {transform_indices = @transform_2, window_bounds = array<i64: 1, 256>}, {transform_indices = @transform_3, window_bounds = array<i64: 1, 256>}, {transform_indices = @transform_4, window_bounds = array<i64: 2, 256>}]} {
    %c0_i32 = arith.constant 0 : i32
    %0 = arith.cmpi eq, %arg2, %c0_i32 : i32
    %1 = arith.extui %0 : i1 to i32
    %c0_i32_0 = arith.constant 0 : i32
    %2 = arith.cmpi ne, %1, %c0_i32_0 : i32
    scf.if %2 {
      %cst_10 = arith.constant 0.000000e+00 : f32
      %12 = vector.broadcast %cst_10 : f32 to vector<2x256xf32>
      %c0_11 = arith.constant 0 : index
      %c0_12 = arith.constant 0 : index
      %13 = vector.load %arg8[%c0_11, %c0_12] : memref<2x256xf32, #tpu.memory_space<vmem>>, vector<2x256xf32>
      tpu.vector_store %arg8[%c0_11, %c0_12], %12 {strides = array<i32>} : memref<2x256xf32, #tpu.memory_space<vmem>>, vector<2x256xf32>,
    } else {
    }
    %c0 = arith.constant 0 : index
    %c0_1 = arith.constant 0 : index
    %3 = vector.load %arg8[%c0, %c0_1] : memref<2x256xf32, #tpu.memory_space<vmem>>, vector<2x256xf32>
    %c0_2 = arith.constant 0 : index
    %c0_3 = arith.constant 0 : index
    %4 = vector.load %arg3[%c0_2, %c0_3] : memref<2x256xbf16, #tpu.memory_space<vmem>>, vector<2x256xbf16>
    %c0_4 = arith.constant 0 : index
    %c0_5 = arith.constant 0 : index
    %5 = vector.load %arg4[%c0_4, %c0_5] : memref<256x256xbf16, #tpu.memory_space<vmem>>, vector<256x256xbf16>
    %cst = arith.constant dense<0.000000e+00> : vector<2x256xf32>
    %6 = tpu.matmul %4, %5, %cst {dimension_numbers = #tpu.dot_dimension_numbers<[1], [0], [0], [1], [0, 0, 1, 1], [], []>} : vector<2x256xbf16>, vector<256x256xbf16>, vector<2x256xf32> -> vector<2x256xf32>
    %7 = arith.addf %3, %6 : vector<2x256xf32>
    %c0_6 = arith.constant 0 : index
    %c0_7 = arith.constant 0 : index
    %8 = vector.load %arg8[%c0_6, %c0_7] : memref<2x256xf32, #tpu.memory_space<vmem>>, vector<2x256xf32>
    tpu.vector_store %arg8[%c0_6, %c0_7], %7 {strides = array<i32>} : memref<2x256xf32, #tpu.memory_space<vmem>>, vector<2x256xf32>,
    %c0_i32_8 = arith.constant 0 : i32
    %9 = arith.cmpi eq, %arg2, %c0_i32_8 : i32
    %10 = arith.extui %9 : i1 to i32
    %c0_i32_9 = arith.constant 0 : i32
    %11 = arith.cmpi ne, %10, %c0_i32_9 : i32
    scf.if %11 {
      %c0_10 = arith.constant 0 : index
      %c0_11 = arith.constant 0 : index
      %12 = vector.load %arg8[%c0_10, %c0_11] : memref<2x256xf32, #tpu.memory_space<vmem>>, vector<2x256xf32>
      %c0_12 = arith.constant 0 : index
      %c0_13 = arith.constant 0 : index
      %13 = vector.load %arg5[%c0_12, %c0_13] : memref<1x256xf32, #tpu.memory_space<vmem>>, vector<1x256xf32>
      %14 = vector.broadcast %13 : vector<1x256xf32> to vector<2x256xf32>
      %15 = arith.mulf %12, %14 : vector<2x256xf32>
      %c0_14 = arith.constant 0 : index
      %c0_15 = arith.constant 0 : index
      %16 = vector.load %arg6[%c0_14, %c0_15] : memref<1x256xf32, #tpu.memory_space<vmem>>, vector<1x256xf32>
      %17 = vector.broadcast %16 : vector<1x256xf32> to vector<2x256xf32>
      %18 = arith.addf %15, %17 : vector<2x256xf32>
      %19 = arith.truncf %18 : vector<2x256xf32> to vector<2x256xbf16>
      %c0_16 = arith.constant 0 : index
      %c0_17 = arith.constant 0 : index
      %20 = vector.load %arg7[%c0_16, %c0_17] : memref<2x256xbf16, #tpu.memory_space<vmem>>, vector<2x256xbf16>
      tpu.vector_store %arg7[%c0_16, %c0_17], %19 {strides = array<i32>} : memref<2x256xbf16, #tpu.memory_space<vmem>>, vector<2x256xbf16>,
    } else {
    }
    return
  }
  func.func @transform_0(%arg0: i32, %arg1: i32, %arg2: i32) -> (i32, i32) {
    %c0_i32 = arith.constant 0 : i32
    return %arg0, %arg2 : i32, i32
  }
  func.func @transform_1(%arg0: i32, %arg1: i32, %arg2: i32) -> (i32, i32) {
    %c0_i32 = arith.constant 0 : i32
    return %arg2, %arg1 : i32, i32
  }
  func.func @transform_2(%arg0: i32, %arg1: i32, %arg2: i32) -> (i32, i32) {
    %c0_i32 = arith.constant 0 : i32
    %c0_i32_0 = arith.constant 0 : i32
    return %c0_i32, %arg1 : i32, i32
  }
  func.func @transform_3(%arg0: i32, %arg1: i32, %arg2: i32) -> (i32, i32) {
    %c0_i32 = arith.constant 0 : i32
    %c0_i32_0 = arith.constant 0 : i32
    return %c0_i32, %arg1 : i32, i32
  }
  func.func @transform_4(%arg0: i32, %arg1: i32, %arg2: i32) -> (i32, i32) {
    %c0_i32 = arith.constant 0 : i32
    return %arg0, %arg1 : i32, i32
  }
}

module attributes {stable_mosaic.version = 11 : i64} {
  func.func @_mm_res_kernel(%arg0: i32, %arg1: i32, %arg2: i32, %arg3: memref<2x512xbf16, #tpu.memory_space<vmem>>, %arg4: memref<512x256xbf16, #tpu.memory_space<vmem>>, %arg5: memref<1x256xf32, #tpu.memory_space<vmem>>, %arg6: memref<1x256xf32, #tpu.memory_space<vmem>>, %arg7: memref<2x256xbf16, #tpu.memory_space<vmem>>, %arg8: memref<2x256xbf16, #tpu.memory_space<vmem>>, %arg9: memref<2x256xf32, #tpu.memory_space<vmem>>) attributes {dimension_semantics = [#tpu.dimension_semantics<parallel>, #tpu.dimension_semantics<parallel>, #tpu.dimension_semantics<arbitrary>], iteration_bounds = array<i64: 1, 2, 9>, scalar_prefetch = 0 : i64, scratch_operands = 1 : i64, tpu.core_type = #tpu.core_type<tc>, window_params = [{transform_indices = @transform_0, window_bounds = array<i64: 2, 512>}, {transform_indices = @transform_1, window_bounds = array<i64: 512, 256>}, {transform_indices = @transform_2, window_bounds = array<i64: 1, 256>}, {transform_indices = @transform_3, window_bounds = array<i64: 1, 256>}, {transform_indices = @transform_4, window_bounds = array<i64: 2, 256>}, {transform_indices = @transform_5, window_bounds = array<i64: 2, 256>}]} {
    %c0_i32 = arith.constant 0 : i32
    %0 = arith.cmpi eq, %arg2, %c0_i32 : i32
    %1 = arith.extui %0 : i1 to i32
    %c0_i32_0 = arith.constant 0 : i32
    %2 = arith.cmpi ne, %1, %c0_i32_0 : i32
    scf.if %2 {
      %cst_9 = arith.constant 0.000000e+00 : f32
      %12 = vector.broadcast %cst_9 : f32 to vector<2x256xf32>
      %c0_10 = arith.constant 0 : index
      %c0_11 = arith.constant 0 : index
      %13 = vector.load %arg9[%c0_10, %c0_11] : memref<2x256xf32, #tpu.memory_space<vmem>>, vector<2x256xf32>
      tpu.vector_store %arg9[%c0_10, %c0_11], %12 {strides = array<i32>} : memref<2x256xf32, #tpu.memory_space<vmem>>, vector<2x256xf32>,
    } else {
    }
    %c0 = arith.constant 0 : index
    %c0_1 = arith.constant 0 : index
    %3 = vector.load %arg9[%c0, %c0_1] : memref<2x256xf32, #tpu.memory_space<vmem>>, vector<2x256xf32>
    %c0_2 = arith.constant 0 : index
    %c0_3 = arith.constant 0 : index
    %4 = vector.load %arg3[%c0_2, %c0_3] : memref<2x512xbf16, #tpu.memory_space<vmem>>, vector<2x512xbf16>
    %c0_4 = arith.constant 0 : index
    %c0_5 = arith.constant 0 : index
    %5 = vector.load %arg4[%c0_4, %c0_5] : memref<512x256xbf16, #tpu.memory_space<vmem>>, vector<512x256xbf16>
    %cst = arith.constant dense<0.000000e+00> : vector<2x256xf32>
    %6 = tpu.matmul %4, %5, %cst {dimension_numbers = #tpu.dot_dimension_numbers<[1], [0], [0], [1], [0, 0, 1, 1], [], []>} : vector<2x512xbf16>, vector<512x256xbf16>, vector<2x256xf32> -> vector<2x256xf32>
    %7 = arith.addf %3, %6 : vector<2x256xf32>
    %c0_6 = arith.constant 0 : index
    %c0_7 = arith.constant 0 : index
    %8 = vector.load %arg9[%c0_6, %c0_7] : memref<2x256xf32, #tpu.memory_space<vmem>>, vector<2x256xf32>
    tpu.vector_store %arg9[%c0_6, %c0_7], %7 {strides = array<i32>} : memref<2x256xf32, #tpu.memory_space<vmem>>, vector<2x256xf32>,
    %c8_i32 = arith.constant 8 : i32
    %9 = arith.cmpi eq, %arg2, %c8_i32 : i32
    %10 = arith.extui %9 : i1 to i32
    %c0_i32_8 = arith.constant 0 : i32
    %11 = arith.cmpi ne, %10, %c0_i32_8 : i32
    scf.if %11 {
      %c0_9 = arith.constant 0 : index
      %c0_10 = arith.constant 0 : index
      %12 = vector.load %arg9[%c0_9, %c0_10] : memref<2x256xf32, #tpu.memory_space<vmem>>, vector<2x256xf32>
      %c0_11 = arith.constant 0 : index
      %c0_12 = arith.constant 0 : index
      %13 = vector.load %arg5[%c0_11, %c0_12] : memref<1x256xf32, #tpu.memory_space<vmem>>, vector<1x256xf32>
      %14 = vector.broadcast %13 : vector<1x256xf32> to vector<2x256xf32>
      %15 = arith.mulf %12, %14 : vector<2x256xf32>
      %c0_13 = arith.constant 0 : index
      %c0_14 = arith.constant 0 : index
      %16 = vector.load %arg6[%c0_13, %c0_14] : memref<1x256xf32, #tpu.memory_space<vmem>>, vector<1x256xf32>
      %17 = vector.broadcast %16 : vector<1x256xf32> to vector<2x256xf32>
      %18 = arith.addf %15, %17 : vector<2x256xf32>
      %c0_15 = arith.constant 0 : index
      %c0_16 = arith.constant 0 : index
      %19 = vector.load %arg7[%c0_15, %c0_16] : memref<2x256xbf16, #tpu.memory_space<vmem>>, vector<2x256xbf16>
      %20 = arith.extf %19 : vector<2x256xbf16> to vector<2x256xf32>
      %21 = arith.addf %18, %20 : vector<2x256xf32>
      %cst_17 = arith.constant 0.000000e+00 : f32
      %22 = vector.broadcast %cst_17 : f32 to vector<2x256xf32>
      %23 = arith.maximumf %21, %22 : vector<2x256xf32>
      %24 = arith.truncf %23 : vector<2x256xf32> to vector<2x256xbf16>
      %c0_18 = arith.constant 0 : index
      %c0_19 = arith.constant 0 : index
      %25 = vector.load %arg8[%c0_18, %c0_19] : memref<2x256xbf16, #tpu.memory_space<vmem>>, vector<2x256xbf16>
      tpu.vector_store %arg8[%c0_18, %c0_19], %24 {strides = array<i32>} : memref<2x256xbf16, #tpu.memory_space<vmem>>, vector<2x256xbf16>,
    } else {
    }
    return
  }
  func.func @transform_0(%arg0: i32, %arg1: i32, %arg2: i32) -> (i32, i32) {
    %c0_i32 = arith.constant 0 : i32
    return %arg0, %arg2 : i32, i32
  }
  func.func @transform_1(%arg0: i32, %arg1: i32, %arg2: i32) -> (i32, i32) {
    %c0_i32 = arith.constant 0 : i32
    return %arg2, %arg1 : i32, i32
  }
  func.func @transform_2(%arg0: i32, %arg1: i32, %arg2: i32) -> (i32, i32) {
    %c0_i32 = arith.constant 0 : i32
    %c0_i32_0 = arith.constant 0 : i32
    return %c0_i32, %arg1 : i32, i32
  }
  func.func @transform_3(%arg0: i32, %arg1: i32, %arg2: i32) -> (i32, i32) {
    %c0_i32 = arith.constant 0 : i32
    %c0_i32_0 = arith.constant 0 : i32
    return %c0_i32, %arg1 : i32, i32
  }
  func.func @transform_4(%arg0: i32, %arg1: i32, %arg2: i32) -> (i32, i32) {
    %c0_i32 = arith.constant 0 : i32
    return %arg0, %arg1 : i32, i32
  }
  func.func @transform_5(%arg0: i32, %arg1: i32, %arg2: i32) -> (i32, i32) {
    %c0_i32 = arith.constant 0 : i32
    return %arg0, %arg1 : i32, i32
  }
}

module attributes {stable_mosaic.version = 11 : i64} {
  func.func @_mm_kernel(%arg0: i32, %arg1: i32, %arg2: i32, %arg3: memref<2x512xbf16, #tpu.memory_space<vmem>>, %arg4: memref<512x256xbf16, #tpu.memory_space<vmem>>, %arg5: memref<1x256xf32, #tpu.memory_space<vmem>>, %arg6: memref<1x256xf32, #tpu.memory_space<vmem>>, %arg7: memref<2x256xbf16, #tpu.memory_space<vmem>>, %arg8: memref<2x256xf32, #tpu.memory_space<vmem>>) attributes {dimension_semantics = [#tpu.dimension_semantics<parallel>, #tpu.dimension_semantics<parallel>, #tpu.dimension_semantics<arbitrary>], iteration_bounds = array<i64: 1, 2, 9>, scalar_prefetch = 0 : i64, scratch_operands = 1 : i64, tpu.core_type = #tpu.core_type<tc>, window_params = [{transform_indices = @transform_0, window_bounds = array<i64: 2, 512>}, {transform_indices = @transform_1, window_bounds = array<i64: 512, 256>}, {transform_indices = @transform_2, window_bounds = array<i64: 1, 256>}, {transform_indices = @transform_3, window_bounds = array<i64: 1, 256>}, {transform_indices = @transform_4, window_bounds = array<i64: 2, 256>}]} {
    %c0_i32 = arith.constant 0 : i32
    %0 = arith.cmpi eq, %arg2, %c0_i32 : i32
    %1 = arith.extui %0 : i1 to i32
    %c0_i32_0 = arith.constant 0 : i32
    %2 = arith.cmpi ne, %1, %c0_i32_0 : i32
    scf.if %2 {
      %cst_9 = arith.constant 0.000000e+00 : f32
      %12 = vector.broadcast %cst_9 : f32 to vector<2x256xf32>
      %c0_10 = arith.constant 0 : index
      %c0_11 = arith.constant 0 : index
      %13 = vector.load %arg8[%c0_10, %c0_11] : memref<2x256xf32, #tpu.memory_space<vmem>>, vector<2x256xf32>
      tpu.vector_store %arg8[%c0_10, %c0_11], %12 {strides = array<i32>} : memref<2x256xf32, #tpu.memory_space<vmem>>, vector<2x256xf32>,
    } else {
    }
    %c0 = arith.constant 0 : index
    %c0_1 = arith.constant 0 : index
    %3 = vector.load %arg8[%c0, %c0_1] : memref<2x256xf32, #tpu.memory_space<vmem>>, vector<2x256xf32>
    %c0_2 = arith.constant 0 : index
    %c0_3 = arith.constant 0 : index
    %4 = vector.load %arg3[%c0_2, %c0_3] : memref<2x512xbf16, #tpu.memory_space<vmem>>, vector<2x512xbf16>
    %c0_4 = arith.constant 0 : index
    %c0_5 = arith.constant 0 : index
    %5 = vector.load %arg4[%c0_4, %c0_5] : memref<512x256xbf16, #tpu.memory_space<vmem>>, vector<512x256xbf16>
    %cst = arith.constant dense<0.000000e+00> : vector<2x256xf32>
    %6 = tpu.matmul %4, %5, %cst {dimension_numbers = #tpu.dot_dimension_numbers<[1], [0], [0], [1], [0, 0, 1, 1], [], []>} : vector<2x512xbf16>, vector<512x256xbf16>, vector<2x256xf32> -> vector<2x256xf32>
    %7 = arith.addf %3, %6 : vector<2x256xf32>
    %c0_6 = arith.constant 0 : index
    %c0_7 = arith.constant 0 : index
    %8 = vector.load %arg8[%c0_6, %c0_7] : memref<2x256xf32, #tpu.memory_space<vmem>>, vector<2x256xf32>
    tpu.vector_store %arg8[%c0_6, %c0_7], %7 {strides = array<i32>} : memref<2x256xf32, #tpu.memory_space<vmem>>, vector<2x256xf32>,
    %c8_i32 = arith.constant 8 : i32
    %9 = arith.cmpi eq, %arg2, %c8_i32 : i32
    %10 = arith.extui %9 : i1 to i32
    %c0_i32_8 = arith.constant 0 : i32
    %11 = arith.cmpi ne, %10, %c0_i32_8 : i32
    scf.if %11 {
      %c0_9 = arith.constant 0 : index
      %c0_10 = arith.constant 0 : index
      %12 = vector.load %arg8[%c0_9, %c0_10] : memref<2x256xf32, #tpu.memory_space<vmem>>, vector<2x256xf32>
      %c0_11 = arith.constant 0 : index
      %c0_12 = arith.constant 0 : index
      %13 = vector.load %arg5[%c0_11, %c0_12] : memref<1x256xf32, #tpu.memory_space<vmem>>, vector<1x256xf32>
      %14 = vector.broadcast %13 : vector<1x256xf32> to vector<2x256xf32>
      %15 = arith.mulf %12, %14 : vector<2x256xf32>
      %c0_13 = arith.constant 0 : index
      %c0_14 = arith.constant 0 : index
      %16 = vector.load %arg6[%c0_13, %c0_14] : memref<1x256xf32, #tpu.memory_space<vmem>>, vector<1x256xf32>
      %17 = vector.broadcast %16 : vector<1x256xf32> to vector<2x256xf32>
      %18 = arith.addf %15, %17 : vector<2x256xf32>
      %cst_15 = arith.constant 0.000000e+00 : f32
      %19 = vector.broadcast %cst_15 : f32 to vector<2x256xf32>
      %20 = arith.maximumf %18, %19 : vector<2x256xf32>
      %21 = arith.truncf %20 : vector<2x256xf32> to vector<2x256xbf16>
      %c0_16 = arith.constant 0 : index
      %c0_17 = arith.constant 0 : index
      %22 = vector.load %arg7[%c0_16, %c0_17] : memref<2x256xbf16, #tpu.memory_space<vmem>>, vector<2x256xbf16>
      tpu.vector_store %arg7[%c0_16, %c0_17], %21 {strides = array<i32>} : memref<2x256xbf16, #tpu.memory_space<vmem>>, vector<2x256xbf16>,
    } else {
    }
    return
  }
  func.func @transform_0(%arg0: i32, %arg1: i32, %arg2: i32) -> (i32, i32) {
    %c0_i32 = arith.constant 0 : i32
    return %arg0, %arg2 : i32, i32
  }
  func.func @transform_1(%arg0: i32, %arg1: i32, %arg2: i32) -> (i32, i32) {
    %c0_i32 = arith.constant 0 : i32
    return %arg2, %arg1 : i32, i32
  }
  func.func @transform_2(%arg0: i32, %arg1: i32, %arg2: i32) -> (i32, i32) {
    %c0_i32 = arith.constant 0 : i32
    %c0_i32_0 = arith.constant 0 : i32
    return %c0_i32, %arg1 : i32, i32
  }
  func.func @transform_3(%arg0: i32, %arg1: i32, %arg2: i32) -> (i32, i32) {
    %c0_i32 = arith.constant 0 : i32
    %c0_i32_0 = arith.constant 0 : i32
    return %c0_i32, %arg1 : i32, i32
  }
  func.func @transform_4(%arg0: i32, %arg1: i32, %arg2: i32) -> (i32, i32) {
    %c0_i32 = arith.constant 0 : i32
    return %arg0, %arg1 : i32, i32
  }
}

module attributes {stable_mosaic.version = 11 : i64} {
  func.func @_avgpool_kernel(%arg0: i32, %arg1: memref<2x1x512xbf16, #tpu.memory_space<vmem>>, %arg2: memref<2x512xf32, #tpu.memory_space<vmem>>) attributes {dimension_semantics = [#tpu.dimension_semantics<parallel>], iteration_bounds = array<i64: 1>, scalar_prefetch = 0 : i64, scratch_operands = 0 : i64, tpu.core_type = #tpu.core_type<tc>, window_params = [{transform_indices = @transform_0, window_bounds = array<i64: 2, 1, 512>}, {transform_indices = @transform_1, window_bounds = array<i64: 2, 512>}]} {
    %c0 = arith.constant 0 : index
    %c0_0 = arith.constant 0 : index
    %c0_1 = arith.constant 0 : index
    %0 = vector.load %arg1[%c0, %c0_0, %c0_1] : memref<2x1x512xbf16, #tpu.memory_space<vmem>>, vector<2x1x512xbf16>
    %1 = arith.extf %0 : vector<2x1x512xbf16> to vector<2x1x512xf32>
    %cst = arith.constant dense<0.000000e+00> : vector<2x512xf32>
    %2 = vector.multi_reduction <add>, %1, %cst [1] : vector<2x1x512xf32> to vector<2x512xf32>
    %cst_2 = arith.constant 1.000000e+00 : f32
    %3 = vector.broadcast %cst_2 : f32 to vector<2x512xf32>
    %4 = arith.divf %2, %3 : vector<2x512xf32>
    %c0_3 = arith.constant 0 : index
    %c0_4 = arith.constant 0 : index
    %5 = vector.load %arg2[%c0_3, %c0_4] : memref<2x512xf32, #tpu.memory_space<vmem>>, vector<2x512xf32>
    tpu.vector_store %arg2[%c0_3, %c0_4], %4 {strides = array<i32>} : memref<2x512xf32, #tpu.memory_space<vmem>>, vector<2x512xf32>,
    return
  }
  func.func @transform_0(%arg0: i32) -> (i32, i32, i32) {
    %c0_i32 = arith.constant 0 : i32
    %c0_i32_0 = arith.constant 0 : i32
    %c0_i32_1 = arith.constant 0 : i32
    return %arg0, %c0_i32, %c0_i32_0 : i32, i32, i32
  }
  func.func @transform_1(%arg0: i32) -> (i32, i32) {
    %c0_i32 = arith.constant 0 : i32
    %c0_i32_0 = arith.constant 0 : i32
    return %arg0, %c0_i32 : i32, i32
  }
}

module attributes {stable_mosaic.version = 11 : i64} {
  func.func @_heads_kernel(%arg0: i32, %arg1: memref<2x512xf32, #tpu.memory_space<vmem>>, %arg2: memref<1x512x128xbf16, #tpu.memory_space<vmem>>, %arg3: memref<1x1x128xf32, #tpu.memory_space<vmem>>, %arg4: memref<1x128x128xbf16, #tpu.memory_space<vmem>>, %arg5: memref<1x1x128xf32, #tpu.memory_space<vmem>>, %arg6: memref<1x128x128xbf16, #tpu.memory_space<vmem>>, %arg7: memref<1x1x128xf32, #tpu.memory_space<vmem>>, %arg8: memref<1x2x128xf32, #tpu.memory_space<vmem>>, %arg9: memref<1x2x128xf32, #tpu.memory_space<vmem>>) attributes {dimension_semantics = [#tpu.dimension_semantics<parallel>], iteration_bounds = array<i64: 2>, scalar_prefetch = 0 : i64, scratch_operands = 0 : i64, tpu.core_type = #tpu.core_type<tc>, window_params = [{pipeline_mode = #tpu.pipeline_mode<synchronous>, transform_indices = @transform_0, window_bounds = array<i64: 2, 512>}, {transform_indices = @transform_1, window_bounds = array<i64: 1, 512, 128>}, {transform_indices = @transform_2, window_bounds = array<i64: 1, 1, 128>}, {transform_indices = @transform_3, window_bounds = array<i64: 1, 128, 128>}, {transform_indices = @transform_4, window_bounds = array<i64: 1, 1, 128>}, {transform_indices = @transform_5, window_bounds = array<i64: 1, 128, 128>}, {transform_indices = @transform_6, window_bounds = array<i64: 1, 1, 128>}, {transform_indices = @transform_7, window_bounds = array<i64: 1, 2, 128>}, {transform_indices = @transform_8, window_bounds = array<i64: 1, 2, 128>}]} {
    %c0 = arith.constant 0 : index
    %c0_0 = arith.constant 0 : index
    %0 = vector.load %arg1[%c0, %c0_0] : memref<2x512xf32, #tpu.memory_space<vmem>>, vector<2x512xf32>
    %1 = arith.truncf %0 : vector<2x512xf32> to vector<2x512xbf16>
    %c0_1 = arith.constant 0 : index
    %c0_2 = arith.constant 0 : index
    %c0_3 = arith.constant 0 : index
    %2 = vector.load %arg2[%c0_1, %c0_2, %c0_3] : memref<1x512x128xbf16, #tpu.memory_space<vmem>>, vector<1x512x128xbf16>
    %3 = vector.shape_cast %2 : vector<1x512x128xbf16> to vector<512x128xbf16>
    %cst = arith.constant dense<0.000000e+00> : vector<2x128xf32>
    %4 = tpu.matmul %1, %3, %cst {dimension_numbers = #tpu.dot_dimension_numbers<[1], [0], [0], [1], [0, 0, 1, 1], [], []>} : vector<2x512xbf16>, vector<512x128xbf16>, vector<2x128xf32> -> vector<2x128xf32>
    %c0_4 = arith.constant 0 : index
    %c0_5 = arith.constant 0 : index
    %c0_6 = arith.constant 0 : index
    %5 = vector.load %arg3[%c0_4, %c0_5, %c0_6] : memref<1x1x128xf32, #tpu.memory_space<vmem>>, vector<1x1x128xf32>
    %6 = vector.shape_cast %5 : vector<1x1x128xf32> to vector<1x128xf32>
    %7 = vector.broadcast %6 : vector<1x128xf32> to vector<2x128xf32>
    %8 = arith.addf %4, %7 : vector<2x128xf32>
    %cst_7 = arith.constant 0.000000e+00 : f32
    %9 = vector.broadcast %cst_7 : f32 to vector<2x128xf32>
    %10 = arith.maximumf %8, %9 : vector<2x128xf32>
    %11 = arith.truncf %10 : vector<2x128xf32> to vector<2x128xbf16>
    %c0_8 = arith.constant 0 : index
    %c0_9 = arith.constant 0 : index
    %c0_10 = arith.constant 0 : index
    %12 = vector.load %arg4[%c0_8, %c0_9, %c0_10] : memref<1x128x128xbf16, #tpu.memory_space<vmem>>, vector<1x128x128xbf16>
    %13 = vector.shape_cast %12 : vector<1x128x128xbf16> to vector<128x128xbf16>
    %cst_11 = arith.constant dense<0.000000e+00> : vector<2x128xf32>
    %14 = tpu.matmul %11, %13, %cst_11 {dimension_numbers = #tpu.dot_dimension_numbers<[1], [0], [0], [1], [0, 0, 1, 1], [], []>} : vector<2x128xbf16>, vector<128x128xbf16>, vector<2x128xf32> -> vector<2x128xf32>
    %c0_12 = arith.constant 0 : index
    %c0_13 = arith.constant 0 : index
    %c0_14 = arith.constant 0 : index
    %15 = vector.load %arg5[%c0_12, %c0_13, %c0_14] : memref<1x1x128xf32, #tpu.memory_space<vmem>>, vector<1x1x128xf32>
    %16 = vector.shape_cast %15 : vector<1x1x128xf32> to vector<1x128xf32>
    %17 = vector.broadcast %16 : vector<1x128xf32> to vector<2x128xf32>
    %18 = arith.addf %14, %17 : vector<2x128xf32>
    %cst_15 = arith.constant 0.000000e+00 : f32
    %19 = vector.broadcast %cst_15 : f32 to vector<2x128xf32>
    %20 = arith.maximumf %18, %19 : vector<2x128xf32>
    %c0_16 = arith.constant 0 : index
    %c0_17 = arith.constant 0 : index
    %c0_18 = arith.constant 0 : index
    %21 = vector.load %arg8[%c0_16, %c0_17, %c0_18] : memref<1x2x128xf32, #tpu.memory_space<vmem>>, vector<1x2x128xf32>
    %22 = vector.shape_cast %21 : vector<1x2x128xf32> to vector<2x128xf32>
    %23 = vector.shape_cast %20 : vector<2x128xf32> to vector<1x2x128xf32>
    tpu.vector_store %arg8[%c0_16, %c0_17, %c0_18], %23 {strides = array<i32>} : memref<1x2x128xf32, #tpu.memory_space<vmem>>, vector<1x2x128xf32>,
    %24 = arith.truncf %20 : vector<2x128xf32> to vector<2x128xbf16>
    %c0_19 = arith.constant 0 : index
    %c0_20 = arith.constant 0 : index
    %c0_21 = arith.constant 0 : index
    %25 = vector.load %arg6[%c0_19, %c0_20, %c0_21] : memref<1x128x128xbf16, #tpu.memory_space<vmem>>, vector<1x128x128xbf16>
    %26 = vector.shape_cast %25 : vector<1x128x128xbf16> to vector<128x128xbf16>
    %cst_22 = arith.constant dense<0.000000e+00> : vector<2x128xf32>
    %27 = tpu.matmul %24, %26, %cst_22 {dimension_numbers = #tpu.dot_dimension_numbers<[1], [0], [0], [1], [0, 0, 1, 1], [], []>} : vector<2x128xbf16>, vector<128x128xbf16>, vector<2x128xf32> -> vector<2x128xf32>
    %c0_23 = arith.constant 0 : index
    %c0_24 = arith.constant 0 : index
    %c0_25 = arith.constant 0 : index
    %28 = vector.load %arg7[%c0_23, %c0_24, %c0_25] : memref<1x1x128xf32, #tpu.memory_space<vmem>>, vector<1x1x128xf32>
    %29 = vector.shape_cast %28 : vector<1x1x128xf32> to vector<1x128xf32>
    %30 = vector.broadcast %29 : vector<1x128xf32> to vector<2x128xf32>
    %31 = arith.addf %27, %30 : vector<2x128xf32>
    %c0_26 = arith.constant 0 : index
    %c0_27 = arith.constant 0 : index
    %c0_28 = arith.constant 0 : index
    %32 = vector.load %arg9[%c0_26, %c0_27, %c0_28] : memref<1x2x128xf32, #tpu.memory_space<vmem>>, vector<1x2x128xf32>
    %33 = vector.shape_cast %32 : vector<1x2x128xf32> to vector<2x128xf32>
    %34 = vector.shape_cast %31 : vector<2x128xf32> to vector<1x2x128xf32>
    tpu.vector_store %arg9[%c0_26, %c0_27, %c0_28], %34 {strides = array<i32>} : memref<1x2x128xf32, #tpu.memory_space<vmem>>, vector<1x2x128xf32>,
    return
  }
  func.func @transform_0(%arg0: i32) -> (i32, i32) {
    %c0_i32 = arith.constant 0 : i32
    %c0_i32_0 = arith.constant 0 : i32
    %c0_i32_1 = arith.constant 0 : i32
    return %c0_i32, %c0_i32_0 : i32, i32
  }
  func.func @transform_1(%arg0: i32) -> (i32, i32, i32) {
    %c0_i32 = arith.constant 0 : i32
    %c0_i32_0 = arith.constant 0 : i32
    %c0_i32_1 = arith.constant 0 : i32
    return %arg0, %c0_i32, %c0_i32_0 : i32, i32, i32
  }
  func.func @transform_2(%arg0: i32) -> (i32, i32, i32) {
    %c0_i32 = arith.constant 0 : i32
    %c0_i32_0 = arith.constant 0 : i32
    %c0_i32_1 = arith.constant 0 : i32
    return %arg0, %c0_i32, %c0_i32_0 : i32, i32, i32
  }
  func.func @transform_3(%arg0: i32) -> (i32, i32, i32) {
    %c0_i32 = arith.constant 0 : i32
    %c0_i32_0 = arith.constant 0 : i32
    %c0_i32_1 = arith.constant 0 : i32
    return %arg0, %c0_i32, %c0_i32_0 : i32, i32, i32
  }
  func.func @transform_4(%arg0: i32) -> (i32, i32, i32) {
    %c0_i32 = arith.constant 0 : i32
    %c0_i32_0 = arith.constant 0 : i32
    %c0_i32_1 = arith.constant 0 : i32
    return %arg0, %c0_i32, %c0_i32_0 : i32, i32, i32
  }
  func.func @transform_5(%arg0: i32) -> (i32, i32, i32) {
    %c0_i32 = arith.constant 0 : i32
    %c0_i32_0 = arith.constant 0 : i32
    %c0_i32_1 = arith.constant 0 : i32
    return %arg0, %c0_i32, %c0_i32_0 : i32, i32, i32
  }
  func.func @transform_6(%arg0: i32) -> (i32, i32, i32) {
    %c0_i32 = arith.constant 0 : i32
    %c0_i32_0 = arith.constant 0 : i32
    %c0_i32_1 = arith.constant 0 : i32
    return %arg0, %c0_i32, %c0_i32_0 : i32, i32, i32
  }
  func.func @transform_7(%arg0: i32) -> (i32, i32, i32) {
    %c0_i32 = arith.constant 0 : i32
    %c0_i32_0 = arith.constant 0 : i32
    %c0_i32_1 = arith.constant 0 : i32
    return %arg0, %c0_i32, %c0_i32_0 : i32, i32, i32
  }
  func.func @transform_8(%arg0: i32) -> (i32, i32, i32) {
    %c0_i32 = arith.constant 0 : i32
    %c0_i32_0 = arith.constant 0 : i32
    %c0_i32_1 = arith.constant 0 : i32
    return %arg0, %c0_i32, %c0_i32_0 : i32, i32, i32
  }
}

</mosaic_0001>

<bundles_post_ra>
// kernel: _forward.26
= control target key start
LH: loop header
LB: loop body
LE: loop exit
PB: predicated region body
PF: predicated region fallthrough
CT: control target
= control target key end

     0   :  { %vm153_vm0 = vcmask 519168   ;;  %s1385_s0 = inlined_call_operand.vmem [shape: bf16[9,128,64], index: 0, kind: input, shape index: {}]   ;;  %s1386_s1 = inlined_call_operand.vmem [shape: bf16[128,64], index: 1, kind: output, shape index: {}]  }
   0x1   :  { %v9_v0 = vld [vmem:[%s1385_s0] sm:$0xf]  ;;  %v10_v12 = vld [vmem:[%s1385_s0 + $0x4] sm:$0xf]  ;;  %v11_v33 = vld [vmem:[%s1385_s0 + $0x8] sm:$0xf] }
   0x2   :  { %v25_v1 = vld [vmem:[%s1385_s0 + $0x40] sm:$0xf]  ;;  %v156_v4 = vsel %vm153_vm0, %v9_v0, 4286644096  ;;  %v26_v13 = vld [vmem:[%s1385_s0 + $0x44] sm:$0xf] }
   0x3   :  { %v41_v2 = vld [vmem:[%s1385_s0 + $0x80] sm:$0xf]  ;;  %v159_v5 = vsel %vm153_vm0, %v25_v1, 4286644096  ;;  %v42_v14 = vld [vmem:[%s1385_s0 + $0x84] sm:$0xf] }
   0x4   :  { %v57_v3 = vld [vmem:[%s1385_s0 + $0xc0] sm:$0xf]  ;;  %v163_v6 = vsel %vm153_vm0, %v41_v2, 4286644096  ;;  %v161_v8 = vmax.bf16 %v159_v5, %v156_v4  ;;  %v58_v19 = vld [vmem:[%s1385_s0 + $0xc4] sm:$0xf] }
   0x5   :  { %v73_v7 = vld [vmem:[%s1385_s0 + $0x100] sm:$0xf]  ;;  %v167_v10 = vsel %vm153_vm0, %v57_v3, 4286644096  ;;  %v191_v20 = vsel %vm153_vm0, %v10_v12, 4286644096 }
   0x6   :  { %v89_v9 = vld [vmem:[%s1385_s0 + $0x140] sm:$0xf]  ;;  %v165_v11 = vmax.bf16 %v163_v6, %v161_v8  ;;  %v171_v15 = vsel %vm153_vm0, %v73_v7, 4286644096  ;;  %v194_v21 = vsel %vm153_vm0, %v26_v13, 4286644096 }
   0x7   :  { %v105_v16 = vld [vmem:[%s1385_s0 + $0x180] sm:$0xf]  ;;  %v175_v18 = vsel %vm153_vm0, %v89_v9, 4286644096  ;;  %v198_v22 = vsel %vm153_vm0, %v42_v14, 4286644096  ;;  %v196_v27 = vmax.bf16 %v194_v21, %v191_v20 }
   0x8   :  { %v169_v17 = vmax.bf16 %v167_v10, %v165_v11  ;;  %v121_v23 = vld [vmem:[%s1385_s0 + $0x1c0] sm:$0xf]  ;;  %v74_v26 = vld [vmem:[%s1385_s0 + $0x104] sm:$0xf]  ;;  %v179_v28 = vsel %vm153_vm0, %v105_v16, 4286644096 }
   0x9   :  { %v137_v24 = vld [vmem:[%s1385_s0 + $0x200] sm:$0xf]  ;;  %v90_v29 = vld [vmem:[%s1385_s0 + $0x144] sm:$0xf]  ;;  %v202_v30 = vsel %vm153_vm0, %v58_v19, 4286644096  ;;  %v200_v32 = vmax.bf16 %v198_v22, %v196_v27 }
   0xa   :  { %v173_v25 = vmax.bf16 %v171_v15, %v169_v17  ;;  %v27_v34 = vld [vmem:[%s1385_s0 + $0x48] sm:$0xf]  ;;  %v183_v36 = vsel %vm153_vm0, %v121_v23, 4286644096  ;;  %v187_v37 = vsel %vm153_vm0, %v137_v24, 4286644096 }
   0xb   :  { %v43_v35 = vld [vmem:[%s1385_s0 + $0x88] sm:$0xf]  ;;  %v206_v38 = vsel %vm153_vm0, %v74_v26, 4286644096  ;;  %v106_v40 = vld [vmem:[%s1385_s0 + $0x184] sm:$0xf]  ;;  %v204_v41 = vmax.bf16 %v202_v30, %v200_v32 }
   0xc   :  { %v177_v31 = vmax.bf16 %v175_v18, %v173_v25  ;;  %v210_v42 = vsel %vm153_vm0, %v90_v29, 4286644096  ;;  %v59_v43 = vld [vmem:[%s1385_s0 + $0xc8] sm:$0xf]  ;;  %v226_v44 = vsel %vm153_vm0, %v11_v33, 4286644096 }
   0xd   :  { %v229_v45 = vsel %vm153_vm0, %v27_v34, 4286644096  ;;  %v233_v46 = vsel %vm153_vm0, %v43_v35, 4286644096  ;;  %v122_v48 = vld [vmem:[%s1385_s0 + $0x1c4] sm:$0xf]  ;;  %v208_v50 = vmax.bf16 %v206_v38, %v204_v41 }
   0xe   :  { %v181_v39 = vmax.bf16 %v179_v28, %v177_v31  ;;  %v138_v49 = vld [vmem:[%s1385_s0 + $0x204] sm:$0xf]  ;;  %v75_v51 = vld [vmem:[%s1385_s0 + $0x108] sm:$0xf]  ;;  %v231_v52 = vmax.bf16 %v229_v45, %v226_v44  ;;  %v214_v53 = vsel %vm153_vm0, %v106_v40, 4286644096 }
   0xf   :  { %v91_v54 = vld [vmem:[%s1385_s0 + $0x148] sm:$0xf]  ;;  %v237_v55 = vsel %vm153_vm0, %v59_v43, 4286644096  ;;  %v212_v57 = vmax.bf16 %v210_v42, %v208_v50  ;;  %v12_v59 = vld [vmem:[%s1385_s0 + $0xc] sm:$0xf] }
  0x10   :  { %v185_v47 = vmax.bf16 %v183_v36, %v181_v39  ;;  %v235_v58 = vmax.bf16 %v233_v46, %v231_v52  ;;  %v28_v60 = vld [vmem:[%s1385_s0 + $0x4c] sm:$0xf]  ;;  %v218_v62 = vsel %vm153_vm0, %v122_v48, 4286644096  ;;  %v222_v63 = vsel %vm153_vm0, %v138_v49, 4286644096 }
  0x11   :  { %v44_v61 = vld [vmem:[%s1385_s0 + $0x8c] sm:$0xf]  ;;  %v241_v0 = vsel %vm153_vm0, %v75_v51, 4286644096  ;;  %v216_v1 = vmax.bf16 %v214_v53, %v212_v57  ;;  %v107_v2 = vld [vmem:[%s1385_s0 + $0x188] sm:$0xf] }
  0x12   :  { %v189_v56 = vmax.bf16 %v187_v37, %v185_v47  ;;  %v239_v3 = vmax.bf16 %v237_v55, %v235_v58  ;;  %v245_v4 = vsel %vm153_vm0, %v91_v54, 4286644096  ;;  %v60_v5 = vld [vmem:[%s1385_s0 + $0xcc] sm:$0xf]  ;;  %v261_v6 = vsel %vm153_vm0, %v12_v59, 4286644096 }
  0x13   :  { %v264_v7 = vsel %vm153_vm0, %v28_v60, 4286644096  ;;  %v268_v8 = vsel %vm153_vm0, %v44_v61, 4286644096  ;;  %v220_v9 = vmax.bf16 %v218_v62, %v216_v1  ;;  %v123_v10 = vld [vmem:[%s1385_s0 + $0x1c8] sm:$0xf] }
  0x14   :  { %715 = vst.msk [vmem:[%s1386_s1] sm:$0xf] %vm153_vm0, %v189_v56  ;;  %v139_v11 = vld [vmem:[%s1385_s0 + $0x208] sm:$0xf]  ;;  %v243_v12 = vmax.bf16 %v241_v0, %v239_v3  ;;  %v76_v13 = vld [vmem:[%s1385_s0 + $0x10c] sm:$0xf]  ;;  %v266_v14 = vmax.bf16 %v264_v7, %v261_v6 }
  0x15   :  { %v249_v15 = vsel %vm153_vm0, %v107_v2, 4286644096  ;;  %v92_v16 = vld [vmem:[%s1385_s0 + $0x14c] sm:$0xf]  ;;  %v272_v17 = vsel %vm153_vm0, %v60_v5, 4286644096  ;;  %v224_v18 = vmax.bf16 %v222_v63, %v220_v9 }
  0x16   :  { %v247_v19 = vmax.bf16 %v245_v4, %v243_v12  ;;  %v270_v20 = vmax.bf16 %v268_v8, %v266_v14  ;;  %v13_v21 = vld [vmem:[%s1385_s0 + $0x10] sm:$0xf]  ;;  %v253_v24 = vsel %vm153_vm0, %v123_v10, 4286644096  ;;  %v257_v25 = vsel %vm153_vm0, %v139_v11, 4286644096 }
  0x17   :  { %v29_v22 = vld [vmem:[%s1385_s0 + $0x50] sm:$0xf]  ;;  %v276_v26 = vsel %vm153_vm0, %v76_v13, 4286644096  ;;  %716 = vst.msk [vmem:[%s1386_s1 + $0x4] sm:$0xf] %vm153_vm0, %v224_v18 }
  0x18   :  { %v45_v23 = vld [vmem:[%s1385_s0 + $0x90] sm:$0xf]  ;;  %v251_v27 = vmax.bf16 %v249_v15, %v247_v19  ;;  %v108_v28 = vld [vmem:[%s1385_s0 + $0x18c] sm:$0xf]  ;;  %v274_v29 = vmax.bf16 %v272_v17, %v270_v20  ;;  %v280_v30 = vsel %vm153_vm0, %v92_v16, 4286644096 }
  0x19   :  { %v61_v31 = vld [vmem:[%s1385_s0 + $0xd0] sm:$0xf]  ;;  %v296_v32 = vsel %vm153_vm0, %v13_v21, 4286644096  ;;  %v299_v33 = vsel %vm153_vm0, %v29_v22, 4286644096 }
  0x1a   :  { %v303_v34 = vsel %vm153_vm0, %v45_v23, 4286644096  ;;  %v255_v35 = vmax.bf16 %v253_v24, %v251_v27  ;;  %v124_v36 = vld [vmem:[%s1385_s0 + $0x1cc] sm:$0xf]  ;;  %v278_v38 = vmax.bf16 %v276_v26, %v274_v29  ;;  %v77_v39 = vld [vmem:[%s1385_s0 + $0x110] sm:$0xf]  ;;  %v301_v40 = vmax.bf16 %v299_v33, %v296_v32 }
  0x1b   :  { %v140_v37 = vld [vmem:[%s1385_s0 + $0x20c] sm:$0xf]  ;;  %v284_v41 = vsel %vm153_vm0, %v108_v28, 4286644096  ;;  %v93_v42 = vld [vmem:[%s1385_s0 + $0x150] sm:$0xf] }
  0x1c   :  { %v307_v43 = vsel %vm153_vm0, %v61_v31, 4286644096  ;;  %v259_v44 = vmax.bf16 %v257_v25, %v255_v35  ;;  %v282_v45 = vmax.bf16 %v280_v30, %v278_v38  ;;  %v305_v46 = vmax.bf16 %v303_v34, %v301_v40  ;;  %v14_v47 = vld [vmem:[%s1385_s0 + $0x14] sm:$0xf]  ;;  %v109_v54 = vld [vmem:[%s1385_s0 + $0x190] sm:$0xf] }
  0x1d   :  { %v30_v48 = vld [vmem:[%s1385_s0 + $0x54] sm:$0xf]  ;;  %v288_v50 = vsel %vm153_vm0, %v124_v36, 4286644096  ;;  %v292_v51 = vsel %vm153_vm0, %v140_v37, 4286644096 }
  0x1e   :  { %v46_v49 = vld [vmem:[%s1385_s0 + $0x94] sm:$0xf]  ;;  %v311_v52 = vsel %vm153_vm0, %v77_v39, 4286644096  ;;  %717 = vst.msk [vmem:[%s1386_s1 + $0x8] sm:$0xf] %vm153_vm0, %v259_v44  ;;  %v286_v53 = vmax.bf16 %v284_v41, %v282_v45  ;;  %v309_v55 = vmax.bf16 %v307_v43, %v305_v46 }
  0x1f   :  { %v315_v56 = vsel %vm153_vm0, %v93_v42, 4286644096  ;;  %v62_v57 = vld [vmem:[%s1385_s0 + $0xd4] sm:$0xf]  ;;  %v331_v58 = vsel %vm153_vm0, %v14_v47, 4286644096 }
  0x20   :  { %v334_v59 = vsel %vm153_vm0, %v30_v48, 4286644096  ;;  %v338_v60 = vsel %vm153_vm0, %v46_v49, 4286644096  ;;  %v290_v61 = vmax.bf16 %v288_v50, %v286_v53  ;;  %v125_v62 = vld [vmem:[%s1385_s0 + $0x1d0] sm:$0xf]  ;;  %v313_v0 = vmax.bf16 %v311_v52, %v309_v55 }
  0x21   :  { %v141_v63 = vld [vmem:[%s1385_s0 + $0x210] sm:$0xf]  ;;  %v78_v1 = vld [vmem:[%s1385_s0 + $0x114] sm:$0xf]  ;;  %v336_v2 = vmax.bf16 %v334_v59, %v331_v58  ;;  %v319_v3 = vsel %vm153_vm0, %v109_v54, 4286644096 }
  0x22   :  { %v94_v4 = vld [vmem:[%s1385_s0 + $0x154] sm:$0xf]  ;;  %v342_v5 = vsel %vm153_vm0, %v62_v57, 4286644096  ;;  %v294_v6 = vmax.bf16 %v292_v51, %v290_v61  ;;  %v317_v7 = vmax.bf16 %v315_v56, %v313_v0  ;;  %v15_v9 = vld [vmem:[%s1385_s0 + $0x18] sm:$0xf] }
  0x23   :  { %v340_v8 = vmax.bf16 %v338_v60, %v336_v2  ;;  %v31_v10 = vld [vmem:[%s1385_s0 + $0x58] sm:$0xf]  ;;  %v323_v12 = vsel %vm153_vm0, %v125_v62, 4286644096  ;;  %v327_v13 = vsel %vm153_vm0, %v141_v63, 4286644096 }
  0x24   :  { %v47_v11 = vld [vmem:[%s1385_s0 + $0x98] sm:$0xf]  ;;  %v346_v14 = vsel %vm153_vm0, %v78_v1, 4286644096  ;;  %718 = vst.msk [vmem:[%s1386_s1 + $0xc] sm:$0xf] %vm153_vm0, %v294_v6  ;;  %v321_v15 = vmax.bf16 %v319_v3, %v317_v7 }
  0x25   :  { %v110_v16 = vld [vmem:[%s1385_s0 + $0x194] sm:$0xf]  ;;  %v344_v17 = vmax.bf16 %v342_v5, %v340_v8  ;;  %v350_v18 = vsel %vm153_vm0, %v94_v4, 4286644096  ;;  %v63_v19 = vld [vmem:[%s1385_s0 + $0xd8] sm:$0xf] }
  0x26   :  { %v366_v20 = vsel %vm153_vm0, %v15_v9, 4286644096  ;;  %v369_v21 = vsel %vm153_vm0, %v31_v10, 4286644096  ;;  %v373_v22 = vsel %vm153_vm0, %v47_v11, 4286644096  ;;  %v325_v23 = vmax.bf16 %v323_v12, %v321_v15 }
  0x27   :  { %v126_v24 = vld [vmem:[%s1385_s0 + $0x1d4] sm:$0xf]  ;;  %v348_v26 = vmax.bf16 %v346_v14, %v344_v17  ;;  %v79_v27 = vld [vmem:[%s1385_s0 + $0x118] sm:$0xf]  ;;  %v371_v28 = vmax.bf16 %v369_v21, %v366_v20  ;;  %v354_v29 = vsel %vm153_vm0, %v110_v16, 4286644096 }
  0x28   :  { %v142_v25 = vld [vmem:[%s1385_s0 + $0x214] sm:$0xf]  ;;  %v95_v30 = vld [vmem:[%s1385_s0 + $0x158] sm:$0xf]  ;;  %v377_v31 = vsel %vm153_vm0, %v63_v19, 4286644096  ;;  %v329_v32 = vmax.bf16 %v327_v13, %v325_v23 }
  0x29   :  { %v352_v33 = vmax.bf16 %v350_v18, %v348_v26  ;;  %v375_v34 = vmax.bf16 %v373_v22, %v371_v28  ;;  %v16_v35 = vld [vmem:[%s1385_s0 + $0x1c] sm:$0xf]  ;;  %v358_v38 = vsel %vm153_vm0, %v126_v24, 4286644096  ;;  %v362_v39 = vsel %vm153_vm0, %v142_v25, 4286644096 }
  0x2a   :  { %v32_v36 = vld [vmem:[%s1385_s0 + $0x5c] sm:$0xf]  ;;  %v381_v40 = vsel %vm153_vm0, %v79_v27, 4286644096  ;;  %719 = vst.msk [vmem:[%s1386_s1 + $0x10] sm:$0xf] %vm153_vm0, %v329_v32 }
  0x2b   :  { %v48_v37 = vld [vmem:[%s1385_s0 + $0x9c] sm:$0xf]  ;;  %v356_v41 = vmax.bf16 %v354_v29, %v352_v33  ;;  %v111_v42 = vld [vmem:[%s1385_s0 + $0x198] sm:$0xf]  ;;  %v379_v43 = vmax.bf16 %v377_v31, %v375_v34  ;;  %v385_v44 = vsel %vm153_vm0, %v95_v30, 4286644096 }
  0x2c   :  { %v64_v45 = vld [vmem:[%s1385_s0 + $0xdc] sm:$0xf]  ;;  %v401_v46 = vsel %vm153_vm0, %v16_v35, 4286644096  ;;  %v404_v47 = vsel %vm153_vm0, %v32_v36, 4286644096 }
  0x2d   :  { %v408_v48 = vsel %vm153_vm0, %v48_v37, 4286644096  ;;  %v360_v49 = vmax.bf16 %v358_v38, %v356_v41  ;;  %v127_v50 = vld [vmem:[%s1385_s0 + $0x1d8] sm:$0xf]  ;;  %v383_v52 = vmax.bf16 %v381_v40, %v379_v43  ;;  %v80_v53 = vld [vmem:[%s1385_s0 + $0x11c] sm:$0xf]  ;;  %v406_v54 = vmax.bf16 %v404_v47, %v401_v46 }
  0x2e   :  { %v143_v51 = vld [vmem:[%s1385_s0 + $0x218] sm:$0xf]  ;;  %v389_v55 = vsel %vm153_vm0, %v111_v42, 4286644096  ;;  %v96_v56 = vld [vmem:[%s1385_s0 + $0x15c] sm:$0xf] }
  0x2f   :  { %v412_v57 = vsel %vm153_vm0, %v64_v45, 4286644096  ;;  %v364_v58 = vmax.bf16 %v362_v39, %v360_v49  ;;  %v387_v59 = vmax.bf16 %v385_v44, %v383_v52  ;;  %v410_v60 = vmax.bf16 %v408_v48, %v406_v54  ;;  %v17_v61 = vld [vmem:[%s1385_s0 + $0x20] sm:$0xf]  ;;  %v112_v4 = vld [vmem:[%s1385_s0 + $0x19c] sm:$0xf] }
  0x30   :  { %v33_v62 = vld [vmem:[%s1385_s0 + $0x60] sm:$0xf]  ;;  %v393_v0 = vsel %vm153_vm0, %v127_v50, 4286644096  ;;  %v397_v1 = vsel %vm153_vm0, %v143_v51, 4286644096 }
  0x31   :  { %v49_v63 = vld [vmem:[%s1385_s0 + $0xa0] sm:$0xf]  ;;  %v416_v2 = vsel %vm153_vm0, %v80_v53, 4286644096  ;;  %720 = vst.msk [vmem:[%s1386_s1 + $0x14] sm:$0xf] %vm153_vm0, %v364_v58  ;;  %v391_v3 = vmax.bf16 %v389_v55, %v387_v59  ;;  %v414_v5 = vmax.bf16 %v412_v57, %v410_v60 }
  0x32   :  { %v420_v6 = vsel %vm153_vm0, %v96_v56, 4286644096  ;;  %v65_v7 = vld [vmem:[%s1385_s0 + $0xe0] sm:$0xf]  ;;  %v436_v8 = vsel %vm153_vm0, %v17_v61, 4286644096 }
  0x33   :  { %v439_v9 = vsel %vm153_vm0, %v33_v62, 4286644096  ;;  %v443_v10 = vsel %vm153_vm0, %v49_v63, 4286644096  ;;  %v395_v11 = vmax.bf16 %v393_v0, %v391_v3  ;;  %v128_v12 = vld [vmem:[%s1385_s0 + $0x1dc] sm:$0xf]  ;;  %v418_v14 = vmax.bf16 %v416_v2, %v414_v5 }
  0x34   :  { %v144_v13 = vld [vmem:[%s1385_s0 + $0x21c] sm:$0xf]  ;;  %v81_v15 = vld [vmem:[%s1385_s0 + $0x120] sm:$0xf]  ;;  %v441_v16 = vmax.bf16 %v439_v9, %v436_v8  ;;  %v424_v17 = vsel %vm153_vm0, %v112_v4, 4286644096 }
  0x35   :  { %v97_v18 = vld [vmem:[%s1385_s0 + $0x160] sm:$0xf]  ;;  %v447_v19 = vsel %vm153_vm0, %v65_v7, 4286644096  ;;  %v399_v20 = vmax.bf16 %v397_v1, %v395_v11  ;;  %v422_v21 = vmax.bf16 %v420_v6, %v418_v14  ;;  %v18_v23 = vld [vmem:[%s1385_s0 + $0x24] sm:$0xf] }
  0x36   :  { %v445_v22 = vmax.bf16 %v443_v10, %v441_v16  ;;  %v34_v24 = vld [vmem:[%s1385_s0 + $0x64] sm:$0xf]  ;;  %v428_v26 = vsel %vm153_vm0, %v128_v12, 4286644096  ;;  %v432_v27 = vsel %vm153_vm0, %v144_v13, 4286644096 }
  0x37   :  { %v50_v25 = vld [vmem:[%s1385_s0 + $0xa4] sm:$0xf]  ;;  %v451_v28 = vsel %vm153_vm0, %v81_v15, 4286644096  ;;  %721 = vst.msk [vmem:[%s1386_s1 + $0x18] sm:$0xf] %vm153_vm0, %v399_v20  ;;  %v426_v29 = vmax.bf16 %v424_v17, %v422_v21 }
  0x38   :  { %v113_v30 = vld [vmem:[%s1385_s0 + $0x1a0] sm:$0xf]  ;;  %v449_v31 = vmax.bf16 %v447_v19, %v445_v22  ;;  %v455_v32 = vsel %vm153_vm0, %v97_v18, 4286644096  ;;  %v66_v33 = vld [vmem:[%s1385_s0 + $0xe4] sm:$0xf] }
  0x39   :  { %v471_v34 = vsel %vm153_vm0, %v18_v23, 4286644096  ;;  %v474_v35 = vsel %vm153_vm0, %v34_v24, 4286644096  ;;  %v478_v36 = vsel %vm153_vm0, %v50_v25, 4286644096  ;;  %v430_v37 = vmax.bf16 %v428_v26, %v426_v29 }
  0x3a   :  { %v129_v38 = vld [vmem:[%s1385_s0 + $0x1e0] sm:$0xf]  ;;  %v453_v40 = vmax.bf16 %v451_v28, %v449_v31  ;;  %v82_v41 = vld [vmem:[%s1385_s0 + $0x124] sm:$0xf]  ;;  %v476_v42 = vmax.bf16 %v474_v35, %v471_v34  ;;  %v459_v43 = vsel %vm153_vm0, %v113_v30, 4286644096 }
  0x3b   :  { %v145_v39 = vld [vmem:[%s1385_s0 + $0x220] sm:$0xf]  ;;  %v98_v44 = vld [vmem:[%s1385_s0 + $0x164] sm:$0xf]  ;;  %v482_v45 = vsel %vm153_vm0, %v66_v33, 4286644096  ;;  %v434_v46 = vmax.bf16 %v432_v27, %v430_v37 }
  0x3c   :  { %v457_v47 = vmax.bf16 %v455_v32, %v453_v40  ;;  %v480_v48 = vmax.bf16 %v478_v36, %v476_v42  ;;  %v19_v49 = vld [vmem:[%s1385_s0 + $0x28] sm:$0xf]  ;;  %v463_v52 = vsel %vm153_vm0, %v129_v38, 4286644096  ;;  %v467_v53 = vsel %vm153_vm0, %v145_v39, 4286644096 }
  0x3d   :  { %v35_v50 = vld [vmem:[%s1385_s0 + $0x68] sm:$0xf]  ;;  %v486_v54 = vsel %vm153_vm0, %v82_v41, 4286644096  ;;  %722 = vst.msk [vmem:[%s1386_s1 + $0x1c] sm:$0xf] %vm153_vm0, %v434_v46 }
  0x3e   :  { %v51_v51 = vld [vmem:[%s1385_s0 + $0xa8] sm:$0xf]  ;;  %v461_v55 = vmax.bf16 %v459_v43, %v457_v47  ;;  %v114_v56 = vld [vmem:[%s1385_s0 + $0x1a4] sm:$0xf]  ;;  %v484_v57 = vmax.bf16 %v482_v45, %v480_v48  ;;  %v490_v58 = vsel %vm153_vm0, %v98_v44, 4286644096 }
  0x3f   :  { %v67_v59 = vld [vmem:[%s1385_s0 + $0xe8] sm:$0xf]  ;;  %v506_v60 = vsel %vm153_vm0, %v19_v49, 4286644096  ;;  %v509_v61 = vsel %vm153_vm0, %v35_v50, 4286644096 }
  0x40   :  { %v513_v62 = vsel %vm153_vm0, %v51_v51, 4286644096  ;;  %v465_v63 = vmax.bf16 %v463_v52, %v461_v55  ;;  %v130_v0 = vld [vmem:[%s1385_s0 + $0x1e4] sm:$0xf]  ;;  %v488_v2 = vmax.bf16 %v486_v54, %v484_v57  ;;  %v83_v3 = vld [vmem:[%s1385_s0 + $0x128] sm:$0xf]  ;;  %v511_v4 = vmax.bf16 %v509_v61, %v506_v60 }
  0x41   :  { %v146_v1 = vld [vmem:[%s1385_s0 + $0x224] sm:$0xf]  ;;  %v494_v5 = vsel %vm153_vm0, %v114_v56, 4286644096  ;;  %v99_v6 = vld [vmem:[%s1385_s0 + $0x168] sm:$0xf] }
  0x42   :  { %v517_v7 = vsel %vm153_vm0, %v67_v59, 4286644096  ;;  %v469_v8 = vmax.bf16 %v467_v53, %v465_v63  ;;  %v492_v9 = vmax.bf16 %v490_v58, %v488_v2  ;;  %v515_v10 = vmax.bf16 %v513_v62, %v511_v4  ;;  %v20_v11 = vld [vmem:[%s1385_s0 + $0x2c] sm:$0xf]  ;;  %v115_v18 = vld [vmem:[%s1385_s0 + $0x1a8] sm:$0xf] }
  0x43   :  { %v36_v12 = vld [vmem:[%s1385_s0 + $0x6c] sm:$0xf]  ;;  %v498_v14 = vsel %vm153_vm0, %v130_v0, 4286644096  ;;  %v502_v15 = vsel %vm153_vm0, %v146_v1, 4286644096 }
  0x44   :  { %v52_v13 = vld [vmem:[%s1385_s0 + $0xac] sm:$0xf]  ;;  %v521_v16 = vsel %vm153_vm0, %v83_v3, 4286644096  ;;  %723 = vst.msk [vmem:[%s1386_s1 + $0x20] sm:$0xf] %vm153_vm0, %v469_v8  ;;  %v496_v17 = vmax.bf16 %v494_v5, %v492_v9  ;;  %v519_v19 = vmax.bf16 %v517_v7, %v515_v10 }
  0x45   :  { %v525_v20 = vsel %vm153_vm0, %v99_v6, 4286644096  ;;  %v68_v21 = vld [vmem:[%s1385_s0 + $0xec] sm:$0xf]  ;;  %v541_v22 = vsel %vm153_vm0, %v20_v11, 4286644096 }
  0x46   :  { %v544_v23 = vsel %vm153_vm0, %v36_v12, 4286644096  ;;  %v548_v24 = vsel %vm153_vm0, %v52_v13, 4286644096  ;;  %v500_v25 = vmax.bf16 %v498_v14, %v496_v17  ;;  %v131_v26 = vld [vmem:[%s1385_s0 + $0x1e8] sm:$0xf]  ;;  %v523_v28 = vmax.bf16 %v521_v16, %v519_v19 }
  0x47   :  { %v147_v27 = vld [vmem:[%s1385_s0 + $0x228] sm:$0xf]  ;;  %v84_v29 = vld [vmem:[%s1385_s0 + $0x12c] sm:$0xf]  ;;  %v546_v30 = vmax.bf16 %v544_v23, %v541_v22  ;;  %v529_v31 = vsel %vm153_vm0, %v115_v18, 4286644096 }
  0x48   :  { %v100_v32 = vld [vmem:[%s1385_s0 + $0x16c] sm:$0xf]  ;;  %v552_v33 = vsel %vm153_vm0, %v68_v21, 4286644096  ;;  %v504_v34 = vmax.bf16 %v502_v15, %v500_v25  ;;  %v527_v35 = vmax.bf16 %v525_v20, %v523_v28  ;;  %v21_v37 = vld [vmem:[%s1385_s0 + $0x30] sm:$0xf] }
  0x49   :  { %v550_v36 = vmax.bf16 %v548_v24, %v546_v30  ;;  %v37_v38 = vld [vmem:[%s1385_s0 + $0x70] sm:$0xf]  ;;  %v533_v40 = vsel %vm153_vm0, %v131_v26, 4286644096  ;;  %v537_v41 = vsel %vm153_vm0, %v147_v27, 4286644096 }
  0x4a   :  { %v53_v39 = vld [vmem:[%s1385_s0 + $0xb0] sm:$0xf]  ;;  %v556_v42 = vsel %vm153_vm0, %v84_v29, 4286644096  ;;  %724 = vst.msk [vmem:[%s1386_s1 + $0x24] sm:$0xf] %vm153_vm0, %v504_v34  ;;  %v531_v43 = vmax.bf16 %v529_v31, %v527_v35 }
  0x4b   :  { %v116_v44 = vld [vmem:[%s1385_s0 + $0x1ac] sm:$0xf]  ;;  %v554_v45 = vmax.bf16 %v552_v33, %v550_v36  ;;  %v560_v46 = vsel %vm153_vm0, %v100_v32, 4286644096  ;;  %v69_v47 = vld [vmem:[%s1385_s0 + $0xf0] sm:$0xf] }
  0x4c   :  { %v576_v48 = vsel %vm153_vm0, %v21_v37, 4286644096  ;;  %v579_v49 = vsel %vm153_vm0, %v37_v38, 4286644096  ;;  %v583_v50 = vsel %vm153_vm0, %v53_v39, 4286644096  ;;  %v535_v51 = vmax.bf16 %v533_v40, %v531_v43 }
  0x4d   :  { %v132_v52 = vld [vmem:[%s1385_s0 + $0x1ec] sm:$0xf]  ;;  %v558_v54 = vmax.bf16 %v556_v42, %v554_v45  ;;  %v85_v55 = vld [vmem:[%s1385_s0 + $0x130] sm:$0xf]  ;;  %v581_v56 = vmax.bf16 %v579_v49, %v576_v48  ;;  %v564_v57 = vsel %vm153_vm0, %v116_v44, 4286644096 }
  0x4e   :  { %v148_v53 = vld [vmem:[%s1385_s0 + $0x22c] sm:$0xf]  ;;  %v101_v58 = vld [vmem:[%s1385_s0 + $0x170] sm:$0xf]  ;;  %v587_v59 = vsel %vm153_vm0, %v69_v47, 4286644096  ;;  %v539_v60 = vmax.bf16 %v537_v41, %v535_v51 }
  0x4f   :  { %v562_v61 = vmax.bf16 %v560_v46, %v558_v54  ;;  %v585_v62 = vmax.bf16 %v583_v50, %v581_v56  ;;  %v22_v63 = vld [vmem:[%s1385_s0 + $0x34] sm:$0xf]  ;;  %v568_v2 = vsel %vm153_vm0, %v132_v52, 4286644096  ;;  %v572_v3 = vsel %vm153_vm0, %v148_v53, 4286644096 }
  0x50   :  { %v38_v0 = vld [vmem:[%s1385_s0 + $0x74] sm:$0xf]  ;;  %v591_v4 = vsel %vm153_vm0, %v85_v55, 4286644096  ;;  %725 = vst.msk [vmem:[%s1386_s1 + $0x28] sm:$0xf] %vm153_vm0, %v539_v60 }
  0x51   :  { %v54_v1 = vld [vmem:[%s1385_s0 + $0xb4] sm:$0xf]  ;;  %v566_v5 = vmax.bf16 %v564_v57, %v562_v61  ;;  %v117_v6 = vld [vmem:[%s1385_s0 + $0x1b0] sm:$0xf]  ;;  %v589_v7 = vmax.bf16 %v587_v59, %v585_v62  ;;  %v595_v8 = vsel %vm153_vm0, %v101_v58, 4286644096 }
  0x52   :  { %v70_v9 = vld [vmem:[%s1385_s0 + $0xf4] sm:$0xf]  ;;  %v611_v10 = vsel %vm153_vm0, %v22_v63, 4286644096  ;;  %v614_v11 = vsel %vm153_vm0, %v38_v0, 4286644096 }
  0x53   :  { %v618_v12 = vsel %vm153_vm0, %v54_v1, 4286644096  ;;  %v570_v13 = vmax.bf16 %v568_v2, %v566_v5  ;;  %v133_v14 = vld [vmem:[%s1385_s0 + $0x1f0] sm:$0xf]  ;;  %v593_v16 = vmax.bf16 %v591_v4, %v589_v7  ;;  %v86_v17 = vld [vmem:[%s1385_s0 + $0x134] sm:$0xf]  ;;  %v616_v18 = vmax.bf16 %v614_v11, %v611_v10 }
  0x54   :  { %v149_v15 = vld [vmem:[%s1385_s0 + $0x230] sm:$0xf]  ;;  %v599_v19 = vsel %vm153_vm0, %v117_v6, 4286644096  ;;  %v102_v20 = vld [vmem:[%s1385_s0 + $0x174] sm:$0xf] }
  0x55   :  { %v622_v21 = vsel %vm153_vm0, %v70_v9, 4286644096  ;;  %v574_v22 = vmax.bf16 %v572_v3, %v570_v13  ;;  %v597_v23 = vmax.bf16 %v595_v8, %v593_v16  ;;  %v620_v24 = vmax.bf16 %v618_v12, %v616_v18  ;;  %v23_v25 = vld [vmem:[%s1385_s0 + $0x38] sm:$0xf]  ;;  %v118_v32 = vld [vmem:[%s1385_s0 + $0x1b4] sm:$0xf] }
  0x56   :  { %v39_v26 = vld [vmem:[%s1385_s0 + $0x78] sm:$0xf]  ;;  %v603_v28 = vsel %vm153_vm0, %v133_v14, 4286644096  ;;  %v607_v29 = vsel %vm153_vm0, %v149_v15, 4286644096 }
  0x57   :  { %v55_v27 = vld [vmem:[%s1385_s0 + $0xb8] sm:$0xf]  ;;  %v626_v30 = vsel %vm153_vm0, %v86_v17, 4286644096  ;;  %726 = vst.msk [vmem:[%s1386_s1 + $0x2c] sm:$0xf] %vm153_vm0, %v574_v22  ;;  %v601_v31 = vmax.bf16 %v599_v19, %v597_v23  ;;  %v624_v33 = vmax.bf16 %v622_v21, %v620_v24 }
  0x58   :  { %v630_v34 = vsel %vm153_vm0, %v102_v20, 4286644096  ;;  %v71_v35 = vld [vmem:[%s1385_s0 + $0xf8] sm:$0xf]  ;;  %v646_v36 = vsel %vm153_vm0, %v23_v25, 4286644096 }
  0x59   :  { %v649_v37 = vsel %vm153_vm0, %v39_v26, 4286644096  ;;  %v653_v38 = vsel %vm153_vm0, %v55_v27, 4286644096  ;;  %v605_v39 = vmax.bf16 %v603_v28, %v601_v31  ;;  %v134_v40 = vld [vmem:[%s1385_s0 + $0x1f4] sm:$0xf]  ;;  %v628_v42 = vmax.bf16 %v626_v30, %v624_v33 }
  0x5a   :  { %v150_v41 = vld [vmem:[%s1385_s0 + $0x234] sm:$0xf]  ;;  %v87_v43 = vld [vmem:[%s1385_s0 + $0x138] sm:$0xf]  ;;  %v651_v44 = vmax.bf16 %v649_v37, %v646_v36  ;;  %v634_v45 = vsel %vm153_vm0, %v118_v32, 4286644096 }
  0x5b   :  { %v103_v46 = vld [vmem:[%s1385_s0 + $0x178] sm:$0xf]  ;;  %v657_v47 = vsel %vm153_vm0, %v71_v35, 4286644096  ;;  %v609_v48 = vmax.bf16 %v607_v29, %v605_v39  ;;  %v632_v49 = vmax.bf16 %v630_v34, %v628_v42  ;;  %v24_v51 = vld [vmem:[%s1385_s0 + $0x3c] sm:$0xf] }
  0x5c   :  { %v655_v50 = vmax.bf16 %v653_v38, %v651_v44  ;;  %v40_v52 = vld [vmem:[%s1385_s0 + $0x7c] sm:$0xf]  ;;  %v638_v54 = vsel %vm153_vm0, %v134_v40, 4286644096  ;;  %v642_v55 = vsel %vm153_vm0, %v150_v41, 4286644096 }
  0x5d   :  { %v56_v53 = vld [vmem:[%s1385_s0 + $0xbc] sm:$0xf]  ;;  %v661_v56 = vsel %vm153_vm0, %v87_v43, 4286644096  ;;  %727 = vst.msk [vmem:[%s1386_s1 + $0x30] sm:$0xf] %vm153_vm0, %v609_v48  ;;  %v636_v57 = vmax.bf16 %v634_v45, %v632_v49 }
  0x5e   :  { %v119_v58 = vld [vmem:[%s1385_s0 + $0x1b8] sm:$0xf]  ;;  %v659_v59 = vmax.bf16 %v657_v47, %v655_v50  ;;  %v665_v60 = vsel %vm153_vm0, %v103_v46, 4286644096  ;;  %v72_v61 = vld [vmem:[%s1385_s0 + $0xfc] sm:$0xf] }
  0x5f   :  { %v681_v62 = vsel %vm153_vm0, %v24_v51, 4286644096  ;;  %v684_v63 = vsel %vm153_vm0, %v40_v52, 4286644096  ;;  %v688_v0 = vsel %vm153_vm0, %v56_v53, 4286644096  ;;  %v640_v1 = vmax.bf16 %v638_v54, %v636_v57 }
  0x60   :  { %v135_v2 = vld [vmem:[%s1385_s0 + $0x1f8] sm:$0xf]  ;;  %v663_v3 = vmax.bf16 %v661_v56, %v659_v59  ;;  %v88_v4 = vld [vmem:[%s1385_s0 + $0x13c] sm:$0xf]  ;;  %v686_v5 = vmax.bf16 %v684_v63, %v681_v62  ;;  %v669_v6 = vsel %vm153_vm0, %v119_v58, 4286644096 }
  0x61   :  { %v692_v7 = vsel %vm153_vm0, %v72_v61, 4286644096  ;;  %v644_v8 = vmax.bf16 %v642_v55, %v640_v1  ;;  %v151_v9 = vld [vmem:[%s1385_s0 + $0x238] sm:$0xf]  ;;  %v104_v11 = vld [vmem:[%s1385_s0 + $0x17c] sm:$0xf] }
  0x62   :  { %v667_v10 = vmax.bf16 %v665_v60, %v663_v3  ;;  %v690_v12 = vmax.bf16 %v688_v0, %v686_v5  ;;  %v673_v13 = vsel %vm153_vm0, %v135_v2, 4286644096  ;;  %v696_v14 = vsel %vm153_vm0, %v88_v4, 4286644096  ;;  %v120_v16 = vld [vmem:[%s1385_s0 + $0x1bc] sm:$0xf] }
  0x63   :  { %728 = vst.msk [vmem:[%s1386_s1 + $0x34] sm:$0xf] %vm153_vm0, %v644_v8  ;;  %v677_v18 = vsel %vm153_vm0, %v151_v9, 4286644096  ;;  %v700_v19 = vsel %vm153_vm0, %v104_v11, 4286644096 }
  0x64   :  { %v671_v15 = vmax.bf16 %v669_v6, %v667_v10  ;;  %v694_v17 = vmax.bf16 %v692_v7, %v690_v12  ;;  %v136_v21 = vld [vmem:[%s1385_s0 + $0x1fc] sm:$0xf]  ;;  %v704_v23 = vsel %vm153_vm0, %v120_v16, 4286644096 }
  0x65   :  { %v152_v25 = vld [vmem:[%s1385_s0 + $0x23c] sm:$0xf]  ;;  %v708_v27 = vsel %vm153_vm0, %v136_v21, 4286644096 }
  0x66   :  { %v675_v20 = vmax.bf16 %v673_v13, %v671_v15  ;;  %v698_v22 = vmax.bf16 %v696_v14, %v694_v17  ;;  %v712_v29 = vsel %vm153_vm0, %v152_v25, 4286644096 }
  0x68   :  { %v679_v24 = vmax.bf16 %v677_v18, %v675_v20  ;;  %v702_v26 = vmax.bf16 %v700_v19, %v698_v22 }
  0x6a   :  { %729 = vst.msk [vmem:[%s1386_s1 + $0x38] sm:$0xf] %vm153_vm0, %v679_v24  ;;  %v706_v28 = vmax.bf16 %v704_v23, %v702_v26 }
  0x6c   :  { %v710_v30 = vmax.bf16 %v708_v27, %v706_v28 }
  0x6e   :  { %v714_v31 = vmax.bf16 %v712_v29, %v710_v30 }
  0x70   :  { %730 = vst.msk [vmem:[%s1386_s1 + $0x3c] sm:$0xf] %vm153_vm0, %v714_v31 }

// kernel: _forward.25
= control target key start
LH: loop header
LB: loop body
LE: loop exit
PB: predicated region body
PF: predicated region fallthrough
CT: control target
= control target key end

     0   :  { %v2066_v0 = vmov 0   ;;  %vm579_vm0 = vcmask 154624   ;;  %vm676_vm1 = vcmask 1040384   ;;  %vm677_vm2 = vcmask 1041408   ;;  %s2948_s1 = inlined_call_operand.vmem [shape: bf16[147,64], index: 1, kind: input, shape index: {}]   ;;  %s2949_s0 = inlined_call_operand.vmem [shape: bf16[512,147], index: 0, kind: input, shape index: {}]   ;;  %s2950_s2 = inlined_call_operand.vmem [shape: f32[1,64], index: 2, kind: input, shape index: {}]   ;;  %s2951_s3 = inlined_call_operand.vmem [shape: f32[1,64], index: 3, kind: input, shape index: {}]   ;;  %s2952_s4 = inlined_call_operand.vmem [shape: bf16[512,64], index: 4, kind: output, shape index: {}]  }
   0x1   :  { %683 = vmatprep.subr.bf16.mxu0 %v2066_v0  ;;  %1935 = vmatprep.subr.bf16.mxu1 %v2066_v0  ;;  %v1958_v1 = vld [vmem:[%s2948_s1 + $0x38] sm:$0xff]   ;;  %v1959_v2 = vld [vmem:[%s2948_s1 + $0x30] sm:$0xff]   ;;  %v1960_v3 = vld [vmem:[%s2948_s1 + $0x28] sm:$0xff]   ;;  %v2067_v10 = vmov 65535   ;;  %vm22_vm3 = vcmask 523264   ;;  %v2068_v17 = vmov 0.0  }
   0x2   :  { %684 = vmatpush1.bf16.msra.mxu0 %v1958_v1  ;;  %1945 = vmatpush1.bf16.msra.mxu1 %v1958_v1  ;;  %v1961_v4 = vld [vmem:[%s2948_s1 + $0x20] sm:$0xff]   ;;  %v1962_v7 = vld [vmem:[%s2948_s1 + $0x18] sm:$0xff]   ;;  %v1963_v8 = vld [vmem:[%s2948_s1 + $0x10] sm:$0xff]   ;;  %v678_v11 = vsel %vm676_vm1, 4294967295, %v2067_v10  ;;  %23 = vst.msk [vmem:[#allocation2] sm:$0xff] %vm22_vm3, %v2068_v17  ;;  %vm1630_vm4 = vcmask 519168  }
   0x3   :  { %685 = vmatprep.subr.bf16.mxu0 %v2066_v0  ;;  %1936 = vmatprep.subr.bf16.mxu1 %v2066_v0  ;;  %v1970_v5 = vld [vmem:[%s2949_s0 + $0x4] ss:$8 sps:$4 sm:$0xff]   ;;  %v1966_v13 = vld [vmem:[%s2948_s1 + $0x48] ss:$0 sps:$4 sm:$0x33]   ;;  %v679_v14 = vsel %vm677_vm2, %v678_v11, 0 }
   0x4   :  { %1773 = vmatprep.mubr.msk.bf16.mxu0 %vm579_vm0, %v1970_v5  ;;  %v1973_v6 = vld [vmem:[%s2949_s0 + $0x104] ss:$8 sps:$4 sm:$0xff]   ;;  %v681_v15 = vand.u32 %v1966_v13, %v679_v14  ;;  %24 = vst.msk [vmem:[#allocation2 + $0x8] sm:$0xff] %vm22_vm3, %v2068_v17  ;;  %25 = vst.msk [vmem:[#allocation2 + $0x10] sm:$0xff] %vm22_vm3, %v2068_v17  ;;  %v1968_v18 = vld [vmem:[%s2949_s0] ss:$8 sps:$4 sm:$0xff]  }
   0x5   :  { %1789 = vmatprep.mubr.msk.bf16.mxu1 %vm579_vm0, %v1973_v6  ;;  %v1964_v9 = vld [vmem:[%s2948_s1 + $0x8] sm:$0xff]   ;;  %v1965_v12 = vld [vmem:[%s2948_s1] sm:$0xff]   ;;  %26 = vst.msk [vmem:[#allocation2 + $0x18] sm:$0xff] %vm22_vm3, %v2068_v17  ;;  %27 = vst.msk [vmem:[#allocation2 + $0x20] sm:$0xff] %vm22_vm3, %v2068_v17 }
   0x6   :  { %686 = vmatpush1.bf16.msra.mxu0 %v1959_v2  ;;  %1946 = vmatpush1.bf16.msra.mxu1 %v1959_v2  ;;  %v2132_v16 = vld [vmem:[%s2948_s1 + $0x40] sm:$0xff]   ;;  %28 = vst.msk [vmem:[#allocation2 + $0x28] sm:$0xff] %vm22_vm3, %v2068_v17  ;;  %29 = vst.msk [vmem:[#allocation2 + $0x30] sm:$0xff] %vm22_vm3, %v2068_v17  ;;  %v1974_v20 = vld [vmem:[%s2949_s0 + $0x14] ss:$8 sps:$4 sm:$0xff]  }
   0x7   :  { %687 = vmatprep.subr.bf16.mxu0 %v2066_v0  ;;  %1937 = vmatprep.subr.bf16.mxu1 %v2066_v0  ;;  %30 = vst.msk [vmem:[#allocation2 + $0x38] sm:$0xff] %vm22_vm3, %v2068_v17  ;;  %31 = vst.msk [vmem:[#allocation2 + $0x40] sm:$0xff] %vm22_vm3, %v2068_v17  ;;  %v1971_v19 = vld [vmem:[%s2949_s0 + $0x100] ss:$8 sps:$4 sm:$0xff]   ;;  %v1976_v21 = vld [vmem:[%s2949_s0 + $0x114] ss:$8 sps:$4 sm:$0xff]  }
   0x8   :  { %32 = vst.msk [vmem:[#allocation2 + $0x48] sm:$0xff] %vm22_vm3, %v2068_v17  ;;  %33 = vst.msk [vmem:[#allocation2 + $0x50] sm:$0xff] %vm22_vm3, %v2068_v17  ;;  %v1978_v22 = vld [vmem:[%s2949_s0 + $0x10] ss:$8 sps:$4 sm:$0xff]   ;;  %v1980_v24 = vld [vmem:[%s2949_s0 + $0x24] ss:$8 sps:$4 sm:$0xff]  }
   0x9   :  { %34 = vst.msk [vmem:[#allocation2 + $0x58] sm:$0xff] %vm22_vm3, %v2068_v17  ;;  %35 = vst.msk [vmem:[#allocation2 + $0x60] sm:$0xff] %vm22_vm3, %v2068_v17  ;;  %v1979_v23 = vld [vmem:[%s2949_s0 + $0x110] ss:$8 sps:$4 sm:$0xff]   ;;  %v1982_v25 = vld [vmem:[%s2949_s0 + $0x124] ss:$8 sps:$4 sm:$0xff]  }
   0xa   :  { %688 = vmatpush1.bf16.msra.mxu0 %v1960_v3  ;;  %1947 = vmatpush1.bf16.msra.mxu1 %v1960_v3  ;;  %36 = vst.msk [vmem:[#allocation2 + $0x68] sm:$0xff] %vm22_vm3, %v2068_v17  ;;  %37 = vst.msk [vmem:[#allocation2 + $0x70] sm:$0xff] %vm22_vm3, %v2068_v17  ;;  %v1984_v26 = vld [vmem:[%s2949_s0 + $0x20] ss:$8 sps:$4 sm:$0xff]   ;;  %v1986_v28 = vld [vmem:[%s2949_s0 + $0x34] ss:$8 sps:$4 sm:$0xff]  }
   0xb   :  { %689 = vmatprep.subr.bf16.mxu0 %v2066_v0  ;;  %1938 = vmatprep.subr.bf16.mxu1 %v2066_v0  ;;  %38 = vst.msk [vmem:[#allocation2 + $0x78] sm:$0xff] %vm22_vm3, %v2068_v17  ;;  %39 = vst.msk [vmem:[#allocation2 + $0x80] sm:$0xff] %vm22_vm3, %v2068_v17  ;;  %v1985_v27 = vld [vmem:[%s2949_s0 + $0x120] ss:$8 sps:$4 sm:$0xff]   ;;  %v1988_v29 = vld [vmem:[%s2949_s0 + $0x134] ss:$8 sps:$4 sm:$0xff]  }
   0xc   :  { %40 = vst.msk [vmem:[#allocation2 + $0x88] sm:$0xff] %vm22_vm3, %v2068_v17  ;;  %41 = vst.msk [vmem:[#allocation2 + $0x90] sm:$0xff] %vm22_vm3, %v2068_v17  ;;  %v1990_v30 = vld [vmem:[%s2949_s0 + $0x30] ss:$8 sps:$4 sm:$0xff]   ;;  %v1992_v32 = vld [vmem:[%s2949_s0 + $0x44] ss:$8 sps:$4 sm:$0xff]  }
   0xd   :  { %42 = vst.msk [vmem:[#allocation2 + $0x98] sm:$0xff] %vm22_vm3, %v2068_v17  ;;  %43 = vst.msk [vmem:[#allocation2 + $0xa0] sm:$0xff] %vm22_vm3, %v2068_v17  ;;  %v1991_v31 = vld [vmem:[%s2949_s0 + $0x130] ss:$8 sps:$4 sm:$0xff]   ;;  %v1994_v33 = vld [vmem:[%s2949_s0 + $0x144] ss:$8 sps:$4 sm:$0xff]  }
   0xe   :  { %690 = vmatpush1.bf16.msra.mxu0 %v1961_v4  ;;  %1948 = vmatpush1.bf16.msra.mxu1 %v1961_v4  ;;  %44 = vst.msk [vmem:[#allocation2 + $0xa8] sm:$0xff] %vm22_vm3, %v2068_v17  ;;  %45 = vst.msk [vmem:[#allocation2 + $0xb0] sm:$0xff] %vm22_vm3, %v2068_v17  ;;  %v1996_v34 = vld [vmem:[%s2949_s0 + $0x40] ss:$8 sps:$4 sm:$0xff]   ;;  %v1998_v36 = vld [vmem:[%s2949_s0 + $0x54] ss:$8 sps:$4 sm:$0xff]  }
   0xf   :  { %691 = vmatprep.subr.bf16.mxu0 %v2066_v0  ;;  %1939 = vmatprep.subr.bf16.mxu1 %v2066_v0  ;;  %46 = vst.msk [vmem:[#allocation2 + $0xb8] sm:$0xff] %vm22_vm3, %v2068_v17  ;;  %47 = vst.msk [vmem:[#allocation2 + $0xc0] sm:$0xff] %vm22_vm3, %v2068_v17  ;;  %v1997_v35 = vld [vmem:[%s2949_s0 + $0x140] ss:$8 sps:$4 sm:$0xff]   ;;  %v2000_v37 = vld [vmem:[%s2949_s0 + $0x154] ss:$8 sps:$4 sm:$0xff]  }
  0x10   :  { %48 = vst.msk [vmem:[#allocation2 + $0xc8] sm:$0xff] %vm22_vm3, %v2068_v17  ;;  %49 = vst.msk [vmem:[#allocation2 + $0xd0] sm:$0xff] %vm22_vm3, %v2068_v17  ;;  %v2002_v38 = vld [vmem:[%s2949_s0 + $0x50] ss:$8 sps:$4 sm:$0xff]   ;;  %v2004_v40 = vld [vmem:[%s2949_s0 + $0x64] ss:$8 sps:$4 sm:$0xff]  }
  0x11   :  { %50 = vst.msk [vmem:[#allocation2 + $0xd8] sm:$0xff] %vm22_vm3, %v2068_v17  ;;  %51 = vst.msk [vmem:[#allocation2 + $0xe0] sm:$0xff] %vm22_vm3, %v2068_v17  ;;  %v2003_v39 = vld [vmem:[%s2949_s0 + $0x150] ss:$8 sps:$4 sm:$0xff]   ;;  %v2006_v41 = vld [vmem:[%s2949_s0 + $0x164] ss:$8 sps:$4 sm:$0xff]  }
  0x12   :  { %692 = vmatpush1.bf16.msra.mxu0 %v1962_v7  ;;  %1949 = vmatpush1.bf16.msra.mxu1 %v1962_v7  ;;  %52 = vst.msk [vmem:[#allocation2 + $0xe8] sm:$0xff] %vm22_vm3, %v2068_v17  ;;  %53 = vst.msk [vmem:[#allocation2 + $0xf0] sm:$0xff] %vm22_vm3, %v2068_v17  ;;  %v2008_v42 = vld [vmem:[%s2949_s0 + $0x60] ss:$8 sps:$4 sm:$0xff]   ;;  %v2010_v44 = vld [vmem:[%s2949_s0 + $0x74] ss:$8 sps:$4 sm:$0xff]  }
  0x13   :  { %693 = vmatprep.subr.bf16.mxu0 %v2066_v0  ;;  %1940 = vmatprep.subr.bf16.mxu1 %v2066_v0  ;;  %54 = vst.msk [vmem:[#allocation2 + $0xf8] sm:$0xff] %vm22_vm3, %v2068_v17  ;;  %55 = vst.msk [vmem:[#allocation2 + $0x100] sm:$0xff] %vm22_vm3, %v2068_v17  ;;  %v2009_v43 = vld [vmem:[%s2949_s0 + $0x160] ss:$8 sps:$4 sm:$0xff]   ;;  %v2012_v45 = vld [vmem:[%s2949_s0 + $0x174] ss:$8 sps:$4 sm:$0xff]  }
  0x14   :  { %56 = vst.msk [vmem:[#allocation2 + $0x108] sm:$0xff] %vm22_vm3, %v2068_v17  ;;  %57 = vst.msk [vmem:[#allocation2 + $0x110] sm:$0xff] %vm22_vm3, %v2068_v17  ;;  %v2014_v46 = vld [vmem:[%s2949_s0 + $0x70] ss:$8 sps:$4 sm:$0xff]   ;;  %v2016_v48 = vld [vmem:[%s2949_s0 + $0x84] ss:$8 sps:$4 sm:$0xff]  }
  0x15   :  { %58 = vst.msk [vmem:[#allocation2 + $0x118] sm:$0xff] %vm22_vm3, %v2068_v17  ;;  %59 = vst.msk [vmem:[#allocation2 + $0x120] sm:$0xff] %vm22_vm3, %v2068_v17  ;;  %v2015_v47 = vld [vmem:[%s2949_s0 + $0x170] ss:$8 sps:$4 sm:$0xff]   ;;  %v2018_v49 = vld [vmem:[%s2949_s0 + $0x184] ss:$8 sps:$4 sm:$0xff]  }
  0x16   :  { %694 = vmatpush1.bf16.msra.mxu0 %v1963_v8  ;;  %1950 = vmatpush1.bf16.msra.mxu1 %v1963_v8  ;;  %60 = vst.msk [vmem:[#allocation2 + $0x128] sm:$0xff] %vm22_vm3, %v2068_v17  ;;  %61 = vst.msk [vmem:[#allocation2 + $0x130] sm:$0xff] %vm22_vm3, %v2068_v17  ;;  %v2020_v50 = vld [vmem:[%s2949_s0 + $0x80] ss:$8 sps:$4 sm:$0xff]   ;;  %v2022_v52 = vld [vmem:[%s2949_s0 + $0x94] ss:$8 sps:$4 sm:$0xff]  }
  0x17   :  { %695 = vmatprep.subr.bf16.mxu0 %v2066_v0  ;;  %1941 = vmatprep.subr.bf16.mxu1 %v2066_v0  ;;  %62 = vst.msk [vmem:[#allocation2 + $0x138] sm:$0xff] %vm22_vm3, %v2068_v17  ;;  %63 = vst.msk [vmem:[#allocation2 + $0x140] sm:$0xff] %vm22_vm3, %v2068_v17  ;;  %v2021_v51 = vld [vmem:[%s2949_s0 + $0x180] ss:$8 sps:$4 sm:$0xff]   ;;  %v2024_v53 = vld [vmem:[%s2949_s0 + $0x194] ss:$8 sps:$4 sm:$0xff]  }
  0x18   :  { %64 = vst.msk [vmem:[#allocation2 + $0x148] sm:$0xff] %vm22_vm3, %v2068_v17  ;;  %65 = vst.msk [vmem:[#allocation2 + $0x150] sm:$0xff] %vm22_vm3, %v2068_v17  ;;  %v2026_v54 = vld [vmem:[%s2949_s0 + $0x90] ss:$8 sps:$4 sm:$0xff]   ;;  %v2028_v56 = vld [vmem:[%s2949_s0 + $0xa4] ss:$8 sps:$4 sm:$0xff]  }
  0x19   :  { %66 = vst.msk [vmem:[#allocation2 + $0x158] sm:$0xff] %vm22_vm3, %v2068_v17  ;;  %67 = vst.msk [vmem:[#allocation2 + $0x160] sm:$0xff] %vm22_vm3, %v2068_v17  ;;  %v2027_v55 = vld [vmem:[%s2949_s0 + $0x190] ss:$8 sps:$4 sm:$0xff]   ;;  %v2030_v57 = vld [vmem:[%s2949_s0 + $0x1a4] ss:$8 sps:$4 sm:$0xff]  }
  0x1a   :  { %696 = vmatpush1.bf16.msra.mxu0 %v1964_v9  ;;  %1951 = vmatpush1.bf16.msra.mxu1 %v1964_v9  ;;  %68 = vst.msk [vmem:[#allocation2 + $0x168] sm:$0xff] %vm22_vm3, %v2068_v17  ;;  %69 = vst.msk [vmem:[#allocation2 + $0x170] sm:$0xff] %vm22_vm3, %v2068_v17  ;;  %v2032_v58 = vld [vmem:[%s2949_s0 + $0xa0] ss:$8 sps:$4 sm:$0xff]   ;;  %v2034_v60 = vld [vmem:[%s2949_s0 + $0xb4] ss:$8 sps:$4 sm:$0xff]  }
  0x1b   :  { %697 = vmatprep.subr.bf16.mxu0 %v2066_v0  ;;  %1942 = vmatprep.subr.bf16.mxu1 %v2066_v0  ;;  %70 = vst.msk [vmem:[#allocation2 + $0x178] sm:$0xff] %vm22_vm3, %v2068_v17  ;;  %71 = vst.msk [vmem:[#allocation2 + $0x180] sm:$0xff] %vm22_vm3, %v2068_v17  ;;  %v2033_v59 = vld [vmem:[%s2949_s0 + $0x1a0] ss:$8 sps:$4 sm:$0xff]   ;;  %v2036_v61 = vld [vmem:[%s2949_s0 + $0x1b4] ss:$8 sps:$4 sm:$0xff]  }
  0x1c   :  { %72 = vst.msk [vmem:[#allocation2 + $0x188] sm:$0xff] %vm22_vm3, %v2068_v17  ;;  %73 = vst.msk [vmem:[#allocation2 + $0x190] sm:$0xff] %vm22_vm3, %v2068_v17  ;;  %v2038_v62 = vld [vmem:[%s2949_s0 + $0xb0] ss:$8 sps:$4 sm:$0xff]   ;;  %v2042_v1 = vld [vmem:[%s2949_s0 + $0x1c4] ss:$8 sps:$4 sm:$0xff]  }
  0x1d   :  { %74 = vst.msk [vmem:[#allocation2 + $0x198] sm:$0xff] %vm22_vm3, %v2068_v17  ;;  %75 = vst.msk [vmem:[#allocation2 + $0x1a0] sm:$0xff] %vm22_vm3, %v2068_v17  ;;  %v2039_v63 = vld [vmem:[%s2949_s0 + $0x1b0] ss:$8 sps:$4 sm:$0xff]   ;;  %v2044_v2 = vld [vmem:[%s2949_s0 + $0xc0] ss:$8 sps:$4 sm:$0xff]  }
  0x1e   :  { %698 = vmatpush1.bf16.msra.mxu0 %v1965_v12  ;;  %1952 = vmatpush1.bf16.msra.mxu1 %v1965_v12  ;;  %76 = vst.msk [vmem:[#allocation2 + $0x1a8] sm:$0xff] %vm22_vm3, %v2068_v17  ;;  %77 = vst.msk [vmem:[#allocation2 + $0x1b0] sm:$0xff] %vm22_vm3, %v2068_v17  ;;  %v2045_v3 = vld [vmem:[%s2949_s0 + $0x1c0] ss:$8 sps:$4 sm:$0xff]   ;;  %v2046_v4 = vld [vmem:[%s2949_s0 + $0xd4] ss:$8 sps:$4 sm:$0xff]  }
  0x1f   :  { %711 = vmatprep.subr.bf16.mxu0 %v2066_v0  ;;  %1943 = vmatprep.subr.bf16.mxu1 %v2066_v0  ;;  %78 = vst.msk [vmem:[#allocation2 + $0x1b8] sm:$0xff] %vm22_vm3, %v2068_v17  ;;  %79 = vst.msk [vmem:[#allocation2 + $0x1c0] sm:$0xff] %vm22_vm3, %v2068_v17  ;;  %v2048_v5 = vld [vmem:[%s2949_s0 + $0x1d4] ss:$8 sps:$4 sm:$0xff]   ;;  %v2050_v6 = vld [vmem:[%s2949_s0 + $0xd0] ss:$8 sps:$4 sm:$0xff]  }
  0x20   :  { %80 = vst.msk [vmem:[#allocation2 + $0x1c8] sm:$0xff] %vm22_vm3, %v2068_v17  ;;  %81 = vst.msk [vmem:[#allocation2 + $0x1d0] sm:$0xff] %vm22_vm3, %v2068_v17  ;;  %v2051_v7 = vld [vmem:[%s2949_s0 + $0x1d0] ss:$8 sps:$4 sm:$0xff]   ;;  %v2052_v8 = vld [vmem:[%s2949_s0 + $0xe4] ss:$8 sps:$4 sm:$0xff]  }
  0x21   :  { %82 = vst.msk [vmem:[#allocation2 + $0x1d8] sm:$0xff] %vm22_vm3, %v2068_v17  ;;  %83 = vst.msk [vmem:[#allocation2 + $0x1e0] sm:$0xff] %vm22_vm3, %v2068_v17  ;;  %v2054_v9 = vld [vmem:[%s2949_s0 + $0x1e4] ss:$8 sps:$4 sm:$0xff]   ;;  %v2056_v10 = vld [vmem:[%s2949_s0 + $0xe0] ss:$8 sps:$4 sm:$0xff]  }
  0x22   :  { %712 = vmatpush2.bf16.msra.mxu0 %v681_v15  ;;  %1953 = vmatpush2.bf16.msra.mxu1 %v681_v15  ;;  %84 = vst.msk [vmem:[#allocation2 + $0x1e8] sm:$0xff] %vm22_vm3, %v2068_v17  ;;  %85 = vst.msk [vmem:[#allocation2 + $0x1f0] sm:$0xff] %vm22_vm3, %v2068_v17  ;;  %v2057_v11 = vld [vmem:[%s2949_s0 + $0x1e0] ss:$8 sps:$4 sm:$0xff]   ;;  %v2058_v12 = vld [vmem:[%s2949_s0 + $0xf4] ss:$8 sps:$4 sm:$0xff]  }
  0x23   :  { %713 = vmatprep.subr.bf16.mxu0 %v2066_v0  ;;  %1944 = vmatprep.subr.bf16.mxu1 %v2066_v0  ;;  %86 = vst.msk [vmem:[#allocation2 + $0x1f8] sm:$0xff] %vm22_vm3, %v2068_v17  ;;  %v2040_v0 = vld [vmem:[%s2949_s0 + $0xc4] ss:$8 sps:$4 sm:$0xff]   ;;  %v2060_v13 = vld [vmem:[%s2949_s0 + $0x1f4] ss:$8 sps:$4 sm:$0xff]  }
  0x24   :  { %v2062_v14 = vld [vmem:[%s2949_s0 + $0xf0] ss:$8 sps:$4 sm:$0xff]   ;;  %v119_v17 = vld [vmem:[#allocation2 + $0x100] sm:$0xff] }
  0x25   :  { %v2063_v15 = vld [vmem:[%s2949_s0 + $0x1f0] ss:$8 sps:$4 sm:$0xff]  }
  0x26   :  { %714 = vmatpush2.bf16.msra.mxu0 %v2132_v16  ;;  %1954 = vmatpush2.bf16.msra.mxu1 %v2132_v16  ;;  %v87_v16 = vld [vmem:[#allocation2] sm:$0xff] }
  0x29   :  { %716 = vmatmul.mubr.bf16.vlgmr.msra.gmra.mxu0 %v1968_v18  ;;  %844 = vmatmul.mubr.bf16.vlgmr.msra.gmra.mxu1 %v1971_v19 }
  0x2a   :  { %1774 = vmatprep.mubr.msk.bf16.mxu0 %vm579_vm0, %v1974_v20  ;;  %1790 = vmatprep.mubr.msk.bf16.mxu1 %vm579_vm0, %v1976_v21 }
  0x31   :  { %724 = vmatmul.mubr.bf16.gmra.mxu0 %v1978_v22  ;;  %852 = vmatmul.mubr.bf16.gmra.mxu1 %v1979_v23 }
  0x32   :  { %1775 = vmatprep.mubr.msk.bf16.mxu0 %vm579_vm0, %v1980_v24  ;;  %1791 = vmatprep.mubr.msk.bf16.mxu1 %vm579_vm0, %v1982_v25  ;;  %v88_v24 = vld [vmem:[#allocation2 + $0x8] sm:$0xff] }
  0x33   :  { %v120_v25 = vld [vmem:[#allocation2 + $0x108] sm:$0xff] }
  0x39   :  { %732 = vmatmul.mubr.bf16.gmra.mxu0 %v1984_v26  ;;  %860 = vmatmul.mubr.bf16.gmra.mxu1 %v1985_v27 }
  0x3a   :  { %1776 = vmatprep.mubr.msk.bf16.mxu0 %vm579_vm0, %v1986_v28  ;;  %1792 = vmatprep.mubr.msk.bf16.mxu1 %vm579_vm0, %v1988_v29 }
  0x41   :  { %740 = vmatmul.mubr.bf16.gmra.mxu0 %v1990_v30  ;;  %868 = vmatmul.mubr.bf16.gmra.mxu1 %v1991_v31 }
  0x42   :  { %1777 = vmatprep.mubr.msk.bf16.mxu0 %vm579_vm0, %v1992_v32  ;;  %1793 = vmatprep.mubr.msk.bf16.mxu1 %vm579_vm0, %v1994_v33  ;;  %v89_v32 = vld [vmem:[#allocation2 + $0x10] sm:$0xff] }
  0x43   :  { %v121_v33 = vld [vmem:[#allocation2 + $0x110] sm:$0xff] }
  0x49   :  { %748 = vmatmul.mubr.bf16.gmra.mxu0 %v1996_v34  ;;  %876 = vmatmul.mubr.bf16.gmra.mxu1 %v1997_v35  ;;  %v2487_v34 = vld [vmem:[%s2950_s2] ss:$0 sm:$0xff] }
  0x4a   :  { %1778 = vmatprep.mubr.msk.bf16.mxu0 %vm579_vm0, %v1998_v36  ;;  %1794 = vmatprep.mubr.msk.bf16.mxu1 %vm579_vm0, %v2000_v37  ;;  %v2492_v37 = vld [vmem:[%s2951_s3] ss:$0 sm:$0xff] }
  0x51   :  { %756 = vmatmul.mubr.bf16.gmra.mxu0 %v2002_v38  ;;  %884 = vmatmul.mubr.bf16.gmra.mxu1 %v2003_v39 }
  0x52   :  { %1779 = vmatprep.mubr.msk.bf16.mxu0 %vm579_vm0, %v2004_v40  ;;  %1795 = vmatprep.mubr.msk.bf16.mxu1 %vm579_vm0, %v2006_v41  ;;  %v90_v40 = vld [vmem:[#allocation2 + $0x18] sm:$0xff] }
  0x59   :  { %764 = vmatmul.mubr.bf16.gmra.mxu0 %v2008_v42  ;;  %892 = vmatmul.mubr.bf16.gmra.mxu1 %v2009_v43 }
  0x5a   :  { %1780 = vmatprep.mubr.msk.bf16.mxu0 %vm579_vm0, %v2010_v44  ;;  %1796 = vmatprep.mubr.msk.bf16.mxu1 %vm579_vm0, %v2012_v45  ;;  %v122_v45 = vld [vmem:[#allocation2 + $0x118] sm:$0xff] }
  0x61   :  { %772 = vmatmul.mubr.bf16.gmra.mxu0 %v2014_v46  ;;  %900 = vmatmul.mubr.bf16.gmra.mxu1 %v2015_v47 }
  0x62   :  { %1781 = vmatprep.mubr.msk.bf16.mxu0 %vm579_vm0, %v2016_v48  ;;  %1797 = vmatprep.mubr.msk.bf16.mxu1 %vm579_vm0, %v2018_v49 }
  0x69   :  { %780 = vmatmul.mubr.bf16.gmra.mxu0 %v2020_v50  ;;  %908 = vmatmul.mubr.bf16.gmra.mxu1 %v2021_v51 }
  0x6a   :  { %1782 = vmatprep.mubr.msk.bf16.mxu0 %vm579_vm0, %v2022_v52  ;;  %1798 = vmatprep.mubr.msk.bf16.mxu1 %vm579_vm0, %v2024_v53 }
  0x71   :  { %788 = vmatmul.mubr.bf16.gmra.mxu0 %v2026_v54  ;;  %916 = vmatmul.mubr.bf16.gmra.mxu1 %v2027_v55 }
  0x72   :  { %1783 = vmatprep.mubr.msk.bf16.mxu0 %vm579_vm0, %v2028_v56  ;;  %1799 = vmatprep.mubr.msk.bf16.mxu1 %vm579_vm0, %v2030_v57 }
  0x79   :  { %796 = vmatmul.mubr.bf16.gmra.mxu0 %v2032_v58  ;;  %924 = vmatmul.mubr.bf16.gmra.mxu1 %v2033_v59 }
  0x7a   :  { %1784 = vmatprep.mubr.msk.bf16.mxu0 %vm579_vm0, %v2034_v60  ;;  %1800 = vmatprep.mubr.msk.bf16.mxu1 %vm579_vm0, %v2036_v61 }
  0x81   :  { %804 = vmatmul.mubr.bf16.gmra.mxu0 %v2038_v62  ;;  %932 = vmatmul.mubr.bf16.gmra.mxu1 %v2039_v63  ;;  %v91_v62 = vld [vmem:[#allocation2 + $0x20] sm:$0xff] }
  0x82   :  { %1785 = vmatprep.mubr.msk.bf16.mxu0 %vm579_vm0, %v2040_v0  ;;  %1801 = vmatprep.mubr.msk.bf16.mxu1 %vm579_vm0, %v2042_v1  ;;  %v123_v63 = vld [vmem:[#allocation2 + $0x120] sm:$0xff] }
  0x89   :  { %812 = vmatmul.mubr.bf16.gmra.mxu0 %v2044_v2  ;;  %940 = vmatmul.mubr.bf16.gmra.mxu1 %v2045_v3 }
  0x8a   :  { %1786 = vmatprep.mubr.msk.bf16.mxu0 %vm579_vm0, %v2046_v4  ;;  %1802 = vmatprep.mubr.msk.bf16.mxu1 %vm579_vm0, %v2048_v5 }
  0x91   :  { %820 = vmatmul.mubr.bf16.gmra.mxu0 %v2050_v6  ;;  %948 = vmatmul.mubr.bf16.gmra.mxu1 %v2051_v7 }
  0x92   :  { %1787 = vmatprep.mubr.msk.bf16.mxu0 %vm579_vm0, %v2052_v8  ;;  %1803 = vmatprep.mubr.msk.bf16.mxu1 %vm579_vm0, %v2054_v9 }
  0x99   :  { %828 = vmatmul.mubr.bf16.gmra.mxu0 %v2056_v10  ;;  %956 = vmatmul.mubr.bf16.gmra.mxu1 %v2057_v11 }
  0x9a   :  { %1788 = vmatprep.mubr.msk.bf16.mxu0 %vm579_vm0, %v2058_v12  ;;  %1804 = vmatprep.mubr.msk.bf16.mxu1 %vm579_vm0, %v2060_v13 }
  0xa1   :  { %836 = vmatmul.mubr.bf16.gmra.mxu0 %v2062_v14  ;;  %964 = vmatmul.mubr.bf16.gmra.mxu1 %v2063_v15 }
  0xe9   :  { %v717_v18 = vpop.f32.mrf.mxu0  ;;  %v845_v19 = vpop.f32.mrf.mxu1 }
  0xea   :  { %v972_v20 = vadd.f32 %v717_v18, %v87_v16  ;;  %v1004_v21 = vadd.f32 %v845_v19, %v119_v17  ;;  %v92_v16 = vld [vmem:[#allocation2 + $0x28] sm:$0xff] }
  0xeb   :  { %v719_v22 = vpop.f32.mrf.mxu0  ;;  %v847_v23 = vpop.f32.mrf.mxu1  ;;  %v124_v17 = vld [vmem:[#allocation2 + $0x128] sm:$0xff] }
  0xec   :  { %1037 = vst.msk [vmem:[#allocation2] sm:$0xff] %vm22_vm3, %v972_v20  ;;  %1069 = vst.msk [vmem:[#allocation2 + $0x100] sm:$0xff] %vm22_vm3, %v1004_v21 }
  0xed   :  { %v720_v26 = vpop.f32.mrf.mxu0  ;;  %v848_v27 = vpop.f32.mrf.mxu1 }
  0xee   :  { %v973_v28 = vadd.f32 %v720_v26, %v88_v24  ;;  %v1005_v29 = vadd.f32 %v848_v27, %v120_v25 }
  0xef   :  { %v722_v30 = vpop.f32.mrf.mxu0  ;;  %v850_v31 = vpop.f32.mrf.mxu1 }
  0xf0   :  { %1038 = vst.msk [vmem:[#allocation2 + $0x8] sm:$0xff] %vm22_vm3, %v973_v28  ;;  %1070 = vst.msk [vmem:[#allocation2 + $0x108] sm:$0xff] %vm22_vm3, %v1005_v29 }
  0xf1   :  { %v725_v35 = vpop.f32.mrf.mxu0  ;;  %v853_v36 = vpop.f32.mrf.mxu1 }
  0xf2   :  { %v974_v38 = vadd.f32 %v725_v35, %v89_v32  ;;  %v1006_v39 = vadd.f32 %v853_v36, %v121_v33  ;;  %v93_v35 = vld [vmem:[#allocation2 + $0x30] sm:$0xff] }
  0xf3   :  { %v1104_v41 = vld [vmem:[#allocation2] sm:$0xff]  ;;  %v727_v43 = vpop.f32.mrf.mxu0  ;;  %v855_v44 = vpop.f32.mrf.mxu1  ;;  %v125_v36 = vld [vmem:[#allocation2 + $0x130] sm:$0xff] }
  0xf4   :  { %v1136_v42 = vld [vmem:[#allocation2 + $0x100] sm:$0xff]  ;;  %v1175_v46 = vmul.f32 %v2487_v34, %v1104_v41  ;;  %1039 = vst.msk [vmem:[#allocation2 + $0x10] sm:$0xff] %vm22_vm3, %v974_v38  ;;  %1071 = vst.msk [vmem:[#allocation2 + $0x110] sm:$0xff] %vm22_vm3, %v1006_v39 }
  0xf5   :  { %v1207_v47 = vmul.f32 %v2487_v34, %v1136_v42  ;;  %v728_v48 = vpop.f32.mrf.mxu0  ;;  %v856_v49 = vpop.f32.mrf.mxu1 }
  0xf6   :  { %v1246_v50 = vadd.f32 %v2492_v37, %v1175_v46  ;;  %v975_v52 = vadd.f32 %v728_v48, %v90_v40  ;;  %v1007_v53 = vadd.f32 %v856_v49, %v122_v45  ;;  %v94_v48 = vld [vmem:[#allocation2 + $0x38] sm:$0xff] }
  0xf7   :  { %v1278_v51 = vadd.f32 %v2492_v37, %v1207_v47  ;;  %v1105_v54 = vld [vmem:[#allocation2 + $0x8] sm:$0xff]  ;;  %v730_v56 = vpop.f32.mrf.mxu0  ;;  %v858_v57 = vpop.f32.mrf.mxu1  ;;  %v126_v49 = vld [vmem:[#allocation2 + $0x138] sm:$0xff] }
  0xf8   :  { %v1137_v55 = vld [vmem:[#allocation2 + $0x108] sm:$0xff]  ;;  %v1310_v58 = vmax.f32 %v1246_v50, 0.0  ;;  %v1176_v60 = vmul.f32 %v2487_v34, %v1105_v54  ;;  %1040 = vst.msk [vmem:[#allocation2 + $0x18] sm:$0xff] %vm22_vm3, %v975_v52  ;;  %1072 = vst.msk [vmem:[#allocation2 + $0x118] sm:$0xff] %vm22_vm3, %v1007_v53 }
  0xf9   :  { %v1342_v59 = vmax.f32 %v1278_v51, 0.0  ;;  %v1208_v61 = vmul.f32 %v2487_v34, %v1137_v55  ;;  %v733_v0 = vpop.f32.mrf.mxu0  ;;  %v861_v1 = vpop.f32.mrf.mxu1 }
  0xfa   :  { %v1871_v2 = vpack.c.bf16 %v1310_v58, %v1310_v58  ;;  %v1247_v4 = vadd.f32 %v2492_v37, %v1176_v60  ;;  %v976_v8 = vadd.f32 %v733_v0, %v91_v62  ;;  %v1008_v9 = vadd.f32 %v861_v1, %v123_v63 }
  0xfb   :  { %v1903_v3 = vpack.c.bf16 %v1342_v59, %v1342_v59  ;;  %v1279_v5 = vadd.f32 %v2492_v37, %v1208_v61  ;;  %v1106_v6 = vld [vmem:[#allocation2 + $0x10] sm:$0xff]  ;;  %v735_v10 = vpop.f32.mrf.mxu0  ;;  %v863_v11 = vpop.f32.mrf.mxu1 }
  0xfc   :  { %v1138_v7 = vld [vmem:[#allocation2 + $0x110] sm:$0xff]  ;;  %1631 = vst.msk [vmem:[%s2952_s4] sm:$0xf] %vm1630_vm4, %v1871_v2  ;;  %v1311_v12 = vmax.f32 %v1247_v4, 0.0  ;;  %v1177_v14 = vmul.f32 %v2487_v34, %v1106_v6  ;;  %v95_v2 = vld [vmem:[#allocation2 + $0x40] sm:$0xff] }
  0xfd   :  { %1663 = vst.msk [vmem:[%s2952_s4 + $0x80] sm:$0xf] %vm1630_vm4, %v1903_v3  ;;  %v1343_v13 = vmax.f32 %v1279_v5, 0.0  ;;  %v1209_v15 = vmul.f32 %v2487_v34, %v1138_v7  ;;  %v736_v18 = vpop.f32.mrf.mxu0  ;;  %v864_v19 = vpop.f32.mrf.mxu1  ;;  %v127_v3 = vld [vmem:[#allocation2 + $0x140] sm:$0xff] }
  0xfe   :  { %1041 = vst.msk [vmem:[#allocation2 + $0x20] sm:$0xff] %vm22_vm3, %v976_v8  ;;  %1073 = vst.msk [vmem:[#allocation2 + $0x120] sm:$0xff] %vm22_vm3, %v1008_v9  ;;  %v1872_v20 = vpack.c.bf16 %v1311_v12, %v1311_v12  ;;  %v1248_v22 = vadd.f32 %v2492_v37, %v1177_v14  ;;  %v977_v26 = vadd.f32 %v736_v18, %v92_v16 }
  0xff   :  { %v1904_v21 = vpack.c.bf16 %v1343_v13, %v1343_v13  ;;  %v1280_v23 = vadd.f32 %v2492_v37, %v1209_v15  ;;  %v1107_v24 = vld [vmem:[#allocation2 + $0x18] sm:$0xff]  ;;  %v1009_v27 = vadd.f32 %v864_v19, %v124_v17  ;;  %v738_v28 = vpop.f32.mrf.mxu0  ;;  %v866_v29 = vpop.f32.mrf.mxu1 }
 0x100   :  { %v1139_v25 = vld [vmem:[#allocation2 + $0x118] sm:$0xff]  ;;  %1632 = vst.msk [vmem:[%s2952_s4 + $0x4] sm:$0xf] %vm1630_vm4, %v1872_v20  ;;  %v1312_v30 = vmax.f32 %v1248_v22, 0.0  ;;  %v1178_v32 = vmul.f32 %v2487_v34, %v1107_v24  ;;  %v96_v20 = vld [vmem:[#allocation2 + $0x48] sm:$0xff] }
 0x101   :  { %1664 = vst.msk [vmem:[%s2952_s4 + $0x84] sm:$0xf] %vm1630_vm4, %v1904_v21  ;;  %v1344_v31 = vmax.f32 %v1280_v23, 0.0  ;;  %v1210_v33 = vmul.f32 %v2487_v34, %v1139_v25  ;;  %v741_v38 = vpop.f32.mrf.mxu0  ;;  %v869_v39 = vpop.f32.mrf.mxu1  ;;  %v128_v21 = vld [vmem:[#allocation2 + $0x148] sm:$0xff] }
 0x102   :  { %1042 = vst.msk [vmem:[#allocation2 + $0x28] sm:$0xff] %vm22_vm3, %v977_v26  ;;  %1074 = vst.msk [vmem:[#allocation2 + $0x128] sm:$0xff] %vm22_vm3, %v1009_v27  ;;  %v1873_v40 = vpack.c.bf16 %v1312_v30, %v1312_v30  ;;  %v1249_v42 = vadd.f32 %v2492_v37, %v1178_v32  ;;  %v978_v44 = vadd.f32 %v741_v38, %v93_v35  ;;  %v97_v32 = vld [vmem:[#allocation2 + $0x50] sm:$0xff] }
 0x103   :  { %v1905_v41 = vpack.c.bf16 %v1344_v31, %v1344_v31  ;;  %v1281_v43 = vadd.f32 %v2492_v37, %v1210_v33  ;;  %v1010_v45 = vadd.f32 %v869_v39, %v125_v36  ;;  %v743_v46 = vpop.f32.mrf.mxu0  ;;  %v871_v47 = vpop.f32.mrf.mxu1 }
 0x104   :  { %1633 = vst.msk [vmem:[%s2952_s4 + $0x8] sm:$0xf] %vm1630_vm4, %v1873_v40  ;;  %v1313_v50 = vmax.f32 %v1249_v42, 0.0 }
 0x105   :  { %1665 = vst.msk [vmem:[%s2952_s4 + $0x88] sm:$0xf] %vm1630_vm4, %v1905_v41  ;;  %v1345_v51 = vmax.f32 %v1281_v43, 0.0  ;;  %v1108_v52 = vld [vmem:[#allocation2 + $0x20] sm:$0xff]  ;;  %v744_v56 = vpop.f32.mrf.mxu0  ;;  %v872_v57 = vpop.f32.mrf.mxu1  ;;  %v129_v43 = vld [vmem:[#allocation2 + $0x150] sm:$0xff] }
 0x106   :  { %v1140_v53 = vld [vmem:[#allocation2 + $0x120] sm:$0xff]  ;;  %v1179_v54 = vmul.f32 %v2487_v34, %v1108_v52  ;;  %1043 = vst.msk [vmem:[#allocation2 + $0x30] sm:$0xff] %vm22_vm3, %v978_v44  ;;  %1075 = vst.msk [vmem:[#allocation2 + $0x130] sm:$0xff] %vm22_vm3, %v1010_v45  ;;  %v1874_v58 = vpack.c.bf16 %v1313_v50, %v1313_v50  ;;  %v979_v60 = vadd.f32 %v744_v56, %v94_v48 }
 0x107   :  { %v1211_v55 = vmul.f32 %v2487_v34, %v1140_v53  ;;  %v1906_v59 = vpack.c.bf16 %v1345_v51, %v1345_v51  ;;  %v1011_v61 = vadd.f32 %v872_v57, %v126_v49  ;;  %v746_v0 = vpop.f32.mrf.mxu0  ;;  %v874_v1 = vpop.f32.mrf.mxu1 }
 0x108   :  { %v1250_v62 = vadd.f32 %v2492_v37, %v1179_v54  ;;  %1634 = vst.msk [vmem:[%s2952_s4 + $0xc] sm:$0xf] %vm1630_vm4, %v1874_v58  ;;  %v98_v0 = vld [vmem:[#allocation2 + $0x58] sm:$0xff] }
 0x109   :  { %v1282_v63 = vadd.f32 %v2492_v37, %v1211_v55  ;;  %1666 = vst.msk [vmem:[%s2952_s4 + $0x8c] sm:$0xf] %vm1630_vm4, %v1906_v59  ;;  %v1109_v4 = vld [vmem:[#allocation2 + $0x28] sm:$0xff]  ;;  %v749_v10 = vpop.f32.mrf.mxu0  ;;  %v877_v11 = vpop.f32.mrf.mxu1  ;;  %v130_v1 = vld [vmem:[#allocation2 + $0x158] sm:$0xff] }
 0x10a   :  { %v1141_v5 = vld [vmem:[#allocation2 + $0x128] sm:$0xff]  ;;  %1044 = vst.msk [vmem:[#allocation2 + $0x38] sm:$0xff] %vm22_vm3, %v979_v60  ;;  %1076 = vst.msk [vmem:[#allocation2 + $0x138] sm:$0xff] %vm22_vm3, %v1011_v61  ;;  %v1314_v6 = vmax.f32 %v1250_v62, 0.0  ;;  %v1180_v8 = vmul.f32 %v2487_v34, %v1109_v4  ;;  %v980_v12 = vadd.f32 %v749_v10, %v95_v2  ;;  %v1012_v13 = vadd.f32 %v877_v11, %v127_v3 }
 0x10b   :  { %v1346_v7 = vmax.f32 %v1282_v63, 0.0  ;;  %v1212_v9 = vmul.f32 %v2487_v34, %v1141_v5  ;;  %v751_v18 = vpop.f32.mrf.mxu0  ;;  %v879_v19 = vpop.f32.mrf.mxu1 }
 0x10c   :  { %v1875_v14 = vpack.c.bf16 %v1314_v6, %v1314_v6  ;;  %v1251_v16 = vadd.f32 %v2492_v37, %v1180_v8  ;;  %1045 = vst.msk [vmem:[#allocation2 + $0x40] sm:$0xff] %vm22_vm3, %v980_v12  ;;  %1077 = vst.msk [vmem:[#allocation2 + $0x140] sm:$0xff] %vm22_vm3, %v1012_v13  ;;  %v99_v18 = vld [vmem:[#allocation2 + $0x60] sm:$0xff] }
 0x10d   :  { %v1907_v15 = vpack.c.bf16 %v1346_v7, %v1346_v7  ;;  %v1283_v17 = vadd.f32 %v2492_v37, %v1212_v9  ;;  %v1110_v22 = vld [vmem:[#allocation2 + $0x30] sm:$0xff]  ;;  %v752_v28 = vpop.f32.mrf.mxu0  ;;  %v880_v29 = vpop.f32.mrf.mxu1  ;;  %v131_v19 = vld [vmem:[#allocation2 + $0x160] sm:$0xff] }
 0x10e   :  { %v1142_v23 = vld [vmem:[#allocation2 + $0x130] sm:$0xff]  ;;  %1635 = vst.msk [vmem:[%s2952_s4 + $0x10] sm:$0xf] %vm1630_vm4, %v1875_v14  ;;  %v1315_v24 = vmax.f32 %v1251_v16, 0.0  ;;  %v1181_v26 = vmul.f32 %v2487_v34, %v1110_v22  ;;  %v981_v30 = vadd.f32 %v752_v28, %v96_v20  ;;  %v1013_v31 = vadd.f32 %v880_v29, %v128_v21 }
 0x10f   :  { %1667 = vst.msk [vmem:[%s2952_s4 + $0x90] sm:$0xf] %vm1630_vm4, %v1907_v15  ;;  %v1347_v25 = vmax.f32 %v1283_v17, 0.0  ;;  %v1213_v27 = vmul.f32 %v2487_v34, %v1142_v23  ;;  %v754_v41 = vpop.f32.mrf.mxu0  ;;  %v882_v42 = vpop.f32.mrf.mxu1 }
 0x110   :  { %v1876_v33 = vpack.c.bf16 %v1315_v24, %v1315_v24  ;;  %v1252_v36 = vadd.f32 %v2492_v37, %v1181_v26  ;;  %1046 = vst.msk [vmem:[#allocation2 + $0x48] sm:$0xff] %vm22_vm3, %v981_v30  ;;  %1078 = vst.msk [vmem:[#allocation2 + $0x148] sm:$0xff] %vm22_vm3, %v1013_v31 }
 0x111   :  { %v1908_v35 = vpack.c.bf16 %v1347_v25, %v1347_v25  ;;  %v1284_v38 = vadd.f32 %v2492_v37, %v1213_v27  ;;  %v1111_v39 = vld [vmem:[#allocation2 + $0x38] sm:$0xff]  ;;  %v757_v48 = vpop.f32.mrf.mxu0  ;;  %v885_v49 = vpop.f32.mrf.mxu1 }
 0x112   :  { %v1143_v40 = vld [vmem:[#allocation2 + $0x138] sm:$0xff]  ;;  %v1182_v44 = vmul.f32 %v2487_v34, %v1111_v39  ;;  %1636 = vst.msk [vmem:[%s2952_s4 + $0x14] sm:$0xf] %vm1630_vm4, %v1876_v33  ;;  %v1316_v46 = vmax.f32 %v1252_v36, 0.0  ;;  %v982_v52 = vadd.f32 %v757_v48, %v97_v32  ;;  %v1014_v53 = vadd.f32 %v885_v49, %v129_v43  ;;  %v132_v39 = vld [vmem:[#allocation2 + $0x168] sm:$0xff] }
 0x113   :  { %v1214_v45 = vmul.f32 %v2487_v34, %v1143_v40  ;;  %1668 = vst.msk [vmem:[%s2952_s4 + $0x94] sm:$0xf] %vm1630_vm4, %v1908_v35  ;;  %v1348_v47 = vmax.f32 %v1284_v38, 0.0  ;;  %v1112_v56 = vld [vmem:[#allocation2 + $0x40] sm:$0xff]  ;;  %v759_v58 = vpop.f32.mrf.mxu0  ;;  %v887_v59 = vpop.f32.mrf.mxu1  ;;  %v100_v38 = vld [vmem:[#allocation2 + $0x68] sm:$0xff] }
 0x114   :  { %v1253_v50 = vadd.f32 %v2492_v37, %v1182_v44  ;;  %v1877_v54 = vpack.c.bf16 %v1316_v46, %v1316_v46  ;;  %v1144_v57 = vld [vmem:[#allocation2 + $0x140] sm:$0xff]  ;;  %v1183_v62 = vmul.f32 %v2487_v34, %v1112_v56  ;;  %1047 = vst.msk [vmem:[#allocation2 + $0x50] sm:$0xff] %vm22_vm3, %v982_v52  ;;  %1079 = vst.msk [vmem:[#allocation2 + $0x150] sm:$0xff] %vm22_vm3, %v1014_v53 }
 0x115   :  { %v1285_v51 = vadd.f32 %v2492_v37, %v1214_v45  ;;  %v1909_v55 = vpack.c.bf16 %v1348_v47, %v1348_v47  ;;  %v1215_v63 = vmul.f32 %v2487_v34, %v1144_v57  ;;  %v760_v2 = vpop.f32.mrf.mxu0  ;;  %v888_v3 = vpop.f32.mrf.mxu1 }
 0x116   :  { %v1317_v60 = vmax.f32 %v1253_v50, 0.0  ;;  %1637 = vst.msk [vmem:[%s2952_s4 + $0x18] sm:$0xf] %vm1630_vm4, %v1877_v54  ;;  %v1254_v6 = vadd.f32 %v2492_v37, %v1183_v62  ;;  %v983_v10 = vadd.f32 %v760_v2, %v98_v0  ;;  %v1015_v11 = vadd.f32 %v888_v3, %v130_v1  ;;  %v101_v50 = vld [vmem:[#allocation2 + $0x70] sm:$0xff] }
 0x117   :  { %v1349_v61 = vmax.f32 %v1285_v51, 0.0  ;;  %1669 = vst.msk [vmem:[%s2952_s4 + $0x98] sm:$0xf] %vm1630_vm4, %v1909_v55  ;;  %v1286_v7 = vadd.f32 %v2492_v37, %v1215_v63  ;;  %v1113_v8 = vld [vmem:[#allocation2 + $0x48] sm:$0xff]  ;;  %v762_v12 = vpop.f32.mrf.mxu0  ;;  %v890_v13 = vpop.f32.mrf.mxu1  ;;  %v133_v51 = vld [vmem:[#allocation2 + $0x170] sm:$0xff] }
 0x118   :  { %v1878_v4 = vpack.c.bf16 %v1317_v60, %v1317_v60  ;;  %v1145_v9 = vld [vmem:[#allocation2 + $0x148] sm:$0xff]  ;;  %v1318_v14 = vmax.f32 %v1254_v6, 0.0  ;;  %v1184_v16 = vmul.f32 %v2487_v34, %v1113_v8  ;;  %1048 = vst.msk [vmem:[#allocation2 + $0x58] sm:$0xff] %vm22_vm3, %v983_v10  ;;  %1080 = vst.msk [vmem:[#allocation2 + $0x158] sm:$0xff] %vm22_vm3, %v1015_v11 }
 0x119   :  { %v1910_v5 = vpack.c.bf16 %v1349_v61, %v1349_v61  ;;  %v1350_v15 = vmax.f32 %v1286_v7, 0.0  ;;  %v1216_v17 = vmul.f32 %v2487_v34, %v1145_v9  ;;  %v765_v20 = vpop.f32.mrf.mxu0  ;;  %v893_v21 = vpop.f32.mrf.mxu1 }
 0x11a   :  { %1638 = vst.msk [vmem:[%s2952_s4 + $0x1c] sm:$0xf] %vm1630_vm4, %v1878_v4  ;;  %v1879_v22 = vpack.c.bf16 %v1318_v14, %v1318_v14  ;;  %v1255_v24 = vadd.f32 %v2492_v37, %v1184_v16  ;;  %v984_v28 = vadd.f32 %v765_v20, %v99_v18  ;;  %v1016_v29 = vadd.f32 %v893_v21, %v131_v19  ;;  %v102_v4 = vld [vmem:[#allocation2 + $0x78] sm:$0xff] }
 0x11b   :  { %1670 = vst.msk [vmem:[%s2952_s4 + $0x9c] sm:$0xf] %vm1630_vm4, %v1910_v5  ;;  %v1911_v23 = vpack.c.bf16 %v1350_v15, %v1350_v15  ;;  %v1287_v25 = vadd.f32 %v2492_v37, %v1216_v17  ;;  %v1114_v26 = vld [vmem:[#allocation2 + $0x50] sm:$0xff]  ;;  %v767_v30 = vpop.f32.mrf.mxu0  ;;  %v895_v31 = vpop.f32.mrf.mxu1  ;;  %v134_v5 = vld [vmem:[#allocation2 + $0x178] sm:$0xff] }
 0x11c   :  { %v1146_v27 = vld [vmem:[#allocation2 + $0x150] sm:$0xff]  ;;  %1639 = vst.msk [vmem:[%s2952_s4 + $0x20] sm:$0xf] %vm1630_vm4, %v1879_v22  ;;  %v1319_v32 = vmax.f32 %v1255_v24, 0.0  ;;  %v1185_v35 = vmul.f32 %v2487_v34, %v1114_v26  ;;  %v103_v22 = vld [vmem:[#allocation2 + $0x80] sm:$0xff] }
 0x11d   :  { %1671 = vst.msk [vmem:[%s2952_s4 + $0xa0] sm:$0xf] %vm1630_vm4, %v1911_v23  ;;  %v1351_v33 = vmax.f32 %v1287_v25, 0.0  ;;  %v1217_v36 = vmul.f32 %v2487_v34, %v1146_v27  ;;  %v768_v40 = vpop.f32.mrf.mxu0  ;;  %v896_v41 = vpop.f32.mrf.mxu1  ;;  %v135_v23 = vld [vmem:[#allocation2 + $0x180] sm:$0xff] }
 0x11e   :  { %1049 = vst.msk [vmem:[#allocation2 + $0x60] sm:$0xff] %vm22_vm3, %v984_v28  ;;  %1081 = vst.msk [vmem:[#allocation2 + $0x160] sm:$0xff] %vm22_vm3, %v1016_v29  ;;  %v1880_v42 = vpack.c.bf16 %v1319_v32, %v1319_v32  ;;  %v1256_v44 = vadd.f32 %v2492_v37, %v1185_v35  ;;  %v985_v46 = vadd.f32 %v768_v40, %v100_v38  ;;  %v104_v35 = vld [vmem:[#allocation2 + $0x88] sm:$0xff] }
 0x11f   :  { %v1912_v43 = vpack.c.bf16 %v1351_v33, %v1351_v33  ;;  %v1288_v45 = vadd.f32 %v2492_v37, %v1217_v36  ;;  %v1017_v47 = vadd.f32 %v896_v41, %v132_v39  ;;  %v770_v48 = vpop.f32.mrf.mxu0  ;;  %v898_v49 = vpop.f32.mrf.mxu1  ;;  %v1115_v54 = vld [vmem:[#allocation2 + $0x58] sm:$0xff] }
 0x120   :  { %1640 = vst.msk [vmem:[%s2952_s4 + $0x24] sm:$0xf] %vm1630_vm4, %v1880_v42  ;;  %v1320_v52 = vmax.f32 %v1256_v44, 0.0  ;;  %v1147_v55 = vld [vmem:[#allocation2 + $0x158] sm:$0xff]  ;;  %v1186_v56 = vmul.f32 %v2487_v34, %v1115_v54 }
 0x121   :  { %1672 = vst.msk [vmem:[%s2952_s4 + $0xa4] sm:$0xf] %vm1630_vm4, %v1912_v43  ;;  %v1352_v53 = vmax.f32 %v1288_v45, 0.0  ;;  %v1218_v57 = vmul.f32 %v2487_v34, %v1147_v55  ;;  %v773_v58 = vpop.f32.mrf.mxu0  ;;  %v901_v59 = vpop.f32.mrf.mxu1  ;;  %v136_v45 = vld [vmem:[#allocation2 + $0x188] sm:$0xff] }
 0x122   :  { %1050 = vst.msk [vmem:[#allocation2 + $0x68] sm:$0xff] %vm22_vm3, %v985_v46  ;;  %1082 = vst.msk [vmem:[#allocation2 + $0x168] sm:$0xff] %vm22_vm3, %v1017_v47  ;;  %v1881_v60 = vpack.c.bf16 %v1320_v52, %v1320_v52  ;;  %v986_v62 = vadd.f32 %v773_v58, %v101_v50  ;;  %v1018_v63 = vadd.f32 %v901_v59, %v133_v51 }
 0x123   :  { %v1913_v61 = vpack.c.bf16 %v1352_v53, %v1352_v53  ;;  %v1257_v0 = vadd.f32 %v2492_v37, %v1186_v56  ;;  %v1289_v1 = vadd.f32 %v2492_v37, %v1218_v57  ;;  %v775_v2 = vpop.f32.mrf.mxu0  ;;  %v903_v3 = vpop.f32.mrf.mxu1 }
 0x124   :  { %1641 = vst.msk [vmem:[%s2952_s4 + $0x28] sm:$0xf] %vm1630_vm4, %v1881_v60  ;;  %v105_v2 = vld [vmem:[#allocation2 + $0x90] sm:$0xff] }
 0x125   :  { %1673 = vst.msk [vmem:[%s2952_s4 + $0xa8] sm:$0xf] %vm1630_vm4, %v1913_v61  ;;  %v1116_v6 = vld [vmem:[#allocation2 + $0x60] sm:$0xff]  ;;  %v1321_v8 = vmax.f32 %v1257_v0, 0.0  ;;  %v1353_v9 = vmax.f32 %v1289_v1, 0.0  ;;  %v776_v12 = vpop.f32.mrf.mxu0  ;;  %v904_v13 = vpop.f32.mrf.mxu1  ;;  %v137_v3 = vld [vmem:[#allocation2 + $0x190] sm:$0xff] }
 0x126   :  { %v1148_v7 = vld [vmem:[#allocation2 + $0x160] sm:$0xff]  ;;  %1051 = vst.msk [vmem:[#allocation2 + $0x70] sm:$0xff] %vm22_vm3, %v986_v62  ;;  %1083 = vst.msk [vmem:[#allocation2 + $0x170] sm:$0xff] %vm22_vm3, %v1018_v63  ;;  %v1187_v10 = vmul.f32 %v2487_v34, %v1116_v6  ;;  %v987_v14 = vadd.f32 %v776_v12, %v102_v4  ;;  %v1019_v15 = vadd.f32 %v904_v13, %v134_v5 }
 0x127   :  { %v1219_v11 = vmul.f32 %v2487_v34, %v1148_v7  ;;  %v1882_v16 = vpack.c.bf16 %v1321_v8, %v1321_v8  ;;  %v1914_v17 = vpack.c.bf16 %v1353_v9, %v1353_v9  ;;  %v778_v20 = vpop.f32.mrf.mxu0  ;;  %v906_v21 = vpop.f32.mrf.mxu1 }
 0x128   :  { %v1258_v18 = vadd.f32 %v2492_v37, %v1187_v10  ;;  %1052 = vst.msk [vmem:[#allocation2 + $0x78] sm:$0xff] %vm22_vm3, %v987_v14  ;;  %1084 = vst.msk [vmem:[#allocation2 + $0x178] sm:$0xff] %vm22_vm3, %v1019_v15  ;;  %v106_v20 = vld [vmem:[#allocation2 + $0x98] sm:$0xff] }
 0x129   :  { %v1290_v19 = vadd.f32 %v2492_v37, %v1219_v11  ;;  %v1117_v24 = vld [vmem:[#allocation2 + $0x68] sm:$0xff]  ;;  %1642 = vst.msk [vmem:[%s2952_s4 + $0x2c] sm:$0xf] %vm1630_vm4, %v1882_v16  ;;  %1674 = vst.msk [vmem:[%s2952_s4 + $0xac] sm:$0xf] %vm1630_vm4, %v1914_v17  ;;  %v781_v30 = vpop.f32.mrf.mxu0  ;;  %v909_v31 = vpop.f32.mrf.mxu1  ;;  %v138_v21 = vld [vmem:[#allocation2 + $0x198] sm:$0xff] }
 0x12a   :  { %v1149_v25 = vld [vmem:[#allocation2 + $0x168] sm:$0xff]  ;;  %v1322_v26 = vmax.f32 %v1258_v18, 0.0  ;;  %v1188_v28 = vmul.f32 %v2487_v34, %v1117_v24  ;;  %v988_v32 = vadd.f32 %v781_v30, %v103_v22  ;;  %v1020_v33 = vadd.f32 %v909_v31, %v135_v23 }
 0x12b   :  { %v1354_v27 = vmax.f32 %v1290_v19, 0.0  ;;  %v1220_v29 = vmul.f32 %v2487_v34, %v1149_v25  ;;  %v783_v43 = vpop.f32.mrf.mxu0  ;;  %v911_v44 = vpop.f32.mrf.mxu1 }
 0x12c   :  { %v1883_v36 = vpack.c.bf16 %v1322_v26, %v1322_v26  ;;  %v1259_v39 = vadd.f32 %v2492_v37, %v1188_v28  ;;  %1053 = vst.msk [vmem:[#allocation2 + $0x80] sm:$0xff] %vm22_vm3, %v988_v32  ;;  %1085 = vst.msk [vmem:[#allocation2 + $0x180] sm:$0xff] %vm22_vm3, %v1020_v33 }
 0x12d   :  { %v1915_v38 = vpack.c.bf16 %v1354_v27, %v1354_v27  ;;  %v1291_v40 = vadd.f32 %v2492_v37, %v1220_v29  ;;  %v1118_v41 = vld [vmem:[#allocation2 + $0x70] sm:$0xff]  ;;  %v784_v50 = vpop.f32.mrf.mxu0  ;;  %v912_v51 = vpop.f32.mrf.mxu1 }
 0x12e   :  { %v1150_v42 = vld [vmem:[#allocation2 + $0x170] sm:$0xff]  ;;  %v1189_v46 = vmul.f32 %v2487_v34, %v1118_v41  ;;  %1643 = vst.msk [vmem:[%s2952_s4 + $0x30] sm:$0xf] %vm1630_vm4, %v1883_v36  ;;  %v1323_v48 = vmax.f32 %v1259_v39, 0.0  ;;  %v989_v54 = vadd.f32 %v784_v50, %v104_v35  ;;  %v1021_v55 = vadd.f32 %v912_v51, %v136_v45  ;;  %v139_v41 = vld [vmem:[#allocation2 + $0x1a0] sm:$0xff] }
 0x12f   :  { %v1221_v47 = vmul.f32 %v2487_v34, %v1150_v42  ;;  %1675 = vst.msk [vmem:[%s2952_s4 + $0xb0] sm:$0xf] %vm1630_vm4, %v1915_v38  ;;  %v1355_v49 = vmax.f32 %v1291_v40, 0.0  ;;  %v1119_v58 = vld [vmem:[#allocation2 + $0x78] sm:$0xff]  ;;  %v786_v60 = vpop.f32.mrf.mxu0  ;;  %v914_v61 = vpop.f32.mrf.mxu1  ;;  %v107_v40 = vld [vmem:[#allocation2 + $0xa0] sm:$0xff] }
 0x130   :  { %v1260_v52 = vadd.f32 %v2492_v37, %v1189_v46  ;;  %v1884_v56 = vpack.c.bf16 %v1323_v48, %v1323_v48  ;;  %v1151_v59 = vld [vmem:[#allocation2 + $0x178] sm:$0xff]  ;;  %v1190_v0 = vmul.f32 %v2487_v34, %v1119_v58  ;;  %1054 = vst.msk [vmem:[#allocation2 + $0x88] sm:$0xff] %vm22_vm3, %v989_v54  ;;  %1086 = vst.msk [vmem:[#allocation2 + $0x188] sm:$0xff] %vm22_vm3, %v1021_v55 }
 0x131   :  { %v1292_v53 = vadd.f32 %v2492_v37, %v1221_v47  ;;  %v1916_v57 = vpack.c.bf16 %v1355_v49, %v1355_v49  ;;  %v1222_v1 = vmul.f32 %v2487_v34, %v1151_v59  ;;  %v789_v4 = vpop.f32.mrf.mxu0  ;;  %v917_v5 = vpop.f32.mrf.mxu1 }
 0x132   :  { %v1324_v62 = vmax.f32 %v1260_v52, 0.0  ;;  %1644 = vst.msk [vmem:[%s2952_s4 + $0x34] sm:$0xf] %vm1630_vm4, %v1884_v56  ;;  %v1261_v8 = vadd.f32 %v2492_v37, %v1190_v0  ;;  %v990_v12 = vadd.f32 %v789_v4, %v105_v2  ;;  %v1022_v13 = vadd.f32 %v917_v5, %v137_v3  ;;  %v108_v52 = vld [vmem:[#allocation2 + $0xa8] sm:$0xff] }
 0x133   :  { %v1356_v63 = vmax.f32 %v1292_v53, 0.0  ;;  %1676 = vst.msk [vmem:[%s2952_s4 + $0xb4] sm:$0xf] %vm1630_vm4, %v1916_v57  ;;  %v1293_v9 = vadd.f32 %v2492_v37, %v1222_v1  ;;  %v1120_v10 = vld [vmem:[#allocation2 + $0x80] sm:$0xff]  ;;  %v791_v14 = vpop.f32.mrf.mxu0  ;;  %v919_v15 = vpop.f32.mrf.mxu1  ;;  %v140_v53 = vld [vmem:[#allocation2 + $0x1a8] sm:$0xff] }
 0x134   :  { %v1885_v6 = vpack.c.bf16 %v1324_v62, %v1324_v62  ;;  %v1152_v11 = vld [vmem:[#allocation2 + $0x180] sm:$0xff]  ;;  %v1325_v16 = vmax.f32 %v1261_v8, 0.0  ;;  %v1191_v18 = vmul.f32 %v2487_v34, %v1120_v10  ;;  %1055 = vst.msk [vmem:[#allocation2 + $0x90] sm:$0xff] %vm22_vm3, %v990_v12  ;;  %1087 = vst.msk [vmem:[#allocation2 + $0x190] sm:$0xff] %vm22_vm3, %v1022_v13 }
 0x135   :  { %v1917_v7 = vpack.c.bf16 %v1356_v63, %v1356_v63  ;;  %v1357_v17 = vmax.f32 %v1293_v9, 0.0  ;;  %v1223_v19 = vmul.f32 %v2487_v34, %v1152_v11  ;;  %v792_v22 = vpop.f32.mrf.mxu0  ;;  %v920_v23 = vpop.f32.mrf.mxu1 }
 0x136   :  { %1645 = vst.msk [vmem:[%s2952_s4 + $0x38] sm:$0xf] %vm1630_vm4, %v1885_v6  ;;  %v1886_v24 = vpack.c.bf16 %v1325_v16, %v1325_v16  ;;  %v1262_v26 = vadd.f32 %v2492_v37, %v1191_v18  ;;  %v991_v30 = vadd.f32 %v792_v22, %v106_v20  ;;  %v1023_v31 = vadd.f32 %v920_v23, %v138_v21  ;;  %v109_v6 = vld [vmem:[#allocation2 + $0xb0] sm:$0xff] }
 0x137   :  { %1677 = vst.msk [vmem:[%s2952_s4 + $0xb8] sm:$0xf] %vm1630_vm4, %v1917_v7  ;;  %v1918_v25 = vpack.c.bf16 %v1357_v17, %v1357_v17  ;;  %v1294_v27 = vadd.f32 %v2492_v37, %v1223_v19  ;;  %v1121_v28 = vld [vmem:[#allocation2 + $0x88] sm:$0xff]  ;;  %v794_v32 = vpop.f32.mrf.mxu0  ;;  %v922_v33 = vpop.f32.mrf.mxu1  ;;  %v141_v7 = vld [vmem:[#allocation2 + $0x1b0] sm:$0xff] }
 0x138   :  { %v1153_v29 = vld [vmem:[#allocation2 + $0x188] sm:$0xff]  ;;  %1646 = vst.msk [vmem:[%s2952_s4 + $0x3c] sm:$0xf] %vm1630_vm4, %v1886_v24  ;;  %v1326_v35 = vmax.f32 %v1262_v26, 0.0  ;;  %v1192_v38 = vmul.f32 %v2487_v34, %v1121_v28  ;;  %v110_v24 = vld [vmem:[#allocation2 + $0xb8] sm:$0xff] }
 0x139   :  { %1678 = vst.msk [vmem:[%s2952_s4 + $0xbc] sm:$0xf] %vm1630_vm4, %v1918_v25  ;;  %v1358_v36 = vmax.f32 %v1294_v27, 0.0  ;;  %v1224_v39 = vmul.f32 %v2487_v34, %v1153_v29  ;;  %v797_v42 = vpop.f32.mrf.mxu0  ;;  %v925_v43 = vpop.f32.mrf.mxu1  ;;  %v142_v25 = vld [vmem:[#allocation2 + $0x1b8] sm:$0xff] }
 0x13a   :  { %1056 = vst.msk [vmem:[#allocation2 + $0x98] sm:$0xff] %vm22_vm3, %v991_v30  ;;  %1088 = vst.msk [vmem:[#allocation2 + $0x198] sm:$0xff] %vm22_vm3, %v1023_v31  ;;  %v1887_v44 = vpack.c.bf16 %v1326_v35, %v1326_v35  ;;  %v1263_v46 = vadd.f32 %v2492_v37, %v1192_v38  ;;  %v992_v48 = vadd.f32 %v797_v42, %v107_v40  ;;  %v111_v38 = vld [vmem:[#allocation2 + $0xc0] sm:$0xff] }
 0x13b   :  { %v1919_v45 = vpack.c.bf16 %v1358_v36, %v1358_v36  ;;  %v1295_v47 = vadd.f32 %v2492_v37, %v1224_v39  ;;  %v1024_v49 = vadd.f32 %v925_v43, %v139_v41  ;;  %v799_v50 = vpop.f32.mrf.mxu0  ;;  %v927_v51 = vpop.f32.mrf.mxu1  ;;  %v1122_v56 = vld [vmem:[#allocation2 + $0x90] sm:$0xff] }
 0x13c   :  { %1647 = vst.msk [vmem:[%s2952_s4 + $0x40] sm:$0xf] %vm1630_vm4, %v1887_v44  ;;  %v1327_v54 = vmax.f32 %v1263_v46, 0.0  ;;  %v1154_v57 = vld [vmem:[#allocation2 + $0x190] sm:$0xff]  ;;  %v1193_v58 = vmul.f32 %v2487_v34, %v1122_v56 }
 0x13d   :  { %1679 = vst.msk [vmem:[%s2952_s4 + $0xc0] sm:$0xf] %vm1630_vm4, %v1919_v45  ;;  %v1359_v55 = vmax.f32 %v1295_v47, 0.0  ;;  %v1225_v59 = vmul.f32 %v2487_v34, %v1154_v57  ;;  %v800_v60 = vpop.f32.mrf.mxu0  ;;  %v928_v61 = vpop.f32.mrf.mxu1  ;;  %v143_v47 = vld [vmem:[#allocation2 + $0x1c0] sm:$0xff] }
 0x13e   :  { %1057 = vst.msk [vmem:[#allocation2 + $0xa0] sm:$0xff] %vm22_vm3, %v992_v48  ;;  %1089 = vst.msk [vmem:[#allocation2 + $0x1a0] sm:$0xff] %vm22_vm3, %v1024_v49  ;;  %v1888_v62 = vpack.c.bf16 %v1327_v54, %v1327_v54  ;;  %v993_v0 = vadd.f32 %v800_v60, %v108_v52  ;;  %v1025_v1 = vadd.f32 %v928_v61, %v140_v53 }
 0x13f   :  { %v1920_v63 = vpack.c.bf16 %v1359_v55, %v1359_v55  ;;  %v1264_v2 = vadd.f32 %v2492_v37, %v1193_v58  ;;  %v1296_v3 = vadd.f32 %v2492_v37, %v1225_v59  ;;  %v802_v4 = vpop.f32.mrf.mxu0  ;;  %v930_v5 = vpop.f32.mrf.mxu1 }
 0x140   :  { %1648 = vst.msk [vmem:[%s2952_s4 + $0x44] sm:$0xf] %vm1630_vm4, %v1888_v62  ;;  %v112_v4 = vld [vmem:[#allocation2 + $0xc8] sm:$0xff] }
 0x141   :  { %1680 = vst.msk [vmem:[%s2952_s4 + $0xc4] sm:$0xf] %vm1630_vm4, %v1920_v63  ;;  %v1123_v8 = vld [vmem:[#allocation2 + $0x98] sm:$0xff]  ;;  %v1328_v10 = vmax.f32 %v1264_v2, 0.0  ;;  %v1360_v11 = vmax.f32 %v1296_v3, 0.0  ;;  %v805_v14 = vpop.f32.mrf.mxu0  ;;  %v933_v15 = vpop.f32.mrf.mxu1  ;;  %v144_v5 = vld [vmem:[#allocation2 + $0x1c8] sm:$0xff] }
 0x142   :  { %v1155_v9 = vld [vmem:[#allocation2 + $0x198] sm:$0xff]  ;;  %1058 = vst.msk [vmem:[#allocation2 + $0xa8] sm:$0xff] %vm22_vm3, %v993_v0  ;;  %1090 = vst.msk [vmem:[#allocation2 + $0x1a8] sm:$0xff] %vm22_vm3, %v1025_v1  ;;  %v1194_v12 = vmul.f32 %v2487_v34, %v1123_v8  ;;  %v994_v16 = vadd.f32 %v805_v14, %v109_v6  ;;  %v1026_v17 = vadd.f32 %v933_v15, %v141_v7 }
 0x143   :  { %v1226_v13 = vmul.f32 %v2487_v34, %v1155_v9  ;;  %v1889_v18 = vpack.c.bf16 %v1328_v10, %v1328_v10  ;;  %v1921_v19 = vpack.c.bf16 %v1360_v11, %v1360_v11  ;;  %v807_v22 = vpop.f32.mrf.mxu0  ;;  %v935_v23 = vpop.f32.mrf.mxu1 }
 0x144   :  { %v1265_v20 = vadd.f32 %v2492_v37, %v1194_v12  ;;  %1059 = vst.msk [vmem:[#allocation2 + $0xb0] sm:$0xff] %vm22_vm3, %v994_v16  ;;  %1091 = vst.msk [vmem:[#allocation2 + $0x1b0] sm:$0xff] %vm22_vm3, %v1026_v17  ;;  %v145_v22 = vld [vmem:[#allocation2 + $0x1d0] sm:$0xff] }
 0x145   :  { %v1297_v21 = vadd.f32 %v2492_v37, %v1226_v13  ;;  %v1124_v26 = vld [vmem:[#allocation2 + $0xa0] sm:$0xff]  ;;  %1649 = vst.msk [vmem:[%s2952_s4 + $0x48] sm:$0xf] %vm1630_vm4, %v1889_v18  ;;  %1681 = vst.msk [vmem:[%s2952_s4 + $0xc8] sm:$0xf] %vm1630_vm4, %v1921_v19  ;;  %v808_v32 = vpop.f32.mrf.mxu0  ;;  %v936_v33 = vpop.f32.mrf.mxu1 }
 0x146   :  { %v1156_v27 = vld [vmem:[#allocation2 + $0x1a0] sm:$0xff]  ;;  %v1329_v28 = vmax.f32 %v1265_v20, 0.0  ;;  %v1195_v30 = vmul.f32 %v2487_v34, %v1124_v26  ;;  %v995_v35 = vadd.f32 %v808_v32, %v110_v24  ;;  %v1027_v36 = vadd.f32 %v936_v33, %v142_v25 }
 0x147   :  { %v1361_v29 = vmax.f32 %v1297_v21, 0.0  ;;  %v1227_v31 = vmul.f32 %v2487_v34, %v1156_v27  ;;  %v810_v45 = vpop.f32.mrf.mxu0  ;;  %v938_v46 = vpop.f32.mrf.mxu1  ;;  %v113_v21 = vld [vmem:[#allocation2 + $0xd0] sm:$0xff]  ;;  %v2820_v27 = vld [vmem:[%s2951_s3] ss:$0 sm:$0xff] }
 0x148   :  { %v1890_v39 = vpack.c.bf16 %v1329_v28, %v1329_v28  ;;  %v1266_v41 = vadd.f32 %v2492_v37, %v1195_v30  ;;  %1060 = vst.msk [vmem:[#allocation2 + $0xb8] sm:$0xff] %vm22_vm3, %v995_v35  ;;  %1092 = vst.msk [vmem:[#allocation2 + $0x1b8] sm:$0xff] %vm22_vm3, %v1027_v36 }
 0x149   :  { %v1922_v40 = vpack.c.bf16 %v1361_v29, %v1361_v29  ;;  %v1298_v42 = vadd.f32 %v2492_v37, %v1227_v31  ;;  %v1125_v43 = vld [vmem:[#allocation2 + $0xa8] sm:$0xff]  ;;  %v813_v52 = vpop.f32.mrf.mxu0  ;;  %v941_v53 = vpop.f32.mrf.mxu1 }
 0x14a   :  { %v1157_v44 = vld [vmem:[#allocation2 + $0x1a8] sm:$0xff]  ;;  %v1196_v48 = vmul.f32 %v2487_v34, %v1125_v43  ;;  %1650 = vst.msk [vmem:[%s2952_s4 + $0x4c] sm:$0xf] %vm1630_vm4, %v1890_v39  ;;  %v1330_v50 = vmax.f32 %v1266_v41, 0.0  ;;  %v996_v56 = vadd.f32 %v813_v52, %v111_v38  ;;  %v1028_v57 = vadd.f32 %v941_v53, %v143_v47  ;;  %v146_v43 = vld [vmem:[#allocation2 + $0x1d8] sm:$0xff] }
 0x14b   :  { %v1228_v49 = vmul.f32 %v2487_v34, %v1157_v44  ;;  %1682 = vst.msk [vmem:[%s2952_s4 + $0xcc] sm:$0xf] %vm1630_vm4, %v1922_v40  ;;  %v1362_v51 = vmax.f32 %v1298_v42, 0.0  ;;  %v1126_v60 = vld [vmem:[#allocation2 + $0xb0] sm:$0xff]  ;;  %v815_v62 = vpop.f32.mrf.mxu0  ;;  %v943_v63 = vpop.f32.mrf.mxu1  ;;  %v114_v42 = vld [vmem:[#allocation2 + $0xd8] sm:$0xff] }
 0x14c   :  { %v1267_v54 = vadd.f32 %v2492_v37, %v1196_v48  ;;  %v1891_v58 = vpack.c.bf16 %v1330_v50, %v1330_v50  ;;  %v1158_v61 = vld [vmem:[#allocation2 + $0x1b0] sm:$0xff]  ;;  %v1197_v2 = vmul.f32 %v2487_v34, %v1126_v60  ;;  %1061 = vst.msk [vmem:[#allocation2 + $0xc0] sm:$0xff] %vm22_vm3, %v996_v56  ;;  %1093 = vst.msk [vmem:[#allocation2 + $0x1c0] sm:$0xff] %vm22_vm3, %v1028_v57 }
 0x14d   :  { %v1299_v55 = vadd.f32 %v2492_v37, %v1228_v49  ;;  %v1923_v59 = vpack.c.bf16 %v1362_v51, %v1362_v51  ;;  %v1229_v3 = vmul.f32 %v2487_v34, %v1158_v61  ;;  %v816_v6 = vpop.f32.mrf.mxu0  ;;  %v944_v7 = vpop.f32.mrf.mxu1 }
 0x14e   :  { %v1331_v0 = vmax.f32 %v1267_v54, 0.0  ;;  %1651 = vst.msk [vmem:[%s2952_s4 + $0x50] sm:$0xf] %vm1630_vm4, %v1891_v58  ;;  %v1268_v9 = vadd.f32 %v2492_v37, %v1197_v2  ;;  %v997_v13 = vadd.f32 %v816_v6, %v112_v4  ;;  %v1029_v14 = vadd.f32 %v944_v7, %v144_v5  ;;  %v115_v54 = vld [vmem:[#allocation2 + $0xe0] sm:$0xff] }
 0x14f   :  { %v1363_v1 = vmax.f32 %v1299_v55, 0.0  ;;  %1683 = vst.msk [vmem:[%s2952_s4 + $0xd0] sm:$0xf] %vm1630_vm4, %v1923_v59  ;;  %v1300_v10 = vadd.f32 %v2492_v37, %v1229_v3  ;;  %v1127_v11 = vld [vmem:[#allocation2 + $0xb8] sm:$0xff]  ;;  %v818_v15 = vpop.f32.mrf.mxu0  ;;  %v946_v16 = vpop.f32.mrf.mxu1  ;;  %v2811_v37 = vld [vmem:[%s2950_s2] ss:$0 sm:$0xff] }
 0x150   :  { %v1892_v8 = vpack.c.bf16 %v1331_v0, %v1331_v0  ;;  %v1159_v12 = vld [vmem:[#allocation2 + $0x1b8] sm:$0xff]  ;;  %v1332_v17 = vmax.f32 %v1268_v9, 0.0  ;;  %v1198_v19 = vmul.f32 %v2811_v37, %v1127_v11  ;;  %1062 = vst.msk [vmem:[#allocation2 + $0xc8] sm:$0xff] %vm22_vm3, %v997_v13  ;;  %1094 = vst.msk [vmem:[#allocation2 + $0x1c8] sm:$0xff] %vm22_vm3, %v1029_v14  ;;  %v147_v55 = vld [vmem:[#allocation2 + $0x1e0] sm:$0xff] }
 0x151   :  { %v1924_v34 = vpack.c.bf16 %v1363_v1, %v1363_v1  ;;  %v1364_v18 = vmax.f32 %v1300_v10, 0.0  ;;  %v1230_v20 = vmul.f32 %v2811_v37, %v1159_v12  ;;  %v821_v23 = vpop.f32.mrf.mxu0  ;;  %v949_v24 = vpop.f32.mrf.mxu1 }
 0x152   :  { %1652 = vst.msk [vmem:[%s2952_s4 + $0x54] sm:$0xf] %vm1630_vm4, %v1892_v8  ;;  %v1893_v25 = vpack.c.bf16 %v1332_v17, %v1332_v17  ;;  %v1269_v28 = vadd.f32 %v2820_v27, %v1198_v19  ;;  %v998_v32 = vadd.f32 %v821_v23, %v113_v21  ;;  %v1030_v33 = vadd.f32 %v949_v24, %v145_v22  ;;  %v116_v8 = vld [vmem:[#allocation2 + $0xe8] sm:$0xff] }
 0x153   :  { %1684 = vst.msk [vmem:[%s2952_s4 + $0xd4] sm:$0xf] %vm1630_vm4, %v1924_v34  ;;  %v1925_v26 = vpack.c.bf16 %v1364_v18, %v1364_v18  ;;  %v1301_v29 = vadd.f32 %v2820_v27, %v1230_v20  ;;  %v1128_v30 = vld [vmem:[#allocation2 + $0xc0] sm:$0xff]  ;;  %v823_v35 = vpop.f32.mrf.mxu0  ;;  %v951_v36 = vpop.f32.mrf.mxu1  ;;  %v148_v34 = vld [vmem:[#allocation2 + $0x1e8] sm:$0xff] }
 0x154   :  { %v1160_v31 = vld [vmem:[#allocation2 + $0x1c0] sm:$0xff]  ;;  %1653 = vst.msk [vmem:[%s2952_s4 + $0x58] sm:$0xf] %vm1630_vm4, %v1893_v25  ;;  %v1333_v38 = vmax.f32 %v1269_v28, 0.0  ;;  %v1199_v40 = vmul.f32 %v2811_v37, %v1128_v30  ;;  %v117_v25 = vld [vmem:[#allocation2 + $0xf0] sm:$0xff] }
 0x155   :  { %1685 = vst.msk [vmem:[%s2952_s4 + $0xd8] sm:$0xf] %vm1630_vm4, %v1925_v26  ;;  %v1365_v39 = vmax.f32 %v1301_v29, 0.0  ;;  %v1231_v41 = vmul.f32 %v2811_v37, %v1160_v31  ;;  %v824_v44 = vpop.f32.mrf.mxu0  ;;  %v952_v45 = vpop.f32.mrf.mxu1  ;;  %v149_v26 = vld [vmem:[#allocation2 + $0x1f0] sm:$0xff] }
 0x156   :  { %1063 = vst.msk [vmem:[#allocation2 + $0xd0] sm:$0xff] %vm22_vm3, %v998_v32  ;;  %1095 = vst.msk [vmem:[#allocation2 + $0x1d0] sm:$0xff] %vm22_vm3, %v1030_v33  ;;  %v1894_v46 = vpack.c.bf16 %v1333_v38, %v1333_v38  ;;  %v1270_v48 = vadd.f32 %v2820_v27, %v1199_v40  ;;  %v999_v50 = vadd.f32 %v824_v44, %v114_v42  ;;  %v118_v40 = vld [vmem:[#allocation2 + $0xf8] sm:$0xff] }
 0x157   :  { %v1926_v47 = vpack.c.bf16 %v1365_v39, %v1365_v39  ;;  %v1302_v49 = vadd.f32 %v2820_v27, %v1231_v41  ;;  %v1031_v51 = vadd.f32 %v952_v45, %v146_v43  ;;  %v826_v52 = vpop.f32.mrf.mxu0  ;;  %v954_v53 = vpop.f32.mrf.mxu1  ;;  %v1129_v58 = vld [vmem:[#allocation2 + $0xc8] sm:$0xff] }
 0x158   :  { %1654 = vst.msk [vmem:[%s2952_s4 + $0x5c] sm:$0xf] %vm1630_vm4, %v1894_v46  ;;  %v1334_v56 = vmax.f32 %v1270_v48, 0.0  ;;  %v1161_v59 = vld [vmem:[#allocation2 + $0x1c8] sm:$0xff]  ;;  %v1200_v60 = vmul.f32 %v2811_v37, %v1129_v58 }
 0x159   :  { %1686 = vst.msk [vmem:[%s2952_s4 + $0xdc] sm:$0xf] %vm1630_vm4, %v1926_v47  ;;  %v1366_v57 = vmax.f32 %v1302_v49, 0.0  ;;  %v1232_v61 = vmul.f32 %v2811_v37, %v1161_v59  ;;  %v829_v62 = vpop.f32.mrf.mxu0  ;;  %v957_v63 = vpop.f32.mrf.mxu1  ;;  %v150_v49 = vld [vmem:[#allocation2 + $0x1f8] sm:$0xff] }
 0x15a   :  { %1064 = vst.msk [vmem:[#allocation2 + $0xd8] sm:$0xff] %vm22_vm3, %v999_v50  ;;  %1096 = vst.msk [vmem:[#allocation2 + $0x1d8] sm:$0xff] %vm22_vm3, %v1031_v51  ;;  %v1895_v0 = vpack.c.bf16 %v1334_v56, %v1334_v56  ;;  %v1000_v2 = vadd.f32 %v829_v62, %v115_v54  ;;  %v1032_v3 = vadd.f32 %v957_v63, %v147_v55 }
 0x15b   :  { %v1927_v1 = vpack.c.bf16 %v1366_v57, %v1366_v57  ;;  %v1271_v4 = vadd.f32 %v2820_v27, %v1200_v60  ;;  %v1303_v5 = vadd.f32 %v2820_v27, %v1232_v61  ;;  %v831_v6 = vpop.f32.mrf.mxu0  ;;  %v959_v7 = vpop.f32.mrf.mxu1 }
 0x15c   :  { %1655 = vst.msk [vmem:[%s2952_s4 + $0x60] sm:$0xf] %vm1630_vm4, %v1895_v0 }
 0x15d   :  { %1687 = vst.msk [vmem:[%s2952_s4 + $0xe0] sm:$0xf] %vm1630_vm4, %v1927_v1  ;;  %v1130_v9 = vld [vmem:[#allocation2 + $0xd0] sm:$0xff]  ;;  %v1335_v11 = vmax.f32 %v1271_v4, 0.0  ;;  %v1367_v12 = vmax.f32 %v1303_v5, 0.0  ;;  %v832_v15 = vpop.f32.mrf.mxu0  ;;  %v960_v16 = vpop.f32.mrf.mxu1 }
 0x15e   :  { %v1162_v10 = vld [vmem:[#allocation2 + $0x1d0] sm:$0xff]  ;;  %1065 = vst.msk [vmem:[#allocation2 + $0xe0] sm:$0xff] %vm22_vm3, %v1000_v2  ;;  %1097 = vst.msk [vmem:[#allocation2 + $0x1e0] sm:$0xff] %vm22_vm3, %v1032_v3  ;;  %v1201_v13 = vmul.f32 %v2811_v37, %v1130_v9  ;;  %v1001_v17 = vadd.f32 %v832_v15, %v116_v8  ;;  %v1033_v18 = vadd.f32 %v960_v16, %v148_v34 }
 0x15f   :  { %v1233_v14 = vmul.f32 %v2811_v37, %v1162_v10  ;;  %v1896_v19 = vpack.c.bf16 %v1335_v11, %v1335_v11  ;;  %v1928_v20 = vpack.c.bf16 %v1367_v12, %v1367_v12  ;;  %v834_v23 = vpop.f32.mrf.mxu0  ;;  %v962_v24 = vpop.f32.mrf.mxu1 }
 0x160   :  { %v1272_v21 = vadd.f32 %v2820_v27, %v1201_v13  ;;  %1066 = vst.msk [vmem:[#allocation2 + $0xe8] sm:$0xff] %vm22_vm3, %v1001_v17  ;;  %1098 = vst.msk [vmem:[#allocation2 + $0x1e8] sm:$0xff] %vm22_vm3, %v1033_v18 }
 0x161   :  { %v1304_v22 = vadd.f32 %v2820_v27, %v1233_v14  ;;  %v1131_v28 = vld [vmem:[#allocation2 + $0xd8] sm:$0xff]  ;;  %1656 = vst.msk [vmem:[%s2952_s4 + $0x64] sm:$0xf] %vm1630_vm4, %v1896_v19  ;;  %1688 = vst.msk [vmem:[%s2952_s4 + $0xe4] sm:$0xf] %vm1630_vm4, %v1928_v20  ;;  %v837_v35 = vpop.f32.mrf.mxu0  ;;  %v965_v36 = vpop.f32.mrf.mxu1 }
 0x162   :  { %v1163_v29 = vld [vmem:[#allocation2 + $0x1d8] sm:$0xff]  ;;  %v1336_v30 = vmax.f32 %v1272_v21, 0.0  ;;  %v1202_v32 = vmul.f32 %v2811_v37, %v1131_v28  ;;  %v1002_v38 = vadd.f32 %v837_v35, %v117_v25  ;;  %v1034_v39 = vadd.f32 %v965_v36, %v149_v26 }
 0x163   :  { %v1368_v31 = vmax.f32 %v1304_v22, 0.0  ;;  %v1234_v33 = vmul.f32 %v2811_v37, %v1163_v29  ;;  %v839_v47 = vpop.f32.mrf.mxu0  ;;  %v967_v48 = vpop.f32.mrf.mxu1 }
 0x164   :  { %v1897_v41 = vpack.c.bf16 %v1336_v30, %v1336_v30  ;;  %v1273_v43 = vadd.f32 %v2820_v27, %v1202_v32  ;;  %1067 = vst.msk [vmem:[#allocation2 + $0xf0] sm:$0xff] %vm22_vm3, %v1002_v38  ;;  %1099 = vst.msk [vmem:[#allocation2 + $0x1f0] sm:$0xff] %vm22_vm3, %v1034_v39 }
 0x165   :  { %v1929_v42 = vpack.c.bf16 %v1368_v31, %v1368_v31  ;;  %v1305_v44 = vadd.f32 %v2820_v27, %v1234_v33  ;;  %v1132_v45 = vld [vmem:[#allocation2 + $0xe0] sm:$0xff]  ;;  %v840_v54 = vpop.f32.mrf.mxu0  ;;  %v968_v55 = vpop.f32.mrf.mxu1 }
 0x166   :  { %v1164_v46 = vld [vmem:[#allocation2 + $0x1e0] sm:$0xff]  ;;  %v1203_v50 = vmul.f32 %v2811_v37, %v1132_v45  ;;  %1657 = vst.msk [vmem:[%s2952_s4 + $0x68] sm:$0xf] %vm1630_vm4, %v1897_v41  ;;  %v1337_v52 = vmax.f32 %v1273_v43, 0.0  ;;  %v1003_v58 = vadd.f32 %v840_v54, %v118_v40  ;;  %v1035_v59 = vadd.f32 %v968_v55, %v150_v49 }
 0x167   :  { %v1235_v51 = vmul.f32 %v2811_v37, %v1164_v46  ;;  %1689 = vst.msk [vmem:[%s2952_s4 + $0xe8] sm:$0xf] %vm1630_vm4, %v1929_v42  ;;  %v1369_v53 = vmax.f32 %v1305_v44, 0.0  ;;  %v1133_v62 = vld [vmem:[#allocation2 + $0xe8] sm:$0xff]  ;;  %v842_v0 = vpop.f32.mrf.mxu0  ;;  %v970_v1 = vpop.f32.mrf.mxu1 }
 0x168   :  { %v1274_v56 = vadd.f32 %v2820_v27, %v1203_v50  ;;  %v1898_v60 = vpack.c.bf16 %v1337_v52, %v1337_v52  ;;  %v1165_v63 = vld [vmem:[#allocation2 + $0x1e8] sm:$0xff]  ;;  %v1204_v4 = vmul.f32 %v2811_v37, %v1133_v62  ;;  %1068 = vst.msk [vmem:[#allocation2 + $0xf8] sm:$0xff] %vm22_vm3, %v1003_v58  ;;  %1100 = vst.msk [vmem:[#allocation2 + $0x1f8] sm:$0xff] %vm22_vm3, %v1035_v59 }
 0x169   :  { %v1306_v57 = vadd.f32 %v2820_v27, %v1235_v51  ;;  %v1930_v61 = vpack.c.bf16 %v1369_v53, %v1369_v53  ;;  %v1236_v5 = vmul.f32 %v2811_v37, %v1165_v63 }
 0x16a   :  { %v1338_v2 = vmax.f32 %v1274_v56, 0.0  ;;  %1658 = vst.msk [vmem:[%s2952_s4 + $0x6c] sm:$0xf] %vm1630_vm4, %v1898_v60  ;;  %v1275_v8 = vadd.f32 %v2820_v27, %v1204_v4 }
 0x16b   :  { %v1370_v3 = vmax.f32 %v1306_v57, 0.0  ;;  %1690 = vst.msk [vmem:[%s2952_s4 + $0xec] sm:$0xf] %vm1630_vm4, %v1930_v61  ;;  %v1307_v34 = vadd.f32 %v2820_v27, %v1236_v5  ;;  %v1134_v9 = vld [vmem:[#allocation2 + $0xf0] sm:$0xff] }
 0x16c   :  { %v1899_v6 = vpack.c.bf16 %v1338_v2, %v1338_v2  ;;  %v1166_v10 = vld [vmem:[#allocation2 + $0x1f0] sm:$0xff]  ;;  %v1339_v11 = vmax.f32 %v1275_v8, 0.0  ;;  %v1205_v13 = vmul.f32 %v2811_v37, %v1134_v9 }
 0x16d   :  { %v1931_v7 = vpack.c.bf16 %v1370_v3, %v1370_v3  ;;  %v1371_v12 = vmax.f32 %v1307_v34, 0.0  ;;  %v1237_v14 = vmul.f32 %v2811_v37, %v1166_v10 }
 0x16e   :  { %1659 = vst.msk [vmem:[%s2952_s4 + $0x70] sm:$0xf] %vm1630_vm4, %v1899_v6  ;;  %v1900_v15 = vpack.c.bf16 %v1339_v11, %v1339_v11  ;;  %v1276_v17 = vadd.f32 %v2820_v27, %v1205_v13 }
 0x16f   :  { %1691 = vst.msk [vmem:[%s2952_s4 + $0xf0] sm:$0xf] %vm1630_vm4, %v1931_v7  ;;  %v1932_v16 = vpack.c.bf16 %v1371_v12, %v1371_v12  ;;  %v1308_v18 = vadd.f32 %v2820_v27, %v1237_v14  ;;  %v1135_v19 = vld [vmem:[#allocation2 + $0xf8] sm:$0xff] }
 0x170   :  { %v1167_v20 = vld [vmem:[#allocation2 + $0x1f8] sm:$0xff]  ;;  %1660 = vst.msk [vmem:[%s2952_s4 + $0x74] sm:$0xf] %vm1630_vm4, %v1900_v15  ;;  %v1340_v21 = vmax.f32 %v1276_v17, 0.0  ;;  %v1206_v23 = vmul.f32 %v2811_v37, %v1135_v19 }
 0x171   :  { %1692 = vst.msk [vmem:[%s2952_s4 + $0xf4] sm:$0xf] %vm1630_vm4, %v1932_v16  ;;  %v1372_v22 = vmax.f32 %v1308_v18, 0.0  ;;  %v1238_v24 = vmul.f32 %v2811_v37, %v1167_v20 }
 0x172   :  { %v1901_v25 = vpack.c.bf16 %v1340_v21, %v1340_v21  ;;  %v1277_v28 = vadd.f32 %v2820_v27, %v1206_v23 }
 0x173   :  { %v1933_v26 = vpack.c.bf16 %v1372_v22, %v1372_v22  ;;  %v1309_v29 = vadd.f32 %v2820_v27, %v1238_v24 }
 0x174   :  { %1661 = vst.msk [vmem:[%s2952_s4 + $0x78] sm:$0xf] %vm1630_vm4, %v1901_v25  ;;  %v1341_v30 = vmax.f32 %v1277_v28, 0.0 }
 0x175   :  { %1693 = vst.msk [vmem:[%s2952_s4 + $0xf8] sm:$0xf] %vm1630_vm4, %v1933_v26  ;;  %v1373_v31 = vmax.f32 %v1309_v29, 0.0 }
 0x176   :  { %v1902_v32 = vpack.c.bf16 %v1341_v30, %v1341_v30 }
 0x177   :  { %v1934_v37 = vpack.c.bf16 %v1373_v31, %v1373_v31 }
 0x178   :  { %1662 = vst.msk [vmem:[%s2952_s4 + $0x7c] sm:$0xf] %vm1630_vm4, %v1902_v32 }
 0x179   :  { %1694 = vst.msk [vmem:[%s2952_s4 + $0xfc] sm:$0xf] %vm1630_vm4, %v1934_v37 }

// kernel: _forward.27
= control target key start
LH: loop header
LB: loop body
LE: loop exit
PB: predicated region body
PF: predicated region fallthrough
CT: control target
= control target key end

     0   :  { %vm22_vm0 = vcmask 523264   ;;  %vm1084_vm1 = vcmask 519168   ;;  %s1939_s1 = inlined_call_operand.vmem [shape: bf16[576,64], index: 1, kind: input, shape index: {}]   ;;  %s1940_s0 = inlined_call_operand.vmem [shape: bf16[128,576], index: 0, kind: input, shape index: {}]   ;;  %s1941_s2 = inlined_call_operand.vmem [shape: f32[1,64], index: 2, kind: input, shape index: {}]   ;;  %s1942_s3 = inlined_call_operand.vmem [shape: f32[1,64], index: 3, kind: input, shape index: {}]   ;;  %s1943_s4 = inlined_call_operand.vmem [shape: bf16[128,64], index: 4, kind: output, shape index: {}]  }
   0x1   :  { %v1396_v0 = vld [vmem:[%s1939_s1 + $0x78] sm:$0xff]   ;;  %v1400_v4 = vld [vmem:[%s1939_s1 + $0x70] sm:$0xff]   ;;  %v1404_v8 = vld [vmem:[%s1939_s1 + $0x68] sm:$0xff]  }
   0x2   :  { %v1397_v1 = vld [vmem:[%s1939_s1 + $0xf8] sm:$0xff]   ;;  %1223 = vmatprep.subr.bf16.mxu0 %v1396_v0  ;;  %v1401_v5 = vld [vmem:[%s1939_s1 + $0xf0] sm:$0xff]   ;;  %v1405_v9 = vld [vmem:[%s1939_s1 + $0xe8] sm:$0xff]  }
   0x3   :  { %v1398_v2 = vld [vmem:[%s1939_s1 + $0x38] sm:$0xff]   ;;  %1287 = vmatprep.subr.bf16.mxu1 %v1397_v1  ;;  %v1402_v6 = vld [vmem:[%s1939_s1 + $0x30] sm:$0xff]   ;;  %v1406_v10 = vld [vmem:[%s1939_s1 + $0x28] sm:$0xff]  }
   0x4   :  { %v1399_v3 = vld [vmem:[%s1939_s1 + $0xb8] sm:$0xff]   ;;  %1224 = vmatpush3.bf16.msra.mxu0 %v1398_v2  ;;  %v1403_v7 = vld [vmem:[%s1939_s1 + $0xb0] sm:$0xff]   ;;  %v1407_v11 = vld [vmem:[%s1939_s1 + $0xa8] sm:$0xff]  }
   0x5   :  { %1288 = vmatpush3.bf16.msra.mxu1 %v1399_v3  ;;  %1225 = vmatprep.subr.bf16.mxu0 %v1400_v4  ;;  %v1408_v12 = vld [vmem:[%s1939_s1 + $0x60] sm:$0xff]   ;;  %v1412_v16 = vld [vmem:[%s1939_s1 + $0x58] sm:$0xff]   ;;  %v1416_v20 = vld [vmem:[%s1939_s1 + $0x50] sm:$0xff]  }
   0x6   :  { %1289 = vmatprep.subr.bf16.mxu1 %v1401_v5  ;;  %v1409_v13 = vld [vmem:[%s1939_s1 + $0xe0] sm:$0xff]   ;;  %v1413_v17 = vld [vmem:[%s1939_s1 + $0xd8] sm:$0xff]   ;;  %v1417_v21 = vld [vmem:[%s1939_s1 + $0xd0] sm:$0xff]  }
   0x7   :  { %v1410_v14 = vld [vmem:[%s1939_s1 + $0x20] sm:$0xff]   ;;  %v1414_v18 = vld [vmem:[%s1939_s1 + $0x18] sm:$0xff]   ;;  %v1418_v22 = vld [vmem:[%s1939_s1 + $0x10] sm:$0xff]  }
   0x8   :  { %1226 = vmatpush3.bf16.msra.mxu0 %v1402_v6  ;;  %v1411_v15 = vld [vmem:[%s1939_s1 + $0xa0] sm:$0xff]   ;;  %v1415_v19 = vld [vmem:[%s1939_s1 + $0x98] sm:$0xff]   ;;  %v1419_v23 = vld [vmem:[%s1939_s1 + $0x90] sm:$0xff]  }
   0x9   :  { %1290 = vmatpush3.bf16.msra.mxu1 %v1403_v7  ;;  %1227 = vmatprep.subr.bf16.mxu0 %v1404_v8  ;;  %v1420_v24 = vld [vmem:[%s1939_s1 + $0x48] sm:$0xff]   ;;  %v1424_v28 = vld [vmem:[%s1939_s1 + $0x40] sm:$0xff]   ;;  %v1434_v36 = vld [vmem:[%s1939_s1 + $0x118] sm:$0xff]  }
   0xa   :  { %1291 = vmatprep.subr.bf16.mxu1 %v1405_v9  ;;  %v1421_v25 = vld [vmem:[%s1939_s1 + $0xc8] sm:$0xff]   ;;  %v1425_v29 = vld [vmem:[%s1939_s1 + $0xc0] sm:$0xff]   ;;  %v1447_v42 = vld [vmem:[%s1939_s1 + $0x110] sm:$0xff]  }
   0xb   :  { %v1422_v26 = vld [vmem:[%s1939_s1 + $0x8] sm:$0xff]   ;;  %v1426_v30 = vld [vmem:[%s1939_s1] sm:$0xff]   ;;  %v1443_v43 = vld [vmem:[%s1940_s0 + $0x5c] ss:$20 sps:$4 sm:$0xff]  }
   0xc   :  { %1228 = vmatpush3.bf16.msra.mxu0 %v1406_v10  ;;  %v1423_v27 = vld [vmem:[%s1939_s1 + $0x88] sm:$0xff]   ;;  %v1427_v31 = vld [vmem:[%s1939_s1 + $0x80] sm:$0xff]   ;;  %v1448_v47 = vld [vmem:[%s1940_s0 + $0x7c] ss:$20 sps:$4 sm:$0xff]  }
   0xd   :  { %1292 = vmatpush3.bf16.msra.mxu1 %v1407_v11  ;;  %1229 = vmatprep.subr.bf16.mxu0 %v1408_v12  ;;  %v1428_v32 = vld [vmem:[%s1940_s0] ss:$20 sps:$4 sm:$0xff]   ;;  %v1430_v33 = vld [vmem:[%s1940_s0 + $0x4] ss:$20 sps:$4 sm:$0xff]   ;;  %v1431_v34 = vld [vmem:[%s1940_s0 + $0x8] ss:$20 sps:$4 sm:$0xff]  }
   0xe   :  { %1293 = vmatprep.subr.bf16.mxu1 %v1409_v13  ;;  %v1433_v35 = vld [vmem:[%s1940_s0 + $0xc] ss:$20 sps:$4 sm:$0xff]   ;;  %648 = vmatprep.mubr.bf16.mxu0 %v1430_v33  ;;  %v1437_v38 = vld [vmem:[%s1940_s0 + $0x34] ss:$20 sps:$4 sm:$0xff]   ;;  %v1440_v40 = vld [vmem:[%s1940_s0 + $0x30] ss:$20 sps:$4 sm:$0xff]  }
   0xf   :  { %745 = vmatprep.mubr.bf16.mxu1 %v1433_v35  ;;  %v1435_v37 = vld [vmem:[%s1940_s0 + $0x2c] ss:$20 sps:$4 sm:$0xff]   ;;  %v1439_v39 = vld [vmem:[%s1940_s0 + $0x28] ss:$20 sps:$4 sm:$0xff]   ;;  %v1445_v44 = vld [vmem:[%s1940_s0 + $0x50] ss:$20 sps:$4 sm:$0xff]  }
  0x10   :  { %1230 = vmatpush3.bf16.msra.mxu0 %v1410_v14  ;;  %v1441_v41 = vld [vmem:[%s1940_s0 + $0x54] ss:$20 sps:$4 sm:$0xff]   ;;  %v1446_v45 = vld [vmem:[%s1940_s0 + $0x58] ss:$20 sps:$4 sm:$0xff]   ;;  %v1473_v49 = vld [vmem:[%s1939_s1 + $0x100] sm:$0xff]   ;;  %v1488_v12 = vmov 0.0  }
  0x11   :  { %1294 = vmatpush3.bf16.msra.mxu1 %v1411_v15  ;;  %1231 = vmatprep.subr.bf16.mxu0 %v1412_v16  ;;  %v1460_v46 = vld [vmem:[%s1939_s1 + $0x108] sm:$0xff]   ;;  %v1450_v48 = vld [vmem:[%s1940_s0 + $0x84] ss:$20 sps:$4 sm:$0xff]   ;;  %v1453_v51 = vld [vmem:[%s1940_s0 + $0x80] ss:$20 sps:$4 sm:$0xff]   ;;  %25 = vst.msk [vmem:[#allocation2 + $0x10] sm:$0xff] %vm22_vm0, %v1488_v12 }
  0x12   :  { %1295 = vmatprep.subr.bf16.mxu1 %v1413_v17  ;;  %v1452_v50 = vld [vmem:[%s1940_s0 + $0x78] ss:$20 sps:$4 sm:$0xff]   ;;  %v1458_v54 = vld [vmem:[%s1940_s0 + $0xa0] ss:$20 sps:$4 sm:$0xff]   ;;  %v1459_v55 = vld [vmem:[%s1940_s0 + $0xa8] ss:$20 sps:$4 sm:$0xff]  }
  0x13   :  { %v1454_v52 = vld [vmem:[%s1940_s0 + $0xa4] ss:$20 sps:$4 sm:$0xff]   ;;  %v1456_v53 = vld [vmem:[%s1940_s0 + $0xac] ss:$20 sps:$4 sm:$0xff]   ;;  %v1463_v57 = vld [vmem:[%s1940_s0 + $0xd4] ss:$20 sps:$4 sm:$0xff]  }
  0x14   :  { %1232 = vmatpush3.bf16.msra.mxu0 %v1414_v18  ;;  %v1461_v56 = vld [vmem:[%s1940_s0 + $0xcc] ss:$20 sps:$4 sm:$0xff]   ;;  %v1465_v58 = vld [vmem:[%s1940_s0 + $0xc8] ss:$20 sps:$4 sm:$0xff]   ;;  %v1466_v59 = vld [vmem:[%s1940_s0 + $0xd0] ss:$20 sps:$4 sm:$0xff]  }
  0x15   :  { %1296 = vmatpush3.bf16.msra.mxu1 %v1415_v19  ;;  %1233 = vmatprep.subr.bf16.mxu0 %v1416_v20  ;;  %v1467_v60 = vld [vmem:[%s1940_s0 + $0xf4] ss:$20 sps:$4 sm:$0xff]   ;;  %v1469_v61 = vld [vmem:[%s1940_s0 + $0xfc] ss:$20 sps:$4 sm:$0xff]   ;;  %v1472_v63 = vld [vmem:[%s1940_s0 + $0xf8] ss:$20 sps:$4 sm:$0xff]  }
  0x16   :  { %1297 = vmatprep.subr.bf16.mxu1 %v1417_v21  ;;  %v1471_v62 = vld [vmem:[%s1940_s0 + $0xf0] ss:$20 sps:$4 sm:$0xff]   ;;  %v1478_v2 = vld [vmem:[%s1940_s0 + $0x118] ss:$20 sps:$4 sm:$0xff]   ;;  %v1479_v3 = vld [vmem:[%s1940_s0 + $0x120] ss:$20 sps:$4 sm:$0xff]  }
  0x17   :  { %v1474_v0 = vld [vmem:[%s1940_s0 + $0x11c] ss:$20 sps:$4 sm:$0xff]   ;;  %v1476_v1 = vld [vmem:[%s1940_s0 + $0x124] ss:$20 sps:$4 sm:$0xff]   ;;  %v1484_v8 = vld [vmem:[%s1940_s0 + $0x60] ss:$20 sps:$4 sm:$0xff]  }
  0x18   :  { %1234 = vmatpush3.bf16.msra.mxu0 %v1418_v22  ;;  %v1480_v4 = vld [vmem:[%s1940_s0 + $0x10] ss:$20 sps:$4 sm:$0xff]   ;;  %v1482_v6 = vld [vmem:[%s1940_s0 + $0x38] ss:$20 sps:$4 sm:$0xff]   ;;  %v1485_v9 = vld [vmem:[%s1940_s0 + $0x100] ss:$20 sps:$4 sm:$0xff]  }
  0x19   :  { %1298 = vmatpush3.bf16.msra.mxu1 %v1419_v23  ;;  %1235 = vmatprep.subr.bf16.mxu0 %v1420_v24  ;;  %v1481_v5 = vld [vmem:[%s1940_s0 + $0xb0] ss:$20 sps:$4 sm:$0xff]   ;;  %v1483_v7 = vld [vmem:[%s1940_s0 + $0xd8] ss:$20 sps:$4 sm:$0xff]   ;;  %v1486_v10 = vld [vmem:[%s1940_s0 + $0x88] ss:$20 sps:$4 sm:$0xff]  }
  0x1a   :  { %1299 = vmatprep.subr.bf16.mxu1 %v1421_v25  ;;  %v1487_v11 = vld [vmem:[%s1940_s0 + $0x128] ss:$20 sps:$4 sm:$0xff]   ;;  %23 = vst.msk [vmem:[#allocation2] sm:$0xff] %vm22_vm0, %v1488_v12  ;;  %24 = vst.msk [vmem:[#allocation2 + $0x8] sm:$0xff] %vm22_vm0, %v1488_v12 }
  0x1b   :  { %26 = vst.msk [vmem:[#allocation2 + $0x18] sm:$0xff] %vm22_vm0, %v1488_v12  ;;  %27 = vst.msk [vmem:[#allocation2 + $0x20] sm:$0xff] %vm22_vm0, %v1488_v12 }
  0x1c   :  { %1236 = vmatpush3.bf16.msra.mxu0 %v1422_v26  ;;  %28 = vst.msk [vmem:[#allocation2 + $0x28] sm:$0xff] %vm22_vm0, %v1488_v12  ;;  %29 = vst.msk [vmem:[#allocation2 + $0x30] sm:$0xff] %vm22_vm0, %v1488_v12 }
  0x1d   :  { %1300 = vmatpush3.bf16.msra.mxu1 %v1423_v27  ;;  %1237 = vmatprep.subr.bf16.mxu0 %v1424_v28  ;;  %30 = vst.msk [vmem:[#allocation2 + $0x38] sm:$0xff] %vm22_vm0, %v1488_v12  ;;  %31 = vst.msk [vmem:[#allocation2 + $0x40] sm:$0xff] %vm22_vm0, %v1488_v12 }
  0x1e   :  { %1301 = vmatprep.subr.bf16.mxu1 %v1425_v29  ;;  %32 = vst.msk [vmem:[#allocation2 + $0x48] sm:$0xff] %vm22_vm0, %v1488_v12  ;;  %33 = vst.msk [vmem:[#allocation2 + $0x50] sm:$0xff] %vm22_vm0, %v1488_v12 }
  0x1f   :  { %34 = vst.msk [vmem:[#allocation2 + $0x58] sm:$0xff] %vm22_vm0, %v1488_v12  ;;  %35 = vst.msk [vmem:[#allocation2 + $0x60] sm:$0xff] %vm22_vm0, %v1488_v12 }
  0x20   :  { %1238 = vmatpush3.bf16.msra.mxu0 %v1426_v30  ;;  %36 = vst.msk [vmem:[#allocation2 + $0x68] sm:$0xff] %vm22_vm0, %v1488_v12  ;;  %37 = vst.msk [vmem:[#allocation2 + $0x70] sm:$0xff] %vm22_vm0, %v1488_v12 }
  0x21   :  { %1302 = vmatpush3.bf16.msra.mxu1 %v1427_v31  ;;  %1363 = vmatprep.subr.bf16.mxu0 %v1434_v36  ;;  %38 = vst.msk [vmem:[#allocation2 + $0x78] sm:$0xff] %vm22_vm0, %v1488_v12 }
  0x22   :  { %1387 = vmatprep.subr.bf16.mxu1 %v1434_v36 }
  0x23   :  { %649 = vmatmul.mubr.bf16.vlgmr.msra.gmra.mxu0 %v1428_v32 }
  0x24   :  { %746 = vmatmul.mubr.bf16.vlgmr.msra.gmra.mxu1 %v1431_v34  ;;  %1364 = vmatpush3.bf16.msra.mxu0 %v1434_v36 }
  0x25   :  { %1391 = vmatpush3.bf16.msra.mxu1 %v1434_v36  ;;  %656 = vmatprep.mubr.bf16.mxu0 %v1435_v37 }
  0x26   :  { %753 = vmatprep.mubr.bf16.mxu1 %v1437_v38  ;;  %1365 = vmatprep.subr.bf16.mxu0 %v1447_v42 }
  0x27   :  { %1388 = vmatprep.subr.bf16.mxu1 %v1447_v42 }
  0x28   :  { %1366 = vmatpush3.bf16.msra.mxu0 %v1447_v42 }
  0x29   :  { %1392 = vmatpush3.bf16.msra.mxu1 %v1447_v42  ;;  %1367 = vmatprep.subr.bf16.mxu0 %v1460_v46 }
  0x2a   :  { %1389 = vmatprep.subr.bf16.mxu1 %v1460_v46 }
  0x2b   :  { %657 = vmatmul.mubr.bf16.gmra.mxu0 %v1439_v39 }
  0x2c   :  { %754 = vmatmul.mubr.bf16.gmra.mxu1 %v1440_v40  ;;  %664 = vmatprep.mubr.bf16.mxu0 %v1441_v41 }
  0x2d   :  { %761 = vmatprep.mubr.bf16.mxu1 %v1443_v43  ;;  %1368 = vmatpush3.bf16.msra.mxu0 %v1460_v46 }
  0x2e   :  { %1393 = vmatpush3.bf16.msra.mxu1 %v1460_v46  ;;  %1369 = vmatprep.subr.bf16.mxu0 %v1473_v49 }
  0x2f   :  { %1390 = vmatprep.subr.bf16.mxu1 %v1473_v49 }
  0x31   :  { %1370 = vmatpush3.bf16.msra.mxu0 %v1473_v49 }
  0x32   :  { %1394 = vmatpush3.bf16.msra.mxu1 %v1473_v49 }
  0x33   :  { %665 = vmatmul.mubr.bf16.gmra.mxu0 %v1445_v44 }
  0x34   :  { %762 = vmatmul.mubr.bf16.gmra.mxu1 %v1446_v45  ;;  %672 = vmatprep.mubr.bf16.mxu0 %v1448_v47 }
  0x35   :  { %769 = vmatprep.mubr.bf16.mxu1 %v1450_v48 }
  0x3b   :  { %673 = vmatmul.mubr.bf16.gmra.mxu0 %v1452_v50 }
  0x3c   :  { %770 = vmatmul.mubr.bf16.gmra.mxu1 %v1453_v51  ;;  %680 = vmatprep.mubr.bf16.mxu0 %v1454_v52 }
  0x3d   :  { %777 = vmatprep.mubr.bf16.mxu1 %v1456_v53 }
  0x43   :  { %681 = vmatmul.mubr.bf16.gmra.mxu0 %v1458_v54 }
  0x44   :  { %778 = vmatmul.mubr.bf16.gmra.mxu1 %v1459_v55  ;;  %688 = vmatprep.mubr.bf16.mxu0 %v1461_v56 }
  0x45   :  { %785 = vmatprep.mubr.bf16.mxu1 %v1463_v57 }
  0x4b   :  { %689 = vmatmul.mubr.bf16.gmra.mxu0 %v1465_v58 }
  0x4c   :  { %786 = vmatmul.mubr.bf16.gmra.mxu1 %v1466_v59  ;;  %696 = vmatprep.mubr.bf16.mxu0 %v1467_v60 }
  0x4d   :  { %793 = vmatprep.mubr.bf16.mxu1 %v1469_v61 }
  0x53   :  { %697 = vmatmul.mubr.bf16.gmra.mxu0 %v1471_v62 }
  0x54   :  { %794 = vmatmul.mubr.bf16.gmra.mxu1 %v1472_v63  ;;  %704 = vmatprep.mubr.bf16.mxu0 %v1474_v0 }
  0x55   :  { %801 = vmatprep.mubr.bf16.mxu1 %v1476_v1 }
  0x5b   :  { %705 = vmatmul.mubr.bf16.gmra.mxu0 %v1478_v2 }
  0x5c   :  { %802 = vmatmul.mubr.bf16.gmra.mxu1 %v1479_v3  ;;  %1371 = vmatprep.mubr.msk.bf16.mxu0 %vm22_vm0, %v1480_v4 }
  0x5d   :  { %1379 = vmatprep.mubr.msk.bf16.mxu1 %vm22_vm0, %v1481_v5 }
  0x63   :  { %1372 = vmatmul.mubr.msk.bf16.vlgmr.msra.gmra.mxu0 %vm22_vm0, %v1482_v6 }
  0x64   :  { %1380 = vmatmul.mubr.msk.bf16.vlgmr.msra.gmra.mxu1 %vm22_vm0, %v1483_v7  ;;  %1375 = vmatprep.mubr.msk.bf16.mxu0 %vm22_vm0, %v1484_v8 }
  0x65   :  { %1383 = vmatprep.mubr.msk.bf16.mxu1 %vm22_vm0, %v1485_v9 }
  0x6b   :  { %1376 = vmatmul.mubr.msk.bf16.gmra.mxu0 %vm22_vm0, %v1486_v10 }
  0x6c   :  { %1384 = vmatmul.mubr.msk.bf16.gmra.mxu1 %vm22_vm0, %v1487_v11 }
  0xe3   :  { %v1239_v13 = vpop.f32.mrf.mxu0 }
  0xe4   :  { %v1303_v14 = vpop.f32.mrf.mxu1 }
  0xe5   :  { %v1240_v15 = vpop.f32.mrf.mxu0 }
  0xe6   :  { %v1304_v16 = vpop.f32.mrf.mxu1  ;;  %v1241_v7 = vadd.f32 %v1240_v15, %v1239_v13 }
  0xe7   :  { %v1242_v17 = vpop.f32.mrf.mxu0  ;;  %v1305_v8 = vadd.f32 %v1304_v16, %v1303_v14 }
  0xe8   :  { %v1306_v18 = vpop.f32.mrf.mxu1 }
  0xe9   :  { %v1243_v19 = vpop.f32.mrf.mxu0  ;;  %v748_v16 = vadd.f32 %v1305_v8, %v1241_v7 }
  0xea   :  { %v1307_v20 = vpop.f32.mrf.mxu1  ;;  %v1244_v10 = vadd.f32 %v1243_v19, %v1242_v17 }
  0xeb   :  { %v1245_v21 = vpop.f32.mrf.mxu0  ;;  %v1308_v11 = vadd.f32 %v1307_v20, %v1306_v18 }
  0xec   :  { %v1309_v22 = vpop.f32.mrf.mxu1 }
  0xed   :  { %v1246_v23 = vpop.f32.mrf.mxu0  ;;  %v751_v17 = vadd.f32 %v1308_v11, %v1244_v10 }
  0xee   :  { %v1310_v24 = vpop.f32.mrf.mxu1  ;;  %v1247_v12 = vadd.f32 %v1246_v23, %v1245_v21  ;;  %v41_v21 = vld [vmem:[#allocation2 + $0x10] sm:$0xff] }
  0xef   :  { %v1248_v25 = vpop.f32.mrf.mxu0 }
  0xf0   :  { %v1312_v26 = vpop.f32.mrf.mxu1 }
  0xf1   :  { %v1249_v27 = vpop.f32.mrf.mxu0 }
  0xf2   :  { %v1313_v28 = vpop.f32.mrf.mxu1 }
  0xf3   :  { %v1251_v29 = vpop.f32.mrf.mxu0 }
  0xf4   :  { %v1315_v30 = vpop.f32.mrf.mxu1 }
  0xf5   :  { %v1252_v31 = vpop.f32.mrf.mxu0 }
  0xf6   :  { %v1316_v32 = vpop.f32.mrf.mxu1 }
  0xf7   :  { %v1766_v33 = vpop.f32.mrf.mxu0 }
  0xf8   :  { %v1768_v34 = vpop.f32.mrf.mxu1 }
  0xf9   :  { %1944 = vst [vmem:[#allocation3_spill] sm:$0xff] %v1768_v34  ;;  %v1770_v35 = vpop.f32.mrf.mxu0 }
  0xfa   :  { %1945 = vst [vmem:[#allocation4_spill] sm:$0xff] %v1770_v35  ;;  %v1772_v36 = vpop.f32.mrf.mxu1 }
  0xfb   :  { %1946 = vst [vmem:[#allocation5_spill] sm:$0xff] %v1772_v36  ;;  %v1257_v37 = vpop.f32.mrf.mxu0  ;;  %v1311_v36 = vadd.f32 %v1310_v24, %v1309_v22 }
  0xfc   :  { %v1321_v38 = vpop.f32.mrf.mxu1 }
  0xfd   :  { %v1258_v39 = vpop.f32.mrf.mxu0  ;;  %v756_v15 = vadd.f32 %v1311_v36, %v1247_v12 }
  0xfe   :  { %v1322_v40 = vpop.f32.mrf.mxu1  ;;  %v1259_v13 = vadd.f32 %v1258_v39, %v1257_v37  ;;  %v39_v37 = vld [vmem:[#allocation2] sm:$0xff] }
  0xff   :  { %v1774_v41 = vpop.f32.mrf.mxu0  ;;  %v1323_v18 = vadd.f32 %v1322_v40, %v1321_v38 }
 0x100   :  { %1947 = vst [vmem:[#allocation6_spill] sm:$0xff] %v1774_v41  ;;  %v1776_v42 = vpop.f32.mrf.mxu1  ;;  %v1253_v41 = vadd.f32 %v1252_v31, %v1251_v29 }
 0x101   :  { %1948 = vst [vmem:[#allocation7_spill] sm:$0xff] %v1776_v42  ;;  %v1778_v43 = vpop.f32.mrf.mxu0  ;;  %v1957_v24 = vld [vmem:[#allocation4_spill] sm:$0xff] }
 0x102   :  { %1949 = vst [vmem:[#allocation8_spill] sm:$0xff] %v1778_v43  ;;  %v1780_v44 = vpop.f32.mrf.mxu1 }
 0x103   :  { %1950 = vst [vmem:[#allocation9_spill] sm:$0xff] %v1780_v44  ;;  %v1263_v45 = vpop.f32.mrf.mxu0 }
 0x104   :  { %v1327_v46 = vpop.f32.mrf.mxu1 }
 0x105   :  { %v1264_v47 = vpop.f32.mrf.mxu0 }
 0x106   :  { %v1328_v48 = vpop.f32.mrf.mxu1 }
 0x107   :  { %v1266_v49 = vpop.f32.mrf.mxu0 }
 0x108   :  { %v1330_v50 = vpop.f32.mrf.mxu1 }
 0x109   :  { %v1267_v51 = vpop.f32.mrf.mxu0 }
 0x10a   :  { %v1331_v52 = vpop.f32.mrf.mxu1  ;;  %v1268_v31 = vadd.f32 %v1267_v51, %v1266_v49 }
 0x10b   :  { %v1269_v53 = vpop.f32.mrf.mxu0 }
 0x10c   :  { %v1333_v54 = vpop.f32.mrf.mxu1 }
 0x10d   :  { %v1270_v55 = vpop.f32.mrf.mxu0 }
 0x10e   :  { %v1334_v56 = vpop.f32.mrf.mxu1  ;;  %v1271_v44 = vadd.f32 %v1270_v55, %v1269_v53  ;;  %v42_v53 = vld [vmem:[#allocation2 + $0x18] sm:$0xff] }
 0x10f   :  { %v1272_v57 = vpop.f32.mrf.mxu0  ;;  %v1335_v42 = vadd.f32 %v1334_v56, %v1333_v54  ;;  %v772_v56 = vadd.f32 %v1323_v18, %v1259_v13  ;;  %v45_v18 = vld [vmem:[#allocation2 + $0x30] sm:$0xff] }
 0x110   :  { %v1336_v58 = vpop.f32.mrf.mxu1 }
 0x111   :  { %v1273_v59 = vpop.f32.mrf.mxu0  ;;  %v788_v23 = vadd.f32 %v1335_v42, %v1271_v44  ;;  %v47_v44 = vld [vmem:[#allocation2 + $0x40] sm:$0xff] }
 0x112   :  { %v1337_v60 = vpop.f32.mrf.mxu1  ;;  %v1274_v19 = vadd.f32 %v1273_v59, %v1272_v57  ;;  %v1960_v59 = vld [vmem:[#allocation6_spill] sm:$0xff] }
 0x113   :  { %v1782_v61 = vpop.f32.mrf.mxu0  ;;  %v1338_v20 = vadd.f32 %v1337_v60, %v1336_v58  ;;  %v50_v58 = vld [vmem:[#allocation2 + $0x58] sm:$0xff]  ;;  %v1961_v60 = vld [vmem:[#allocation8_spill] sm:$0xff] }
 0x114   :  { %1951 = vst [vmem:[#allocation10_spill] sm:$0xff] %v1782_v61  ;;  %v1784_v62 = vpop.f32.mrf.mxu1  ;;  %v1329_v61 = vadd.f32 %v1328_v48, %v1327_v46 }
 0x115   :  { %1952 = vst [vmem:[#allocation11_spill] sm:$0xff] %v1784_v62  ;;  %v1276_v63 = vpop.f32.mrf.mxu0  ;;  %v791_v55 = vadd.f32 %v1338_v20, %v1274_v19  ;;  %v1964_v20 = vld [vmem:[#allocation3_spill] sm:$0xff] }
 0x116   :  { %v1340_v0 = vpop.f32.mrf.mxu1 }
 0x117   :  { %v1786_v1 = vpop.f32.mrf.mxu0 }
 0x118   :  { %1953 = vst [vmem:[#allocation12_spill] sm:$0xff] %v1786_v1  ;;  %v1788_v2 = vpop.f32.mrf.mxu1  ;;  %v1250_v1 = vadd.f32 %v1249_v27, %v1248_v25  ;;  %v1798_v25 = vadd.f32 %v1957_v24, %v1766_v33  ;;  %v49_v27 = vld [vmem:[#allocation2 + $0x50] sm:$0xff] }
 0x119   :  { %1954 = vst [vmem:[#allocation13_spill] sm:$0xff] %v1788_v2  ;;  %v1790_v3 = vpop.f32.mrf.mxu0  ;;  %v1314_v2 = vadd.f32 %v1313_v28, %v1312_v26 }
 0x11a   :  { %1955 = vst [vmem:[#allocation14_spill] sm:$0xff] %v1790_v3  ;;  %v1792_v4 = vpop.f32.mrf.mxu1  ;;  %v1317_v3 = vadd.f32 %v1316_v32, %v1315_v30  ;;  %v1332_v32 = vadd.f32 %v1331_v52, %v1330_v50 }
 0x11b   :  { %1956 = vst [vmem:[#allocation15_spill] sm:$0xff] %v1792_v4  ;;  %v1281_v5 = vpop.f32.mrf.mxu0  ;;  %v1265_v4 = vadd.f32 %v1264_v47, %v1263_v45  ;;  %v759_v29 = vadd.f32 %v1314_v2, %v1250_v1 }
 0x11c   :  { %v1345_v6 = vpop.f32.mrf.mxu1  ;;  %v1800_v30 = vadd.f32 %v1317_v3, %v1253_v41  ;;  %v1958_v41 = vld [vmem:[#allocation10_spill] sm:$0xff]  ;;  %v1959_v49 = vld [vmem:[#allocation11_spill] sm:$0xff]  ;;  %v40_v3 = vld [vmem:[#allocation2 + $0x8] sm:$0xff] }
 0x11d   :  { %v1282_v9 = vpop.f32.mrf.mxu0  ;;  %v780_v39 = vadd.f32 %v1329_v61, %v1265_v4  ;;  %v1277_v57 = vadd.f32 %v1276_v63, %v1958_v41  ;;  %v1341_v50 = vadd.f32 %v1340_v0, %v1959_v49  ;;  %v1262_v61 = vadd.f32 %v1961_v60, %v1960_v59  ;;  %v1963_v63 = vld [vmem:[#allocation9_spill] sm:$0xff]  ;;  %v54_v49 = vld [vmem:[#allocation2 + $0x78] sm:$0xff]  ;;  %v44_v60 = vld [vmem:[#allocation2 + $0x28] sm:$0xff] }
 0x11e   :  { %v1346_v34 = vpop.f32.mrf.mxu1  ;;  %v1283_v40 = vadd.f32 %v1282_v9, %v1281_v5  ;;  %v783_v5 = vadd.f32 %v1332_v32, %v1268_v31  ;;  %v48_v9 = vld [vmem:[#allocation2 + $0x48] sm:$0xff]  ;;  %v1823_v31 = vld [vmem:[%s1941_s2] ss:$0 sm:$0xff] }
 0x11f   :  { %v1794_v43 = vpop.f32.mrf.mxu0  ;;  %v1347_v45 = vadd.f32 %v1346_v34, %v1345_v6  ;;  %v1962_v6 = vld [vmem:[#allocation7_spill] sm:$0xff] }
 0x120   :  { %v1348_v62 = vpop.f32.mrf.mxu1  ;;  %v1326_v7 = vadd.f32 %v1963_v63, %v1962_v6 }
 0x121   :  { %v1285_v35 = vpop.f32.mrf.mxu0  ;;  %v804_v11 = vadd.f32 %v1347_v45, %v1283_v40  ;;  %v51_v45 = vld [vmem:[#allocation2 + $0x60] sm:$0xff] }
 0x122   :  { %v1349_v14 = vpop.f32.mrf.mxu1  ;;  %v1286_v12 = vadd.f32 %v1285_v35, %v1794_v43  ;;  %v1968_v43 = vld [vmem:[#allocation13_spill] sm:$0xff] }
 0x123   :  { %v1373_v22 = vpop.f32.mrf.mxu0  ;;  %v1350_v13 = vadd.f32 %v1349_v14, %v1348_v62  ;;  %v1969_v62 = vld [vmem:[#allocation15_spill] sm:$0xff] }
 0x124   :  { %v853_v26 = vadd.f32 %v1373_v22, %v756_v15  ;;  %v1381_v28 = vpop.f32.mrf.mxu1  ;;  %v1344_v14 = vadd.f32 %v1969_v62, %v1968_v43 }
 0x125   :  { %v885_v36 = vadd.f32 %v1381_v28, %v788_v23  ;;  %v844_v38 = vpop.f32.mrf.mxu0  ;;  %v1966_v28 = vld [vmem:[#allocation12_spill] sm:$0xff] }
 0x126   :  { %v909_v46 = vadd.f32 %v853_v26, %v41_v21  ;;  %v845_v42 = vadd.f32 %v844_v38, %v748_v16  ;;  %v876_v47 = vpop.f32.mrf.mxu1  ;;  %v1965_v21 = vld [vmem:[#allocation5_spill] sm:$0xff] }
 0x127   :  { %v917_v33 = vadd.f32 %v885_v36, %v49_v27  ;;  %v877_v48 = vadd.f32 %v876_v47, %v780_v39  ;;  %v1374_v54 = vpop.f32.mrf.mxu0  ;;  %v1320_v22 = vadd.f32 %v1965_v21, %v1964_v20  ;;  %v796_v27 = vadd.f32 %v1341_v50, %v1277_v57  ;;  %v1831_v47 = vld [vmem:[%s1942_s3] ss:$0 sm:$0xff] }
 0x128   :  { %925 = vst.msk [vmem:[#allocation2 + $0x10] sm:$0xff] %vm22_vm0, %v909_v46  ;;  %v907_v51 = vadd.f32 %v845_v42, %v39_v37  ;;  %v856_v52 = vadd.f32 %v1374_v54, %v759_v29  ;;  %v1382_v34 = vpop.f32.mrf.mxu1  ;;  %v1967_v29 = vld [vmem:[#allocation14_spill] sm:$0xff]  ;;  %v43_v37 = vld [vmem:[#allocation2 + $0x20] sm:$0xff]  ;;  %v775_v42 = vadd.f32 %v1326_v7, %v1262_v61 }
 0x129   :  { %933 = vst.msk [vmem:[#allocation2 + $0x50] sm:$0xff] %vm22_vm0, %v917_v33  ;;  %v915_v1 = vadd.f32 %v877_v48, %v47_v44  ;;  %v888_v2 = vadd.f32 %v1382_v34, %v791_v55  ;;  %v847_v4 = vpop.f32.mrf.mxu0  ;;  %v1280_v35 = vadd.f32 %v1967_v29, %v1966_v28  ;;  %v807_v55 = vadd.f32 %v1350_v13, %v1286_v12 }
 0x12a   :  { %923 = vst.msk [vmem:[#allocation2] sm:$0xff] %vm22_vm0, %v907_v51  ;;  %v910_v0 = vadd.f32 %v856_v52, %v42_v53  ;;  %v848_v8 = vadd.f32 %v847_v4, %v751_v17  ;;  %v879_v10 = vpop.f32.mrf.mxu1  ;;  %v53_v17 = vld [vmem:[#allocation2 + $0x70] sm:$0xff]  ;;  %v46_v53 = vld [vmem:[#allocation2 + $0x38] sm:$0xff]  ;;  %v767_v51 = vadd.f32 %v1320_v22, %v1798_v25  ;;  %v52_v25 = vld [vmem:[#allocation2 + $0x68] sm:$0xff] }
 0x12b   :  { %931 = vst.msk [vmem:[#allocation2 + $0x40] sm:$0xff] %vm22_vm0, %v915_v1  ;;  %v918_v15 = vadd.f32 %v888_v2, %v50_v58  ;;  %v880_v16 = vadd.f32 %v879_v10, %v783_v5  ;;  %v1377_v19 = vpop.f32.mrf.mxu0  ;;  %v799_v1 = vadd.f32 %v1344_v14, %v1280_v35 }
 0x12c   :  { %926 = vst.msk [vmem:[#allocation2 + $0x18] sm:$0xff] %vm22_vm0, %v910_v0  ;;  %v908_v23 = vadd.f32 %v848_v8, %v40_v3  ;;  %v869_v24 = vadd.f32 %v1377_v19, %v772_v56  ;;  %v1385_v26 = vpop.f32.mrf.mxu1 }
 0x12d   :  { %934 = vst.msk [vmem:[#allocation2 + $0x58] sm:$0xff] %vm22_vm0, %v918_v15  ;;  %v916_v32 = vadd.f32 %v880_v16, %v48_v9  ;;  %v901_v36 = vadd.f32 %v1385_v26, %v804_v11  ;;  %v860_v38 = vpop.f32.mrf.mxu0 }
 0x12e   :  { %924 = vst.msk [vmem:[#allocation2 + $0x8] sm:$0xff] %vm22_vm0, %v908_v23  ;;  %v913_v39 = vadd.f32 %v869_v24, %v45_v18  ;;  %v861_v40 = vadd.f32 %v860_v38, %v1800_v30  ;;  %v892_v46 = vpop.f32.mrf.mxu1 }
 0x12f   :  { %v944_v44 = vld [vmem:[#allocation2 + $0x10] sm:$0xff]  ;;  %932 = vst.msk [vmem:[#allocation2 + $0x48] sm:$0xff] %vm22_vm0, %v916_v32  ;;  %v921_v33 = vadd.f32 %v901_v36, %v53_v17  ;;  %v893_v48 = vadd.f32 %v892_v46, %v796_v27  ;;  %v1378_v54 = vpop.f32.mrf.mxu0 }
 0x130   :  { %v967_v56 = vmul.f32 %v1823_v31, %v944_v44  ;;  %v952_v30 = vld [vmem:[#allocation2 + $0x50] sm:$0xff]  ;;  %929 = vst.msk [vmem:[#allocation2 + $0x30] sm:$0xff] %vm22_vm0, %v913_v39  ;;  %v911_v41 = vadd.f32 %v861_v40, %v43_v37  ;;  %v872_v57 = vadd.f32 %v1378_v54, %v775_v42  ;;  %v1386_v50 = vpop.f32.mrf.mxu1 }
 0x131   :  { %v975_v52 = vmul.f32 %v1823_v31, %v952_v30  ;;  %v942_v58 = vld [vmem:[#allocation2] sm:$0xff]  ;;  %937 = vst.msk [vmem:[#allocation2 + $0x70] sm:$0xff] %vm22_vm0, %v921_v33  ;;  %v919_v34 = vadd.f32 %v893_v48, %v51_v45  ;;  %v904_v59 = vadd.f32 %v1386_v50, %v807_v55  ;;  %v863_v61 = vpop.f32.mrf.mxu0 }
 0x132   :  { %v990_v2 = vadd.f32 %v1831_v47, %v967_v56  ;;  %v965_v3 = vmul.f32 %v1823_v31, %v942_v58  ;;  %v950_v4 = vld [vmem:[#allocation2 + $0x40] sm:$0xff]  ;;  %927 = vst.msk [vmem:[#allocation2 + $0x20] sm:$0xff] %vm22_vm0, %v911_v41  ;;  %v914_v5 = vadd.f32 %v872_v57, %v46_v53  ;;  %v864_v6 = vadd.f32 %v863_v61, %v767_v51  ;;  %v895_v63 = vpop.f32.mrf.mxu1 }
 0x133   :  { %v998_v7 = vadd.f32 %v1831_v47, %v975_v52  ;;  %v973_v0 = vmul.f32 %v1823_v31, %v950_v4  ;;  %v945_v8 = vld [vmem:[#allocation2 + $0x18] sm:$0xff]  ;;  %935 = vst.msk [vmem:[#allocation2 + $0x60] sm:$0xff] %vm22_vm0, %v919_v34  ;;  %v922_v9 = vadd.f32 %v904_v59, %v54_v49  ;;  %v896_v10 = vadd.f32 %v895_v63, %v799_v1 }
 0x134   :  { %v1006_v11 = vmax.f32 %v990_v2, 0.0  ;;  %v988_v12 = vadd.f32 %v1831_v47, %v965_v3  ;;  %v968_v13 = vmul.f32 %v1823_v31, %v945_v8  ;;  %v953_v15 = vld [vmem:[#allocation2 + $0x58] sm:$0xff]  ;;  %930 = vst.msk [vmem:[#allocation2 + $0x38] sm:$0xff] %vm22_vm0, %v914_v5  ;;  %v912_v16 = vadd.f32 %v864_v6, %v44_v60 }
 0x135   :  { %v1014_v18 = vmax.f32 %v998_v7, 0.0  ;;  %v996_v19 = vadd.f32 %v1831_v47, %v973_v0  ;;  %v976_v20 = vmul.f32 %v1823_v31, %v953_v15  ;;  %v943_v21 = vld [vmem:[#allocation2 + $0x8] sm:$0xff]  ;;  %938 = vst.msk [vmem:[#allocation2 + $0x78] sm:$0xff] %vm22_vm0, %v922_v9  ;;  %v920_v22 = vadd.f32 %v896_v10, %v52_v25 }
 0x136   :  { %v1209_v23 = vpack.c.bf16 %v1006_v11, %v1006_v11  ;;  %v1004_v24 = vmax.f32 %v988_v12, 0.0  ;;  %v991_v17 = vadd.f32 %v1831_v47, %v968_v13  ;;  %v966_v26 = vmul.f32 %v1823_v31, %v943_v21  ;;  %v951_v27 = vld [vmem:[#allocation2 + $0x48] sm:$0xff]  ;;  %928 = vst.msk [vmem:[#allocation2 + $0x28] sm:$0xff] %vm22_vm0, %v912_v16 }
 0x137   :  { %v1217_v28 = vpack.c.bf16 %v1014_v18, %v1014_v18  ;;  %v1012_v29 = vmax.f32 %v996_v19, 0.0  ;;  %v999_v35 = vadd.f32 %v1831_v47, %v976_v20  ;;  %v974_v43 = vmul.f32 %v1823_v31, %v951_v27  ;;  %v948_v62 = vld [vmem:[#allocation2 + $0x30] sm:$0xff]  ;;  %936 = vst.msk [vmem:[#allocation2 + $0x68] sm:$0xff] %vm22_vm0, %v920_v22 }
 0x138   :  { %1087 = vst.msk [vmem:[%s1943_s4 + $0x8] sm:$0xf] %vm1084_vm1, %v1209_v23  ;;  %v1207_v14 = vpack.c.bf16 %v1004_v24, %v1004_v24  ;;  %v1007_v32 = vmax.f32 %v991_v17, 0.0  ;;  %v989_v36 = vadd.f32 %v1831_v47, %v966_v26  ;;  %v971_v37 = vmul.f32 %v1823_v31, %v948_v62  ;;  %v956_v38 = vld [vmem:[#allocation2 + $0x70] sm:$0xff] }
 0x139   :  { %1095 = vst.msk [vmem:[%s1943_s4 + $0x28] sm:$0xf] %vm1084_vm1, %v1217_v28  ;;  %v1215_v39 = vpack.c.bf16 %v1012_v29, %v1012_v29  ;;  %v1015_v40 = vmax.f32 %v999_v35, 0.0  ;;  %v997_v45 = vadd.f32 %v1831_v47, %v974_v43  ;;  %v979_v46 = vmul.f32 %v1823_v31, %v956_v38  ;;  %v946_v42 = vld [vmem:[#allocation2 + $0x20] sm:$0xff] }
 0x13a   :  { %1085 = vst.msk [vmem:[%s1943_s4] sm:$0xf] %vm1084_vm1, %v1207_v14  ;;  %v1210_v44 = vpack.c.bf16 %v1007_v32, %v1007_v32  ;;  %v1005_v33 = vmax.f32 %v989_v36, 0.0  ;;  %v994_v48 = vadd.f32 %v1831_v47, %v971_v37  ;;  %v969_v53 = vmul.f32 %v1823_v31, %v946_v42  ;;  %v954_v54 = vld [vmem:[#allocation2 + $0x60] sm:$0xff] }
 0x13b   :  { %1093 = vst.msk [vmem:[%s1943_s4 + $0x20] sm:$0xf] %vm1084_vm1, %v1215_v39  ;;  %v1218_v55 = vpack.c.bf16 %v1015_v40, %v1015_v40  ;;  %v1013_v56 = vmax.f32 %v997_v45, 0.0  ;;  %v1002_v30 = vadd.f32 %v1831_v47, %v979_v46  ;;  %v977_v41 = vmul.f32 %v1823_v31, %v954_v54  ;;  %v949_v57 = vld [vmem:[#allocation2 + $0x38] sm:$0xff] }
 0x13c   :  { %1088 = vst.msk [vmem:[%s1943_s4 + $0xc] sm:$0xf] %vm1084_vm1, %v1210_v44  ;;  %v1208_v49 = vpack.c.bf16 %v1005_v33, %v1005_v33  ;;  %v1010_v50 = vmax.f32 %v994_v48, 0.0  ;;  %v992_v51 = vadd.f32 %v1831_v47, %v969_v53  ;;  %v972_v52 = vmul.f32 %v1823_v31, %v949_v57  ;;  %v957_v58 = vld [vmem:[#allocation2 + $0x78] sm:$0xff] }
 0x13d   :  { %1096 = vst.msk [vmem:[%s1943_s4 + $0x2c] sm:$0xf] %vm1084_vm1, %v1218_v55  ;;  %v1216_v34 = vpack.c.bf16 %v1013_v56, %v1013_v56  ;;  %v1018_v59 = vmax.f32 %v1002_v30, 0.0  ;;  %v1000_v60 = vadd.f32 %v1831_v47, %v977_v41  ;;  %v980_v61 = vmul.f32 %v1823_v31, %v957_v58  ;;  %v947_v1 = vld [vmem:[#allocation2 + $0x28] sm:$0xff] }
 0x13e   :  { %1086 = vst.msk [vmem:[%s1943_s4 + $0x4] sm:$0xf] %vm1084_vm1, %v1208_v49  ;;  %v1213_v2 = vpack.c.bf16 %v1010_v50, %v1010_v50  ;;  %v1008_v3 = vmax.f32 %v992_v51, 0.0  ;;  %v995_v4 = vadd.f32 %v1831_v47, %v972_v52  ;;  %v970_v5 = vmul.f32 %v1823_v31, %v947_v1  ;;  %v955_v6 = vld [vmem:[#allocation2 + $0x68] sm:$0xff] }
 0x13f   :  { %1094 = vst.msk [vmem:[%s1943_s4 + $0x24] sm:$0xf] %vm1084_vm1, %v1216_v34  ;;  %v1221_v25 = vpack.c.bf16 %v1018_v59, %v1018_v59  ;;  %v1016_v63 = vmax.f32 %v1000_v60, 0.0  ;;  %v1003_v7 = vadd.f32 %v1831_v47, %v980_v61  ;;  %v978_v0 = vmul.f32 %v1823_v31, %v955_v6 }
 0x140   :  { %1091 = vst.msk [vmem:[%s1943_s4 + $0x18] sm:$0xf] %vm1084_vm1, %v1213_v2  ;;  %v1211_v8 = vpack.c.bf16 %v1008_v3, %v1008_v3  ;;  %v1011_v9 = vmax.f32 %v995_v4, 0.0  ;;  %v993_v10 = vadd.f32 %v1831_v47, %v970_v5 }
 0x141   :  { %1099 = vst.msk [vmem:[%s1943_s4 + $0x38] sm:$0xf] %vm1084_vm1, %v1221_v25  ;;  %v1219_v11 = vpack.c.bf16 %v1016_v63, %v1016_v63  ;;  %v1019_v12 = vmax.f32 %v1003_v7, 0.0  ;;  %v1001_v13 = vadd.f32 %v1831_v47, %v978_v0 }
 0x142   :  { %1089 = vst.msk [vmem:[%s1943_s4 + $0x10] sm:$0xf] %vm1084_vm1, %v1211_v8  ;;  %v1214_v31 = vpack.c.bf16 %v1011_v9, %v1011_v9  ;;  %v1009_v15 = vmax.f32 %v993_v10, 0.0 }
 0x143   :  { %1097 = vst.msk [vmem:[%s1943_s4 + $0x30] sm:$0xf] %vm1084_vm1, %v1219_v11  ;;  %v1222_v16 = vpack.c.bf16 %v1019_v12, %v1019_v12  ;;  %v1017_v18 = vmax.f32 %v1001_v13, 0.0 }
 0x144   :  { %1092 = vst.msk [vmem:[%s1943_s4 + $0x1c] sm:$0xf] %vm1084_vm1, %v1214_v31  ;;  %v1212_v47 = vpack.c.bf16 %v1009_v15, %v1009_v15 }
 0x145   :  { %1100 = vst.msk [vmem:[%s1943_s4 + $0x3c] sm:$0xf] %vm1084_vm1, %v1222_v16  ;;  %v1220_v19 = vpack.c.bf16 %v1017_v18, %v1017_v18 }
 0x146   :  { %1090 = vst.msk [vmem:[%s1943_s4 + $0x14] sm:$0xf] %vm1084_vm1, %v1212_v47 }
 0x147   :  { %1098 = vst.msk [vmem:[%s1943_s4 + $0x34] sm:$0xf] %vm1084_vm1, %v1220_v19 }

// kernel: _forward.28
= control target key start
LH: loop header
LB: loop body
LE: loop exit
PB: predicated region body
PF: predicated region fallthrough
CT: control target
= control target key end

     0   :  { %vm25_vm0 = vcmask 523264   ;;  %vm1135_vm1 = vcmask 519168   ;;  %s2221_s1 = inlined_call_operand.vmem [shape: bf16[576,64], index: 1, kind: input, shape index: {}]   ;;  %s2222_s0 = inlined_call_operand.vmem [shape: bf16[128,576], index: 0, kind: input, shape index: {}]   ;;  %s2223_s4 = inlined_call_operand.vmem [shape: bf16[128,64], index: 4, kind: input, shape index: {}]   ;;  %s2224_s2 = inlined_call_operand.vmem [shape: f32[1,64], index: 2, kind: input, shape index: {}]   ;;  %s2225_s3 = inlined_call_operand.vmem [shape: f32[1,64], index: 3, kind: input, shape index: {}]   ;;  %s2226_s5 = inlined_call_operand.vmem [shape: bf16[128,64], index: 5, kind: output, shape index: {}]  }
   0x1   :  { %v1486_v0 = vld [vmem:[%s2221_s1 + $0x78] sm:$0xff]   ;;  %v1490_v4 = vld [vmem:[%s2221_s1 + $0x70] sm:$0xff]   ;;  %v1494_v8 = vld [vmem:[%s2221_s1 + $0x68] sm:$0xff]  }
   0x2   :  { %v1487_v1 = vld [vmem:[%s2221_s1 + $0xf8] sm:$0xff]   ;;  %1313 = vmatprep.subr.bf16.mxu0 %v1486_v0  ;;  %v1491_v5 = vld [vmem:[%s2221_s1 + $0xf0] sm:$0xff]   ;;  %v1495_v9 = vld [vmem:[%s2221_s1 + $0xe8] sm:$0xff]  }
   0x3   :  { %v1488_v2 = vld [vmem:[%s2221_s1 + $0x38] sm:$0xff]   ;;  %1377 = vmatprep.subr.bf16.mxu1 %v1487_v1  ;;  %v1492_v6 = vld [vmem:[%s2221_s1 + $0x30] sm:$0xff]   ;;  %v1496_v10 = vld [vmem:[%s2221_s1 + $0x28] sm:$0xff]  }
   0x4   :  { %v1489_v3 = vld [vmem:[%s2221_s1 + $0xb8] sm:$0xff]   ;;  %1314 = vmatpush3.bf16.msra.mxu0 %v1488_v2  ;;  %v1493_v7 = vld [vmem:[%s2221_s1 + $0xb0] sm:$0xff]   ;;  %v1497_v11 = vld [vmem:[%s2221_s1 + $0xa8] sm:$0xff]  }
   0x5   :  { %1378 = vmatpush3.bf16.msra.mxu1 %v1489_v3  ;;  %1315 = vmatprep.subr.bf16.mxu0 %v1490_v4  ;;  %v1498_v12 = vld [vmem:[%s2221_s1 + $0x60] sm:$0xff]   ;;  %v1502_v16 = vld [vmem:[%s2221_s1 + $0x58] sm:$0xff]   ;;  %v1506_v20 = vld [vmem:[%s2221_s1 + $0x50] sm:$0xff]  }
   0x6   :  { %1379 = vmatprep.subr.bf16.mxu1 %v1491_v5  ;;  %v1499_v13 = vld [vmem:[%s2221_s1 + $0xe0] sm:$0xff]   ;;  %v1503_v17 = vld [vmem:[%s2221_s1 + $0xd8] sm:$0xff]   ;;  %v1507_v21 = vld [vmem:[%s2221_s1 + $0xd0] sm:$0xff]  }
   0x7   :  { %v1500_v14 = vld [vmem:[%s2221_s1 + $0x20] sm:$0xff]   ;;  %v1504_v18 = vld [vmem:[%s2221_s1 + $0x18] sm:$0xff]   ;;  %v1508_v22 = vld [vmem:[%s2221_s1 + $0x10] sm:$0xff]  }
   0x8   :  { %1316 = vmatpush3.bf16.msra.mxu0 %v1492_v6  ;;  %v1501_v15 = vld [vmem:[%s2221_s1 + $0xa0] sm:$0xff]   ;;  %v1505_v19 = vld [vmem:[%s2221_s1 + $0x98] sm:$0xff]   ;;  %v1509_v23 = vld [vmem:[%s2221_s1 + $0x90] sm:$0xff]  }
   0x9   :  { %1380 = vmatpush3.bf16.msra.mxu1 %v1493_v7  ;;  %1317 = vmatprep.subr.bf16.mxu0 %v1494_v8  ;;  %v1510_v24 = vld [vmem:[%s2221_s1 + $0x48] sm:$0xff]   ;;  %v1514_v28 = vld [vmem:[%s2221_s1 + $0x40] sm:$0xff]   ;;  %v1524_v36 = vld [vmem:[%s2221_s1 + $0x118] sm:$0xff]  }
   0xa   :  { %1381 = vmatprep.subr.bf16.mxu1 %v1495_v9  ;;  %v1511_v25 = vld [vmem:[%s2221_s1 + $0xc8] sm:$0xff]   ;;  %v1515_v29 = vld [vmem:[%s2221_s1 + $0xc0] sm:$0xff]   ;;  %v1537_v42 = vld [vmem:[%s2221_s1 + $0x110] sm:$0xff]  }
   0xb   :  { %v1512_v26 = vld [vmem:[%s2221_s1 + $0x8] sm:$0xff]   ;;  %v1516_v30 = vld [vmem:[%s2221_s1] sm:$0xff]   ;;  %v1533_v43 = vld [vmem:[%s2222_s0 + $0x5c] ss:$20 sps:$4 sm:$0xff]  }
   0xc   :  { %1318 = vmatpush3.bf16.msra.mxu0 %v1496_v10  ;;  %v1513_v27 = vld [vmem:[%s2221_s1 + $0x88] sm:$0xff]   ;;  %v1517_v31 = vld [vmem:[%s2221_s1 + $0x80] sm:$0xff]   ;;  %v1538_v47 = vld [vmem:[%s2222_s0 + $0x7c] ss:$20 sps:$4 sm:$0xff]  }
   0xd   :  { %1382 = vmatpush3.bf16.msra.mxu1 %v1497_v11  ;;  %1319 = vmatprep.subr.bf16.mxu0 %v1498_v12  ;;  %v1518_v32 = vld [vmem:[%s2222_s0] ss:$20 sps:$4 sm:$0xff]   ;;  %v1520_v33 = vld [vmem:[%s2222_s0 + $0x4] ss:$20 sps:$4 sm:$0xff]   ;;  %v1521_v34 = vld [vmem:[%s2222_s0 + $0x8] ss:$20 sps:$4 sm:$0xff]  }
   0xe   :  { %1383 = vmatprep.subr.bf16.mxu1 %v1499_v13  ;;  %v1523_v35 = vld [vmem:[%s2222_s0 + $0xc] ss:$20 sps:$4 sm:$0xff]   ;;  %651 = vmatprep.mubr.bf16.mxu0 %v1520_v33  ;;  %v1527_v38 = vld [vmem:[%s2222_s0 + $0x34] ss:$20 sps:$4 sm:$0xff]   ;;  %v1530_v40 = vld [vmem:[%s2222_s0 + $0x30] ss:$20 sps:$4 sm:$0xff]  }
   0xf   :  { %748 = vmatprep.mubr.bf16.mxu1 %v1523_v35  ;;  %v1525_v37 = vld [vmem:[%s2222_s0 + $0x2c] ss:$20 sps:$4 sm:$0xff]   ;;  %v1529_v39 = vld [vmem:[%s2222_s0 + $0x28] ss:$20 sps:$4 sm:$0xff]   ;;  %v1535_v44 = vld [vmem:[%s2222_s0 + $0x50] ss:$20 sps:$4 sm:$0xff]  }
  0x10   :  { %1320 = vmatpush3.bf16.msra.mxu0 %v1500_v14  ;;  %v1531_v41 = vld [vmem:[%s2222_s0 + $0x54] ss:$20 sps:$4 sm:$0xff]   ;;  %v1536_v45 = vld [vmem:[%s2222_s0 + $0x58] ss:$20 sps:$4 sm:$0xff]   ;;  %v1563_v49 = vld [vmem:[%s2221_s1 + $0x100] sm:$0xff]   ;;  %v1578_v12 = vmov 0.0  }
  0x11   :  { %1384 = vmatpush3.bf16.msra.mxu1 %v1501_v15  ;;  %1321 = vmatprep.subr.bf16.mxu0 %v1502_v16  ;;  %v1550_v46 = vld [vmem:[%s2221_s1 + $0x108] sm:$0xff]   ;;  %v1540_v48 = vld [vmem:[%s2222_s0 + $0x84] ss:$20 sps:$4 sm:$0xff]   ;;  %v1543_v51 = vld [vmem:[%s2222_s0 + $0x80] ss:$20 sps:$4 sm:$0xff]   ;;  %28 = vst.msk [vmem:[#allocation2 + $0x10] sm:$0xff] %vm25_vm0, %v1578_v12 }
  0x12   :  { %1385 = vmatprep.subr.bf16.mxu1 %v1503_v17  ;;  %v1542_v50 = vld [vmem:[%s2222_s0 + $0x78] ss:$20 sps:$4 sm:$0xff]   ;;  %v1548_v54 = vld [vmem:[%s2222_s0 + $0xa0] ss:$20 sps:$4 sm:$0xff]   ;;  %v1549_v55 = vld [vmem:[%s2222_s0 + $0xa8] ss:$20 sps:$4 sm:$0xff]  }
  0x13   :  { %v1544_v52 = vld [vmem:[%s2222_s0 + $0xa4] ss:$20 sps:$4 sm:$0xff]   ;;  %v1546_v53 = vld [vmem:[%s2222_s0 + $0xac] ss:$20 sps:$4 sm:$0xff]   ;;  %v1553_v57 = vld [vmem:[%s2222_s0 + $0xd4] ss:$20 sps:$4 sm:$0xff]  }
  0x14   :  { %1322 = vmatpush3.bf16.msra.mxu0 %v1504_v18  ;;  %v1551_v56 = vld [vmem:[%s2222_s0 + $0xcc] ss:$20 sps:$4 sm:$0xff]   ;;  %v1555_v58 = vld [vmem:[%s2222_s0 + $0xc8] ss:$20 sps:$4 sm:$0xff]   ;;  %v1556_v59 = vld [vmem:[%s2222_s0 + $0xd0] ss:$20 sps:$4 sm:$0xff]  }
  0x15   :  { %1386 = vmatpush3.bf16.msra.mxu1 %v1505_v19  ;;  %1323 = vmatprep.subr.bf16.mxu0 %v1506_v20  ;;  %v1557_v60 = vld [vmem:[%s2222_s0 + $0xf4] ss:$20 sps:$4 sm:$0xff]   ;;  %v1559_v61 = vld [vmem:[%s2222_s0 + $0xfc] ss:$20 sps:$4 sm:$0xff]   ;;  %v1562_v63 = vld [vmem:[%s2222_s0 + $0xf8] ss:$20 sps:$4 sm:$0xff]  }
  0x16   :  { %1387 = vmatprep.subr.bf16.mxu1 %v1507_v21  ;;  %v1561_v62 = vld [vmem:[%s2222_s0 + $0xf0] ss:$20 sps:$4 sm:$0xff]   ;;  %v1568_v2 = vld [vmem:[%s2222_s0 + $0x118] ss:$20 sps:$4 sm:$0xff]   ;;  %v1569_v3 = vld [vmem:[%s2222_s0 + $0x120] ss:$20 sps:$4 sm:$0xff]  }
  0x17   :  { %v1564_v0 = vld [vmem:[%s2222_s0 + $0x11c] ss:$20 sps:$4 sm:$0xff]   ;;  %v1566_v1 = vld [vmem:[%s2222_s0 + $0x124] ss:$20 sps:$4 sm:$0xff]   ;;  %v1574_v8 = vld [vmem:[%s2222_s0 + $0x60] ss:$20 sps:$4 sm:$0xff]  }
  0x18   :  { %1324 = vmatpush3.bf16.msra.mxu0 %v1508_v22  ;;  %v1570_v4 = vld [vmem:[%s2222_s0 + $0x10] ss:$20 sps:$4 sm:$0xff]   ;;  %v1572_v6 = vld [vmem:[%s2222_s0 + $0x38] ss:$20 sps:$4 sm:$0xff]   ;;  %v1575_v9 = vld [vmem:[%s2222_s0 + $0x100] ss:$20 sps:$4 sm:$0xff]  }
  0x19   :  { %1388 = vmatpush3.bf16.msra.mxu1 %v1509_v23  ;;  %1325 = vmatprep.subr.bf16.mxu0 %v1510_v24  ;;  %v1571_v5 = vld [vmem:[%s2222_s0 + $0xb0] ss:$20 sps:$4 sm:$0xff]   ;;  %v1573_v7 = vld [vmem:[%s2222_s0 + $0xd8] ss:$20 sps:$4 sm:$0xff]   ;;  %v1576_v10 = vld [vmem:[%s2222_s0 + $0x88] ss:$20 sps:$4 sm:$0xff]  }
  0x1a   :  { %1389 = vmatprep.subr.bf16.mxu1 %v1511_v25  ;;  %v1577_v11 = vld [vmem:[%s2222_s0 + $0x128] ss:$20 sps:$4 sm:$0xff]   ;;  %26 = vst.msk [vmem:[#allocation2] sm:$0xff] %vm25_vm0, %v1578_v12  ;;  %27 = vst.msk [vmem:[#allocation2 + $0x8] sm:$0xff] %vm25_vm0, %v1578_v12 }
  0x1b   :  { %29 = vst.msk [vmem:[#allocation2 + $0x18] sm:$0xff] %vm25_vm0, %v1578_v12  ;;  %30 = vst.msk [vmem:[#allocation2 + $0x20] sm:$0xff] %vm25_vm0, %v1578_v12 }
  0x1c   :  { %1326 = vmatpush3.bf16.msra.mxu0 %v1512_v26  ;;  %31 = vst.msk [vmem:[#allocation2 + $0x28] sm:$0xff] %vm25_vm0, %v1578_v12  ;;  %32 = vst.msk [vmem:[#allocation2 + $0x30] sm:$0xff] %vm25_vm0, %v1578_v12 }
  0x1d   :  { %1390 = vmatpush3.bf16.msra.mxu1 %v1513_v27  ;;  %1327 = vmatprep.subr.bf16.mxu0 %v1514_v28  ;;  %33 = vst.msk [vmem:[#allocation2 + $0x38] sm:$0xff] %vm25_vm0, %v1578_v12  ;;  %34 = vst.msk [vmem:[#allocation2 + $0x40] sm:$0xff] %vm25_vm0, %v1578_v12 }
  0x1e   :  { %1391 = vmatprep.subr.bf16.mxu1 %v1515_v29  ;;  %35 = vst.msk [vmem:[#allocation2 + $0x48] sm:$0xff] %vm25_vm0, %v1578_v12  ;;  %36 = vst.msk [vmem:[#allocation2 + $0x50] sm:$0xff] %vm25_vm0, %v1578_v12 }
  0x1f   :  { %37 = vst.msk [vmem:[#allocation2 + $0x58] sm:$0xff] %vm25_vm0, %v1578_v12  ;;  %38 = vst.msk [vmem:[#allocation2 + $0x60] sm:$0xff] %vm25_vm0, %v1578_v12 }
  0x20   :  { %1328 = vmatpush3.bf16.msra.mxu0 %v1516_v30  ;;  %39 = vst.msk [vmem:[#allocation2 + $0x68] sm:$0xff] %vm25_vm0, %v1578_v12  ;;  %40 = vst.msk [vmem:[#allocation2 + $0x70] sm:$0xff] %vm25_vm0, %v1578_v12 }
  0x21   :  { %1392 = vmatpush3.bf16.msra.mxu1 %v1517_v31  ;;  %1453 = vmatprep.subr.bf16.mxu0 %v1524_v36  ;;  %41 = vst.msk [vmem:[#allocation2 + $0x78] sm:$0xff] %vm25_vm0, %v1578_v12 }
  0x22   :  { %1477 = vmatprep.subr.bf16.mxu1 %v1524_v36 }
  0x23   :  { %652 = vmatmul.mubr.bf16.vlgmr.msra.gmra.mxu0 %v1518_v32 }
  0x24   :  { %749 = vmatmul.mubr.bf16.vlgmr.msra.gmra.mxu1 %v1521_v34  ;;  %1454 = vmatpush3.bf16.msra.mxu0 %v1524_v36 }
  0x25   :  { %1481 = vmatpush3.bf16.msra.mxu1 %v1524_v36  ;;  %659 = vmatprep.mubr.bf16.mxu0 %v1525_v37 }
  0x26   :  { %756 = vmatprep.mubr.bf16.mxu1 %v1527_v38  ;;  %1455 = vmatprep.subr.bf16.mxu0 %v1537_v42 }
  0x27   :  { %1478 = vmatprep.subr.bf16.mxu1 %v1537_v42 }
  0x28   :  { %1456 = vmatpush3.bf16.msra.mxu0 %v1537_v42 }
  0x29   :  { %1482 = vmatpush3.bf16.msra.mxu1 %v1537_v42  ;;  %1457 = vmatprep.subr.bf16.mxu0 %v1550_v46 }
  0x2a   :  { %1479 = vmatprep.subr.bf16.mxu1 %v1550_v46 }
  0x2b   :  { %660 = vmatmul.mubr.bf16.gmra.mxu0 %v1529_v39 }
  0x2c   :  { %757 = vmatmul.mubr.bf16.gmra.mxu1 %v1530_v40  ;;  %667 = vmatprep.mubr.bf16.mxu0 %v1531_v41 }
  0x2d   :  { %764 = vmatprep.mubr.bf16.mxu1 %v1533_v43  ;;  %1458 = vmatpush3.bf16.msra.mxu0 %v1550_v46 }
  0x2e   :  { %1483 = vmatpush3.bf16.msra.mxu1 %v1550_v46  ;;  %1459 = vmatprep.subr.bf16.mxu0 %v1563_v49 }
  0x2f   :  { %1480 = vmatprep.subr.bf16.mxu1 %v1563_v49 }
  0x31   :  { %1460 = vmatpush3.bf16.msra.mxu0 %v1563_v49 }
  0x32   :  { %1484 = vmatpush3.bf16.msra.mxu1 %v1563_v49 }
  0x33   :  { %668 = vmatmul.mubr.bf16.gmra.mxu0 %v1535_v44 }
  0x34   :  { %765 = vmatmul.mubr.bf16.gmra.mxu1 %v1536_v45  ;;  %675 = vmatprep.mubr.bf16.mxu0 %v1538_v47 }
  0x35   :  { %772 = vmatprep.mubr.bf16.mxu1 %v1540_v48 }
  0x3b   :  { %676 = vmatmul.mubr.bf16.gmra.mxu0 %v1542_v50 }
  0x3c   :  { %773 = vmatmul.mubr.bf16.gmra.mxu1 %v1543_v51  ;;  %683 = vmatprep.mubr.bf16.mxu0 %v1544_v52 }
  0x3d   :  { %780 = vmatprep.mubr.bf16.mxu1 %v1546_v53 }
  0x43   :  { %684 = vmatmul.mubr.bf16.gmra.mxu0 %v1548_v54 }
  0x44   :  { %781 = vmatmul.mubr.bf16.gmra.mxu1 %v1549_v55  ;;  %691 = vmatprep.mubr.bf16.mxu0 %v1551_v56 }
  0x45   :  { %788 = vmatprep.mubr.bf16.mxu1 %v1553_v57 }
  0x4b   :  { %692 = vmatmul.mubr.bf16.gmra.mxu0 %v1555_v58 }
  0x4c   :  { %789 = vmatmul.mubr.bf16.gmra.mxu1 %v1556_v59  ;;  %699 = vmatprep.mubr.bf16.mxu0 %v1557_v60 }
  0x4d   :  { %796 = vmatprep.mubr.bf16.mxu1 %v1559_v61 }
  0x53   :  { %700 = vmatmul.mubr.bf16.gmra.mxu0 %v1561_v62 }
  0x54   :  { %797 = vmatmul.mubr.bf16.gmra.mxu1 %v1562_v63  ;;  %707 = vmatprep.mubr.bf16.mxu0 %v1564_v0 }
  0x55   :  { %804 = vmatprep.mubr.bf16.mxu1 %v1566_v1 }
  0x5b   :  { %708 = vmatmul.mubr.bf16.gmra.mxu0 %v1568_v2  ;;  %v1950_v2 = vld [vmem:[%s2223_s4 + $0x8] sm:$0xff]  }
  0x5c   :  { %805 = vmatmul.mubr.bf16.gmra.mxu1 %v1569_v3  ;;  %1461 = vmatprep.mubr.msk.bf16.mxu0 %vm25_vm0, %v1570_v4  ;;  %v1957_v4 = vld [vmem:[%s2223_s4 + $0x28] sm:$0xff]  }
  0x5d   :  { %1469 = vmatprep.mubr.msk.bf16.mxu1 %vm25_vm0, %v1571_v5  ;;  %v1962_v5 = vld [vmem:[%s2223_s4] sm:$0xff]  }
  0x5e   :  { %2238 = vst [vmem:[#allocation10_spill] sm:$0xff] %v1962_v5 }
  0x63   :  { %1462 = vmatmul.mubr.msk.bf16.vlgmr.msra.gmra.mxu0 %vm25_vm0, %v1572_v6  ;;  %v1967_v6 = vld [vmem:[%s2223_s4 + $0x20] sm:$0xff]  }
  0x64   :  { %1470 = vmatmul.mubr.msk.bf16.vlgmr.msra.gmra.mxu1 %vm25_vm0, %v1573_v7  ;;  %1465 = vmatprep.mubr.msk.bf16.mxu0 %vm25_vm0, %v1574_v8  ;;  %2239 = vst [vmem:[#allocation11_spill] sm:$0xff] %v1967_v6 }
  0x65   :  { %1473 = vmatprep.mubr.msk.bf16.mxu1 %vm25_vm0, %v1575_v9  ;;  %v1976_v9 = vld [vmem:[%s2223_s4 + $0x18] sm:$0xff]  }
  0x6b   :  { %1466 = vmatmul.mubr.msk.bf16.gmra.mxu0 %vm25_vm0, %v1576_v10  ;;  %v1981_v10 = vld [vmem:[%s2223_s4 + $0x38] sm:$0xff]  }
  0x6c   :  { %1474 = vmatmul.mubr.msk.bf16.gmra.mxu1 %vm25_vm0, %v1577_v11 }
  0xe3   :  { %v1861_v13 = vpop.f32.mrf.mxu0 }
  0xe4   :  { %v1863_v14 = vpop.f32.mrf.mxu1 }
  0xe5   :  { %v1865_v15 = vpop.f32.mrf.mxu0 }
  0xe6   :  { %v1867_v16 = vpop.f32.mrf.mxu1 }
  0xe7   :  { %v1869_v17 = vpop.f32.mrf.mxu0 }
  0xe8   :  { %v1871_v18 = vpop.f32.mrf.mxu1 }
  0xe9   :  { %v1873_v19 = vpop.f32.mrf.mxu0 }
  0xea   :  { %v1875_v20 = vpop.f32.mrf.mxu1 }
  0xeb   :  { %v1877_v21 = vpop.f32.mrf.mxu0  ;;  %v1398_v12 = vadd.f32 %v1875_v20, %v1871_v18 }
  0xec   :  { %v1879_v22 = vpop.f32.mrf.mxu1 }
  0xed   :  { %v1881_v23 = vpop.f32.mrf.mxu0 }
  0xee   :  { %v1883_v24 = vpop.f32.mrf.mxu1  ;;  %v1337_v6 = vadd.f32 %v1881_v23, %v1877_v21 }
  0xef   :  { %v1885_v25 = vpop.f32.mrf.mxu0 }
  0xf0   :  { %v1887_v26 = vpop.f32.mrf.mxu1 }
  0xf1   :  { %v1889_v27 = vpop.f32.mrf.mxu0 }
  0xf2   :  { %v1891_v28 = vpop.f32.mrf.mxu1 }
  0xf3   :  { %v1893_v29 = vpop.f32.mrf.mxu0  ;;  %v1404_v18 = vadd.f32 %v1891_v28, %v1887_v26 }
  0xf4   :  { %v1895_v30 = vpop.f32.mrf.mxu1 }
  0xf5   :  { %v1897_v31 = vpop.f32.mrf.mxu0 }
  0xf6   :  { %v1899_v32 = vpop.f32.mrf.mxu1 }
  0xf7   :  { %v1901_v33 = vpop.f32.mrf.mxu0  ;;  %v1407_v20 = vadd.f32 %v1899_v32, %v1895_v30 }
  0xf8   :  { %v1903_v34 = vpop.f32.mrf.mxu1 }
  0xf9   :  { %2231 = vst [vmem:[#allocation3_spill] sm:$0xff] %v1903_v34  ;;  %v1905_v35 = vpop.f32.mrf.mxu0  ;;  %v1395_v34 = vadd.f32 %v1867_v16, %v1863_v14 }
  0xfa   :  { %v1907_v36 = vpop.f32.mrf.mxu1 }
  0xfb   :  { %2232 = vst [vmem:[#allocation4_spill] sm:$0xff] %v1907_v36  ;;  %v1909_v37 = vpop.f32.mrf.mxu0 }
  0xfc   :  { %v1911_v38 = vpop.f32.mrf.mxu1 }
  0xfd   :  { %v1913_v39 = vpop.f32.mrf.mxu0 }
  0xfe   :  { %v1915_v40 = vpop.f32.mrf.mxu1  ;;  %v1349_v26 = vadd.f32 %v1913_v39, %v1909_v37 }
  0xff   :  { %v1917_v41 = vpop.f32.mrf.mxu0  ;;  %v1413_v30 = vadd.f32 %v1915_v40, %v1911_v38 }
 0x100   :  { %v1919_v42 = vpop.f32.mrf.mxu1 }
 0x101   :  { %2233 = vst [vmem:[#allocation5_spill] sm:$0xff] %v1919_v42  ;;  %v1921_v43 = vpop.f32.mrf.mxu0 }
 0x102   :  { %2234 = vst [vmem:[#allocation6_spill] sm:$0xff] %v1921_v43  ;;  %v1923_v44 = vpop.f32.mrf.mxu1  ;;  %v1994_v43 = vld [vmem:[%s2223_s4 + $0x10] sm:$0xff]  }
 0x103   :  { %2235 = vst [vmem:[#allocation7_spill] sm:$0xff] %v1923_v44  ;;  %v1925_v45 = vpop.f32.mrf.mxu0  ;;  %v1284_v44 = vunpack.c.l.bf16 %v1994_v43 }
 0x104   :  { %v1927_v46 = vpop.f32.mrf.mxu1 }
 0x105   :  { %v1354_v47 = vpop.f32.mrf.mxu0 }
 0x106   :  { %v1418_v48 = vpop.f32.mrf.mxu1 }
 0x107   :  { %v1929_v49 = vpop.f32.mrf.mxu0  ;;  %v1419_v23 = vadd.f32 %v1418_v48, %v1927_v46  ;;  %v2039_v48 = vadd.f32 %v1905_v35, %v1901_v33 }
 0x108   :  { %v1931_v50 = vpop.f32.mrf.mxu1 }
 0x109   :  { %v1933_v51 = vpop.f32.mrf.mxu0 }
 0x10a   :  { %v1935_v52 = vpop.f32.mrf.mxu1 }
 0x10b   :  { %v1359_v53 = vpop.f32.mrf.mxu0  ;;  %v1422_v38 = vadd.f32 %v1935_v52, %v1931_v50  ;;  %v53_v52 = vld [vmem:[#allocation2 + $0x58] sm:$0xff] }
 0x10c   :  { %v1423_v54 = vpop.f32.mrf.mxu1 }
 0x10d   :  { %v1360_v55 = vpop.f32.mrf.mxu0 }
 0x10e   :  { %v1424_v56 = vpop.f32.mrf.mxu1  ;;  %v1361_v5 = vadd.f32 %v1360_v55, %v1359_v53  ;;  %v1289_v53 = vunpack.c.h.bf16 %v1976_v9 }
 0x10f   :  { %v1362_v57 = vpop.f32.mrf.mxu0  ;;  %v1425_v14 = vadd.f32 %v1424_v56, %v1423_v54  ;;  %v52_v56 = vld [vmem:[#allocation2 + $0x50] sm:$0xff] }
 0x110   :  { %v1426_v58 = vpop.f32.mrf.mxu1 }
 0x111   :  { %v1363_v59 = vpop.f32.mrf.mxu0  ;;  %v791_v46 = vadd.f32 %v1425_v14, %v1361_v5  ;;  %v50_v5 = vld [vmem:[#allocation2 + $0x40] sm:$0xff] }
 0x112   :  { %v1427_v60 = vpop.f32.mrf.mxu1  ;;  %v1364_v32 = vadd.f32 %v1363_v59, %v1362_v57  ;;  %v42_v57 = vld [vmem:[#allocation2] sm:$0xff] }
 0x113   :  { %v1937_v61 = vpop.f32.mrf.mxu0  ;;  %v1428_v54 = vadd.f32 %v1427_v60, %v1426_v58 }
 0x114   :  { %v1939_v62 = vpop.f32.mrf.mxu1 }
 0x115   :  { %v1941_v63 = vpop.f32.mrf.mxu0 }
 0x116   :  { %v1943_v0 = vpop.f32.mrf.mxu1 }
 0x117   :  { %v1945_v1 = vpop.f32.mrf.mxu0  ;;  %v1431_v50 = vadd.f32 %v1943_v0, %v1939_v62 }
 0x118   :  { %2236 = vst [vmem:[#allocation8_spill] sm:$0xff] %v1945_v1  ;;  %v1952_v3 = vpop.f32.mrf.mxu1  ;;  %v1999_v1 = vld [vmem:[%s2223_s4 + $0x30] sm:$0xff]  }
 0x119   :  { %2237 = vst [vmem:[#allocation9_spill] sm:$0xff] %v1952_v3  ;;  %v1969_v7 = vpop.f32.mrf.mxu0  ;;  %v1334_v3 = vadd.f32 %v1873_v19, %v1869_v17  ;;  %v1300_v42 = vunpack.c.l.bf16 %v1999_v1  ;;  %v1340_v17 = vadd.f32 %v1889_v27, %v1885_v25  ;;  %v1343_v19 = vadd.f32 %v1897_v31, %v1893_v29 }
 0x11a   :  { %2240 = vst [vmem:[#allocation12_spill] sm:$0xff] %v1969_v7  ;;  %v1971_v8 = vpop.f32.mrf.mxu1  ;;  %v1331_v7 = vadd.f32 %v1865_v15, %v1861_v13  ;;  %v1401_v13 = vadd.f32 %v1883_v24, %v1879_v22  ;;  %v1355_v22 = vadd.f32 %v1354_v47, %v1925_v45  ;;  %v44_v45 = vld [vmem:[#allocation2 + $0x10] sm:$0xff] }
 0x11b   :  { %2241 = vst [vmem:[#allocation13_spill] sm:$0xff] %v1971_v8  ;;  %v1371_v11 = vpop.f32.mrf.mxu0  ;;  %v754_v31 = vadd.f32 %v1398_v12, %v1334_v3  ;;  %v762_v37 = vadd.f32 %v1404_v18, %v1340_v17  ;;  %v2041_v39 = vadd.f32 %v1407_v20, %v1343_v19  ;;  %v794_v17 = vadd.f32 %v1428_v54, %v1364_v32 }
 0x11c   :  { %v1435_v8 = vpop.f32.mrf.mxu1  ;;  %v759_v28 = vadd.f32 %v1401_v13, %v1337_v6  ;;  %v751_v29 = vadd.f32 %v1395_v34, %v1331_v7  ;;  %v1358_v34 = vadd.f32 %v1933_v51, %v1929_v49  ;;  %v783_v59 = vadd.f32 %v1419_v23, %v1355_v22  ;;  %v45_v13 = vld [vmem:[#allocation2 + $0x18] sm:$0xff]  ;;  %v43_v22 = vld [vmem:[#allocation2 + $0x8] sm:$0xff] }
 0x11d   :  { %v1372_v36 = vpop.f32.mrf.mxu0  ;;  %v775_v18 = vadd.f32 %v1413_v30, %v1349_v26  ;;  %v1367_v49 = vadd.f32 %v1941_v63, %v1937_v61  ;;  %v2243_v61 = vld [vmem:[#allocation5_spill] sm:$0xff]  ;;  %v2244_v63 = vld [vmem:[#allocation7_spill] sm:$0xff] }
 0x11e   :  { %v1436_v15 = vpop.f32.mrf.mxu1  ;;  %v1373_v60 = vadd.f32 %v1372_v36, %v1371_v11  ;;  %v2242_v11 = vld [vmem:[#allocation6_spill] sm:$0xff]  ;;  %v1416_v26 = vadd.f32 %v2244_v63, %v2243_v61 }
 0x11f   :  { %v2015_v16 = vpop.f32.mrf.mxu0  ;;  %v1437_v3 = vadd.f32 %v1436_v15, %v1435_v8  ;;  %v1352_v15 = vadd.f32 %v2242_v11, %v1917_v41 }
 0x120   :  { %v2027_v21 = vpop.f32.mrf.mxu1 }
 0x121   :  { %v1375_v24 = vpop.f32.mrf.mxu0  ;;  %v807_v30 = vadd.f32 %v1437_v3, %v1373_v60  ;;  %v2071_v60 = vld [vmem:[%s2224_s2] ss:$0 sm:$0xff] }
 0x122   :  { %v1439_v27 = vpop.f32.mrf.mxu1  ;;  %v1376_v32 = vadd.f32 %v1375_v24, %v2015_v16  ;;  %v2248_v16 = vld [vmem:[#allocation12_spill] sm:$0xff] }
 0x123   :  { %v1463_v47 = vpop.f32.mrf.mxu0  ;;  %v1440_v41 = vadd.f32 %v1439_v27, %v2027_v21  ;;  %v2249_v21 = vld [vmem:[#allocation9_spill] sm:$0xff] }
 0x124   :  { %v856_v55 = vadd.f32 %v1463_v47, %v759_v28  ;;  %v1471_v25 = vpop.f32.mrf.mxu1  ;;  %v51_v28 = vld [vmem:[#allocation2 + $0x48] sm:$0xff]  ;;  %v48_v47 = vld [vmem:[#allocation2 + $0x30] sm:$0xff] }
 0x125   :  { %v888_v40 = vadd.f32 %v1471_v25, %v791_v46  ;;  %v847_v58 = vpop.f32.mrf.mxu0  ;;  %v786_v25 = vadd.f32 %v1422_v38, %v1358_v34  ;;  %v56_v38 = vld [vmem:[#allocation2 + $0x70] sm:$0xff] }
 0x126   :  { %v912_v33 = vadd.f32 %v856_v55, %v44_v45  ;;  %v848_v35 = vadd.f32 %v847_v58, %v751_v29  ;;  %v879_v6 = vpop.f32.mrf.mxu1  ;;  %v2245_v55 = vld [vmem:[#allocation3_spill] sm:$0xff]  ;;  %v2247_v58 = vld [vmem:[#allocation8_spill] sm:$0xff]  ;;  %v2250_v27 = vld [vmem:[#allocation13_spill] sm:$0xff] }
 0x127   :  { %v920_v7 = vadd.f32 %v888_v40, %v52_v56  ;;  %v880_v12 = vadd.f32 %v879_v6, %v783_v59  ;;  %v1464_v14 = vpop.f32.mrf.mxu0  ;;  %v2246_v56 = vld [vmem:[#allocation4_spill] sm:$0xff]  ;;  %v1370_v24 = vadd.f32 %v2248_v16, %v2247_v58  ;;  %v1434_v59 = vadd.f32 %v2250_v27, %v2249_v21 }
 0x128   :  { %928 = vst.msk [vmem:[#allocation2 + $0x10] sm:$0xff] %vm25_vm0, %v912_v33  ;;  %v910_v36 = vadd.f32 %v848_v35, %v42_v57  ;;  %v859_v51 = vadd.f32 %v1464_v14, %v762_v37  ;;  %v1472_v8 = vpop.f32.mrf.mxu1  ;;  %v1410_v37 = vadd.f32 %v2246_v56, %v2245_v55  ;;  %v799_v57 = vadd.f32 %v1431_v50, %v1367_v49  ;;  %v46_v35 = vld [vmem:[#allocation2 + $0x20] sm:$0xff] }
 0x129   :  { %936 = vst.msk [vmem:[#allocation2 + $0x50] sm:$0xff] %vm25_vm0, %v920_v7  ;;  %v918_v19 = vadd.f32 %v880_v12, %v50_v5  ;;  %v891_v20 = vadd.f32 %v1472_v8, %v794_v17  ;;  %v850_v23 = vpop.f32.mrf.mxu0  ;;  %v54_v12 = vld [vmem:[#allocation2 + $0x60] sm:$0xff]  ;;  %v778_v14 = vadd.f32 %v1416_v26, %v1352_v15  ;;  %v1285_v17 = vunpack.c.h.bf16 %v1994_v43 }
 0x12a   :  { %926 = vst.msk [vmem:[#allocation2] sm:$0xff] %vm25_vm0, %v910_v36  ;;  %v913_v62 = vadd.f32 %v859_v51, %v45_v13  ;;  %v851_v0 = vadd.f32 %v850_v23, %v754_v31  ;;  %v882_v29 = vpop.f32.mrf.mxu1  ;;  %v2080_v49 = vld [vmem:[%s2225_s3] ss:$0 sm:$0xff]  ;;  %v49_v51 = vld [vmem:[#allocation2 + $0x38] sm:$0xff]  ;;  %v810_v8 = vadd.f32 %v1440_v41, %v1376_v32 }
 0x12b   :  { %934 = vst.msk [vmem:[#allocation2 + $0x40] sm:$0xff] %vm25_vm0, %v918_v19  ;;  %v921_v54 = vadd.f32 %v891_v20, %v53_v52  ;;  %v883_v45 = vadd.f32 %v882_v29, %v786_v25  ;;  %v1467_v46 = vpop.f32.mrf.mxu0  ;;  %v770_v25 = vadd.f32 %v1410_v37, %v2039_v48  ;;  %v802_v29 = vadd.f32 %v1434_v59, %v1370_v24  ;;  %v55_v48 = vld [vmem:[#allocation2 + $0x68] sm:$0xff] }
 0x12c   :  { %929 = vst.msk [vmem:[#allocation2 + $0x18] sm:$0xff] %vm25_vm0, %v913_v62  ;;  %v911_v34 = vadd.f32 %v851_v0, %v43_v22  ;;  %v872_v31 = vadd.f32 %v1467_v46, %v775_v18  ;;  %v1475_v40 = vpop.f32.mrf.mxu1  ;;  %v57_v22 = vld [vmem:[#allocation2 + $0x78] sm:$0xff]  ;;  %v47_v0 = vld [vmem:[#allocation2 + $0x28] sm:$0xff]  ;;  %v2252_v24 = vunpack.c.l.bf16 %v1957_v4 }
 0x12d   :  { %937 = vst.msk [vmem:[#allocation2 + $0x58] sm:$0xff] %vm25_vm0, %v921_v54  ;;  %v919_v3 = vadd.f32 %v883_v45, %v51_v28  ;;  %v904_v33 = vadd.f32 %v1475_v40, %v807_v30  ;;  %v863_v5 = vpop.f32.mrf.mxu0 }
 0x12e   :  { %927 = vst.msk [vmem:[#allocation2 + $0x8] sm:$0xff] %vm25_vm0, %v911_v34  ;;  %v916_v6 = vadd.f32 %v872_v31, %v48_v47  ;;  %v864_v7 = vadd.f32 %v863_v5, %v2041_v39  ;;  %v895_v13 = vpop.f32.mrf.mxu1  ;;  %v1301_v39 = vunpack.c.h.bf16 %v1999_v1  ;;  %v2251_v31 = vunpack.c.l.bf16 %v1950_v2  ;;  %v2253_v5 = vld [vmem:[#allocation10_spill] sm:$0xff] }
 0x12f   :  { %v947_v18 = vld [vmem:[#allocation2 + $0x10] sm:$0xff]  ;;  %935 = vst.msk [vmem:[#allocation2 + $0x48] sm:$0xff] %vm25_vm0, %v919_v3  ;;  %v924_v50 = vadd.f32 %v904_v33, %v56_v38  ;;  %v896_v36 = vadd.f32 %v895_v13, %v799_v57  ;;  %v1468_v52 = vpop.f32.mrf.mxu0 }
 0x130   :  { %v970_v11 = vmul.f32 %v2071_v60, %v947_v18  ;;  %v955_v15 = vld [vmem:[#allocation2 + $0x50] sm:$0xff]  ;;  %932 = vst.msk [vmem:[#allocation2 + $0x30] sm:$0xff] %vm25_vm0, %v916_v6  ;;  %v914_v19 = vadd.f32 %v864_v7, %v46_v35  ;;  %v875_v20 = vadd.f32 %v1468_v52, %v778_v14  ;;  %v1476_v23 = vpop.f32.mrf.mxu1  ;;  %v2254_v6 = vunpack.c.l.bf16 %v2253_v5 }
 0x131   :  { %v978_v61 = vmul.f32 %v2071_v60, %v955_v15  ;;  %v945_v63 = vld [vmem:[#allocation2] sm:$0xff]  ;;  %940 = vst.msk [vmem:[#allocation2 + $0x70] sm:$0xff] %vm25_vm0, %v924_v50  ;;  %v922_v26 = vadd.f32 %v896_v36, %v54_v12  ;;  %v907_v62 = vadd.f32 %v1476_v23, %v810_v8  ;;  %v866_v28 = vpop.f32.mrf.mxu0 }
 0x132   :  { %v993_v30 = vadd.f32 %v2080_v49, %v970_v11  ;;  %v968_v32 = vmul.f32 %v2071_v60, %v945_v63  ;;  %v953_v41 = vld [vmem:[#allocation2 + $0x40] sm:$0xff]  ;;  %930 = vst.msk [vmem:[#allocation2 + $0x20] sm:$0xff] %vm25_vm0, %v914_v19  ;;  %v917_v54 = vadd.f32 %v875_v20, %v49_v51  ;;  %v867_v45 = vadd.f32 %v866_v28, %v770_v25  ;;  %v898_v47 = vpop.f32.mrf.mxu1 }
 0x133   :  { %v1001_v46 = vadd.f32 %v2080_v49, %v978_v61  ;;  %v976_v55 = vmul.f32 %v2071_v60, %v953_v41  ;;  %v948_v56 = vld [vmem:[#allocation2 + $0x18] sm:$0xff]  ;;  %938 = vst.msk [vmem:[#allocation2 + $0x60] sm:$0xff] %vm25_vm0, %v922_v26  ;;  %v925_v37 = vadd.f32 %v907_v62, %v57_v22  ;;  %v899_v34 = vadd.f32 %v898_v47, %v802_v29  ;;  %v2255_v50 = vld [vmem:[#allocation11_spill] sm:$0xff] }
 0x134   :  { %v1041_v38 = vadd.f32 %v2251_v31, %v993_v30  ;;  %v991_v40 = vadd.f32 %v2080_v49, %v968_v32  ;;  %v971_v57 = vmul.f32 %v2071_v60, %v948_v56  ;;  %v956_v58 = vld [vmem:[#allocation2 + $0x58] sm:$0xff]  ;;  %933 = vst.msk [vmem:[#allocation2 + $0x38] sm:$0xff] %vm25_vm0, %v917_v54  ;;  %v915_v16 = vadd.f32 %v867_v45, %v47_v0 }
 0x135   :  { %v1049_v21 = vadd.f32 %v2252_v24, %v1001_v46  ;;  %v999_v27 = vadd.f32 %v2080_v49, %v976_v55  ;;  %v979_v59 = vmul.f32 %v2071_v60, %v956_v58  ;;  %v946_v3 = vld [vmem:[#allocation2 + $0x8] sm:$0xff]  ;;  %941 = vst.msk [vmem:[#allocation2 + $0x78] sm:$0xff] %vm25_vm0, %v925_v37  ;;  %v923_v33 = vadd.f32 %v899_v34, %v55_v48 }
 0x136   :  { %v1057_v35 = vmax.f32 %v1041_v38, 0.0  ;;  %v1039_v7 = vadd.f32 %v2254_v6, %v991_v40  ;;  %v994_v12 = vadd.f32 %v2080_v49, %v971_v57  ;;  %v969_v13 = vmul.f32 %v2071_v60, %v946_v3  ;;  %v954_v14 = vld [vmem:[#allocation2 + $0x48] sm:$0xff]  ;;  %931 = vst.msk [vmem:[#allocation2 + $0x28] sm:$0xff] %vm25_vm0, %v915_v16 }
 0x137   :  { %v1065_v18 = vmax.f32 %v1049_v21, 0.0  ;;  %v2256_v36 = vunpack.c.l.bf16 %v2255_v50  ;;  %v1002_v52 = vadd.f32 %v2080_v49, %v979_v59  ;;  %v977_v8 = vmul.f32 %v2071_v60, %v954_v14  ;;  %v951_v11 = vld [vmem:[#allocation2 + $0x30] sm:$0xff]  ;;  %939 = vst.msk [vmem:[#allocation2 + $0x68] sm:$0xff] %vm25_vm0, %v923_v33 }
 0x138   :  { %v1260_v15 = vpack.c.bf16 %v1057_v35, %v1057_v35  ;;  %v1055_v19 = vmax.f32 %v1039_v7, 0.0  ;;  %v2257_v20 = vunpack.c.h.bf16 %v1950_v2  ;;  %v992_v23 = vadd.f32 %v2080_v49, %v969_v13  ;;  %v959_v25 = vld [vmem:[#allocation2 + $0x70] sm:$0xff] }
 0x139   :  { %v1047_v51 = vadd.f32 %v2256_v36, %v999_v27  ;;  %v1268_v61 = vpack.c.bf16 %v1065_v18, %v1065_v18  ;;  %v2258_v26 = vunpack.c.h.bf16 %v1957_v4  ;;  %v1000_v0 = vadd.f32 %v2080_v49, %v977_v8  ;;  %v949_v28 = vld [vmem:[#allocation2 + $0x20] sm:$0xff] }
 0x13a   :  { %v1042_v22 = vadd.f32 %v2257_v20, %v994_v12  ;;  %1138 = vst.msk [vmem:[%s2226_s5 + $0x8] sm:$0xf] %vm1135_vm1, %v1260_v15  ;;  %v1258_v29 = vpack.c.bf16 %v1055_v19, %v1055_v19  ;;  %v2259_v2 = vunpack.c.h.bf16 %v2253_v5  ;;  %v974_v41 = vmul.f32 %v2071_v60, %v951_v11  ;;  %v957_v54 = vld [vmem:[#allocation2 + $0x60] sm:$0xff] }
 0x13b   :  { %v1063_v63 = vmax.f32 %v1047_v51, 0.0  ;;  %v1050_v62 = vadd.f32 %v2258_v26, %v1002_v52  ;;  %1146 = vst.msk [vmem:[%s2226_s5 + $0x28] sm:$0xf] %vm1135_vm1, %v1268_v61  ;;  %v2260_v48 = vunpack.c.h.bf16 %v2255_v50  ;;  %v982_v46 = vmul.f32 %v2071_v60, %v959_v25  ;;  %v952_v55 = vld [vmem:[#allocation2 + $0x38] sm:$0xff] }
 0x13c   :  { %v1058_v30 = vmax.f32 %v1042_v22, 0.0  ;;  %v1040_v32 = vadd.f32 %v2259_v2, %v992_v23  ;;  %1136 = vst.msk [vmem:[%s2226_s5] sm:$0xf] %vm1135_vm1, %v1258_v29  ;;  %v997_v34 = vadd.f32 %v2080_v49, %v974_v41  ;;  %v972_v31 = vmul.f32 %v2071_v60, %v949_v28  ;;  %v960_v38 = vld [vmem:[#allocation2 + $0x78] sm:$0xff] }
 0x13d   :  { %v1266_v4 = vpack.c.bf16 %v1063_v63, %v1063_v63  ;;  %v1066_v45 = vmax.f32 %v1050_v62, 0.0  ;;  %v1048_v47 = vadd.f32 %v2260_v48, %v1000_v0  ;;  %v1005_v58 = vadd.f32 %v2080_v49, %v982_v46  ;;  %v950_v24 = vld [vmem:[#allocation2 + $0x28] sm:$0xff] }
 0x13e   :  { %v1261_v56 = vpack.c.bf16 %v1058_v30, %v1058_v30  ;;  %v1056_v37 = vmax.f32 %v1040_v32, 0.0  ;;  %v980_v16 = vmul.f32 %v2071_v60, %v957_v54  ;;  %v2261_v27 = vunpack.c.l.bf16 %v1976_v9  ;;  %v958_v35 = vld [vmem:[#allocation2 + $0x68] sm:$0xff] }
 0x13f   :  { %1144 = vst.msk [vmem:[%s2226_s5 + $0x20] sm:$0xf] %vm1135_vm1, %v1266_v4  ;;  %v1269_v40 = vpack.c.bf16 %v1066_v45, %v1066_v45  ;;  %v1064_v57 = vmax.f32 %v1048_v47, 0.0  ;;  %v995_v3 = vadd.f32 %v2080_v49, %v972_v31  ;;  %v975_v33 = vmul.f32 %v2071_v60, %v952_v55 }
 0x140   :  { %1139 = vst.msk [vmem:[%s2226_s5 + $0xc] sm:$0xf] %vm1135_vm1, %v1261_v56  ;;  %v1259_v21 = vpack.c.bf16 %v1056_v37, %v1056_v37  ;;  %v1045_v59 = vadd.f32 %v2261_v27, %v997_v34  ;;  %v2262_v6 = vunpack.c.l.bf16 %v1981_v10  ;;  %v1003_v12 = vadd.f32 %v2080_v49, %v980_v16 }
 0x141   :  { %1147 = vst.msk [vmem:[%s2226_s5 + $0x2c] sm:$0xf] %vm1135_vm1, %v1269_v40  ;;  %v1267_v5 = vpack.c.bf16 %v1064_v57, %v1064_v57  ;;  %v983_v13 = vmul.f32 %v2071_v60, %v960_v38  ;;  %v1043_v18 = vadd.f32 %v1284_v44, %v995_v3  ;;  %v998_v50 = vadd.f32 %v2080_v49, %v975_v33 }
 0x142   :  { %v1053_v7 = vadd.f32 %v2262_v6, %v1005_v58  ;;  %1137 = vst.msk [vmem:[%s2226_s5 + $0x4] sm:$0xf] %vm1135_vm1, %v1259_v21  ;;  %v1061_v14 = vmax.f32 %v1045_v59, 0.0  ;;  %v973_v36 = vmul.f32 %v2071_v60, %v950_v24  ;;  %v1051_v52 = vadd.f32 %v1300_v42, %v1003_v12 }
 0x143   :  { %1145 = vst.msk [vmem:[%s2226_s5 + $0x24] sm:$0xf] %vm1135_vm1, %v1267_v5  ;;  %v1006_v8 = vadd.f32 %v2080_v49, %v983_v13  ;;  %v981_v11 = vmul.f32 %v2071_v60, %v958_v35  ;;  %v1059_v19 = vmax.f32 %v1043_v18, 0.0  ;;  %v1046_v44 = vadd.f32 %v1289_v53, %v998_v50 }
 0x144   :  { %v1069_v51 = vmax.f32 %v1053_v7, 0.0  ;;  %v1264_v15 = vpack.c.bf16 %v1061_v14, %v1061_v14  ;;  %v996_v20 = vadd.f32 %v2080_v49, %v973_v36  ;;  %v1067_v23 = vmax.f32 %v1051_v52, 0.0 }
 0x145   :  { %v2263_v25 = vunpack.c.h.bf16 %v1981_v10  ;;  %v1004_v63 = vadd.f32 %v2080_v49, %v981_v11  ;;  %v1262_v42 = vpack.c.bf16 %v1059_v19, %v1059_v19  ;;  %v1062_v60 = vmax.f32 %v1046_v44, 0.0 }
 0x146   :  { %v1272_v22 = vpack.c.bf16 %v1069_v51, %v1069_v51  ;;  %1142 = vst.msk [vmem:[%s2226_s5 + $0x18] sm:$0xf] %vm1135_vm1, %v1264_v15  ;;  %v1044_v9 = vadd.f32 %v1285_v17, %v996_v20  ;;  %v1270_v53 = vpack.c.bf16 %v1067_v23, %v1067_v23 }
 0x147   :  { %v1054_v61 = vadd.f32 %v2263_v25, %v1006_v8  ;;  %v1052_v49 = vadd.f32 %v1301_v39, %v1004_v63  ;;  %1140 = vst.msk [vmem:[%s2226_s5 + $0x10] sm:$0xf] %vm1135_vm1, %v1262_v42  ;;  %v1265_v26 = vpack.c.bf16 %v1062_v60, %v1062_v60 }
 0x148   :  { %1150 = vst.msk [vmem:[%s2226_s5 + $0x38] sm:$0xf] %vm1135_vm1, %v1272_v22  ;;  %v1060_v62 = vmax.f32 %v1044_v9, 0.0  ;;  %1148 = vst.msk [vmem:[%s2226_s5 + $0x30] sm:$0xf] %vm1135_vm1, %v1270_v53 }
 0x149   :  { %v1070_v10 = vmax.f32 %v1054_v61, 0.0  ;;  %v1068_v17 = vmax.f32 %v1052_v49, 0.0  ;;  %1143 = vst.msk [vmem:[%s2226_s5 + $0x1c] sm:$0xf] %vm1135_vm1, %v1265_v26 }
 0x14a   :  { %v1263_v1 = vpack.c.bf16 %v1060_v62, %v1060_v62 }
 0x14b   :  { %v1273_v43 = vpack.c.bf16 %v1070_v10, %v1070_v10  ;;  %v1271_v39 = vpack.c.bf16 %v1068_v17, %v1068_v17 }
 0x14c   :  { %1141 = vst.msk [vmem:[%s2226_s5 + $0x14] sm:$0xf] %vm1135_vm1, %v1263_v1 }
 0x14d   :  { %1151 = vst.msk [vmem:[%s2226_s5 + $0x3c] sm:$0xf] %vm1135_vm1, %v1273_v43  ;;  %1149 = vst.msk [vmem:[%s2226_s5 + $0x34] sm:$0xf] %vm1135_vm1, %v1271_v39 }

// kernel: _forward.32
= control target key start
LH: loop header
LB: loop body
LE: loop exit
PB: predicated region body
PF: predicated region fallthrough
CT: control target
= control target key end

     0   :  { %vm380_vm0 = vcmask 523264   ;;  %s967_s1 = inlined_call_operand.vmem [shape: bf16[576,128], index: 1, kind: input, shape index: {}]   ;;  %s968_s0 = inlined_call_operand.vmem [shape: bf16[32,576], index: 0, kind: input, shape index: {}]   ;;  %s969_s2 = inlined_call_operand.vmem [shape: f32[1,128], index: 2, kind: input, shape index: {}]   ;;  %s970_s3 = inlined_call_operand.vmem [shape: f32[1,128], index: 3, kind: input, shape index: {}]   ;;  %s971_s4 = inlined_call_operand.vmem [shape: bf16[32,128], index: 4, kind: output, shape index: {}]  }
   0x1   :  { %v742_v0 = vld [vmem:[%s967_s1 + $0x78] sm:$0xff]   ;;  %v746_v4 = vld [vmem:[%s967_s1 + $0x70] sm:$0xff]   ;;  %v750_v8 = vld [vmem:[%s967_s1 + $0x68] sm:$0xff]  }
   0x2   :  { %v743_v1 = vld [vmem:[%s967_s1 + $0xf8] sm:$0xff]   ;;  %668 = vmatprep.subr.bf16.mxu0 %v742_v0  ;;  %v747_v5 = vld [vmem:[%s967_s1 + $0xf0] sm:$0xff]   ;;  %v751_v9 = vld [vmem:[%s967_s1 + $0xe8] sm:$0xff]  }
   0x3   :  { %v744_v2 = vld [vmem:[%s967_s1 + $0x38] sm:$0xff]   ;;  %696 = vmatprep.subr.bf16.mxu1 %v743_v1  ;;  %v748_v6 = vld [vmem:[%s967_s1 + $0x30] sm:$0xff]   ;;  %v752_v10 = vld [vmem:[%s967_s1 + $0x28] sm:$0xff]  }
   0x4   :  { %v745_v3 = vld [vmem:[%s967_s1 + $0xb8] sm:$0xff]   ;;  %669 = vmatpush3.bf16.msra.mxu0 %v744_v2  ;;  %v749_v7 = vld [vmem:[%s967_s1 + $0xb0] sm:$0xff]   ;;  %v753_v11 = vld [vmem:[%s967_s1 + $0xa8] sm:$0xff]  }
   0x5   :  { %697 = vmatpush3.bf16.msra.mxu1 %v745_v3  ;;  %670 = vmatprep.subr.bf16.mxu0 %v746_v4  ;;  %v754_v12 = vld [vmem:[%s967_s1 + $0x60] sm:$0xff]   ;;  %v758_v16 = vld [vmem:[%s967_s1 + $0x58] sm:$0xff]   ;;  %v762_v20 = vld [vmem:[%s967_s1 + $0x50] sm:$0xff]  }
   0x6   :  { %698 = vmatprep.subr.bf16.mxu1 %v747_v5  ;;  %v755_v13 = vld [vmem:[%s967_s1 + $0xe0] sm:$0xff]   ;;  %v759_v17 = vld [vmem:[%s967_s1 + $0xd8] sm:$0xff]   ;;  %v763_v21 = vld [vmem:[%s967_s1 + $0xd0] sm:$0xff]  }
   0x7   :  { %v756_v14 = vld [vmem:[%s967_s1 + $0x20] sm:$0xff]   ;;  %v760_v18 = vld [vmem:[%s967_s1 + $0x18] sm:$0xff]   ;;  %v764_v22 = vld [vmem:[%s967_s1 + $0x10] sm:$0xff]  }
   0x8   :  { %671 = vmatpush3.bf16.msra.mxu0 %v748_v6  ;;  %v757_v15 = vld [vmem:[%s967_s1 + $0xa0] sm:$0xff]   ;;  %v761_v19 = vld [vmem:[%s967_s1 + $0x98] sm:$0xff]   ;;  %v765_v23 = vld [vmem:[%s967_s1 + $0x90] sm:$0xff]  }
   0x9   :  { %699 = vmatpush3.bf16.msra.mxu1 %v749_v7  ;;  %672 = vmatprep.subr.bf16.mxu0 %v750_v8  ;;  %v766_v24 = vld [vmem:[%s967_s1 + $0x48] sm:$0xff]   ;;  %v770_v28 = vld [vmem:[%s967_s1 + $0x40] sm:$0xff]   ;;  %v780_v36 = vld [vmem:[%s967_s1 + $0x118] sm:$0xff]  }
   0xa   :  { %700 = vmatprep.subr.bf16.mxu1 %v751_v9  ;;  %v767_v25 = vld [vmem:[%s967_s1 + $0xc8] sm:$0xff]   ;;  %v771_v29 = vld [vmem:[%s967_s1 + $0xc0] sm:$0xff]   ;;  %v781_v37 = vld [vmem:[%s967_s1 + $0x110] sm:$0xff]  }
   0xb   :  { %v768_v26 = vld [vmem:[%s967_s1 + $0x8] sm:$0xff]   ;;  %v772_v30 = vld [vmem:[%s967_s1] sm:$0xff]  }
   0xc   :  { %673 = vmatpush3.bf16.msra.mxu0 %v752_v10  ;;  %v769_v27 = vld [vmem:[%s967_s1 + $0x88] sm:$0xff]   ;;  %v773_v31 = vld [vmem:[%s967_s1 + $0x80] sm:$0xff]  }
   0xd   :  { %701 = vmatpush3.bf16.msra.mxu1 %v753_v11  ;;  %674 = vmatprep.subr.bf16.mxu0 %v754_v12  ;;  %v774_v32 = vld [vmem:[%s968_s0] ss:$20 sps:$4 sm:$0xff]   ;;  %v776_v33 = vld [vmem:[%s968_s0 + $0x4] ss:$20 sps:$4 sm:$0xff]   ;;  %v777_v34 = vld [vmem:[%s968_s0 + $0x8] ss:$20 sps:$4 sm:$0xff]  }
   0xe   :  { %702 = vmatprep.subr.bf16.mxu1 %v755_v13  ;;  %v779_v35 = vld [vmem:[%s968_s0 + $0xc] ss:$20 sps:$4 sm:$0xff]   ;;  %419 = vmatprep.mubr.bf16.mxu0 %v776_v33  ;;  %v784_v39 = vld [vmem:[%s968_s0 + $0x34] ss:$20 sps:$4 sm:$0xff]   ;;  %v787_v42 = vld [vmem:[%s968_s0 + $0x30] ss:$20 sps:$4 sm:$0xff]  }
   0xf   :  { %468 = vmatprep.mubr.bf16.mxu1 %v779_v35  ;;  %v782_v38 = vld [vmem:[%s968_s0 + $0x2c] ss:$20 sps:$4 sm:$0xff]   ;;  %v786_v40 = vld [vmem:[%s968_s0 + $0x28] ss:$20 sps:$4 sm:$0xff]   ;;  %v790_v43 = vld [vmem:[%s968_s0 + $0x10] ss:$20 sps:$4 sm:$0xff]  }
  0x10   :  { %675 = vmatpush3.bf16.msra.mxu0 %v756_v14  ;;  %v788_v41 = vld [vmem:[%s967_s1 + $0x108] sm:$0xff]   ;;  %v789_v44 = vld [vmem:[%s967_s1 + $0x100] sm:$0xff]  }
  0x11   :  { %703 = vmatpush3.bf16.msra.mxu1 %v757_v15  ;;  %676 = vmatprep.subr.bf16.mxu0 %v758_v16  ;;  %v791_v45 = vld [vmem:[%s968_s0 + $0x38] ss:$20 sps:$4 sm:$0xff]   ;;  %v647_v6 = vld [vmem:[%s969_s2] ss:$0 sm:$0xff] }
  0x12   :  { %704 = vmatprep.subr.bf16.mxu1 %v759_v17  ;;  %v648_v15 = vld [vmem:[%s970_s3] ss:$0 sm:$0xff] }
  0x14   :  { %677 = vmatpush3.bf16.msra.mxu0 %v760_v18 }
  0x15   :  { %705 = vmatpush3.bf16.msra.mxu1 %v761_v19  ;;  %678 = vmatprep.subr.bf16.mxu0 %v762_v20 }
  0x16   :  { %706 = vmatprep.subr.bf16.mxu1 %v763_v21 }
  0x18   :  { %679 = vmatpush3.bf16.msra.mxu0 %v764_v22 }
  0x19   :  { %707 = vmatpush3.bf16.msra.mxu1 %v765_v23  ;;  %680 = vmatprep.subr.bf16.mxu0 %v766_v24 }
  0x1a   :  { %708 = vmatprep.subr.bf16.mxu1 %v767_v25 }
  0x1c   :  { %681 = vmatpush3.bf16.msra.mxu0 %v768_v26 }
  0x1d   :  { %709 = vmatpush3.bf16.msra.mxu1 %v769_v27  ;;  %682 = vmatprep.subr.bf16.mxu0 %v770_v28 }
  0x1e   :  { %710 = vmatprep.subr.bf16.mxu1 %v771_v29 }
  0x20   :  { %683 = vmatpush3.bf16.msra.mxu0 %v772_v30 }
  0x21   :  { %711 = vmatpush3.bf16.msra.mxu1 %v773_v31  ;;  %730 = vmatprep.subr.bf16.mxu0 %v780_v36 }
  0x23   :  { %420 = vmatmul.mubr.bf16.vlgmr.msra.gmra.mxu0 %v774_v32 }
  0x24   :  { %469 = vmatmul.mubr.bf16.vlgmr.msra.gmra.mxu1 %v777_v34  ;;  %731 = vmatpush3.bf16.msra.mxu0 %v780_v36 }
  0x25   :  { %732 = vmatprep.subr.bf16.mxu0 %v781_v37  ;;  %427 = vmatprep.mubr.bf16.mxu0 %v782_v38 }
  0x26   :  { %476 = vmatprep.mubr.bf16.mxu1 %v784_v39 }
  0x28   :  { %733 = vmatpush3.bf16.msra.mxu0 %v781_v37 }
  0x29   :  { %734 = vmatprep.subr.bf16.mxu0 %v788_v41 }
  0x2b   :  { %428 = vmatmul.mubr.bf16.gmra.mxu0 %v786_v40 }
  0x2c   :  { %477 = vmatmul.mubr.bf16.gmra.mxu1 %v787_v42  ;;  %738 = vmatprep.mubr.msk.bf16.mxu0 %vm380_vm0, %v790_v43 }
  0x2d   :  { %735 = vmatpush3.bf16.msra.mxu0 %v788_v41 }
  0x2e   :  { %736 = vmatprep.subr.bf16.mxu0 %v789_v44 }
  0x31   :  { %737 = vmatpush3.bf16.msra.mxu0 %v789_v44 }
  0x34   :  { %739 = vmatmul.mubr.msk.bf16.vlgmr.msra.gmra.mxu0 %vm380_vm0, %v791_v45 }
  0xe3   :  { %v684_v46 = vpop.f32.mrf.mxu0 }
  0xe4   :  { %v712_v47 = vpop.f32.mrf.mxu1 }
  0xe5   :  { %v685_v48 = vpop.f32.mrf.mxu0 }
  0xe6   :  { %v713_v49 = vpop.f32.mrf.mxu1  ;;  %v686_v62 = vadd.f32 %v685_v48, %v684_v46 }
  0xe7   :  { %v687_v50 = vpop.f32.mrf.mxu0  ;;  %v714_v63 = vadd.f32 %v713_v49, %v712_v47 }
  0xe8   :  { %v715_v51 = vpop.f32.mrf.mxu1 }
  0xe9   :  { %v688_v52 = vpop.f32.mrf.mxu0  ;;  %v471_v10 = vadd.f32 %v714_v63, %v686_v62 }
  0xea   :  { %v716_v53 = vpop.f32.mrf.mxu1  ;;  %v689_v7 = vadd.f32 %v688_v52, %v687_v50 }
  0xeb   :  { %v690_v54 = vpop.f32.mrf.mxu0  ;;  %v717_v8 = vadd.f32 %v716_v53, %v715_v51 }
  0xec   :  { %v718_v55 = vpop.f32.mrf.mxu1 }
  0xed   :  { %v691_v56 = vpop.f32.mrf.mxu0  ;;  %v474_v19 = vadd.f32 %v717_v8, %v689_v7 }
  0xee   :  { %v719_v57 = vpop.f32.mrf.mxu1  ;;  %v692_v58 = vadd.f32 %v691_v56, %v690_v54 }
  0xef   :  { %v720_v59 = vadd.f32 %v719_v57, %v718_v55  ;;  %v693_v60 = vpop.f32.mrf.mxu0 }
  0xf0   :  { %v721_v61 = vpop.f32.mrf.mxu1 }
  0xf1   :  { %v694_v0 = vpop.f32.mrf.mxu0  ;;  %v479_v4 = vadd.f32 %v720_v59, %v692_v58 }
  0xf2   :  { %v722_v1 = vpop.f32.mrf.mxu1  ;;  %v695_v2 = vadd.f32 %v694_v0, %v693_v60 }
  0xf3   :  { %v723_v3 = vadd.f32 %v722_v1, %v721_v61 }
  0xf4   :  { %v740_v5 = vpop.f32.mrf.mxu0 }
  0xf5   :  { %v528_v9 = vadd.f32 %v740_v5, %v479_v4  ;;  %v482_v14 = vadd.f32 %v723_v3, %v695_v2 }
  0xf6   :  { %v519_v11 = vpop.f32.mrf.mxu0 }
  0xf7   :  { %v558_v12 = vmul.f32 %v647_v6, %v528_v9  ;;  %v520_v13 = vadd.f32 %v519_v11, %v471_v10 }
  0xf8   :  { %v741_v16 = vpop.f32.mrf.mxu0 }
  0xf9   :  { %v556_v17 = vmul.f32 %v647_v6, %v520_v13  ;;  %v531_v18 = vadd.f32 %v741_v16, %v482_v14  ;;  %v569_v21 = vadd.f32 %v648_v15, %v558_v12 }
  0xfa   :  { %v522_v20 = vpop.f32.mrf.mxu0 }
  0xfb   :  { %v559_v22 = vmul.f32 %v647_v6, %v531_v18  ;;  %v523_v23 = vadd.f32 %v522_v20, %v474_v19  ;;  %v567_v24 = vadd.f32 %v648_v15, %v556_v17  ;;  %v573_v27 = vmax.f32 %v569_v21, 0.0 }
  0xfd   :  { %v570_v25 = vadd.f32 %v648_v15, %v559_v22  ;;  %v557_v26 = vmul.f32 %v647_v6, %v523_v23  ;;  %v571_v30 = vmax.f32 %v567_v24, 0.0 }
  0xff   :  { %v574_v28 = vmax.f32 %v570_v25, 0.0  ;;  %v568_v29 = vadd.f32 %v648_v15, %v557_v26 }
 0x101   :  { %v665_v31 = vpack.c.bf16 %v574_v28, %v573_v27  ;;  %v572_v32 = vmax.f32 %v568_v29, 0.0 }
 0x103   :  { %667 = vst [vmem:[%s971_s4 + $0x8] sm:$0xff] %v665_v31   ;;  %v660_v33 = vpack.c.bf16 %v572_v32, %v571_v30 }
 0x105   :  { %661 = vst [vmem:[%s971_s4] sm:$0xff] %v660_v33  }

// kernel: _forward.31
= control target key start
LH: loop header
LB: loop body
LE: loop exit
PB: predicated region body
PF: predicated region fallthrough
CT: control target
= control target key end

     0   :  { %vm76_vm0 = vcmask 523264   ;;  %s301_s1 = inlined_call_operand.vmem [shape: bf16[64,128], index: 1, kind: input, shape index: {}]   ;;  %s302_s0 = inlined_call_operand.vmem [shape: bf16[32,64], index: 0, kind: input, shape index: {}]   ;;  %s303_s2 = inlined_call_operand.vmem [shape: f32[1,128], index: 2, kind: input, shape index: {}]   ;;  %s304_s3 = inlined_call_operand.vmem [shape: f32[1,128], index: 3, kind: input, shape index: {}]   ;;  %s305_s4 = inlined_call_operand.vmem [shape: bf16[32,128], index: 4, kind: output, shape index: {}]  }
   0x1   :  { %v240_v0 = vld [vmem:[%s301_s1 + $0x18] sm:$0xff]   ;;  %v241_v1 = vld [vmem:[%s301_s1 + $0x10] sm:$0xff]   ;;  %v242_v2 = vld [vmem:[%s301_s1 + $0x8] sm:$0xff]  }
   0x2   :  { %228 = vmatprep.subr.bf16.mxu0 %v240_v0  ;;  %v244_v3 = vld [vmem:[%s302_s0] sm:$0xff]   ;;  %v245_v5 = vld [vmem:[%s302_s0 + $0x8] sm:$0xff]  }
   0x3   :  { %229 = vmatpush3.bf16.msra.mxu0 %v240_v0  ;;  %236 = vmatprep.mubr.msk.bf16.mxu0 %vm76_vm0, %v244_v3  ;;  %v243_v4 = vld [vmem:[%s301_s1] sm:$0xff]  }
   0x4   :  { %230 = vmatprep.subr.bf16.mxu0 %v241_v1  ;;  %v201_v7 = vld [vmem:[%s303_s2] ss:$0 sm:$0xff] }
   0x5   :  { %v202_v10 = vld [vmem:[%s304_s3] ss:$0 sm:$0xff] }
   0x7   :  { %231 = vmatpush3.bf16.msra.mxu0 %v241_v1 }
   0x8   :  { %232 = vmatprep.subr.bf16.mxu0 %v242_v2 }
   0xb   :  { %233 = vmatpush3.bf16.msra.mxu0 %v242_v2 }
   0xc   :  { %234 = vmatprep.subr.bf16.mxu0 %v243_v4 }
   0xf   :  { %235 = vmatpush3.bf16.msra.mxu0 %v243_v4 }
  0x12   :  { %237 = vmatmul.mubr.msk.bf16.vlgmr.msra.gmra.mxu0 %vm76_vm0, %v245_v5 }
  0xd2   :  { %v238_v6 = vpop.f32.mrf.mxu0 }
  0xd3   :  { %v156_v9 = vmul.f32 %v238_v6, %v201_v7 }
  0xd4   :  { %v117_v8 = vpop.f32.mrf.mxu0 }
  0xd5   :  { %v154_v12 = vmul.f32 %v201_v7, %v117_v8  ;;  %v167_v15 = vadd.f32 %v202_v10, %v156_v9 }
  0xd6   :  { %v239_v11 = vpop.f32.mrf.mxu0 }
  0xd7   :  { %v157_v13 = vmul.f32 %v239_v11, %v201_v7  ;;  %v165_v18 = vadd.f32 %v202_v10, %v154_v12 }
  0xd8   :  { %v120_v14 = vpop.f32.mrf.mxu0 }
  0xd9   :  { %v168_v16 = vadd.f32 %v202_v10, %v157_v13  ;;  %v155_v17 = vmul.f32 %v201_v7, %v120_v14 }
  0xdb   :  { %v219_v19 = vpack.c.bf16 %v168_v16, %v167_v15  ;;  %v166_v20 = vadd.f32 %v202_v10, %v155_v17 }
  0xdd   :  { %221 = vst [vmem:[%s305_s4 + $0x8] sm:$0xff] %v219_v19   ;;  %v214_v21 = vpack.c.bf16 %v166_v20, %v165_v18 }
  0xdf   :  { %215 = vst [vmem:[%s305_s4] sm:$0xff] %v214_v21  }

// kernel: _forward.33
= control target key start
LH: loop header
LB: loop body
LE: loop exit
PB: predicated region body
PF: predicated region fallthrough
CT: control target
= control target key end

     0   :  { %s1248_s18 = smov 0   ;;  %s1250_s19 = smov 0   ;;  %s1367_s0 = inlined_call_operand.vmem [shape: bf16[32,1152], index: 0, kind: input, shape index: {}]   ;;  %s1368_s1 = inlined_call_operand.vmem [shape: bf16[1152,128], index: 1, kind: input, shape index: {}]   ;;  %s1369_s2 = inlined_call_operand.vmem [shape: f32[1,128], index: 2, kind: input, shape index: {}]   ;;  %s1370_s3 = inlined_call_operand.vmem [shape: f32[1,128], index: 3, kind: input, shape index: {}]   ;;  %s1371_s4 = inlined_call_operand.vmem [shape: bf16[32,128], index: 4, kind: input, shape index: {}]   ;;  %s1372_s5 = inlined_call_operand.vmem [shape: bf16[32,128], index: 5, kind: output, shape index: {}]  }
   0x1   :  { %s1252_s20 = smov 0   ;;  %s1254_s21 = smov 0  }
   0x2   :  { %s1256_s22 = smov 0  }
   0x3 LB: > { %s27_s23 = sadd.s32 1, %s1211_s21  ;;  %p50_p1 = scmp.ne.s32.totalorder %s1203_s19, %s1199_s18  ;;  %s1215_s22 = sphi %s1256_s22, %s15_s22   ;;  %s1211_s21 = sphi %s1254_s21, %s1376_s21   ;;  %s1207_s20 = sphi %s1252_s20, %s1375_s20   ;;  %s1203_s19 = sphi %s1250_s19, %s1374_s19   ;;  %s1199_s18 = sphi %s1248_s18, %s1373_s18  }
   0x4   : > { %p28_p0 = scmp.ge.s32.totalorder %s27_s23, 3  ;;  %p51_p2 = scmp.eq.s32.totalorder %s1215_s22, 0 }
   0x5   : > { %s43_s25 = sadd.s32 1, %s1203_s19  ;;  %p965_p5 = scmp.ge.s32.totalorder %s1215_s22, 3 }
   0x6   : > { %s1378_s23 = smov (%p28_p0, %s27_s23), 0  ;;  %p52_p3 = por %p51_p2, %p50_p1 }
   0x7   : > { %s39_s24 = ssub.s32 %s1211_s21, %s1378_s23  ;;  %236 = sbr.rel (%p965_p5) target bundleno = 21 (0x15), region = 28 }
   0x8   : > { %p41_p4 = scmp.eq.s32.totalorder %s39_s24, 0 }
   0xa   : > { %s1283_s26 = scalar_select %p41_p4, %s1203_s19, %s43_s25  }
   0xc   : > { %239 = sbr.rel (!%p52_p3) target bundleno = 21 (0x15), region = 32  ;;  %s241_s27 = sand.u32 (%p52_p3), 1, %s1203_s19  }
   0xd   : > { %s1019_s28 = smul.u32 (%p52_p3), 12, %s1211_s21 }
   0xe   : > { %s1102_s29 = smul.u32 (%p52_p3), 48, %s241_s27 }
   0xf   : > { %s249_s7 = scalar_lea.vmem (%p52_p3), %s1367_s0, %s1019_s28 }
  0x10   : > { %v264_v0 = vld [vmem:[%s249_s7] sm:$0xff] (%p52_p3)  ;;  %v268_v2 = vld [vmem:[%s249_s7 + $0x48] sm:$0xff] (%p52_p3)  ;;  %s243_s8 = scalar_lea.vmem (%p52_p3), [#allocation3], %s1102_s29  ;;  %v971_v6 = vld [vmem:[%s249_s7 + $0x50] sm:$0xf] (%p52_p3) }
  0x11   : > { %v266_v1 = vld [vmem:[%s249_s7 + $0x24] sm:$0xff]  ;;  %265 = vst [vmem:[%s243_s8] sm:$0xff] %v264_v0  ;;  %269 = vst [vmem:[%s243_s8 + $0x18] sm:$0xff] %v268_v2  ;;  %v270_v3 = vld [vmem:[%s249_s7 + $0x6c] sm:$0xff] }
  0x12   : > { %267 = vst [vmem:[%s243_s8 + $0xc] sm:$0xff] %v266_v1  ;;  %v967_v4 = vld [vmem:[%s249_s7 + $0x8] sm:$0xf]  ;;  %v969_v5 = vld [vmem:[%s249_s7 + $0x2c] sm:$0xf]  ;;  %271 = vst [vmem:[%s243_s8 + $0x24] sm:$0xff] %v270_v3 }
  0x13   : > { %968 = vst [vmem:[%s243_s8 + $0x8] sm:$0xf] %v967_v4  ;;  %970 = vst [vmem:[%s243_s8 + $0x14] sm:$0xf] %v969_v5  ;;  %v973_v7 = vld [vmem:[%s249_s7 + $0x74] sm:$0xf] }
  0x14   : > { %972 = vst [vmem:[%s243_s8 + $0x20] sm:$0xf] %v971_v6  ;;  %974 = vst [vmem:[%s243_s8 + $0x2c] sm:$0xf] %v973_v7 }
  0x15 PF: > { %p975_p6 = scmp.ge.s32.totalorder %s1215_s22, 1  ;;  %p304_p7 = scmp.lt.s32.totalorder %s1215_s22, 4 }
  0x17   : > { %p305_p8 = pnand %p975_p6, %p304_p7 }
  0x18   : > { %s311_s9 = sand.u32 (!%p305_p8), 1, %s1199_s18   ;;  %s365_s10 = smul.u32 (!%p305_p8), 48, %s1207_s20 }
  0x19   : > { %308 = sbr.rel (%p305_p8) target bundleno = 303 (0x12f), region = 62  ;;  %p977_p10 = scmp.ne.s32.totalorder (!%p305_p8), %s1207_s20, 0 }
  0x1a   : > { %s1103_s11 = smul.u32 (!%p305_p8), 48, %s311_s9  ;;  %p366_p9 = scmp.lt.s32.totalorder (!%p305_p8), %s365_s10, 143 }
  0x1c   : > { %s1300_s16 = scalar_lea.vmem (!%p305_p8), [#allocation3], %s1103_s11 }
  0x1e   : > { %s1380_s10 = smov (!%p366_p9, %s365_s10), 143  ;;  %402 = sbr.rel (%p977_p10) target bundleno = 38 (0x26), region = 70 }
  0x1f   : > { %s976_s12 = sshll.u32 %s1380_s10, 2 }
  0x20   : > { %s1298_s15 = scalar_lea.vmem %s1368_s1, %s976_s12 }
  0x23   : > { %v1217_v8 = vmov 0.0  }
  0x24   : > { %403 = vst [vmem:[#allocation2 + $0x10] sm:$0xff] %v1217_v8  ;;  %404 = vst [vmem:[#allocation2] sm:$0xff] %v1217_v8 }
  0x25   : > { %405 = vst [vmem:[#allocation2 + $0x18] sm:$0xff] %v1217_v8  ;;  %406 = vst [vmem:[#allocation2 + $0x8] sm:$0xff] %v1217_v8 }
  0x26 PF: > { %v1145_v9 = vld [vmem:[%s1298_s15 + $0x78] sm:$0xff]   ;;  %v1148_v12 = vld [vmem:[%s1298_s15 + $0x70] sm:$0xff]   ;;  %v1151_v15 = vld [vmem:[%s1298_s15 + $0x68] sm:$0xff]   ;;  %p1008_p11 = scmp.ne.s32.totalorder %s1207_s20, 2 }
  0x27   : > { %v1146_v10 = vld [vmem:[%s1298_s15 + $0x38] sm:$0xff]   ;;  %1044 = vmatprep.subr.bf16.mxu0 %v1145_v9  ;;  %v1149_v13 = vld [vmem:[%s1298_s15 + $0x30] sm:$0xff]   ;;  %v1152_v16 = vld [vmem:[%s1298_s15 + $0x28] sm:$0xff]  }
  0x28   : > { %v1147_v11 = vld [vmem:[%s1298_s15 + $0xb8] sm:$0xff]   ;;  %1045 = vmatpush3.bf16.msra.mxu0 %v1146_v10  ;;  %v1150_v14 = vld [vmem:[%s1298_s15 + $0xb0] sm:$0xff]   ;;  %v1153_v17 = vld [vmem:[%s1298_s15 + $0xa8] sm:$0xff]  }
  0x29   : > { %1082 = vmatprep.subr.bf16.mxu1 %v1147_v11  ;;  %1046 = vmatprep.subr.bf16.mxu0 %v1148_v12  ;;  %v1154_v18 = vld [vmem:[%s1298_s15 + $0x60] sm:$0xff]   ;;  %v1157_v21 = vld [vmem:[%s1298_s15 + $0x58] sm:$0xff]   ;;  %v1160_v24 = vld [vmem:[%s1298_s15 + $0x50] sm:$0xff]  }
  0x2a   : > { %1083 = vmatpush3.bf16.msra.mxu1 %v1147_v11  ;;  %v1155_v19 = vld [vmem:[%s1298_s15 + $0x20] sm:$0xff]   ;;  %v1159_v22 = vld [vmem:[%s1298_s15 + $0x98] sm:$0xff]   ;;  %v1162_v25 = vld [vmem:[%s1298_s15 + $0x90] sm:$0xff]  }
  0x2b   : > { %1084 = vmatprep.subr.bf16.mxu1 %v1150_v14  ;;  %v1156_v20 = vld [vmem:[%s1298_s15 + $0xa0] sm:$0xff]   ;;  %v1158_v23 = vld [vmem:[%s1298_s15 + $0x18] sm:$0xff]   ;;  %v1161_v26 = vld [vmem:[%s1298_s15 + $0x10] sm:$0xff]  }
  0x2c   : > { %1047 = vmatpush3.bf16.msra.mxu0 %v1149_v13  ;;  %v1163_v27 = vld [vmem:[%s1298_s15 + $0x48] sm:$0xff]   ;;  %v1166_v30 = vld [vmem:[%s1298_s15 + $0x40] sm:$0xff]   ;;  %v407_v44 = vld [vmem:[#allocation2 + $0x10] sm:$0xff] }
  0x2d   : > { %1048 = vmatprep.subr.bf16.mxu0 %v1151_v15  ;;  %v1164_v28 = vld [vmem:[%s1298_s15 + $0x8] sm:$0xff]   ;;  %v1168_v31 = vld [vmem:[%s1298_s15 + $0x80] sm:$0xff]   ;;  %v409_v58 = vld [vmem:[#allocation2 + $0x18] sm:$0xff] }
  0x2e   : > { %1085 = vmatpush3.bf16.msra.mxu1 %v1150_v14  ;;  %v1165_v29 = vld [vmem:[%s1298_s15 + $0x88] sm:$0xff]   ;;  %v1171_v32 = vld [vmem:[%s1300_s16 + $0x4] ss:$12 sps:$4 sm:$0xff]  }
  0x2f   : > { %1086 = vmatprep.subr.bf16.mxu1 %v1153_v17  ;;  %v1172_v33 = vld [vmem:[%s1300_s16 + $0x8] ss:$12 sps:$4 sm:$0xff]   ;;  %675 = vmatprep.mubr.bf16.mxu0 %v1171_v32  ;;  %v1169_v35 = vld [vmem:[%s1300_s16] ss:$12 sps:$4 sm:$0xff]   ;;  %v1176_v38 = vld [vmem:[%s1300_s16 + $0x18] ss:$12 sps:$4 sm:$0xff]  }
  0x30   : > { %1049 = vmatpush3.bf16.msra.mxu0 %v1152_v16  ;;  %v1167_v34 = vld [vmem:[%s1298_s15] sm:$0xff]   ;;  %1098 = vmatprep.mubr.bf16.mxu1 %v1172_v33  ;;  %v1174_v36 = vld [vmem:[%s1300_s16 + $0x1c] ss:$12 sps:$4 sm:$0xff]  }
  0x31   : > { %1050 = vmatprep.subr.bf16.mxu0 %v1154_v18  ;;  %v1173_v37 = vld [vmem:[%s1300_s16 + $0x20] ss:$12 sps:$4 sm:$0xff]  }
  0x32   : > { %1087 = vmatpush3.bf16.msra.mxu1 %v1153_v17  ;;  %v408_v52 = vld [vmem:[#allocation2] sm:$0xff]  ;;  %v410_v0 = vld [vmem:[#allocation2 + $0x8] sm:$0xff] }
  0x33   : > { %1088 = vmatprep.subr.bf16.mxu1 %v1156_v20 }
  0x34   : > { %1051 = vmatpush3.bf16.msra.mxu0 %v1155_v19 }
  0x35   : > { %1052 = vmatprep.subr.bf16.mxu0 %v1157_v21 }
  0x36   : > { %1089 = vmatpush3.bf16.msra.mxu1 %v1156_v20 }
  0x37   : > { %1090 = vmatprep.subr.bf16.mxu1 %v1159_v22 }
  0x38   : > { %1053 = vmatpush3.bf16.msra.mxu0 %v1158_v23 }
  0x39   : > { %1054 = vmatprep.subr.bf16.mxu0 %v1160_v24 }
  0x3a   : > { %1091 = vmatpush3.bf16.msra.mxu1 %v1159_v22 }
  0x3b   : > { %1092 = vmatprep.subr.bf16.mxu1 %v1162_v25 }
  0x3c   : > { %1055 = vmatpush3.bf16.msra.mxu0 %v1161_v26 }
  0x3d   : > { %1056 = vmatprep.subr.bf16.mxu0 %v1163_v27 }
  0x3e   : > { %1093 = vmatpush3.bf16.msra.mxu1 %v1162_v25 }
  0x3f   : > { %1094 = vmatprep.subr.bf16.mxu1 %v1165_v29 }
  0x40   : > { %1057 = vmatpush3.bf16.msra.mxu0 %v1164_v28 }
  0x41   : > { %1058 = vmatprep.subr.bf16.mxu0 %v1166_v30 }
  0x42   : > { %1095 = vmatpush3.bf16.msra.mxu1 %v1165_v29 }
  0x43   : > { %1096 = vmatprep.subr.bf16.mxu1 %v1168_v31 }
  0x44   : > { %1059 = vmatpush3.bf16.msra.mxu0 %v1167_v34 }
  0x46   : > { %1097 = vmatpush3.bf16.msra.mxu1 %v1168_v31 }
  0x47   : > { %676 = vmatmul.mubr.bf16.vlgmr.msra.gmra.mxu0 %v1169_v35 }
  0x48   : > { %683 = vmatprep.mubr.bf16.mxu0 %v1174_v36 }
  0x49   : > { %1099 = vmatmul.mubr.bf16.vlgmr.msra.gmra.mxu1 %v1173_v37 }
  0x4f   : > { %684 = vmatmul.mubr.bf16.gmra.mxu0 %v1176_v38 }
 0x107   : > { %v1060_v39 = vpop.f32.mrf.mxu0 }
 0x109   : > { %v1061_v40 = vpop.f32.mrf.mxu0  ;;  %v1100_v41 = vpop.f32.mrf.mxu1 }
 0x10a   : > { %v1062_v42 = vadd.f32 %v1061_v40, %v1060_v39 }
 0x10b   : > { %v1063_v43 = vpop.f32.mrf.mxu0  ;;  %v726_v45 = vpop.f32.mrf.mxu1 }
 0x10c   : > { %v727_v46 = vadd.f32 %v1062_v42, %v726_v45 }
 0x10d   : > { %v1064_v47 = vpop.f32.mrf.mxu0  ;;  %v1101_v48 = vpop.f32.mrf.mxu1 }
 0x10e   : > { %v741_v49 = vadd.f32 %v727_v46, %v407_v44  ;;  %v1065_v50 = vadd.f32 %v1064_v47, %v1063_v43 }
 0x10f   : > { %v1066_v51 = vpop.f32.mrf.mxu0  ;;  %v729_v53 = vpop.f32.mrf.mxu1 }
 0x110   : > { %745 = vst [vmem:[#allocation2 + $0x10] sm:$0xff] %v741_v49  ;;  %v730_v54 = vadd.f32 %v1065_v50, %v729_v53 }
 0x111   : > { %v1067_v55 = vpop.f32.mrf.mxu0 }
 0x112   : > { %v742_v56 = vadd.f32 %v730_v54, %v408_v52  ;;  %v1068_v57 = vadd.f32 %v1067_v55, %v1066_v51 }
 0x113   : > { %v1069_v59 = vpop.f32.mrf.mxu0 }
 0x114   : > { %746 = vst [vmem:[#allocation2] sm:$0xff] %v742_v56  ;;  %v735_v60 = vadd.f32 %v1100_v41, %v1068_v57 }
 0x115   : > { %v1070_v61 = vpop.f32.mrf.mxu0 }
 0x116   : > { %v743_v62 = vadd.f32 %v735_v60, %v409_v58  ;;  %v1071_v63 = vadd.f32 %v1070_v61, %v1069_v59 }
 0x118   : > { %747 = vst [vmem:[#allocation2 + $0x18] sm:$0xff] %v743_v62  ;;  %v738_v1 = vadd.f32 %v1101_v48, %v1071_v63  ;;  %752 = sbr.rel (%p1008_p11) target bundleno = 303 (0x12f), region = 74 }
 0x11a   : > { %v744_v2 = vadd.f32 %v738_v1, %v410_v0 }
 0x11c   : > { %748 = vst [vmem:[#allocation2 + $0x8] sm:$0xff] %v744_v2 }
 0x11d   : > { %v753_v3 = vld [vmem:[#allocation2 + $0x10] sm:$0xff]  ;;  %v754_v4 = vld [vmem:[#allocation2] sm:$0xff]  ;;  %v1042_v15 = vld [vmem:[%s1371_s4 + $0x8] sm:$0xff]  }
 0x11e   : > { %v1009_v5 = vld [vmem:[%s1369_s2] ss:$0 sm:$0xff]  ;;  %v1030_v19 = vunpack.c.l.bf16 %v1042_v15  ;;  %v1031_v21 = vunpack.c.h.bf16 %v1042_v15 }
 0x11f   : > { %v764_v6 = vmul.f32 %v1009_v5, %v753_v3  ;;  %v765_v7 = vmul.f32 %v1009_v5, %v754_v4  ;;  %v1010_v8 = vld [vmem:[%s1370_s3] ss:$0 sm:$0xff]  ;;  %v755_v10 = vld [vmem:[#allocation2 + $0x18] sm:$0xff] }
 0x120   : > { %v1025_v9 = vld [vmem:[%s1371_s4] sm:$0xff]   ;;  %v766_v14 = vmul.f32 %v1009_v5, %v755_v10 }
 0x121   : > { %v1026_v11 = vunpack.c.l.bf16 %v1025_v9  ;;  %v1027_v12 = vunpack.c.h.bf16 %v1025_v9  ;;  %v775_v16 = vadd.f32 %v1010_v8, %v764_v6  ;;  %v776_v17 = vadd.f32 %v1010_v8, %v765_v7 }
 0x122   : > { %v777_v20 = vadd.f32 %v1010_v8, %v766_v14 }
 0x123   : > { %v756_v13 = vld [vmem:[#allocation2 + $0x8] sm:$0xff]  ;;  %v787_v22 = vadd.f32 %v1026_v11, %v775_v16  ;;  %v788_v23 = vadd.f32 %v1027_v12, %v776_v17 }
 0x124   : > { %v767_v18 = vmul.f32 %v1009_v5, %v756_v13  ;;  %v789_v25 = vadd.f32 %v1030_v19, %v777_v20 }
 0x125   : > { %v791_v26 = vmax.f32 %v787_v22, 0.0  ;;  %v792_v27 = vmax.f32 %v788_v23, 0.0 }
 0x126   : > { %v778_v24 = vadd.f32 %v1010_v8, %v767_v18  ;;  %v793_v29 = vmax.f32 %v789_v25, 0.0 }
 0x127   : > { %v1035_v30 = vpack.c.bf16 %v792_v27, %v791_v26 }
 0x128   : > { %v790_v28 = vadd.f32 %v1031_v21, %v778_v24 }
 0x129   : > { %1036 = vst [vmem:[%s1372_s5] sm:$0xff] %v1035_v30  }
 0x12a   : > { %v794_v31 = vmax.f32 %v790_v28, 0.0 }
 0x12c   : > { %v1040_v32 = vpack.c.bf16 %v794_v31, %v793_v29 }
 0x12e   : > { %1043 = vst [vmem:[%s1372_s5 + $0x8] sm:$0xff] %v1040_v32  }
 0x12f PF: > { %s15_s22 = sadd.s32 1, %s1215_s22   ;;  %s1373_s18 = smov %s1203_s19 }
 0x130   : > { %p12_p12 = scmp.ge.s32.totalorder %s15_s22, 5   ;;  %s1374_s19 = smov %s1283_s26 }
 0x131   : > { %s1375_s20 = smov %s1211_s21  ;;  %s1376_s21 = smov %s1378_s23 }
 0x132   :  { %14 = sbr.rel (!%p12_p12) target bundleno = 3 (0x3), region = 127 }

// kernel: _forward.34
= control target key start
LH: loop header
LB: loop body
LE: loop exit
PB: predicated region body
PF: predicated region fallthrough
CT: control target
= control target key end

     0   :  { %s1143_s15 = smov 0   ;;  %s1145_s16 = smov 0   ;;  %s1256_s0 = inlined_call_operand.vmem [shape: bf16[32,1152], index: 0, kind: input, shape index: {}]   ;;  %s1257_s1 = inlined_call_operand.vmem [shape: bf16[1152,128], index: 1, kind: input, shape index: {}]   ;;  %s1258_s2 = inlined_call_operand.vmem [shape: f32[1,128], index: 2, kind: input, shape index: {}]   ;;  %s1259_s3 = inlined_call_operand.vmem [shape: f32[1,128], index: 3, kind: input, shape index: {}]   ;;  %s1260_s4 = inlined_call_operand.vmem [shape: bf16[32,128], index: 4, kind: output, shape index: {}]  }
   0x1   :  { %s1147_s17 = smov 0   ;;  %s1149_s18 = smov 0  }
   0x2   :  { %s1151_s19 = smov 0  }
   0x3 LB: > { %s26_s20 = sadd.s32 1, %s1111_s18  ;;  %p49_p1 = scmp.ne.s32.totalorder %s1103_s16, %s1099_s15  ;;  %s1115_s19 = sphi %s1151_s19, %s14_s19   ;;  %s1111_s18 = sphi %s1149_s18, %s1264_s18   ;;  %s1107_s17 = sphi %s1147_s17, %s1263_s17   ;;  %s1103_s16 = sphi %s1145_s16, %s1262_s16   ;;  %s1099_s15 = sphi %s1143_s15, %s1261_s15  }
   0x4   : > { %p27_p0 = scmp.ge.s32.totalorder %s26_s20, 3  ;;  %p50_p2 = scmp.eq.s32.totalorder %s1115_s19, 0 }
   0x5   : > { %s42_s22 = sadd.s32 1, %s1103_s16  ;;  %p874_p5 = scmp.ge.s32.totalorder %s1115_s19, 3 }
   0x6   : > { %s1266_s20 = smov (%p27_p0, %s26_s20), 0  ;;  %p51_p3 = por %p50_p2, %p49_p1 }
   0x7   : > { %s38_s21 = ssub.s32 %s1111_s18, %s1266_s20  ;;  %195 = sbr.rel (%p874_p5) target bundleno = 21 (0x15), region = 24 }
   0x8   : > { %p40_p4 = scmp.eq.s32.totalorder %s38_s21, 0 }
   0xa   : > { %s1178_s23 = scalar_select %p40_p4, %s1103_s16, %s42_s22  }
   0xc   : > { %198 = sbr.rel (!%p51_p3) target bundleno = 21 (0x15), region = 28  ;;  %s200_s24 = sand.u32 (%p51_p3), 1, %s1103_s16  }
   0xd   : > { %s928_s25 = smul.u32 (%p51_p3), 12, %s1111_s18 }
   0xe   : > { %s1002_s26 = smul.u32 (%p51_p3), 48, %s200_s24 }
   0xf   : > { %s208_s29 = scalar_lea.vmem (%p51_p3), %s1256_s0, %s928_s25 }
  0x10   : > { %v223_v0 = vld [vmem:[%s208_s29] sm:$0xff] (%p51_p3)  ;;  %v227_v2 = vld [vmem:[%s208_s29 + $0x48] sm:$0xff] (%p51_p3)  ;;  %s202_s30 = scalar_lea.vmem (%p51_p3), [#allocation3], %s1002_s26  ;;  %v880_v6 = vld [vmem:[%s208_s29 + $0x50] sm:$0xf] (%p51_p3) }
  0x11   : > { %v225_v1 = vld [vmem:[%s208_s29 + $0x24] sm:$0xff]  ;;  %224 = vst [vmem:[%s202_s30] sm:$0xff] %v223_v0  ;;  %228 = vst [vmem:[%s202_s30 + $0x18] sm:$0xff] %v227_v2  ;;  %v229_v3 = vld [vmem:[%s208_s29 + $0x6c] sm:$0xff] }
  0x12   : > { %226 = vst [vmem:[%s202_s30 + $0xc] sm:$0xff] %v225_v1  ;;  %v876_v4 = vld [vmem:[%s208_s29 + $0x8] sm:$0xf]  ;;  %v878_v5 = vld [vmem:[%s208_s29 + $0x2c] sm:$0xf]  ;;  %230 = vst [vmem:[%s202_s30 + $0x24] sm:$0xff] %v229_v3 }
  0x13   : > { %877 = vst [vmem:[%s202_s30 + $0x8] sm:$0xf] %v876_v4  ;;  %879 = vst [vmem:[%s202_s30 + $0x14] sm:$0xf] %v878_v5  ;;  %v882_v7 = vld [vmem:[%s208_s29 + $0x74] sm:$0xf] }
  0x14   : > { %881 = vst [vmem:[%s202_s30 + $0x20] sm:$0xf] %v880_v6  ;;  %883 = vst [vmem:[%s202_s30 + $0x2c] sm:$0xf] %v882_v7 }
  0x15 PF: > { %p884_p6 = scmp.ge.s32.totalorder %s1115_s19, 1  ;;  %p263_p7 = scmp.lt.s32.totalorder %s1115_s19, 4 }
  0x17   : > { %p264_p8 = pnand %p884_p6, %p263_p7 }
  0x18   : > { %s270_s5 = sand.u32 (!%p264_p8), 1, %s1099_s15   ;;  %s314_s6 = smul.u32 (!%p264_p8), 48, %s1107_s17 }
  0x19   : > { %267 = sbr.rel (%p264_p8) target bundleno = 301 (0x12d), region = 58  ;;  %p886_p10 = scmp.ne.s32.totalorder (!%p264_p8), %s1107_s17, 0 }
  0x1a   : > { %s1003_s7 = smul.u32 (!%p264_p8), 48, %s270_s5  ;;  %p315_p9 = scmp.lt.s32.totalorder (!%p264_p8), %s314_s6, 143 }
  0x1c   : > { %s1195_s12 = scalar_lea.vmem (!%p264_p8), [#allocation3], %s1003_s7 }
  0x1e   : > { %s1268_s6 = smov (!%p315_p9, %s314_s6), 143  ;;  %342 = sbr.rel (%p886_p10) target bundleno = 38 (0x26), region = 66 }
  0x1f   : > { %s885_s8 = sshll.u32 %s1268_s6, 2 }
  0x20   : > { %s1193_s11 = scalar_lea.vmem %s1257_s1, %s885_s8 }
  0x23   : > { %v1117_v8 = vmov 0.0  }
  0x24   : > { %343 = vst [vmem:[#allocation2 + $0x10] sm:$0xff] %v1117_v8  ;;  %344 = vst [vmem:[#allocation2] sm:$0xff] %v1117_v8 }
  0x25   : > { %345 = vst [vmem:[#allocation2 + $0x18] sm:$0xff] %v1117_v8  ;;  %346 = vst [vmem:[#allocation2 + $0x8] sm:$0xff] %v1117_v8 }
  0x26 PF: > { %v1045_v9 = vld [vmem:[%s1193_s11 + $0x78] sm:$0xff]   ;;  %v1048_v12 = vld [vmem:[%s1193_s11 + $0x70] sm:$0xff]   ;;  %v1051_v15 = vld [vmem:[%s1193_s11 + $0x68] sm:$0xff]   ;;  %p917_p11 = scmp.ne.s32.totalorder %s1107_s17, 2 }
  0x27   : > { %v1046_v10 = vld [vmem:[%s1193_s11 + $0x38] sm:$0xff]   ;;  %944 = vmatprep.subr.bf16.mxu0 %v1045_v9  ;;  %v1049_v13 = vld [vmem:[%s1193_s11 + $0x30] sm:$0xff]   ;;  %v1052_v16 = vld [vmem:[%s1193_s11 + $0x28] sm:$0xff]  }
  0x28   : > { %v1047_v11 = vld [vmem:[%s1193_s11 + $0xb8] sm:$0xff]   ;;  %945 = vmatpush3.bf16.msra.mxu0 %v1046_v10  ;;  %v1050_v14 = vld [vmem:[%s1193_s11 + $0xb0] sm:$0xff]   ;;  %v1053_v17 = vld [vmem:[%s1193_s11 + $0xa8] sm:$0xff]  }
  0x29   : > { %982 = vmatprep.subr.bf16.mxu1 %v1047_v11  ;;  %946 = vmatprep.subr.bf16.mxu0 %v1048_v12  ;;  %v1054_v18 = vld [vmem:[%s1193_s11 + $0x60] sm:$0xff]   ;;  %v1057_v21 = vld [vmem:[%s1193_s11 + $0x58] sm:$0xff]   ;;  %v1060_v24 = vld [vmem:[%s1193_s11 + $0x50] sm:$0xff]  }
  0x2a   : > { %983 = vmatpush3.bf16.msra.mxu1 %v1047_v11  ;;  %v1055_v19 = vld [vmem:[%s1193_s11 + $0x20] sm:$0xff]   ;;  %v1059_v22 = vld [vmem:[%s1193_s11 + $0x98] sm:$0xff]   ;;  %v1062_v25 = vld [vmem:[%s1193_s11 + $0x90] sm:$0xff]  }
  0x2b   : > { %984 = vmatprep.subr.bf16.mxu1 %v1050_v14  ;;  %v1056_v20 = vld [vmem:[%s1193_s11 + $0xa0] sm:$0xff]   ;;  %v1058_v23 = vld [vmem:[%s1193_s11 + $0x18] sm:$0xff]   ;;  %v1061_v26 = vld [vmem:[%s1193_s11 + $0x10] sm:$0xff]  }
  0x2c   : > { %947 = vmatpush3.bf16.msra.mxu0 %v1049_v13  ;;  %v1063_v27 = vld [vmem:[%s1193_s11 + $0x48] sm:$0xff]   ;;  %v1066_v30 = vld [vmem:[%s1193_s11 + $0x40] sm:$0xff]   ;;  %v347_v44 = vld [vmem:[#allocation2 + $0x10] sm:$0xff] }
  0x2d   : > { %948 = vmatprep.subr.bf16.mxu0 %v1051_v15  ;;  %v1064_v28 = vld [vmem:[%s1193_s11 + $0x8] sm:$0xff]   ;;  %v1068_v31 = vld [vmem:[%s1193_s11 + $0x80] sm:$0xff]   ;;  %v349_v58 = vld [vmem:[#allocation2 + $0x18] sm:$0xff] }
  0x2e   : > { %985 = vmatpush3.bf16.msra.mxu1 %v1050_v14  ;;  %v1065_v29 = vld [vmem:[%s1193_s11 + $0x88] sm:$0xff]   ;;  %v1071_v32 = vld [vmem:[%s1195_s12 + $0x4] ss:$12 sps:$4 sm:$0xff]  }
  0x2f   : > { %986 = vmatprep.subr.bf16.mxu1 %v1053_v17  ;;  %v1072_v33 = vld [vmem:[%s1195_s12 + $0x8] ss:$12 sps:$4 sm:$0xff]   ;;  %615 = vmatprep.mubr.bf16.mxu0 %v1071_v32  ;;  %v1069_v35 = vld [vmem:[%s1195_s12] ss:$12 sps:$4 sm:$0xff]   ;;  %v1076_v38 = vld [vmem:[%s1195_s12 + $0x18] ss:$12 sps:$4 sm:$0xff]  }
  0x30   : > { %949 = vmatpush3.bf16.msra.mxu0 %v1052_v16  ;;  %v1067_v34 = vld [vmem:[%s1193_s11] sm:$0xff]   ;;  %998 = vmatprep.mubr.bf16.mxu1 %v1072_v33  ;;  %v1074_v36 = vld [vmem:[%s1195_s12 + $0x1c] ss:$12 sps:$4 sm:$0xff]  }
  0x31   : > { %950 = vmatprep.subr.bf16.mxu0 %v1054_v18  ;;  %v1073_v37 = vld [vmem:[%s1195_s12 + $0x20] ss:$12 sps:$4 sm:$0xff]  }
  0x32   : > { %987 = vmatpush3.bf16.msra.mxu1 %v1053_v17  ;;  %v348_v52 = vld [vmem:[#allocation2] sm:$0xff]  ;;  %v350_v0 = vld [vmem:[#allocation2 + $0x8] sm:$0xff] }
  0x33   : > { %988 = vmatprep.subr.bf16.mxu1 %v1056_v20 }
  0x34   : > { %951 = vmatpush3.bf16.msra.mxu0 %v1055_v19 }
  0x35   : > { %952 = vmatprep.subr.bf16.mxu0 %v1057_v21 }
  0x36   : > { %989 = vmatpush3.bf16.msra.mxu1 %v1056_v20 }
  0x37   : > { %990 = vmatprep.subr.bf16.mxu1 %v1059_v22 }
  0x38   : > { %953 = vmatpush3.bf16.msra.mxu0 %v1058_v23 }
  0x39   : > { %954 = vmatprep.subr.bf16.mxu0 %v1060_v24 }
  0x3a   : > { %991 = vmatpush3.bf16.msra.mxu1 %v1059_v22 }
  0x3b   : > { %992 = vmatprep.subr.bf16.mxu1 %v1062_v25 }
  0x3c   : > { %955 = vmatpush3.bf16.msra.mxu0 %v1061_v26 }
  0x3d   : > { %956 = vmatprep.subr.bf16.mxu0 %v1063_v27 }
  0x3e   : > { %993 = vmatpush3.bf16.msra.mxu1 %v1062_v25 }
  0x3f   : > { %994 = vmatprep.subr.bf16.mxu1 %v1065_v29 }
  0x40   : > { %957 = vmatpush3.bf16.msra.mxu0 %v1064_v28 }
  0x41   : > { %958 = vmatprep.subr.bf16.mxu0 %v1066_v30 }
  0x42   : > { %995 = vmatpush3.bf16.msra.mxu1 %v1065_v29 }
  0x43   : > { %996 = vmatprep.subr.bf16.mxu1 %v1068_v31 }
  0x44   : > { %959 = vmatpush3.bf16.msra.mxu0 %v1067_v34 }
  0x46   : > { %997 = vmatpush3.bf16.msra.mxu1 %v1068_v31 }
  0x47   : > { %616 = vmatmul.mubr.bf16.vlgmr.msra.gmra.mxu0 %v1069_v35 }
  0x48   : > { %623 = vmatprep.mubr.bf16.mxu0 %v1074_v36 }
  0x49   : > { %999 = vmatmul.mubr.bf16.vlgmr.msra.gmra.mxu1 %v1073_v37 }
  0x4f   : > { %624 = vmatmul.mubr.bf16.gmra.mxu0 %v1076_v38 }
 0x107   : > { %v960_v39 = vpop.f32.mrf.mxu0 }
 0x109   : > { %v961_v40 = vpop.f32.mrf.mxu0  ;;  %v1000_v41 = vpop.f32.mrf.mxu1 }
 0x10a   : > { %v962_v42 = vadd.f32 %v961_v40, %v960_v39 }
 0x10b   : > { %v963_v43 = vpop.f32.mrf.mxu0  ;;  %v666_v45 = vpop.f32.mrf.mxu1 }
 0x10c   : > { %v667_v46 = vadd.f32 %v962_v42, %v666_v45 }
 0x10d   : > { %v964_v47 = vpop.f32.mrf.mxu0  ;;  %v1001_v48 = vpop.f32.mrf.mxu1 }
 0x10e   : > { %v681_v49 = vadd.f32 %v667_v46, %v347_v44  ;;  %v965_v50 = vadd.f32 %v964_v47, %v963_v43 }
 0x10f   : > { %v966_v51 = vpop.f32.mrf.mxu0  ;;  %v669_v53 = vpop.f32.mrf.mxu1 }
 0x110   : > { %685 = vst [vmem:[#allocation2 + $0x10] sm:$0xff] %v681_v49  ;;  %v670_v54 = vadd.f32 %v965_v50, %v669_v53 }
 0x111   : > { %v967_v55 = vpop.f32.mrf.mxu0 }
 0x112   : > { %v682_v56 = vadd.f32 %v670_v54, %v348_v52  ;;  %v968_v57 = vadd.f32 %v967_v55, %v966_v51 }
 0x113   : > { %v969_v59 = vpop.f32.mrf.mxu0 }
 0x114   : > { %686 = vst [vmem:[#allocation2] sm:$0xff] %v682_v56  ;;  %v675_v60 = vadd.f32 %v1000_v41, %v968_v57 }
 0x115   : > { %v970_v61 = vpop.f32.mrf.mxu0 }
 0x116   : > { %v683_v62 = vadd.f32 %v675_v60, %v349_v58  ;;  %v971_v63 = vadd.f32 %v970_v61, %v969_v59 }
 0x118   : > { %687 = vst [vmem:[#allocation2 + $0x18] sm:$0xff] %v683_v62  ;;  %v678_v1 = vadd.f32 %v1001_v48, %v971_v63  ;;  %692 = sbr.rel (%p917_p11) target bundleno = 301 (0x12d), region = 70 }
 0x11a   : > { %v684_v2 = vadd.f32 %v678_v1, %v350_v0 }
 0x11c   : > { %688 = vst [vmem:[#allocation2 + $0x8] sm:$0xff] %v684_v2 }
 0x11d   : > { %v693_v3 = vld [vmem:[#allocation2 + $0x10] sm:$0xff]  ;;  %v694_v4 = vld [vmem:[#allocation2] sm:$0xff] }
 0x11e   : > { %v918_v5 = vld [vmem:[%s1258_s2] ss:$0 sm:$0xff] }
 0x11f   : > { %v704_v6 = vmul.f32 %v918_v5, %v693_v3  ;;  %v705_v7 = vmul.f32 %v918_v5, %v694_v4  ;;  %v919_v8 = vld [vmem:[%s1259_s3] ss:$0 sm:$0xff]  ;;  %v695_v9 = vld [vmem:[#allocation2 + $0x18] sm:$0xff] }
 0x120   : > { %v706_v11 = vmul.f32 %v918_v5, %v695_v9 }
 0x121   : > { %v715_v13 = vadd.f32 %v919_v8, %v704_v6  ;;  %v716_v14 = vadd.f32 %v919_v8, %v705_v7 }
 0x122   : > { %v717_v15 = vadd.f32 %v919_v8, %v706_v11 }
 0x123   : > { %v696_v10 = vld [vmem:[#allocation2 + $0x8] sm:$0xff]  ;;  %v719_v17 = vmax.f32 %v715_v13, 0.0  ;;  %v720_v18 = vmax.f32 %v716_v14, 0.0 }
 0x124   : > { %v707_v12 = vmul.f32 %v918_v5, %v696_v10  ;;  %v721_v19 = vmax.f32 %v717_v15, 0.0 }
 0x125   : > { %v936_v21 = vpack.c.bf16 %v720_v18, %v719_v17 }
 0x126   : > { %v718_v16 = vadd.f32 %v919_v8, %v707_v12 }
 0x127   : > { %937 = vst [vmem:[%s1260_s4] sm:$0xff] %v936_v21  }
 0x128   : > { %v722_v20 = vmax.f32 %v718_v16, 0.0 }
 0x12a   : > { %v941_v22 = vpack.c.bf16 %v722_v20, %v721_v19 }
 0x12c   : > { %943 = vst [vmem:[%s1260_s4 + $0x8] sm:$0xff] %v941_v22  }
 0x12d PF: > { %s14_s19 = sadd.s32 1, %s1115_s19   ;;  %s1261_s15 = smov %s1103_s16 }
 0x12e   : > { %p11_p12 = scmp.ge.s32.totalorder %s14_s19, 5   ;;  %s1262_s16 = smov %s1178_s23 }
 0x12f   : > { %s1263_s17 = smov %s1111_s18  ;;  %s1264_s18 = smov %s1266_s20 }
 0x130   :  { %13 = sbr.rel (!%p11_p12) target bundleno = 3 (0x3), region = 120 }

// kernel: _forward.37
= control target key start
LH: loop header
LB: loop body
LE: loop exit
PB: predicated region body
PF: predicated region fallthrough
CT: control target
= control target key end

     0   :  { %s1114_s15 = smov 0   ;;  %s1116_s16 = smov 0   ;;  %s1216_s0 = inlined_call_operand.vmem [shape: bf16[8,1152], index: 0, kind: input, shape index: {}]   ;;  %s1217_s1 = inlined_call_operand.vmem [shape: bf16[1152,256], index: 1, kind: input, shape index: {}]   ;;  %s1218_s2 = inlined_call_operand.vmem [shape: f32[1,256], index: 2, kind: input, shape index: {}]   ;;  %s1219_s3 = inlined_call_operand.vmem [shape: f32[1,256], index: 3, kind: input, shape index: {}]   ;;  %s1220_s4 = inlined_call_operand.vmem [shape: bf16[8,256], index: 4, kind: output, shape index: {}]  }
   0x1   :  { %s1118_s17 = smov 0  }
   0x2 LB: > { %s26_s18 = sadd.s32 1, %s1081_s16  ;;  %p898_p0 = scmp.ge.s32.totalorder %s1085_s17, 1  ;;  %s1085_s17 = sphi %s1118_s17, %s14_s17   ;;  %s1081_s16 = sphi %s1116_s16, %s1222_s16   ;;  %s1077_s15 = sphi %s1114_s15, %s1221_s15  }
   0x3   : > { %p27_p1 = scmp.ge.s32.totalorder %s26_s18, 3  ;;  %p229_p2 = scmp.lt.s32.totalorder %s1085_s17, 4 }
   0x5   : > { %s1224_s18 = smov (%p27_p1, %s26_s18), 0  ;;  %p230_p3 = pnand %p898_p0, %p229_p2 }
   0x6   : > { %s281_s19 = smul.u32 (!%p230_p3), 3, %s1077_s15  ;;  %p902_p6 = scmp.ne.s32.totalorder (!%p230_p3), %s1077_s15, 0 }
   0x7   : > { %233 = sbr.rel (%p230_p3) target bundleno = 304 (0x130), region = 36 }
   0x8   : > { %s291_s20 = smul.u32 (!%p230_p3), 48, %s1077_s15  ;;  %p284_p4 = scmp.lt.s32.totalorder (!%p230_p3), %s281_s19, 8 }
   0xa   : > { %p293_p5 = scmp.lt.s32.totalorder (!%p230_p3), %s291_s20, 143 }
   0xc   : > { %s1226_s19 = smov (!%p284_p4, %s281_s19), 8  ;;  %s1228_s20 = smov (!%p293_p5, %s291_s20), 143 }
   0xd   : > { %s899_s21 = sshll.u32 %s1226_s19, 2  ;;  %s960_s25 = sshll.u32 %s1228_s20, 3 }
   0xe   : > { %s1139_s24 = scalar_lea.vmem %s1216_s0, %s899_s21  ;;  %s1144_s28 = scalar_lea.vmem %s1217_s1, %s960_s25 }
   0xf   : > { %327 = sbr.rel (%p902_p6) target bundleno = 22 (0x16), region = 40 }
  0x14   : > { %v1087_v0 = vmov 0.0  }
  0x15   : > { %328 = vst [vmem:[#allocation2] sm:$0xff] %v1087_v0  ;;  %329 = vst [vmem:[#allocation2 + $0x8] sm:$0xff] %v1087_v0 }
  0x16 PF: > { %v988_v1 = vld [vmem:[%s1144_s28 + $0x74] ss:$8 sps:$4 sm:$0xff]   ;;  %v990_v2 = vld [vmem:[%s1144_s28 + $0x70] ss:$8 sps:$4 sm:$0xff]   ;;  %v1088_v3 = vmov 0   ;;  %v332_v34 = vld [vmem:[%s1139_s24] sm:$0xff] }
  0x17   : > { %706 = vmatprep.mubr.bf16.mxu1 %v1088_v3  ;;  %633 = vmatprep.subr.bf16.mxu0 %v988_v1  ;;  %v991_v4 = vld [vmem:[%s1144_s28 + $0x64] ss:$8 sps:$4 sm:$0xff]   ;;  %v993_v5 = vld [vmem:[%s1144_s28 + $0x60] ss:$8 sps:$4 sm:$0xff]   ;;  %v994_v6 = vld [vmem:[%s1144_s28 + $0x54] ss:$8 sps:$4 sm:$0xff]   ;;  %v904_v36 = vcombine.high %v332_v34, %v332_v34  ;;  %v903_v53 = vcombine.low %v332_v34, %v332_v34 }
  0x18   : > { %634 = vmatpush1.bf16.msra.mxu0 %v990_v2  ;;  %v996_v7 = vld [vmem:[%s1144_s28 + $0x50] ss:$8 sps:$4 sm:$0xff]   ;;  %v997_v8 = vld [vmem:[%s1144_s28 + $0x44] ss:$8 sps:$4 sm:$0xff]   ;;  %v1009_v9 = vld [vmem:[%s1144_s28 + $0x174] ss:$8 sps:$4 sm:$0xff]  }
  0x19   : > { %635 = vmatprep.subr.bf16.mxu0 %v991_v4  ;;  %v1011_v10 = vld [vmem:[%s1144_s28 + $0x170] ss:$8 sps:$4 sm:$0xff]   ;;  %v999_v11 = vld [vmem:[%s1144_s28 + $0x40] ss:$8 sps:$4 sm:$0xff]   ;;  %v1000_v12 = vld [vmem:[%s1144_s28 + $0x34] ss:$8 sps:$4 sm:$0xff]   ;;  %674 = vmatprep.subr.bf16.mxu1 %v1009_v9 }
  0x1a   : > { %v1015_v13 = vld [vmem:[%s1144_s28 + $0x164] ss:$8 sps:$4 sm:$0xff]   ;;  %675 = vmatpush1.bf16.msra.mxu1 %v1011_v10  ;;  %v1017_v14 = vld [vmem:[%s1144_s28 + $0x160] ss:$8 sps:$4 sm:$0xff]   ;;  %v1002_v15 = vld [vmem:[%s1144_s28 + $0x30] ss:$8 sps:$4 sm:$0xff]   ;;  %665 = vmatprep.mubr.bf16.mxu0 %v904_v36 }
  0x1b   : > { %676 = vmatprep.subr.bf16.mxu1 %v1015_v13  ;;  %v1021_v16 = vld [vmem:[%s1144_s28 + $0x154] ss:$8 sps:$4 sm:$0xff]   ;;  %v1003_v17 = vld [vmem:[%s1144_s28 + $0x24] ss:$8 sps:$4 sm:$0xff]   ;;  %v1023_v18 = vld [vmem:[%s1144_s28 + $0x150] ss:$8 sps:$4 sm:$0xff]  }
  0x1c   : > { %636 = vmatpush1.bf16.msra.mxu0 %v993_v5  ;;  %v1027_v19 = vld [vmem:[%s1144_s28 + $0x144] ss:$8 sps:$4 sm:$0xff]   ;;  %v1005_v20 = vld [vmem:[%s1144_s28 + $0x20] ss:$8 sps:$4 sm:$0xff]   ;;  %v1006_v21 = vld [vmem:[%s1144_s28 + $0x14] ss:$8 sps:$4 sm:$0xff]  }
  0x1d   : > { %637 = vmatprep.subr.bf16.mxu0 %v994_v6  ;;  %v1029_v22 = vld [vmem:[%s1144_s28 + $0x140] ss:$8 sps:$4 sm:$0xff]   ;;  %v1033_v23 = vld [vmem:[%s1144_s28 + $0x134] ss:$8 sps:$4 sm:$0xff]   ;;  %v1008_v24 = vld [vmem:[%s1144_s28 + $0x10] ss:$8 sps:$4 sm:$0xff]  }
  0x1e   : > { %677 = vmatpush1.bf16.msra.mxu1 %v1017_v14  ;;  %v1012_v25 = vld [vmem:[%s1144_s28 + $0x4] ss:$8 sps:$4 sm:$0xff]   ;;  %v1035_v26 = vld [vmem:[%s1144_s28 + $0x130] ss:$8 sps:$4 sm:$0xff]   ;;  %v1014_v28 = vld [vmem:[%s1144_s28] ss:$8 sps:$4 sm:$0xff]  }
  0x1f   : > { %678 = vmatprep.subr.bf16.mxu1 %v1021_v16  ;;  %v1039_v27 = vld [vmem:[%s1144_s28 + $0x124] ss:$8 sps:$4 sm:$0xff]   ;;  %v1018_v29 = vld [vmem:[%s1144_s28 + $0xf4] ss:$8 sps:$4 sm:$0xff]   ;;  %v1041_v30 = vld [vmem:[%s1144_s28 + $0x120] ss:$8 sps:$4 sm:$0xff]  }
  0x20   : > { %638 = vmatpush1.bf16.msra.mxu0 %v996_v7  ;;  %v1045_v31 = vld [vmem:[%s1144_s28 + $0x114] ss:$8 sps:$4 sm:$0xff]   ;;  %v1020_v32 = vld [vmem:[%s1144_s28 + $0xf0] ss:$8 sps:$4 sm:$0xff]   ;;  %v1024_v33 = vld [vmem:[%s1144_s28 + $0xe4] ss:$8 sps:$4 sm:$0xff]  }
  0x21   : > { %639 = vmatprep.subr.bf16.mxu0 %v997_v8  ;;  %v1047_v35 = vld [vmem:[%s1144_s28 + $0x110] ss:$8 sps:$4 sm:$0xff]   ;;  %v1051_v37 = vld [vmem:[%s1144_s28 + $0x104] ss:$8 sps:$4 sm:$0xff]   ;;  %v1026_v38 = vld [vmem:[%s1144_s28 + $0xe0] ss:$8 sps:$4 sm:$0xff]  }
  0x22   : > { %679 = vmatpush1.bf16.msra.mxu1 %v1023_v18  ;;  %v1030_v39 = vld [vmem:[%s1144_s28 + $0xd4] ss:$8 sps:$4 sm:$0xff]   ;;  %v1053_v40 = vld [vmem:[%s1144_s28 + $0x100] ss:$8 sps:$4 sm:$0xff]   ;;  %v1032_v41 = vld [vmem:[%s1144_s28 + $0xd0] ss:$8 sps:$4 sm:$0xff]  }
  0x23   : > { %680 = vmatprep.subr.bf16.mxu1 %v1027_v19  ;;  %v1036_v42 = vld [vmem:[%s1144_s28 + $0xc4] ss:$8 sps:$4 sm:$0xff]   ;;  %v1057_v43 = vld [vmem:[%s1139_s24 + $0x8] ss:$0 sps:$4 sm:$0xff]   ;;  %v1042_v45 = vld [vmem:[%s1144_s28 + $0xb4] ss:$8 sps:$4 sm:$0xff]  }
  0x24   : > { %640 = vmatpush1.bf16.msra.mxu0 %v999_v11  ;;  %v1038_v44 = vld [vmem:[%s1144_s28 + $0xc0] ss:$8 sps:$4 sm:$0xff]   ;;  %v1044_v46 = vld [vmem:[%s1144_s28 + $0xb0] ss:$8 sps:$4 sm:$0xff]   ;;  %v1048_v47 = vld [vmem:[%s1144_s28 + $0xa4] ss:$8 sps:$4 sm:$0xff]  }
  0x25   : > { %641 = vmatprep.subr.bf16.mxu0 %v1000_v12  ;;  %v1050_v48 = vld [vmem:[%s1144_s28 + $0xa0] ss:$8 sps:$4 sm:$0xff]   ;;  %v1054_v49 = vld [vmem:[%s1144_s28 + $0x94] ss:$8 sps:$4 sm:$0xff]   ;;  %v1056_v50 = vld [vmem:[%s1144_s28 + $0x90] ss:$8 sps:$4 sm:$0xff]  }
  0x26   : > { %681 = vmatpush1.bf16.msra.mxu1 %v1029_v22  ;;  %v1058_v51 = vld [vmem:[%s1144_s28 + $0x84] ss:$8 sps:$4 sm:$0xff]   ;;  %v1060_v52 = vld [vmem:[%s1144_s28 + $0x80] ss:$8 sps:$4 sm:$0xff]   ;;  %p954_p7 = scmp.ne.s32.totalorder %s1077_s15, 2 }
  0x27   : > { %682 = vmatprep.subr.bf16.mxu1 %v1033_v23  ;;  %v330_v58 = vld [vmem:[#allocation2] sm:$0xff]  ;;  %v331_v61 = vld [vmem:[#allocation2 + $0x8] sm:$0xff] }
  0x28   : > { %642 = vmatpush1.bf16.msra.mxu0 %v1002_v15 }
  0x29   : > { %643 = vmatprep.subr.bf16.mxu0 %v1003_v17 }
  0x2a   : > { %683 = vmatpush1.bf16.msra.mxu1 %v1035_v26 }
  0x2b   : > { %684 = vmatprep.subr.bf16.mxu1 %v1039_v27 }
  0x2c   : > { %644 = vmatpush1.bf16.msra.mxu0 %v1005_v20 }
  0x2d   : > { %645 = vmatprep.subr.bf16.mxu0 %v1006_v21 }
  0x2e   : > { %685 = vmatpush1.bf16.msra.mxu1 %v1041_v30 }
  0x2f   : > { %686 = vmatprep.subr.bf16.mxu1 %v1045_v31 }
  0x30   : > { %646 = vmatpush1.bf16.msra.mxu0 %v1008_v24 }
  0x31   : > { %647 = vmatprep.subr.bf16.mxu0 %v1012_v25 }
  0x32   : > { %687 = vmatpush1.bf16.msra.mxu1 %v1047_v35 }
  0x33   : > { %688 = vmatprep.subr.bf16.mxu1 %v1051_v37 }
  0x34   : > { %648 = vmatpush1.bf16.msra.mxu0 %v1014_v28 }
  0x35   : > { %649 = vmatprep.subr.bf16.mxu0 %v1018_v29 }
  0x36   : > { %689 = vmatpush1.bf16.msra.mxu1 %v1053_v40 }
  0x38   : > { %650 = vmatpush2.bf16.msra.mxu0 %v1020_v32 }
  0x39   : > { %651 = vmatprep.subr.bf16.mxu0 %v1024_v33  ;;  %707 = vmatmul.mubr.bf16.vlgmr.msra.gmra.mxu1 %v1057_v43 }
  0x3c   : > { %652 = vmatpush2.bf16.msra.mxu0 %v1026_v38 }
  0x3d   : > { %653 = vmatprep.subr.bf16.mxu0 %v1030_v39 }
  0x40   : > { %654 = vmatpush2.bf16.msra.mxu0 %v1032_v41 }
  0x41   : > { %655 = vmatprep.subr.bf16.mxu0 %v1036_v42 }
  0x44   : > { %656 = vmatpush2.bf16.msra.mxu0 %v1038_v44 }
  0x45   : > { %657 = vmatprep.subr.bf16.mxu0 %v1042_v45 }
  0x48   : > { %658 = vmatpush2.bf16.msra.mxu0 %v1044_v46 }
  0x49   : > { %659 = vmatprep.subr.bf16.mxu0 %v1048_v47 }
  0x4c   : > { %660 = vmatpush2.bf16.msra.mxu0 %v1050_v48 }
  0x4d   : > { %661 = vmatprep.subr.bf16.mxu0 %v1054_v49 }
  0x50   : > { %662 = vmatpush2.bf16.msra.mxu0 %v1056_v50 }
  0x51   : > { %663 = vmatprep.subr.bf16.mxu0 %v1058_v51 }
  0x54   : > { %664 = vmatpush2.bf16.msra.mxu0 %v1060_v52 }
  0x57   : > { %666 = vmatmul.mubr.bf16.vlgmr.msra.gmra.mxu0 %v903_v53 }
  0xf9   : > { %v708_v54 = vpop.f32.mrf.mxu1 }
  0xfb   : > { %v710_v55 = vpop.f32.mrf.mxu1 }
  0xfd   : > { %v712_v56 = vpop.f32.mrf.mxu1 }
  0xff   : > { %v713_v57 = vpop.f32.mrf.mxu1 }
 0x117   : > { %v667_v59 = vpop.f32.mrf.mxu0 }
 0x118   : > { %v709_v60 = vadd.f32 %v708_v54, %v667_v59 }
 0x119   : > { %v669_v62 = vpop.f32.mrf.mxu0 }
 0x11a   : > { %v715_v63 = vadd.f32 %v709_v60, %v330_v58  ;;  %v711_v0 = vadd.f32 %v710_v55, %v669_v62  ;;  %722 = sbr.rel (%p954_p7) target bundleno = 304 (0x130), region = 44 }
 0x11b   : > { %v671_v1 = vpop.f32.mrf.mxu0 }
 0x11c   : > { %717 = vst [vmem:[#allocation2] sm:$0xff] %v715_v63  ;;  %v716_v2 = vadd.f32 %v711_v0, %v331_v61 }
 0x11d   : > { %v672_v3 = vpop.f32.mrf.mxu0 }
 0x11e   : > { %718 = vst [vmem:[#allocation2 + $0x8] sm:$0xff] %v716_v2 }
 0x11f   : > { %v727_v4 = vlaneseq  ;;  %v725_v6 = vld [vmem:[%s1218_s2] sm:$0x3] }
 0x120   : > { %v739_v7 = vld [vmem:[%s1219_s3] sm:$0x3] }
 0x121   : > { %v728_v5 = vshrl.u32 %v727_v4, 7 }
 0x123   : > { %v729_v8 = vsub.s32 0, %v728_v5  ;;  %v733_v9 = vsub.s32 1, %v728_v5  ;;  %v723_v10 = vld [vmem:[#allocation2] sm:$0xff] }
 0x125   : > { %v724_v11 = vld [vmem:[#allocation2 + $0x8] sm:$0xff]  ;;  %v730_v12 = vrot.slane %v725_v6, %v729_v8  ;;  %v734_v13 = vrot.slane %v725_v6, %v733_v9  ;;  %v744_v14 = vrot.slane %v739_v7, %v729_v8  ;;  %v748_v15 = vrot.slane %v739_v7, %v733_v9 }
 0x127   : > { %v737_v16 = vmul.f32 %v730_v12, %v723_v10  ;;  %v738_v17 = vmul.f32 %v734_v13, %v724_v11 }
 0x129   : > { %v751_v18 = vadd.f32 %v744_v14, %v737_v16  ;;  %v752_v19 = vadd.f32 %v748_v15, %v738_v17 }
 0x12b   : > { %v753_v20 = vmax.f32 %v751_v18, 0.0  ;;  %v754_v21 = vmax.f32 %v752_v19, 0.0 }
 0x12d   : > { %v961_v22 = vpack.c.bf16 %v754_v21, %v753_v20 }
 0x12f   : > { %763 = vst [vmem:[%s1220_s4] sm:$0xff] %v961_v22 }
 0x130 PF: > { %s14_s17 = sadd.s32 1, %s1085_s17   ;;  %s1221_s15 = smov %s1081_s16 }
 0x131   : > { %p11_p8 = scmp.ge.s32.totalorder %s14_s17, 5   ;;  %s1222_s16 = smov %s1224_s18 }
 0x133   :  { %13 = sbr.rel (!%p11_p8) target bundleno = 2 (0x2), region = 83 }

// kernel: _forward.36
= control target key start
LH: loop header
LB: loop body
LE: loop exit
PB: predicated region body
PF: predicated region fallthrough
CT: control target
= control target key end

     0   :  { %v257_v1 = vmov 0   ;;  %v175_v18 = vlaneseq  ;;  %s343_s1 = inlined_call_operand.vmem [shape: bf16[128,256], index: 1, kind: input, shape index: {}]   ;;  %s344_s0 = inlined_call_operand.vmem [shape: bf16[8,128], index: 0, kind: input, shape index: {}]   ;;  %s345_s2 = inlined_call_operand.vmem [shape: f32[1,256], index: 2, kind: input, shape index: {}]   ;;  %s346_s3 = inlined_call_operand.vmem [shape: f32[1,256], index: 3, kind: input, shape index: {}]   ;;  %s347_s4 = inlined_call_operand.vmem [shape: bf16[8,256], index: 4, kind: output, shape index: {}]  }
   0x1   :  { %v233_v0 = vld [vmem:[%s343_s1 + $0x74] ss:$8 sps:$4 sm:$0xff]   ;;  %155 = vmatprep.mubr.bf16.mxu0 %v257_v1  ;;  %v235_v2 = vld [vmem:[%s343_s1 + $0x70] ss:$8 sps:$4 sm:$0xff]   ;;  %v236_v3 = vld [vmem:[%s343_s1 + $0x64] ss:$8 sps:$4 sm:$0xff]  }
   0x2   :  { %123 = vmatprep.subr.bf16.mxu0 %v233_v0  ;;  %v238_v4 = vld [vmem:[%s343_s1 + $0x60] ss:$8 sps:$4 sm:$0xff]   ;;  %v239_v5 = vld [vmem:[%s343_s1 + $0x54] ss:$8 sps:$4 sm:$0xff]   ;;  %v241_v6 = vld [vmem:[%s343_s1 + $0x50] ss:$8 sps:$4 sm:$0xff]  }
   0x3   :  { %124 = vmatpush1.bf16.msra.mxu0 %v235_v2  ;;  %v242_v7 = vld [vmem:[%s343_s1 + $0x44] ss:$8 sps:$4 sm:$0xff]   ;;  %v244_v8 = vld [vmem:[%s343_s1 + $0x40] ss:$8 sps:$4 sm:$0xff]   ;;  %v245_v9 = vld [vmem:[%s343_s1 + $0x34] ss:$8 sps:$4 sm:$0xff]  }
   0x4   :  { %125 = vmatprep.subr.bf16.mxu0 %v236_v3  ;;  %v247_v10 = vld [vmem:[%s343_s1 + $0x30] ss:$8 sps:$4 sm:$0xff]   ;;  %v248_v11 = vld [vmem:[%s343_s1 + $0x24] ss:$8 sps:$4 sm:$0xff]   ;;  %v250_v12 = vld [vmem:[%s343_s1 + $0x20] ss:$8 sps:$4 sm:$0xff]  }
   0x5   :  { %v251_v13 = vld [vmem:[%s343_s1 + $0x14] ss:$8 sps:$4 sm:$0xff]   ;;  %v253_v14 = vld [vmem:[%s343_s1 + $0x10] ss:$8 sps:$4 sm:$0xff]   ;;  %v254_v15 = vld [vmem:[%s343_s1 + $0x4] ss:$8 sps:$4 sm:$0xff]  }
   0x6   :  { %v256_v16 = vld [vmem:[%s343_s1] ss:$8 sps:$4 sm:$0xff]   ;;  %v176_v19 = vshrl.u32 %v175_v18, 7 }
   0x7   :  { %126 = vmatpush1.bf16.msra.mxu0 %v238_v4  ;;  %v26_v17 = vld [vmem:[%s344_s0] sm:$0xf] }
   0x8   :  { %127 = vmatprep.subr.bf16.mxu0 %v239_v5  ;;  %v177_v20 = vsub.s32 0, %v176_v19  ;;  %v173_v21 = vld [vmem:[%s345_s2] sm:$0x3]  ;;  %v181_v22 = vsub.s32 1, %v176_v19 }
   0x9   :  { %v187_v24 = vld [vmem:[%s346_s3] sm:$0x3] }
   0xa   :  { %v178_v23 = vrot.slane %v173_v21, %v177_v20  ;;  %v182_v25 = vrot.slane %v173_v21, %v181_v22  ;;  %v192_v28 = vrot.slane %v187_v24, %v177_v20  ;;  %v196_v29 = vrot.slane %v187_v24, %v181_v22 }
   0xb   :  { %128 = vmatpush1.bf16.msra.mxu0 %v241_v6 }
   0xc   :  { %129 = vmatprep.subr.bf16.mxu0 %v242_v7 }
   0xf   :  { %130 = vmatpush1.bf16.msra.mxu0 %v244_v8 }
  0x10   :  { %131 = vmatprep.subr.bf16.mxu0 %v245_v9 }
  0x13   :  { %132 = vmatpush1.bf16.msra.mxu0 %v247_v10 }
  0x14   :  { %133 = vmatprep.subr.bf16.mxu0 %v248_v11 }
  0x17   :  { %134 = vmatpush1.bf16.msra.mxu0 %v250_v12 }
  0x18   :  { %135 = vmatprep.subr.bf16.mxu0 %v251_v13 }
  0x1b   :  { %136 = vmatpush1.bf16.msra.mxu0 %v253_v14 }
  0x1c   :  { %137 = vmatprep.subr.bf16.mxu0 %v254_v15 }
  0x1f   :  { %138 = vmatpush1.bf16.msra.mxu0 %v256_v16 }
  0x22   :  { %156 = vmatmul.mubr.bf16.vlgmr.msra.gmra.mxu0 %v26_v17 }
  0xe2   :  { %v157_v26 = vpop.f32.mrf.mxu0 }
  0xe3   :  { %v185_v27 = vmul.f32 %v178_v23, %v157_v26 }
  0xe4   :  { %v159_v30 = vpop.f32.mrf.mxu0 }
  0xe5   :  { %v186_v31 = vmul.f32 %v182_v25, %v159_v30  ;;  %v199_v33 = vadd.f32 %v192_v28, %v185_v27 }
  0xe6   :  { %v161_v32 = vpop.f32.mrf.mxu0 }
  0xe7   :  { %v200_v34 = vadd.f32 %v196_v29, %v186_v31 }
  0xe8   :  { %v162_v35 = vpop.f32.mrf.mxu0 }
  0xe9   :  { %v231_v36 = vpack.c.bf16 %v200_v34, %v199_v33 }
  0xeb   :  { %209 = vst [vmem:[%s347_s4] sm:$0xff] %v231_v36 }

// kernel: _forward.38
= control target key start
LH: loop header
LB: loop body
LE: loop exit
PB: predicated region body
PF: predicated region fallthrough
CT: control target
= control target key end

     0   :  { %s1209_s18 = smov 0   ;;  %s1211_s19 = smov 0   ;;  %s1314_s0 = inlined_call_operand.vmem [shape: bf16[8,2304], index: 0, kind: input, shape index: {}]   ;;  %s1315_s1 = inlined_call_operand.vmem [shape: bf16[2304,256], index: 1, kind: input, shape index: {}]   ;;  %s1316_s2 = inlined_call_operand.vmem [shape: f32[1,256], index: 2, kind: input, shape index: {}]   ;;  %s1317_s3 = inlined_call_operand.vmem [shape: f32[1,256], index: 3, kind: input, shape index: {}]   ;;  %s1318_s4 = inlined_call_operand.vmem [shape: bf16[8,256], index: 4, kind: input, shape index: {}]   ;;  %s1319_s5 = inlined_call_operand.vmem [shape: bf16[8,256], index: 5, kind: output, shape index: {}]  }
   0x1   :  { %s1213_s20 = smov 0  }
   0x2 LB: > { %s27_s21 = sadd.s32 1, %s1171_s19  ;;  %p988_p0 = scmp.ge.s32.totalorder %s1175_s20, 1  ;;  %s1175_s20 = sphi %s1213_s20, %s15_s20   ;;  %s1171_s19 = sphi %s1211_s19, %s1321_s19   ;;  %s1167_s18 = sphi %s1209_s18, %s1320_s18  }
   0x3   : > { %p28_p1 = scmp.ge.s32.totalorder %s27_s21, 6  ;;  %p271_p2 = scmp.lt.s32.totalorder %s1175_s20, 7 }
   0x5   : > { %s1323_s21 = smov (%p28_p1, %s27_s21), 0  ;;  %p272_p3 = pnand %p988_p0, %p271_p2 }
   0x6   : > { %s334_s22 = smul.u32 (!%p272_p3), 3, %s1167_s18  ;;  %p992_p6 = scmp.ne.s32.totalorder (!%p272_p3), %s1167_s18, 0 }
   0x7   : > { %275 = sbr.rel (%p272_p3) target bundleno = 306 (0x132), region = 40 }
   0x8   : > { %s344_s23 = smul.u32 (!%p272_p3), 48, %s1167_s18  ;;  %p337_p4 = scmp.lt.s32.totalorder (!%p272_p3), %s334_s22, 17 }
   0xa   : > { %p346_p5 = scmp.lt.s32.totalorder (!%p272_p3), %s344_s23, 287 }
   0xc   : > { %s1325_s22 = smov (!%p337_p4, %s334_s22), 17  ;;  %s1327_s23 = smov (!%p346_p5, %s344_s23), 287 }
   0xd   : > { %s989_s24 = sshll.u32 %s1325_s22, 2  ;;  %s1050_s28 = sshll.u32 %s1327_s23, 3 }
   0xe   : > { %s1234_s27 = scalar_lea.vmem %s1314_s0, %s989_s24  ;;  %s1239_s6 = scalar_lea.vmem %s1315_s1, %s1050_s28 }
   0xf   : > { %390 = sbr.rel (%p992_p6) target bundleno = 22 (0x16), region = 44 }
  0x14   : > { %v1177_v0 = vmov 0.0  }
  0x15   : > { %391 = vst [vmem:[#allocation2] sm:$0xff] %v1177_v0  ;;  %392 = vst [vmem:[#allocation2 + $0x8] sm:$0xff] %v1177_v0 }
  0x16 PF: > { %v1078_v1 = vld [vmem:[%s1239_s6 + $0x74] ss:$8 sps:$4 sm:$0xff]   ;;  %v1080_v2 = vld [vmem:[%s1239_s6 + $0x70] ss:$8 sps:$4 sm:$0xff]   ;;  %v1178_v3 = vmov 0   ;;  %v395_v34 = vld [vmem:[%s1234_s27] sm:$0xff] }
  0x17   : > { %769 = vmatprep.mubr.bf16.mxu1 %v1178_v3  ;;  %696 = vmatprep.subr.bf16.mxu0 %v1078_v1  ;;  %v1081_v4 = vld [vmem:[%s1239_s6 + $0x64] ss:$8 sps:$4 sm:$0xff]   ;;  %v1083_v5 = vld [vmem:[%s1239_s6 + $0x60] ss:$8 sps:$4 sm:$0xff]   ;;  %v1084_v6 = vld [vmem:[%s1239_s6 + $0x54] ss:$8 sps:$4 sm:$0xff]   ;;  %v994_v36 = vcombine.high %v395_v34, %v395_v34  ;;  %v993_v53 = vcombine.low %v395_v34, %v395_v34 }
  0x18   : > { %697 = vmatpush1.bf16.msra.mxu0 %v1080_v2  ;;  %v1086_v7 = vld [vmem:[%s1239_s6 + $0x50] ss:$8 sps:$4 sm:$0xff]   ;;  %v1087_v8 = vld [vmem:[%s1239_s6 + $0x44] ss:$8 sps:$4 sm:$0xff]   ;;  %v1099_v9 = vld [vmem:[%s1239_s6 + $0x174] ss:$8 sps:$4 sm:$0xff]  }
  0x19   : > { %698 = vmatprep.subr.bf16.mxu0 %v1081_v4  ;;  %v1101_v10 = vld [vmem:[%s1239_s6 + $0x170] ss:$8 sps:$4 sm:$0xff]   ;;  %v1089_v11 = vld [vmem:[%s1239_s6 + $0x40] ss:$8 sps:$4 sm:$0xff]   ;;  %v1090_v12 = vld [vmem:[%s1239_s6 + $0x34] ss:$8 sps:$4 sm:$0xff]   ;;  %737 = vmatprep.subr.bf16.mxu1 %v1099_v9 }
  0x1a   : > { %v1105_v13 = vld [vmem:[%s1239_s6 + $0x164] ss:$8 sps:$4 sm:$0xff]   ;;  %738 = vmatpush1.bf16.msra.mxu1 %v1101_v10  ;;  %v1107_v14 = vld [vmem:[%s1239_s6 + $0x160] ss:$8 sps:$4 sm:$0xff]   ;;  %v1092_v15 = vld [vmem:[%s1239_s6 + $0x30] ss:$8 sps:$4 sm:$0xff]   ;;  %728 = vmatprep.mubr.bf16.mxu0 %v994_v36 }
  0x1b   : > { %739 = vmatprep.subr.bf16.mxu1 %v1105_v13  ;;  %v1111_v16 = vld [vmem:[%s1239_s6 + $0x154] ss:$8 sps:$4 sm:$0xff]   ;;  %v1093_v17 = vld [vmem:[%s1239_s6 + $0x24] ss:$8 sps:$4 sm:$0xff]   ;;  %v1113_v18 = vld [vmem:[%s1239_s6 + $0x150] ss:$8 sps:$4 sm:$0xff]  }
  0x1c   : > { %699 = vmatpush1.bf16.msra.mxu0 %v1083_v5  ;;  %v1117_v19 = vld [vmem:[%s1239_s6 + $0x144] ss:$8 sps:$4 sm:$0xff]   ;;  %v1095_v20 = vld [vmem:[%s1239_s6 + $0x20] ss:$8 sps:$4 sm:$0xff]   ;;  %v1096_v21 = vld [vmem:[%s1239_s6 + $0x14] ss:$8 sps:$4 sm:$0xff]  }
  0x1d   : > { %700 = vmatprep.subr.bf16.mxu0 %v1084_v6  ;;  %v1119_v22 = vld [vmem:[%s1239_s6 + $0x140] ss:$8 sps:$4 sm:$0xff]   ;;  %v1123_v23 = vld [vmem:[%s1239_s6 + $0x134] ss:$8 sps:$4 sm:$0xff]   ;;  %v1098_v24 = vld [vmem:[%s1239_s6 + $0x10] ss:$8 sps:$4 sm:$0xff]  }
  0x1e   : > { %740 = vmatpush1.bf16.msra.mxu1 %v1107_v14  ;;  %v1102_v25 = vld [vmem:[%s1239_s6 + $0x4] ss:$8 sps:$4 sm:$0xff]   ;;  %v1125_v26 = vld [vmem:[%s1239_s6 + $0x130] ss:$8 sps:$4 sm:$0xff]   ;;  %v1104_v28 = vld [vmem:[%s1239_s6] ss:$8 sps:$4 sm:$0xff]  }
  0x1f   : > { %741 = vmatprep.subr.bf16.mxu1 %v1111_v16  ;;  %v1129_v27 = vld [vmem:[%s1239_s6 + $0x124] ss:$8 sps:$4 sm:$0xff]   ;;  %v1108_v29 = vld [vmem:[%s1239_s6 + $0xf4] ss:$8 sps:$4 sm:$0xff]   ;;  %v1131_v30 = vld [vmem:[%s1239_s6 + $0x120] ss:$8 sps:$4 sm:$0xff]  }
  0x20   : > { %701 = vmatpush1.bf16.msra.mxu0 %v1086_v7  ;;  %v1135_v31 = vld [vmem:[%s1239_s6 + $0x114] ss:$8 sps:$4 sm:$0xff]   ;;  %v1110_v32 = vld [vmem:[%s1239_s6 + $0xf0] ss:$8 sps:$4 sm:$0xff]   ;;  %v1114_v33 = vld [vmem:[%s1239_s6 + $0xe4] ss:$8 sps:$4 sm:$0xff]  }
  0x21   : > { %702 = vmatprep.subr.bf16.mxu0 %v1087_v8  ;;  %v1137_v35 = vld [vmem:[%s1239_s6 + $0x110] ss:$8 sps:$4 sm:$0xff]   ;;  %v1141_v37 = vld [vmem:[%s1239_s6 + $0x104] ss:$8 sps:$4 sm:$0xff]   ;;  %v1116_v38 = vld [vmem:[%s1239_s6 + $0xe0] ss:$8 sps:$4 sm:$0xff]  }
  0x22   : > { %742 = vmatpush1.bf16.msra.mxu1 %v1113_v18  ;;  %v1120_v39 = vld [vmem:[%s1239_s6 + $0xd4] ss:$8 sps:$4 sm:$0xff]   ;;  %v1143_v40 = vld [vmem:[%s1239_s6 + $0x100] ss:$8 sps:$4 sm:$0xff]   ;;  %v1122_v41 = vld [vmem:[%s1239_s6 + $0xd0] ss:$8 sps:$4 sm:$0xff]  }
  0x23   : > { %743 = vmatprep.subr.bf16.mxu1 %v1117_v19  ;;  %v1126_v42 = vld [vmem:[%s1239_s6 + $0xc4] ss:$8 sps:$4 sm:$0xff]   ;;  %v1147_v43 = vld [vmem:[%s1234_s27 + $0x8] ss:$0 sps:$4 sm:$0xff]   ;;  %v1132_v45 = vld [vmem:[%s1239_s6 + $0xb4] ss:$8 sps:$4 sm:$0xff]  }
  0x24   : > { %703 = vmatpush1.bf16.msra.mxu0 %v1089_v11  ;;  %v1128_v44 = vld [vmem:[%s1239_s6 + $0xc0] ss:$8 sps:$4 sm:$0xff]   ;;  %v1134_v46 = vld [vmem:[%s1239_s6 + $0xb0] ss:$8 sps:$4 sm:$0xff]   ;;  %v1138_v47 = vld [vmem:[%s1239_s6 + $0xa4] ss:$8 sps:$4 sm:$0xff]  }
  0x25   : > { %704 = vmatprep.subr.bf16.mxu0 %v1090_v12  ;;  %v1140_v48 = vld [vmem:[%s1239_s6 + $0xa0] ss:$8 sps:$4 sm:$0xff]   ;;  %v1144_v49 = vld [vmem:[%s1239_s6 + $0x94] ss:$8 sps:$4 sm:$0xff]   ;;  %v1146_v50 = vld [vmem:[%s1239_s6 + $0x90] ss:$8 sps:$4 sm:$0xff]  }
  0x26   : > { %744 = vmatpush1.bf16.msra.mxu1 %v1119_v22  ;;  %v1148_v51 = vld [vmem:[%s1239_s6 + $0x84] ss:$8 sps:$4 sm:$0xff]   ;;  %v1150_v52 = vld [vmem:[%s1239_s6 + $0x80] ss:$8 sps:$4 sm:$0xff]   ;;  %p1044_p7 = scmp.ne.s32.totalorder %s1167_s18, 5 }
  0x27   : > { %745 = vmatprep.subr.bf16.mxu1 %v1123_v23  ;;  %v393_v58 = vld [vmem:[#allocation2] sm:$0xff]  ;;  %v394_v61 = vld [vmem:[#allocation2 + $0x8] sm:$0xff] }
  0x28   : > { %705 = vmatpush1.bf16.msra.mxu0 %v1092_v15 }
  0x29   : > { %706 = vmatprep.subr.bf16.mxu0 %v1093_v17 }
  0x2a   : > { %746 = vmatpush1.bf16.msra.mxu1 %v1125_v26 }
  0x2b   : > { %747 = vmatprep.subr.bf16.mxu1 %v1129_v27 }
  0x2c   : > { %707 = vmatpush1.bf16.msra.mxu0 %v1095_v20 }
  0x2d   : > { %708 = vmatprep.subr.bf16.mxu0 %v1096_v21 }
  0x2e   : > { %748 = vmatpush1.bf16.msra.mxu1 %v1131_v30 }
  0x2f   : > { %749 = vmatprep.subr.bf16.mxu1 %v1135_v31 }
  0x30   : > { %709 = vmatpush1.bf16.msra.mxu0 %v1098_v24 }
  0x31   : > { %710 = vmatprep.subr.bf16.mxu0 %v1102_v25 }
  0x32   : > { %750 = vmatpush1.bf16.msra.mxu1 %v1137_v35 }
  0x33   : > { %751 = vmatprep.subr.bf16.mxu1 %v1141_v37 }
  0x34   : > { %711 = vmatpush1.bf16.msra.mxu0 %v1104_v28 }
  0x35   : > { %712 = vmatprep.subr.bf16.mxu0 %v1108_v29 }
  0x36   : > { %752 = vmatpush1.bf16.msra.mxu1 %v1143_v40 }
  0x38   : > { %713 = vmatpush2.bf16.msra.mxu0 %v1110_v32 }
  0x39   : > { %714 = vmatprep.subr.bf16.mxu0 %v1114_v33  ;;  %770 = vmatmul.mubr.bf16.vlgmr.msra.gmra.mxu1 %v1147_v43 }
  0x3c   : > { %715 = vmatpush2.bf16.msra.mxu0 %v1116_v38 }
  0x3d   : > { %716 = vmatprep.subr.bf16.mxu0 %v1120_v39 }
  0x40   : > { %717 = vmatpush2.bf16.msra.mxu0 %v1122_v41 }
  0x41   : > { %718 = vmatprep.subr.bf16.mxu0 %v1126_v42 }
  0x44   : > { %719 = vmatpush2.bf16.msra.mxu0 %v1128_v44 }
  0x45   : > { %720 = vmatprep.subr.bf16.mxu0 %v1132_v45 }
  0x48   : > { %721 = vmatpush2.bf16.msra.mxu0 %v1134_v46 }
  0x49   : > { %722 = vmatprep.subr.bf16.mxu0 %v1138_v47 }
  0x4c   : > { %723 = vmatpush2.bf16.msra.mxu0 %v1140_v48 }
  0x4d   : > { %724 = vmatprep.subr.bf16.mxu0 %v1144_v49 }
  0x50   : > { %725 = vmatpush2.bf16.msra.mxu0 %v1146_v50 }
  0x51   : > { %726 = vmatprep.subr.bf16.mxu0 %v1148_v51 }
  0x54   : > { %727 = vmatpush2.bf16.msra.mxu0 %v1150_v52 }
  0x57   : > { %729 = vmatmul.mubr.bf16.vlgmr.msra.gmra.mxu0 %v993_v53 }
  0xf9   : > { %v771_v54 = vpop.f32.mrf.mxu1 }
  0xfb   : > { %v773_v55 = vpop.f32.mrf.mxu1 }
  0xfd   : > { %v775_v56 = vpop.f32.mrf.mxu1 }
  0xff   : > { %v776_v57 = vpop.f32.mrf.mxu1 }
 0x117   : > { %v730_v59 = vpop.f32.mrf.mxu0 }
 0x118   : > { %v772_v60 = vadd.f32 %v771_v54, %v730_v59 }
 0x119   : > { %v732_v62 = vpop.f32.mrf.mxu0 }
 0x11a   : > { %v778_v63 = vadd.f32 %v772_v60, %v393_v58  ;;  %v774_v0 = vadd.f32 %v773_v55, %v732_v62  ;;  %785 = sbr.rel (%p1044_p7) target bundleno = 306 (0x132), region = 48 }
 0x11b   : > { %v734_v1 = vpop.f32.mrf.mxu0 }
 0x11c   : > { %780 = vst [vmem:[#allocation2] sm:$0xff] %v778_v63  ;;  %v779_v2 = vadd.f32 %v774_v0, %v394_v61 }
 0x11d   : > { %v735_v3 = vpop.f32.mrf.mxu0 }
 0x11e   : > { %781 = vst [vmem:[#allocation2 + $0x8] sm:$0xff] %v779_v2 }
 0x11f   : > { %v790_v4 = vlaneseq  ;;  %v788_v6 = vld [vmem:[%s1316_s2] sm:$0x3] }
 0x120   : > { %v802_v7 = vld [vmem:[%s1317_s3] sm:$0x3] }
 0x121   : > { %v791_v5 = vshrl.u32 %v790_v4, 7  ;;  %v816_v12 = vld [vmem:[%s1318_s4] sm:$0xff] }
 0x122   : > { %v817_v19 = vunpack.c.l.bf16 %v816_v12  ;;  %v818_v20 = vunpack.c.h.bf16 %v816_v12 }
 0x123   : > { %v792_v8 = vsub.s32 0, %v791_v5  ;;  %v796_v9 = vsub.s32 1, %v791_v5  ;;  %v786_v10 = vld [vmem:[#allocation2] sm:$0xff] }
 0x125   : > { %v787_v11 = vld [vmem:[#allocation2 + $0x8] sm:$0xff]  ;;  %v793_v13 = vrot.slane %v788_v6, %v792_v8  ;;  %v797_v14 = vrot.slane %v788_v6, %v796_v9  ;;  %v807_v15 = vrot.slane %v802_v7, %v792_v8  ;;  %v811_v16 = vrot.slane %v802_v7, %v796_v9 }
 0x127   : > { %v800_v17 = vmul.f32 %v793_v13, %v786_v10  ;;  %v801_v18 = vmul.f32 %v797_v14, %v787_v11 }
 0x129   : > { %v814_v21 = vadd.f32 %v807_v15, %v800_v17  ;;  %v815_v22 = vadd.f32 %v811_v16, %v801_v18 }
 0x12b   : > { %v819_v23 = vadd.f32 %v817_v19, %v814_v21  ;;  %v820_v24 = vadd.f32 %v818_v20, %v815_v22 }
 0x12d   : > { %v821_v25 = vmax.f32 %v819_v23, 0.0  ;;  %v822_v26 = vmax.f32 %v820_v24, 0.0 }
 0x12f   : > { %v1051_v27 = vpack.c.bf16 %v822_v26, %v821_v25 }
 0x131   : > { %831 = vst [vmem:[%s1319_s5] sm:$0xff] %v1051_v27 }
 0x132 PF: > { %s15_s20 = sadd.s32 1, %s1175_s20   ;;  %s1320_s18 = smov %s1171_s19 }
 0x133   : > { %p12_p8 = scmp.ge.s32.totalorder %s15_s20, 8   ;;  %s1321_s19 = smov %s1323_s21 }
 0x135   :  { %14 = sbr.rel (!%p12_p8) target bundleno = 2 (0x2), region = 90 }

// kernel: _forward.39
= control target key start
LH: loop header
LB: loop body
LE: loop exit
PB: predicated region body
PF: predicated region fallthrough
CT: control target
= control target key end

     0   :  { %s1114_s15 = smov 0   ;;  %s1116_s16 = smov 0   ;;  %s1216_s0 = inlined_call_operand.vmem [shape: bf16[8,2304], index: 0, kind: input, shape index: {}]   ;;  %s1217_s1 = inlined_call_operand.vmem [shape: bf16[2304,256], index: 1, kind: input, shape index: {}]   ;;  %s1218_s2 = inlined_call_operand.vmem [shape: f32[1,256], index: 2, kind: input, shape index: {}]   ;;  %s1219_s3 = inlined_call_operand.vmem [shape: f32[1,256], index: 3, kind: input, shape index: {}]   ;;  %s1220_s4 = inlined_call_operand.vmem [shape: bf16[8,256], index: 4, kind: output, shape index: {}]  }
   0x1   :  { %s1118_s17 = smov 0  }
   0x2 LB: > { %s26_s18 = sadd.s32 1, %s1081_s16  ;;  %p898_p0 = scmp.ge.s32.totalorder %s1085_s17, 1  ;;  %s1085_s17 = sphi %s1118_s17, %s14_s17   ;;  %s1081_s16 = sphi %s1116_s16, %s1222_s16   ;;  %s1077_s15 = sphi %s1114_s15, %s1221_s15  }
   0x3   : > { %p27_p1 = scmp.ge.s32.totalorder %s26_s18, 6  ;;  %p229_p2 = scmp.lt.s32.totalorder %s1085_s17, 7 }
   0x5   : > { %s1224_s18 = smov (%p27_p1, %s26_s18), 0  ;;  %p230_p3 = pnand %p898_p0, %p229_p2 }
   0x6   : > { %s281_s19 = smul.u32 (!%p230_p3), 3, %s1077_s15  ;;  %p902_p6 = scmp.ne.s32.totalorder (!%p230_p3), %s1077_s15, 0 }
   0x7   : > { %233 = sbr.rel (%p230_p3) target bundleno = 304 (0x130), region = 36 }
   0x8   : > { %s291_s20 = smul.u32 (!%p230_p3), 48, %s1077_s15  ;;  %p284_p4 = scmp.lt.s32.totalorder (!%p230_p3), %s281_s19, 17 }
   0xa   : > { %p293_p5 = scmp.lt.s32.totalorder (!%p230_p3), %s291_s20, 287 }
   0xc   : > { %s1226_s19 = smov (!%p284_p4, %s281_s19), 17  ;;  %s1228_s20 = smov (!%p293_p5, %s291_s20), 287 }
   0xd   : > { %s899_s21 = sshll.u32 %s1226_s19, 2  ;;  %s960_s25 = sshll.u32 %s1228_s20, 3 }
   0xe   : > { %s1139_s24 = scalar_lea.vmem %s1216_s0, %s899_s21  ;;  %s1144_s28 = scalar_lea.vmem %s1217_s1, %s960_s25 }
   0xf   : > { %327 = sbr.rel (%p902_p6) target bundleno = 22 (0x16), region = 40 }
  0x14   : > { %v1087_v0 = vmov 0.0  }
  0x15   : > { %328 = vst [vmem:[#allocation2] sm:$0xff] %v1087_v0  ;;  %329 = vst [vmem:[#allocation2 + $0x8] sm:$0xff] %v1087_v0 }
  0x16 PF: > { %v988_v1 = vld [vmem:[%s1144_s28 + $0x74] ss:$8 sps:$4 sm:$0xff]   ;;  %v990_v2 = vld [vmem:[%s1144_s28 + $0x70] ss:$8 sps:$4 sm:$0xff]   ;;  %v1088_v3 = vmov 0   ;;  %v332_v34 = vld [vmem:[%s1139_s24] sm:$0xff] }
  0x17   : > { %706 = vmatprep.mubr.bf16.mxu1 %v1088_v3  ;;  %633 = vmatprep.subr.bf16.mxu0 %v988_v1  ;;  %v991_v4 = vld [vmem:[%s1144_s28 + $0x64] ss:$8 sps:$4 sm:$0xff]   ;;  %v993_v5 = vld [vmem:[%s1144_s28 + $0x60] ss:$8 sps:$4 sm:$0xff]   ;;  %v994_v6 = vld [vmem:[%s1144_s28 + $0x54] ss:$8 sps:$4 sm:$0xff]   ;;  %v904_v36 = vcombine.high %v332_v34, %v332_v34  ;;  %v903_v53 = vcombine.low %v332_v34, %v332_v34 }
  0x18   : > { %634 = vmatpush1.bf16.msra.mxu0 %v990_v2  ;;  %v996_v7 = vld [vmem:[%s1144_s28 + $0x50] ss:$8 sps:$4 sm:$0xff]   ;;  %v997_v8 = vld [vmem:[%s1144_s28 + $0x44] ss:$8 sps:$4 sm:$0xff]   ;;  %v1009_v9 = vld [vmem:[%s1144_s28 + $0x174] ss:$8 sps:$4 sm:$0xff]  }
  0x19   : > { %635 = vmatprep.subr.bf16.mxu0 %v991_v4  ;;  %v1011_v10 = vld [vmem:[%s1144_s28 + $0x170] ss:$8 sps:$4 sm:$0xff]   ;;  %v999_v11 = vld [vmem:[%s1144_s28 + $0x40] ss:$8 sps:$4 sm:$0xff]   ;;  %v1000_v12 = vld [vmem:[%s1144_s28 + $0x34] ss:$8 sps:$4 sm:$0xff]   ;;  %674 = vmatprep.subr.bf16.mxu1 %v1009_v9 }
  0x1a   : > { %v1015_v13 = vld [vmem:[%s1144_s28 + $0x164] ss:$8 sps:$4 sm:$0xff]   ;;  %675 = vmatpush1.bf16.msra.mxu1 %v1011_v10  ;;  %v1017_v14 = vld [vmem:[%s1144_s28 + $0x160] ss:$8 sps:$4 sm:$0xff]   ;;  %v1002_v15 = vld [vmem:[%s1144_s28 + $0x30] ss:$8 sps:$4 sm:$0xff]   ;;  %665 = vmatprep.mubr.bf16.mxu0 %v904_v36 }
  0x1b   : > { %676 = vmatprep.subr.bf16.mxu1 %v1015_v13  ;;  %v1021_v16 = vld [vmem:[%s1144_s28 + $0x154] ss:$8 sps:$4 sm:$0xff]   ;;  %v1003_v17 = vld [vmem:[%s1144_s28 + $0x24] ss:$8 sps:$4 sm:$0xff]   ;;  %v1023_v18 = vld [vmem:[%s1144_s28 + $0x150] ss:$8 sps:$4 sm:$0xff]  }
  0x1c   : > { %636 = vmatpush1.bf16.msra.mxu0 %v993_v5  ;;  %v1027_v19 = vld [vmem:[%s1144_s28 + $0x144] ss:$8 sps:$4 sm:$0xff]   ;;  %v1005_v20 = vld [vmem:[%s1144_s28 + $0x20] ss:$8 sps:$4 sm:$0xff]   ;;  %v1006_v21 = vld [vmem:[%s1144_s28 + $0x14] ss:$8 sps:$4 sm:$0xff]  }
  0x1d   : > { %637 = vmatprep.subr.bf16.mxu0 %v994_v6  ;;  %v1029_v22 = vld [vmem:[%s1144_s28 + $0x140] ss:$8 sps:$4 sm:$0xff]   ;;  %v1033_v23 = vld [vmem:[%s1144_s28 + $0x134] ss:$8 sps:$4 sm:$0xff]   ;;  %v1008_v24 = vld [vmem:[%s1144_s28 + $0x10] ss:$8 sps:$4 sm:$0xff]  }
  0x1e   : > { %677 = vmatpush1.bf16.msra.mxu1 %v1017_v14  ;;  %v1012_v25 = vld [vmem:[%s1144_s28 + $0x4] ss:$8 sps:$4 sm:$0xff]   ;;  %v1035_v26 = vld [vmem:[%s1144_s28 + $0x130] ss:$8 sps:$4 sm:$0xff]   ;;  %v1014_v28 = vld [vmem:[%s1144_s28] ss:$8 sps:$4 sm:$0xff]  }
  0x1f   : > { %678 = vmatprep.subr.bf16.mxu1 %v1021_v16  ;;  %v1039_v27 = vld [vmem:[%s1144_s28 + $0x124] ss:$8 sps:$4 sm:$0xff]   ;;  %v1018_v29 = vld [vmem:[%s1144_s28 + $0xf4] ss:$8 sps:$4 sm:$0xff]   ;;  %v1041_v30 = vld [vmem:[%s1144_s28 + $0x120] ss:$8 sps:$4 sm:$0xff]  }
  0x20   : > { %638 = vmatpush1.bf16.msra.mxu0 %v996_v7  ;;  %v1045_v31 = vld [vmem:[%s1144_s28 + $0x114] ss:$8 sps:$4 sm:$0xff]   ;;  %v1020_v32 = vld [vmem:[%s1144_s28 + $0xf0] ss:$8 sps:$4 sm:$0xff]   ;;  %v1024_v33 = vld [vmem:[%s1144_s28 + $0xe4] ss:$8 sps:$4 sm:$0xff]  }
  0x21   : > { %639 = vmatprep.subr.bf16.mxu0 %v997_v8  ;;  %v1047_v35 = vld [vmem:[%s1144_s28 + $0x110] ss:$8 sps:$4 sm:$0xff]   ;;  %v1051_v37 = vld [vmem:[%s1144_s28 + $0x104] ss:$8 sps:$4 sm:$0xff]   ;;  %v1026_v38 = vld [vmem:[%s1144_s28 + $0xe0] ss:$8 sps:$4 sm:$0xff]  }
  0x22   : > { %679 = vmatpush1.bf16.msra.mxu1 %v1023_v18  ;;  %v1030_v39 = vld [vmem:[%s1144_s28 + $0xd4] ss:$8 sps:$4 sm:$0xff]   ;;  %v1053_v40 = vld [vmem:[%s1144_s28 + $0x100] ss:$8 sps:$4 sm:$0xff]   ;;  %v1032_v41 = vld [vmem:[%s1144_s28 + $0xd0] ss:$8 sps:$4 sm:$0xff]  }
  0x23   : > { %680 = vmatprep.subr.bf16.mxu1 %v1027_v19  ;;  %v1036_v42 = vld [vmem:[%s1144_s28 + $0xc4] ss:$8 sps:$4 sm:$0xff]   ;;  %v1057_v43 = vld [vmem:[%s1139_s24 + $0x8] ss:$0 sps:$4 sm:$0xff]   ;;  %v1042_v45 = vld [vmem:[%s1144_s28 + $0xb4] ss:$8 sps:$4 sm:$0xff]  }
  0x24   : > { %640 = vmatpush1.bf16.msra.mxu0 %v999_v11  ;;  %v1038_v44 = vld [vmem:[%s1144_s28 + $0xc0] ss:$8 sps:$4 sm:$0xff]   ;;  %v1044_v46 = vld [vmem:[%s1144_s28 + $0xb0] ss:$8 sps:$4 sm:$0xff]   ;;  %v1048_v47 = vld [vmem:[%s1144_s28 + $0xa4] ss:$8 sps:$4 sm:$0xff]  }
  0x25   : > { %641 = vmatprep.subr.bf16.mxu0 %v1000_v12  ;;  %v1050_v48 = vld [vmem:[%s1144_s28 + $0xa0] ss:$8 sps:$4 sm:$0xff]   ;;  %v1054_v49 = vld [vmem:[%s1144_s28 + $0x94] ss:$8 sps:$4 sm:$0xff]   ;;  %v1056_v50 = vld [vmem:[%s1144_s28 + $0x90] ss:$8 sps:$4 sm:$0xff]  }
  0x26   : > { %681 = vmatpush1.bf16.msra.mxu1 %v1029_v22  ;;  %v1058_v51 = vld [vmem:[%s1144_s28 + $0x84] ss:$8 sps:$4 sm:$0xff]   ;;  %v1060_v52 = vld [vmem:[%s1144_s28 + $0x80] ss:$8 sps:$4 sm:$0xff]   ;;  %p954_p7 = scmp.ne.s32.totalorder %s1077_s15, 5 }
  0x27   : > { %682 = vmatprep.subr.bf16.mxu1 %v1033_v23  ;;  %v330_v58 = vld [vmem:[#allocation2] sm:$0xff]  ;;  %v331_v61 = vld [vmem:[#allocation2 + $0x8] sm:$0xff] }
  0x28   : > { %642 = vmatpush1.bf16.msra.mxu0 %v1002_v15 }
  0x29   : > { %643 = vmatprep.subr.bf16.mxu0 %v1003_v17 }
  0x2a   : > { %683 = vmatpush1.bf16.msra.mxu1 %v1035_v26 }
  0x2b   : > { %684 = vmatprep.subr.bf16.mxu1 %v1039_v27 }
  0x2c   : > { %644 = vmatpush1.bf16.msra.mxu0 %v1005_v20 }
  0x2d   : > { %645 = vmatprep.subr.bf16.mxu0 %v1006_v21 }
  0x2e   : > { %685 = vmatpush1.bf16.msra.mxu1 %v1041_v30 }
  0x2f   : > { %686 = vmatprep.subr.bf16.mxu1 %v1045_v31 }
  0x30   : > { %646 = vmatpush1.bf16.msra.mxu0 %v1008_v24 }
  0x31   : > { %647 = vmatprep.subr.bf16.mxu0 %v1012_v25 }
  0x32   : > { %687 = vmatpush1.bf16.msra.mxu1 %v1047_v35 }
  0x33   : > { %688 = vmatprep.subr.bf16.mxu1 %v1051_v37 }
  0x34   : > { %648 = vmatpush1.bf16.msra.mxu0 %v1014_v28 }
  0x35   : > { %649 = vmatprep.subr.bf16.mxu0 %v1018_v29 }
  0x36   : > { %689 = vmatpush1.bf16.msra.mxu1 %v1053_v40 }
  0x38   : > { %650 = vmatpush2.bf16.msra.mxu0 %v1020_v32 }
  0x39   : > { %651 = vmatprep.subr.bf16.mxu0 %v1024_v33  ;;  %707 = vmatmul.mubr.bf16.vlgmr.msra.gmra.mxu1 %v1057_v43 }
  0x3c   : > { %652 = vmatpush2.bf16.msra.mxu0 %v1026_v38 }
  0x3d   : > { %653 = vmatprep.subr.bf16.mxu0 %v1030_v39 }
  0x40   : > { %654 = vmatpush2.bf16.msra.mxu0 %v1032_v41 }
  0x41   : > { %655 = vmatprep.subr.bf16.mxu0 %v1036_v42 }
  0x44   : > { %656 = vmatpush2.bf16.msra.mxu0 %v1038_v44 }
  0x45   : > { %657 = vmatprep.subr.bf16.mxu0 %v1042_v45 }
  0x48   : > { %658 = vmatpush2.bf16.msra.mxu0 %v1044_v46 }
  0x49   : > { %659 = vmatprep.subr.bf16.mxu0 %v1048_v47 }
  0x4c   : > { %660 = vmatpush2.bf16.msra.mxu0 %v1050_v48 }
  0x4d   : > { %661 = vmatprep.subr.bf16.mxu0 %v1054_v49 }
  0x50   : > { %662 = vmatpush2.bf16.msra.mxu0 %v1056_v50 }
  0x51   : > { %663 = vmatprep.subr.bf16.mxu0 %v1058_v51 }
  0x54   : > { %664 = vmatpush2.bf16.msra.mxu0 %v1060_v52 }
  0x57   : > { %666 = vmatmul.mubr.bf16.vlgmr.msra.gmra.mxu0 %v903_v53 }
  0xf9   : > { %v708_v54 = vpop.f32.mrf.mxu1 }
  0xfb   : > { %v710_v55 = vpop.f32.mrf.mxu1 }
  0xfd   : > { %v712_v56 = vpop.f32.mrf.mxu1 }
  0xff   : > { %v713_v57 = vpop.f32.mrf.mxu1 }
 0x117   : > { %v667_v59 = vpop.f32.mrf.mxu0 }
 0x118   : > { %v709_v60 = vadd.f32 %v708_v54, %v667_v59 }
 0x119   : > { %v669_v62 = vpop.f32.mrf.mxu0 }
 0x11a   : > { %v715_v63 = vadd.f32 %v709_v60, %v330_v58  ;;  %v711_v0 = vadd.f32 %v710_v55, %v669_v62  ;;  %722 = sbr.rel (%p954_p7) target bundleno = 304 (0x130), region = 44 }
 0x11b   : > { %v671_v1 = vpop.f32.mrf.mxu0 }
 0x11c   : > { %717 = vst [vmem:[#allocation2] sm:$0xff] %v715_v63  ;;  %v716_v2 = vadd.f32 %v711_v0, %v331_v61 }
 0x11d   : > { %v672_v3 = vpop.f32.mrf.mxu0 }
 0x11e   : > { %718 = vst [vmem:[#allocation2 + $0x8] sm:$0xff] %v716_v2 }
 0x11f   : > { %v727_v4 = vlaneseq  ;;  %v725_v6 = vld [vmem:[%s1218_s2] sm:$0x3] }
 0x120   : > { %v739_v7 = vld [vmem:[%s1219_s3] sm:$0x3] }
 0x121   : > { %v728_v5 = vshrl.u32 %v727_v4, 7 }
 0x123   : > { %v729_v8 = vsub.s32 0, %v728_v5  ;;  %v733_v9 = vsub.s32 1, %v728_v5  ;;  %v723_v10 = vld [vmem:[#allocation2] sm:$0xff] }
 0x125   : > { %v724_v11 = vld [vmem:[#allocation2 + $0x8] sm:$0xff]  ;;  %v730_v12 = vrot.slane %v725_v6, %v729_v8  ;;  %v734_v13 = vrot.slane %v725_v6, %v733_v9  ;;  %v744_v14 = vrot.slane %v739_v7, %v729_v8  ;;  %v748_v15 = vrot.slane %v739_v7, %v733_v9 }
 0x127   : > { %v737_v16 = vmul.f32 %v730_v12, %v723_v10  ;;  %v738_v17 = vmul.f32 %v734_v13, %v724_v11 }
 0x129   : > { %v751_v18 = vadd.f32 %v744_v14, %v737_v16  ;;  %v752_v19 = vadd.f32 %v748_v15, %v738_v17 }
 0x12b   : > { %v753_v20 = vmax.f32 %v751_v18, 0.0  ;;  %v754_v21 = vmax.f32 %v752_v19, 0.0 }
 0x12d   : > { %v961_v22 = vpack.c.bf16 %v754_v21, %v753_v20 }
 0x12f   : > { %763 = vst [vmem:[%s1220_s4] sm:$0xff] %v961_v22 }
 0x130 PF: > { %s14_s17 = sadd.s32 1, %s1085_s17   ;;  %s1221_s15 = smov %s1081_s16 }
 0x131   : > { %p11_p8 = scmp.ge.s32.totalorder %s14_s17, 8   ;;  %s1222_s16 = smov %s1224_s18 }
 0x133   :  { %13 = sbr.rel (!%p11_p8) target bundleno = 2 (0x2), region = 83 }

// kernel: _forward.46
= control target key start
LH: loop header
LB: loop body
LE: loop exit
PB: predicated region body
PF: predicated region fallthrough
CT: control target
= control target key end

     0   :  { %s1825_s0 = inlined_call_operand.vmem [shape: bf16[2,1,1,9,512], index: 0, kind: input, shape index: {}, may-alias: {0,5}]   ;;  %s1826_s1 = inlined_call_operand.vmem [shape: bf16[2,2304], index: 1, kind: input, shape index: {}]   ;;  %s1827_s2 = inlined_call_operand.vmem [shape: bf16[2304,512], index: 2, kind: input, shape index: {}]   ;;  %s1828_s3 = inlined_call_operand.vmem [shape: f32[1,512], index: 3, kind: input, shape index: {}]   ;;  %s1829_s4 = inlined_call_operand.vmem [shape: f32[1,512], index: 4, kind: input, shape index: {}]   ;;  %s1830_s5 = inlined_call_operand.vmem [shape: bf16[2,1,1,9,512], index: 5, kind: output, shape index: {}, may-alias: {0,5}]  }
   0x1   :  { %1831 = sst [smem:[#allocation5_spill]] %s1827_s2 }
   0x2   :  { %s1494_s18 = smov 0   ;;  %s1496_s19 = smov 0  }
   0x3   :  { %s1498_s0 = smov 0   ;;  %s1500_s20 = smov 0  }
   0x4   :  { %s1502_s21 = smov 0   ;;  %s1504_s22 = smov 0  }
   0x5   :  { %s1506_s23 = smov 0   ;;  %s1508_s24 = smov 0  }
   0x6   :  { %s1510_s25 = smov 0  }
   0x7 LB: > { %s28_s26 = sadd.s32 1, %s1450_s23  ;;  %s31_s27 = sadd.s32 1, %s1454_s24  ;;  %s1458_s25 = sphi %s1510_s25, %s16_s25   ;;  %s1454_s24 = sphi %s1508_s24, %s1842_s24   ;;  %s1450_s23 = sphi %s1506_s23, %s1841_s23   ;;  %s1446_s22 = sphi %s1504_s22, %s1840_s22   ;;  %s1442_s21 = sphi %s1502_s21, %s1839_s21   ;;  %s1438_s20 = sphi %s1500_s20, %s1838_s20   ;;  %s1434_s0 = sphi %s1498_s0, %s1837_s0   ;;  %s1430_s19 = sphi %s1496_s19, %s1836_s19   ;;  %s1426_s18 = sphi %s1494_s18, %s1835_s18  }
   0x8   : > { %p29_p0 = scmp.ge.s32.totalorder %s28_s26, 6  ;;  %p79_p1 = scmp.ne.s32.totalorder %s1438_s20, %s1434_s0 }
   0x9   : > { %s1168_s28 = sadd.s32 4294967295, %s1458_s25   ;;  %p80_p2 = scmp.eq.s32.totalorder %s1458_s25, 0 }
   0xa   : > { %s1844_s26 = smov (%p29_p0, %s28_s26), 0  ;;  %s1846_s27 = smov (!%p29_p0, %s31_s27), %s1454_s24 }
   0xb   : > { %p33_p3 = scmp.ge.s32.totalorder %s1846_s27, 2  ;;  %s67_s29 = ssub.s32 %s1450_s23, %s1844_s26 }
   0xc   : > { %p1550_p4 = por %p80_p2, %p79_p1  ;;  %p162_p5 = scmp.ne.s32.totalorder %s1430_s19, %s1426_s18 }
   0xd   : > { %s1848_s27 = smov (%p33_p3, %s1846_s27), 0  ;;  %s72_s6 = sadd.s32 1, %s1438_s20 }
   0xe   : > { %p163_p6 = scmp.eq.s32.totalorder %s1168_s28, 11  ;;  %s68_s7 = ssub.s32 %s1454_s24, %s1848_s27 }
   0xf   : > { %s152_s8 = sadd.s32 1, %s1430_s19  ;;  %s69_s9 = sor.u32 %s68_s7, %s67_s29 }
  0x10   : > { %p150_p7 = scmp.eq.s32.totalorder %s68_s7, 0  ;;  %p70_p8 = scmp.eq.s32.totalorder %s69_s9, 0 }
  0x11   : > { %p1562_p9 = por %p163_p6, %p162_p5  ;;  %p1171_p10 = scmp.ge.s32.totalorder %s1458_s25, 12 }
  0x12   : > { %s1567_s11 = scalar_select %p150_p7, %s1430_s19, %s152_s8  }
  0x13   : > { %s1570_s12 = scalar_select %p70_p8, %s1438_s20, %s72_s6  }
  0x14   : > { %185 = sbr.rel (%p1171_p10) target bundleno = 59 (0x3b), region = 16 }
  0x19   : > { %200 = sbr.rel (!%p1550_p4) target bundleno = 59 (0x3b), region = 24  ;;  %s202_s13 = sand.u32 (%p1550_p4), 1, %s1438_s20  }
  0x1a   : > { %s1238_s14 = smul.u32 (%p1550_p4), 384, %s202_s13  ;;  %s1172_s15 = sshll.u32 (%p1550_p4), %s1454_s24, 1 }
  0x1b   : > { %s1237_s16 = smul.u32 (%p1550_p4), 192, %s1450_s23  ;;  %s1834_s2 = sld [smem:[#allocation5_spill]] (%p1550_p4) }
  0x1c   : > { %s1586_s30 = scalar_lea.vmem (%p1550_p4), [#allocation3], %s1238_s14 }
  0x1d   : > { %s208_s17 = sadd.s32 (%p1550_p4), %s1237_s16, %s1172_s15 }
  0x1e   : > { %s1174_s28 = sshll.u32 %s208_s17, 2 }
  0x21   : > { %s1581_s6 = scalar_lea.vmem %s1834_s2, %s1174_s28 }
  0x22   : > { %v333_v0 = vld [vmem:[%s1581_s6] sm:$0xff]  ;;  %v335_v1 = vld [vmem:[%s1581_s6 + $0x10] sm:$0xff] }
  0x23   : > { %v337_v2 = vld [vmem:[%s1581_s6 + $0x20] sm:$0xff]  ;;  %334 = vst [vmem:[%s1586_s30] sm:$0xff] %v333_v0  ;;  %336 = vst [vmem:[%s1586_s30 + $0x8] sm:$0xff] %v335_v1  ;;  %v339_v3 = vld [vmem:[%s1581_s6 + $0x30] sm:$0xff] }
  0x24   : > { %338 = vst [vmem:[%s1586_s30 + $0x10] sm:$0xff] %v337_v2  ;;  %v341_v4 = vld [vmem:[%s1581_s6 + $0x40] sm:$0xff]  ;;  %v343_v5 = vld [vmem:[%s1581_s6 + $0x50] sm:$0xff]  ;;  %340 = vst [vmem:[%s1586_s30 + $0x18] sm:$0xff] %v339_v3 }
  0x25   : > { %342 = vst [vmem:[%s1586_s30 + $0x20] sm:$0xff] %v341_v4  ;;  %344 = vst [vmem:[%s1586_s30 + $0x28] sm:$0xff] %v343_v5  ;;  %v345_v6 = vld [vmem:[%s1581_s6 + $0x60] sm:$0xff]  ;;  %v347_v7 = vld [vmem:[%s1581_s6 + $0x70] sm:$0xff] }
  0x26   : > { %v349_v8 = vld [vmem:[%s1581_s6 + $0x80] sm:$0xff]  ;;  %346 = vst [vmem:[%s1586_s30 + $0x30] sm:$0xff] %v345_v6  ;;  %348 = vst [vmem:[%s1586_s30 + $0x38] sm:$0xff] %v347_v7  ;;  %v351_v9 = vld [vmem:[%s1581_s6 + $0x90] sm:$0xff] }
  0x27   : > { %350 = vst [vmem:[%s1586_s30 + $0x40] sm:$0xff] %v349_v8  ;;  %v353_v10 = vld [vmem:[%s1581_s6 + $0xa0] sm:$0xff]  ;;  %v355_v11 = vld [vmem:[%s1581_s6 + $0xb0] sm:$0xff]  ;;  %352 = vst [vmem:[%s1586_s30 + $0x48] sm:$0xff] %v351_v9 }
  0x28   : > { %354 = vst [vmem:[%s1586_s30 + $0x50] sm:$0xff] %v353_v10  ;;  %356 = vst [vmem:[%s1586_s30 + $0x58] sm:$0xff] %v355_v11  ;;  %v357_v12 = vld [vmem:[%s1581_s6 + $0xc0] sm:$0xff]  ;;  %v359_v13 = vld [vmem:[%s1581_s6 + $0xd0] sm:$0xff] }
  0x29   : > { %v361_v14 = vld [vmem:[%s1581_s6 + $0xe0] sm:$0xff]  ;;  %358 = vst [vmem:[%s1586_s30 + $0x60] sm:$0xff] %v357_v12  ;;  %360 = vst [vmem:[%s1586_s30 + $0x68] sm:$0xff] %v359_v13  ;;  %v363_v15 = vld [vmem:[%s1581_s6 + $0xf0] sm:$0xff] }
  0x2a   : > { %362 = vst [vmem:[%s1586_s30 + $0x70] sm:$0xff] %v361_v14  ;;  %v365_v16 = vld [vmem:[%s1581_s6 + $0x100] sm:$0xff]  ;;  %v367_v17 = vld [vmem:[%s1581_s6 + $0x110] sm:$0xff]  ;;  %364 = vst [vmem:[%s1586_s30 + $0x78] sm:$0xff] %v363_v15 }
  0x2b   : > { %366 = vst [vmem:[%s1586_s30 + $0x80] sm:$0xff] %v365_v16  ;;  %368 = vst [vmem:[%s1586_s30 + $0x88] sm:$0xff] %v367_v17  ;;  %v369_v18 = vld [vmem:[%s1581_s6 + $0x120] sm:$0xff]  ;;  %v371_v19 = vld [vmem:[%s1581_s6 + $0x130] sm:$0xff] }
  0x2c   : > { %v373_v20 = vld [vmem:[%s1581_s6 + $0x140] sm:$0xff]  ;;  %370 = vst [vmem:[%s1586_s30 + $0x90] sm:$0xff] %v369_v18  ;;  %372 = vst [vmem:[%s1586_s30 + $0x98] sm:$0xff] %v371_v19  ;;  %v375_v21 = vld [vmem:[%s1581_s6 + $0x150] sm:$0xff] }
  0x2d   : > { %374 = vst [vmem:[%s1586_s30 + $0xa0] sm:$0xff] %v373_v20  ;;  %v377_v22 = vld [vmem:[%s1581_s6 + $0x160] sm:$0xff]  ;;  %v379_v23 = vld [vmem:[%s1581_s6 + $0x170] sm:$0xff]  ;;  %376 = vst [vmem:[%s1586_s30 + $0xa8] sm:$0xff] %v375_v21 }
  0x2e   : > { %378 = vst [vmem:[%s1586_s30 + $0xb0] sm:$0xff] %v377_v22  ;;  %380 = vst [vmem:[%s1586_s30 + $0xb8] sm:$0xff] %v379_v23  ;;  %v381_v24 = vld [vmem:[%s1581_s6 + $0x180] sm:$0xff]  ;;  %v383_v25 = vld [vmem:[%s1581_s6 + $0x190] sm:$0xff] }
  0x2f   : > { %v385_v26 = vld [vmem:[%s1581_s6 + $0x1a0] sm:$0xff]  ;;  %382 = vst [vmem:[%s1586_s30 + $0xc0] sm:$0xff] %v381_v24  ;;  %384 = vst [vmem:[%s1586_s30 + $0xc8] sm:$0xff] %v383_v25  ;;  %v387_v27 = vld [vmem:[%s1581_s6 + $0x1b0] sm:$0xff] }
  0x30   : > { %386 = vst [vmem:[%s1586_s30 + $0xd0] sm:$0xff] %v385_v26  ;;  %v389_v28 = vld [vmem:[%s1581_s6 + $0x1c0] sm:$0xff]  ;;  %v391_v29 = vld [vmem:[%s1581_s6 + $0x1d0] sm:$0xff]  ;;  %388 = vst [vmem:[%s1586_s30 + $0xd8] sm:$0xff] %v387_v27 }
  0x31   : > { %390 = vst [vmem:[%s1586_s30 + $0xe0] sm:$0xff] %v389_v28  ;;  %392 = vst [vmem:[%s1586_s30 + $0xe8] sm:$0xff] %v391_v29  ;;  %v393_v30 = vld [vmem:[%s1581_s6 + $0x1e0] sm:$0xff]  ;;  %v395_v31 = vld [vmem:[%s1581_s6 + $0x1f0] sm:$0xff] }
  0x32   : > { %v397_v32 = vld [vmem:[%s1581_s6 + $0x200] sm:$0xff]  ;;  %394 = vst [vmem:[%s1586_s30 + $0xf0] sm:$0xff] %v393_v30  ;;  %396 = vst [vmem:[%s1586_s30 + $0xf8] sm:$0xff] %v395_v31  ;;  %v399_v33 = vld [vmem:[%s1581_s6 + $0x210] sm:$0xff] }
  0x33   : > { %398 = vst [vmem:[%s1586_s30 + $0x100] sm:$0xff] %v397_v32  ;;  %v401_v34 = vld [vmem:[%s1581_s6 + $0x220] sm:$0xff]  ;;  %v403_v35 = vld [vmem:[%s1581_s6 + $0x230] sm:$0xff]  ;;  %400 = vst [vmem:[%s1586_s30 + $0x108] sm:$0xff] %v399_v33 }
  0x34   : > { %402 = vst [vmem:[%s1586_s30 + $0x110] sm:$0xff] %v401_v34  ;;  %404 = vst [vmem:[%s1586_s30 + $0x118] sm:$0xff] %v403_v35  ;;  %v405_v36 = vld [vmem:[%s1581_s6 + $0x240] sm:$0xff]  ;;  %v407_v37 = vld [vmem:[%s1581_s6 + $0x250] sm:$0xff] }
  0x35   : > { %v409_v38 = vld [vmem:[%s1581_s6 + $0x260] sm:$0xff]  ;;  %406 = vst [vmem:[%s1586_s30 + $0x120] sm:$0xff] %v405_v36  ;;  %408 = vst [vmem:[%s1586_s30 + $0x128] sm:$0xff] %v407_v37  ;;  %v411_v39 = vld [vmem:[%s1581_s6 + $0x270] sm:$0xff] }
  0x36   : > { %410 = vst [vmem:[%s1586_s30 + $0x130] sm:$0xff] %v409_v38  ;;  %v413_v40 = vld [vmem:[%s1581_s6 + $0x280] sm:$0xff]  ;;  %v415_v41 = vld [vmem:[%s1581_s6 + $0x290] sm:$0xff]  ;;  %412 = vst [vmem:[%s1586_s30 + $0x138] sm:$0xff] %v411_v39 }
  0x37   : > { %414 = vst [vmem:[%s1586_s30 + $0x140] sm:$0xff] %v413_v40  ;;  %416 = vst [vmem:[%s1586_s30 + $0x148] sm:$0xff] %v415_v41  ;;  %v417_v42 = vld [vmem:[%s1581_s6 + $0x2a0] sm:$0xff]  ;;  %v419_v43 = vld [vmem:[%s1581_s6 + $0x2b0] sm:$0xff] }
  0x38   : > { %v421_v44 = vld [vmem:[%s1581_s6 + $0x2c0] sm:$0xff]  ;;  %418 = vst [vmem:[%s1586_s30 + $0x150] sm:$0xff] %v417_v42  ;;  %420 = vst [vmem:[%s1586_s30 + $0x158] sm:$0xff] %v419_v43  ;;  %v423_v45 = vld [vmem:[%s1581_s6 + $0x2d0] sm:$0xff] }
  0x39   : > { %422 = vst [vmem:[%s1586_s30 + $0x160] sm:$0xff] %v421_v44  ;;  %v425_v46 = vld [vmem:[%s1581_s6 + $0x2e0] sm:$0xff]  ;;  %v427_v47 = vld [vmem:[%s1581_s6 + $0x2f0] sm:$0xff]  ;;  %424 = vst [vmem:[%s1586_s30 + $0x168] sm:$0xff] %v423_v45 }
  0x3a   : > { %426 = vst [vmem:[%s1586_s30 + $0x170] sm:$0xff] %v425_v46  ;;  %428 = vst [vmem:[%s1586_s30 + $0x178] sm:$0xff] %v427_v47 }
  0x3b PF: > { %p1175_p11 = scmp.ge.s32.totalorder %s1458_s25, 1  ;;  %p449_p12 = scmp.lt.s32.totalorder %s1458_s25, 13 }
  0x3d   : > { %p450_p13 = pnand %p1175_p11, %p449_p12 }
  0x3e   : > { %s456_s8 = sand.u32 (!%p450_p13), 1, %s1434_s0   ;;  %s493_s9 = sand.u32 (!%p450_p13), 1, %s1426_s18  }
  0x3f   : > { %453 = sbr.rel (%p450_p13) target bundleno = 376 (0x178), region = 70  ;;  %s1685_s14 = sshll.u32 (!%p450_p13), %s493_s9, 1 }
  0x40   : > { %s1239_s13 = smul.u32 (!%p450_p13), 384, %s456_s8  ;;  %s1689_s16 = sshll.u32 (!%p450_p13), %s1446_s22, 1 }
  0x41   : > { %s496_s15 = smul.u32 (!%p450_p13), 3, %s1442_s21  ;;  %p508_p1 = scmp.lt.s32.totalorder (!%p450_p13), %s1689_s16, 3 }
  0x42   : > { %s1709_s9 = scalar_lea.vmem (!%p450_p13), [#allocation3], %s1239_s13  ;;  %s495_s2 = scalar_lea.vmem (!%p450_p13), [#allocation4], %s1685_s14 }
  0x43   : > { %p499_p0 = scmp.lt.s32.totalorder (!%p450_p13), %s496_s15, 17  ;;  %p1179_p2 = scmp.ne.s32.totalorder (!%p450_p13), %s1442_s21, 0 }
  0x44   : > { %s1695_s17 = scalar_select %p508_p1, %s1689_s16, 3 }
  0x45   : > { %s1850_s15 = smov (!%p499_p0, %s496_s15), 17  ;;  %522 = sbr.rel (%p1179_p2) target bundleno = 76 (0x4c), region = 78 }
  0x46   : > { %s503_s18 = scalar_lea.vmem %s1826_s1, %s1850_s15  ;;  %s510_s22 = scalar_lea.vmem %s1828_s3, %s1695_s17 }
  0x47   : > { %s515_s8 = scalar_lea.vmem %s1829_s4, %s1695_s17 }
  0x4a   : > { %v1460_v48 = vmov 0.0  }
  0x4b   : > { %523 = vst [vmem:[#allocation2] sm:$0xf] %v1460_v48 }
  0x4c PF: > { %v1316_v49 = vld [vmem:[%s1709_s9 + $0x74] ss:$8 sps:$4 sm:$0xff]   ;;  %v1318_v50 = vld [vmem:[%s1709_s9 + $0x70] ss:$8 sps:$4 sm:$0xff]   ;;  %v1461_v51 = vmov 0   ;;  %v586_v12 = vlaneseq  ;;  %p1229_p3 = scmp.ne.s32.totalorder %s1442_s21, 5 }
  0x4d   : > { %914 = vmatprep.mubr.bf16.mxu1 %v1461_v51  ;;  %841 = vmatprep.subr.bf16.mxu0 %v1316_v49  ;;  %v1319_v52 = vld [vmem:[%s1709_s9 + $0x64] ss:$8 sps:$4 sm:$0xff]   ;;  %v1321_v53 = vld [vmem:[%s1709_s9 + $0x60] ss:$8 sps:$4 sm:$0xff]   ;;  %v1322_v54 = vld [vmem:[%s1709_s9 + $0x54] ss:$8 sps:$4 sm:$0xff]  }
  0x4e   : > { %842 = vmatpush1.bf16.msra.mxu0 %v1318_v50  ;;  %v1324_v55 = vld [vmem:[%s1709_s9 + $0x50] ss:$8 sps:$4 sm:$0xff]   ;;  %v1325_v56 = vld [vmem:[%s1709_s9 + $0x44] ss:$8 sps:$4 sm:$0xff]   ;;  %v1337_v57 = vld [vmem:[%s1709_s9 + $0x174] ss:$8 sps:$4 sm:$0xff]  }
  0x4f   : > { %843 = vmatprep.subr.bf16.mxu0 %v1319_v52  ;;  %v1339_v58 = vld [vmem:[%s1709_s9 + $0x170] ss:$8 sps:$4 sm:$0xff]   ;;  %v1327_v59 = vld [vmem:[%s1709_s9 + $0x40] ss:$8 sps:$4 sm:$0xff]   ;;  %v1328_v60 = vld [vmem:[%s1709_s9 + $0x34] ss:$8 sps:$4 sm:$0xff]   ;;  %882 = vmatprep.subr.bf16.mxu1 %v1337_v57 }
  0x50   : > { %v1343_v61 = vld [vmem:[%s1709_s9 + $0x164] ss:$8 sps:$4 sm:$0xff]   ;;  %883 = vmatpush1.bf16.msra.mxu1 %v1339_v58  ;;  %v1345_v62 = vld [vmem:[%s1709_s9 + $0x160] ss:$8 sps:$4 sm:$0xff]   ;;  %v1330_v63 = vld [vmem:[%s1709_s9 + $0x30] ss:$8 sps:$4 sm:$0xff]  }
  0x51   : > { %884 = vmatprep.subr.bf16.mxu1 %v1343_v61  ;;  %v1349_v0 = vld [vmem:[%s1709_s9 + $0x154] ss:$8 sps:$4 sm:$0xff]   ;;  %v1331_v1 = vld [vmem:[%s1709_s9 + $0x24] ss:$8 sps:$4 sm:$0xff]   ;;  %v1351_v2 = vld [vmem:[%s1709_s9 + $0x150] ss:$8 sps:$4 sm:$0xff]  }
  0x52   : > { %844 = vmatpush1.bf16.msra.mxu0 %v1321_v53  ;;  %v1355_v3 = vld [vmem:[%s1709_s9 + $0x144] ss:$8 sps:$4 sm:$0xff]   ;;  %v1333_v4 = vld [vmem:[%s1709_s9 + $0x20] ss:$8 sps:$4 sm:$0xff]   ;;  %v1334_v5 = vld [vmem:[%s1709_s9 + $0x14] ss:$8 sps:$4 sm:$0xff]  }
  0x53   : > { %845 = vmatprep.subr.bf16.mxu0 %v1322_v54  ;;  %v1357_v6 = vld [vmem:[%s1709_s9 + $0x140] ss:$8 sps:$4 sm:$0xff]   ;;  %v1361_v7 = vld [vmem:[%s1709_s9 + $0x134] ss:$8 sps:$4 sm:$0xff]   ;;  %v1336_v8 = vld [vmem:[%s1709_s9 + $0x10] ss:$8 sps:$4 sm:$0xff]  }
  0x54   : > { %885 = vmatpush1.bf16.msra.mxu1 %v1345_v62  ;;  %v1340_v9 = vld [vmem:[%s1709_s9 + $0x4] ss:$8 sps:$4 sm:$0xff]   ;;  %v1462_v10 = vmov 1966171168   ;;  %v1363_v13 = vld [vmem:[%s1709_s9 + $0x130] ss:$8 sps:$4 sm:$0xff]  }
  0x55   : > { %886 = vmatprep.subr.bf16.mxu1 %v1349_v0  ;;  %v584_v11 = vunpack.c.l.s4 %v1462_v10  ;;  %v1367_v14 = vld [vmem:[%s1709_s9 + $0x124] ss:$8 sps:$4 sm:$0xff]   ;;  %v1342_v15 = vld [vmem:[%s1709_s9] ss:$8 sps:$4 sm:$0xff]   ;;  %v1346_v16 = vld [vmem:[%s1709_s9 + $0xf4] ss:$8 sps:$4 sm:$0xff]  }
  0x56   : > { %846 = vmatpush1.bf16.msra.mxu0 %v1324_v55  ;;  %v1741_v18 = vshrl.u32 %v586_v12, 7  ;;  %v1369_v19 = vld [vmem:[%s1709_s9 + $0x120] ss:$8 sps:$4 sm:$0xff]   ;;  %v1348_v20 = vld [vmem:[%s1709_s9 + $0xf0] ss:$8 sps:$4 sm:$0xff]  }
  0x57   : > { %847 = vmatprep.subr.bf16.mxu0 %v1325_v56  ;;  %v585_v17 = vunpack.c.0.s8 %v584_v11  ;;  %v1373_v21 = vld [vmem:[%s1709_s9 + $0x114] ss:$8 sps:$4 sm:$0xff]   ;;  %v1352_v23 = vld [vmem:[%s1709_s9 + $0xe4] ss:$8 sps:$4 sm:$0xff]   ;;  %v1375_v26 = vld [vmem:[%s1709_s9 + $0x110] ss:$8 sps:$4 sm:$0xff]  }
  0x58   : > { %887 = vmatpush1.bf16.msra.mxu1 %v1351_v2  ;;  %v1180_v22 = vld.sshfl [vmem:[%s503_s18] sm:$0x13 pattern:$0x75316420]  ;;  %v1379_v27 = vld [vmem:[%s1709_s9 + $0x104] ss:$8 sps:$4 sm:$0xff]  }
  0x59   : > { %888 = vmatprep.subr.bf16.mxu1 %v1355_v3  ;;  %v1753_v24 = vsub.s32 %v585_v17, %v1741_v18  ;;  %v582_v25 = vcombine.high %v1180_v22, %v1180_v22  ;;  %v1354_v29 = vld [vmem:[%s1709_s9 + $0xe0] ss:$8 sps:$4 sm:$0xff]   ;;  %v1358_v30 = vld [vmem:[%s1709_s9 + $0xd4] ss:$8 sps:$4 sm:$0xff]   ;;  %v1360_v33 = vld [vmem:[%s1709_s9 + $0xd0] ss:$8 sps:$4 sm:$0xff]  }
  0x5a   : > { %848 = vmatpush1.bf16.msra.mxu0 %v1327_v59  ;;  %v1381_v32 = vld [vmem:[%s1709_s9 + $0x100] ss:$8 sps:$4 sm:$0xff]   ;;  %v1364_v34 = vld [vmem:[%s1709_s9 + $0xc4] ss:$8 sps:$4 sm:$0xff]   ;;  %v1370_v37 = vld [vmem:[%s1709_s9 + $0xb4] ss:$8 sps:$4 sm:$0xff]  }
  0x5b   : > { %849 = vmatprep.subr.bf16.mxu0 %v1328_v60  ;;  %v596_v28 = vrot.slane %v582_v25, %v1753_v24  ;;  %v589_v31 = vrot.slane %v1180_v22, %v1753_v24  ;;  %v1366_v36 = vld [vmem:[%s1709_s9 + $0xc0] ss:$8 sps:$4 sm:$0xff]   ;;  %v1372_v38 = vld [vmem:[%s1709_s9 + $0xb0] ss:$8 sps:$4 sm:$0xff]   ;;  %v1376_v39 = vld [vmem:[%s1709_s9 + $0xa4] ss:$8 sps:$4 sm:$0xff]  }
  0x5c   : > { %889 = vmatpush1.bf16.msra.mxu1 %v1357_v6  ;;  %v1378_v40 = vld [vmem:[%s1709_s9 + $0xa0] ss:$8 sps:$4 sm:$0xff]   ;;  %v1382_v41 = vld [vmem:[%s1709_s9 + $0x94] ss:$8 sps:$4 sm:$0xff]   ;;  %v1384_v42 = vld [vmem:[%s1709_s9 + $0x90] ss:$8 sps:$4 sm:$0xff]  }
  0x5d   : > { %890 = vmatprep.subr.bf16.mxu1 %v1361_v7  ;;  %873 = vmatprep.mubr.bf16.mxu0 %v596_v28  ;;  %v597_v35 = vcombine.high %v589_v31, %v589_v31  ;;  %v1385_v43 = vld [vmem:[%s1709_s9 + $0x84] ss:$8 sps:$4 sm:$0xff]   ;;  %v1387_v44 = vld [vmem:[%s1709_s9 + $0x80] ss:$8 sps:$4 sm:$0xff]   ;;  %v1463_v49 = vmov 1983009808  }
  0x5e   : > { %850 = vmatpush1.bf16.msra.mxu0 %v1330_v63  ;;  %v927_v50 = vunpack.c.l.s4 %v1463_v49  ;;  %v524_v59 = vld [vmem:[#allocation2] sm:$0xf] }
  0x5f   : > { %851 = vmatprep.subr.bf16.mxu0 %v1331_v1 }
  0x60   : > { %891 = vmatpush1.bf16.msra.mxu1 %v1363_v13  ;;  %v928_v51 = vunpack.c.0.s8 %v927_v50 }
  0x61   : > { %892 = vmatprep.subr.bf16.mxu1 %v1367_v14 }
  0x62   : > { %852 = vmatpush1.bf16.msra.mxu0 %v1333_v4  ;;  %v931_v56 = vsub.s32 %v928_v51, %v1741_v18 }
  0x63   : > { %853 = vmatprep.subr.bf16.mxu0 %v1334_v5 }
  0x64   : > { %893 = vmatpush1.bf16.msra.mxu1 %v1369_v19 }
  0x65   : > { %894 = vmatprep.subr.bf16.mxu1 %v1373_v21 }
  0x66   : > { %854 = vmatpush1.bf16.msra.mxu0 %v1336_v8 }
  0x67   : > { %855 = vmatprep.subr.bf16.mxu0 %v1340_v9 }
  0x68   : > { %895 = vmatpush1.bf16.msra.mxu1 %v1375_v26 }
  0x69   : > { %896 = vmatprep.subr.bf16.mxu1 %v1379_v27 }
  0x6a   : > { %856 = vmatpush1.bf16.msra.mxu0 %v1342_v15 }
  0x6b   : > { %857 = vmatprep.subr.bf16.mxu0 %v1346_v16 }
  0x6c   : > { %897 = vmatpush1.bf16.msra.mxu1 %v1381_v32 }
  0x6e   : > { %858 = vmatpush2.bf16.msra.mxu0 %v1348_v20 }
  0x6f   : > { %859 = vmatprep.subr.bf16.mxu0 %v1352_v23  ;;  %915 = vmatmul.mubr.bf16.vlgmr.msra.gmra.mxu1 %v597_v35 }
  0x72   : > { %860 = vmatpush2.bf16.msra.mxu0 %v1354_v29 }
  0x73   : > { %861 = vmatprep.subr.bf16.mxu0 %v1358_v30 }
  0x76   : > { %862 = vmatpush2.bf16.msra.mxu0 %v1360_v33 }
  0x77   : > { %863 = vmatprep.subr.bf16.mxu0 %v1364_v34 }
  0x7a   : > { %864 = vmatpush2.bf16.msra.mxu0 %v1366_v36 }
  0x7b   : > { %865 = vmatprep.subr.bf16.mxu0 %v1370_v37 }
  0x7e   : > { %866 = vmatpush2.bf16.msra.mxu0 %v1372_v38 }
  0x7f   : > { %867 = vmatprep.subr.bf16.mxu0 %v1376_v39 }
  0x82   : > { %868 = vmatpush2.bf16.msra.mxu0 %v1378_v40 }
  0x83   : > { %869 = vmatprep.subr.bf16.mxu0 %v1382_v41 }
  0x86   : > { %870 = vmatpush2.bf16.msra.mxu0 %v1384_v42 }
  0x87   : > { %871 = vmatprep.subr.bf16.mxu0 %v1385_v43 }
  0x8a   : > { %872 = vmatpush2.bf16.msra.mxu0 %v1387_v44 }
  0x8d   : > { %874 = vmatmul.mubr.bf16.vlgmr.msra.gmra.mxu0 %v589_v31 }
 0x12f   : > { %v916_v45 = vpop.f32.mrf.mxu1 }
 0x131   : > { %v918_v46 = vpop.f32.mrf.mxu1 }
 0x133   : > { %v920_v47 = vpop.f32.mrf.mxu1 }
 0x135   : > { %v921_v48 = vpop.f32.mrf.mxu1 }
 0x14d   : > { %v875_v52 = vpop.f32.mrf.mxu0 }
 0x14e   : > { %v917_v54 = vadd.f32 %v916_v45, %v875_v52 }
 0x14f   : > { %v877_v53 = vpop.f32.mrf.mxu0 }
 0x150   : > { %v919_v55 = vadd.f32 %v918_v46, %v877_v53 }
 0x151   : > { %v879_v57 = vpop.f32.mrf.mxu0 }
 0x152   : > { %v925_v58 = vcombine.low %v917_v54, %v919_v55 }
 0x153   : > { %v880_v60 = vpop.f32.mrf.mxu0 }
 0x154   : > { %v932_v61 = vrot.slane %v925_v58, %v931_v56  ;;  %939 = sbr.rel (%p1229_p3) target bundleno = 368 (0x170), region = 82 }
 0x156   : > { %v934_v62 = vadd.f32 %v932_v61, %v524_v59 }
 0x158   : > { %935 = vst [vmem:[#allocation2] sm:$0xf] %v934_v62 }
 0x159   : > { %v941_v63 = vld [vmem:[%s510_s22] sm:$0x3]  ;;  %v945_v0 = vsub.s32 0, %v1741_v18  ;;  %v949_v1 = vsub.s32 1, %v1741_v18 }
 0x15a   : > { %v961_v2 = vld [vmem:[%s515_s8] sm:$0x3] }
 0x15b   : > { %v946_v3 = vrot.slane %v941_v63, %v945_v0  ;;  %v950_v4 = vrot.slane %v941_v63, %v949_v1  ;;  %v966_v5 = vrot.slane %v961_v2, %v945_v0  ;;  %v970_v6 = vrot.slane %v961_v2, %v949_v1 }
 0x15d   : > { %v951_v7 = vcombine.low %v946_v3, %v950_v4  ;;  %v971_v8 = vcombine.low %v966_v5, %v970_v6 }
 0x15f   : > { %v940_v9 = vld [vmem:[#allocation2] sm:$0xf]  ;;  %v958_v10 = vrot.slane %v951_v7, %v931_v56  ;;  %v978_v11 = vrot.slane %v971_v8, %v931_v56 }
 0x161   : > { %v960_v12 = vmul.f32 %v958_v10, %v940_v9 }
 0x163   : > { %v980_v13 = vadd.f32 %v978_v11, %v960_v12 }
 0x165   : > { %v981_v14 = vmax.f32 %v980_v13, 0.0 }
 0x167   : > { %v989_v15 = vrot.slane %v981_v14, %v931_v56 }
 0x169   : > { %v990_v16 = vcombine.high %v989_v15, %v989_v15 }
 0x16b   : > { %v1230_v17 = vpack.c.bf16 %v990_v16, %v989_v15 }
 0x16d   : > { %v1004_v18 = vrot.slane %v1230_v17, %v1753_v24 }
 0x16f   : > { %1231 = vst.sshfl [vmem:[%s495_s2] sm:$0x5 pattern:$0x73625140] %v1004_v18 }
 0x170 PF: > { %1020 = sbr.rel (!%p1562_p9) target bundleno = 376 (0x178), region = 86  ;;  %s1103_s7 = scalar_lea.vmem (%p1562_p9), %s1830_s5, %s1689_s16 }
 0x176   : > { %v1041_v19 = vld [vmem:[%s495_s2] sm:$0x3] }
 0x177   : > { %1234 = vst [vmem:[%s1103_s7 + $0x10] sm:$0x3] %v1041_v19 }
 0x178 PF: > { %s16_s25 = sadd.s32 1, %s1458_s25   ;;  %s1835_s18 = smov %s1430_s19 }
 0x179   : > { %p13_p4 = scmp.ge.s32.totalorder %s16_s25, 14   ;;  %s1836_s19 = smov %s1567_s11 }
 0x17a   : > { %s1837_s0 = smov %s1438_s20  ;;  %s1838_s20 = smov %s1570_s12 }
 0x17b   : > { %s1839_s21 = smov %s1450_s23  ;;  %s1840_s22 = smov %s1454_s24 }
 0x17c   : > { %s1841_s23 = smov %s1844_s26  ;;  %s1842_s24 = smov %s1848_s27 }
 0x17d   :  { %15 = sbr.rel (!%p13_p4) target bundleno = 7 (0x7), region = 161 }

// kernel: _forward.41
= control target key start
LH: loop header
LB: loop body
LE: loop exit
PB: predicated region body
PF: predicated region fallthrough
CT: control target
= control target key end

     0   :  { %s1151_s15 = smov 0   ;;  %s1153_s16 = smov 0   ;;  %s1348_s0 = inlined_call_operand.vmem [shape: bf16[2,256], index: 0, kind: input, shape index: {}]   ;;  %s1349_s1 = inlined_call_operand.vmem [shape: bf16[256,512], index: 1, kind: input, shape index: {}]   ;;  %s1350_s2 = inlined_call_operand.vmem [shape: f32[1,512], index: 2, kind: input, shape index: {}]   ;;  %s1351_s3 = inlined_call_operand.vmem [shape: f32[1,512], index: 3, kind: input, shape index: {}]   ;;  %s1352_s4 = inlined_call_operand.vmem [shape: bf16[2,512], index: 4, kind: output, shape index: {}]  }
   0x1   :  { %s1155_s17 = smov 0   ;;  %s1157_s18 = smov 0  }
   0x2   :  { %s1159_s19 = smov 0  }
   0x3 LB: > { %s29_s20 = sadd.s32 1, %s1117_s18  ;;  %p77_p1 = scmp.ne.s32.totalorder %s1109_s16, %s1105_s15  ;;  %s1121_s19 = sphi %s1159_s19, %s14_s19   ;;  %s1117_s18 = sphi %s1157_s18, %s1356_s18   ;;  %s1113_s17 = sphi %s1155_s17, %s1355_s17   ;;  %s1109_s16 = sphi %s1153_s16, %s1354_s16   ;;  %s1105_s15 = sphi %s1151_s15, %s1353_s15  }
   0x4   : > { %p31_p0 = scmp.ge.s32.totalorder %s29_s20, 2  ;;  %p78_p2 = scmp.eq.s32.totalorder %s1121_s19, 0 }
   0x5   : > { %s70_s22 = sadd.s32 1, %s1109_s16  ;;  %p945_p5 = scmp.ge.s32.totalorder %s1121_s19, 2 }
   0x6   : > { %s1358_s20 = smov (%p31_p0, %s29_s20), 0  ;;  %p79_p3 = por %p78_p2, %p77_p1 }
   0x7   : > { %s66_s21 = ssub.s32 %s1117_s18, %s1358_s20  ;;  %195 = sbr.rel (%p945_p5) target bundleno = 32 (0x20), region = 20 }
   0x8   : > { %p68_p4 = scmp.eq.s32.totalorder %s66_s21, 0 }
   0xa   : > { %s1186_s23 = scalar_select %p68_p4, %s1109_s16, %s70_s22  }
   0xc   : > { %198 = sbr.rel (!%p79_p3) target bundleno = 32 (0x20), region = 24  ;;  %s200_s24 = sand.u32 (%p79_p3), 1, %s1109_s16  }
   0xd   : > { %s991_s25 = sshll.u32 (%p79_p3), %s1117_s18, 3  ;;  %s946_s26 = sshll.u32 (%p79_p3), %s200_s24, 8 }
   0xe   : > { %s1194_s29 = scalar_lea.vmem (%p79_p3), %s1349_s1, %s991_s25  ;;  %s1199_s30 = scalar_lea.vmem (%p79_p3), [#allocation3], %s946_s26 }
   0xf   : > { %v299_v0 = vld [vmem:[%s1194_s29] sm:$0xff] (%p79_p3)  ;;  %v301_v1 = vld [vmem:[%s1194_s29 + $0x10] sm:$0xff] (%p79_p3) }
  0x10   : > { %v303_v2 = vld [vmem:[%s1194_s29 + $0x20] sm:$0xff] (%p79_p3)  ;;  %300 = vst [vmem:[%s1199_s30] sm:$0xff] (%p79_p3), %v299_v0  ;;  %302 = vst [vmem:[%s1199_s30 + $0x8] sm:$0xff] (%p79_p3), %v301_v1  ;;  %v305_v3 = vld [vmem:[%s1194_s29 + $0x30] sm:$0xff] (%p79_p3) }
  0x11   : > { %304 = vst [vmem:[%s1199_s30 + $0x10] sm:$0xff] %v303_v2  ;;  %v307_v4 = vld [vmem:[%s1194_s29 + $0x40] sm:$0xff]  ;;  %v309_v5 = vld [vmem:[%s1194_s29 + $0x50] sm:$0xff]  ;;  %306 = vst [vmem:[%s1199_s30 + $0x18] sm:$0xff] %v305_v3 }
  0x12   : > { %308 = vst [vmem:[%s1199_s30 + $0x20] sm:$0xff] %v307_v4  ;;  %310 = vst [vmem:[%s1199_s30 + $0x28] sm:$0xff] %v309_v5  ;;  %v311_v6 = vld [vmem:[%s1194_s29 + $0x60] sm:$0xff]  ;;  %v313_v7 = vld [vmem:[%s1194_s29 + $0x70] sm:$0xff] }
  0x13   : > { %v315_v8 = vld [vmem:[%s1194_s29 + $0x80] sm:$0xff]  ;;  %312 = vst [vmem:[%s1199_s30 + $0x30] sm:$0xff] %v311_v6  ;;  %314 = vst [vmem:[%s1199_s30 + $0x38] sm:$0xff] %v313_v7  ;;  %v317_v9 = vld [vmem:[%s1194_s29 + $0x90] sm:$0xff] }
  0x14   : > { %316 = vst [vmem:[%s1199_s30 + $0x40] sm:$0xff] %v315_v8  ;;  %v319_v10 = vld [vmem:[%s1194_s29 + $0xa0] sm:$0xff]  ;;  %v321_v11 = vld [vmem:[%s1194_s29 + $0xb0] sm:$0xff]  ;;  %318 = vst [vmem:[%s1199_s30 + $0x48] sm:$0xff] %v317_v9 }
  0x15   : > { %320 = vst [vmem:[%s1199_s30 + $0x50] sm:$0xff] %v319_v10  ;;  %322 = vst [vmem:[%s1199_s30 + $0x58] sm:$0xff] %v321_v11  ;;  %v323_v12 = vld [vmem:[%s1194_s29 + $0xc0] sm:$0xff]  ;;  %v325_v13 = vld [vmem:[%s1194_s29 + $0xd0] sm:$0xff] }
  0x16   : > { %v327_v14 = vld [vmem:[%s1194_s29 + $0xe0] sm:$0xff]  ;;  %324 = vst [vmem:[%s1199_s30 + $0x60] sm:$0xff] %v323_v12  ;;  %326 = vst [vmem:[%s1199_s30 + $0x68] sm:$0xff] %v325_v13  ;;  %v329_v15 = vld [vmem:[%s1194_s29 + $0xf0] sm:$0xff] }
  0x17   : > { %328 = vst [vmem:[%s1199_s30 + $0x70] sm:$0xff] %v327_v14  ;;  %v331_v16 = vld [vmem:[%s1194_s29 + $0x100] sm:$0xff]  ;;  %v333_v17 = vld [vmem:[%s1194_s29 + $0x110] sm:$0xff]  ;;  %330 = vst [vmem:[%s1199_s30 + $0x78] sm:$0xff] %v329_v15 }
  0x18   : > { %332 = vst [vmem:[%s1199_s30 + $0x80] sm:$0xff] %v331_v16  ;;  %334 = vst [vmem:[%s1199_s30 + $0x88] sm:$0xff] %v333_v17  ;;  %v335_v18 = vld [vmem:[%s1194_s29 + $0x120] sm:$0xff]  ;;  %v337_v19 = vld [vmem:[%s1194_s29 + $0x130] sm:$0xff] }
  0x19   : > { %v339_v20 = vld [vmem:[%s1194_s29 + $0x140] sm:$0xff]  ;;  %336 = vst [vmem:[%s1199_s30 + $0x90] sm:$0xff] %v335_v18  ;;  %338 = vst [vmem:[%s1199_s30 + $0x98] sm:$0xff] %v337_v19  ;;  %v341_v21 = vld [vmem:[%s1194_s29 + $0x150] sm:$0xff] }
  0x1a   : > { %340 = vst [vmem:[%s1199_s30 + $0xa0] sm:$0xff] %v339_v20  ;;  %v343_v22 = vld [vmem:[%s1194_s29 + $0x160] sm:$0xff]  ;;  %v345_v23 = vld [vmem:[%s1194_s29 + $0x170] sm:$0xff]  ;;  %342 = vst [vmem:[%s1199_s30 + $0xa8] sm:$0xff] %v341_v21 }
  0x1b   : > { %344 = vst [vmem:[%s1199_s30 + $0xb0] sm:$0xff] %v343_v22  ;;  %346 = vst [vmem:[%s1199_s30 + $0xb8] sm:$0xff] %v345_v23  ;;  %v347_v24 = vld [vmem:[%s1194_s29 + $0x180] sm:$0xff]  ;;  %v349_v25 = vld [vmem:[%s1194_s29 + $0x190] sm:$0xff] }
  0x1c   : > { %v351_v26 = vld [vmem:[%s1194_s29 + $0x1a0] sm:$0xff]  ;;  %348 = vst [vmem:[%s1199_s30 + $0xc0] sm:$0xff] %v347_v24  ;;  %350 = vst [vmem:[%s1199_s30 + $0xc8] sm:$0xff] %v349_v25  ;;  %v353_v27 = vld [vmem:[%s1194_s29 + $0x1b0] sm:$0xff] }
  0x1d   : > { %352 = vst [vmem:[%s1199_s30 + $0xd0] sm:$0xff] %v351_v26  ;;  %v355_v28 = vld [vmem:[%s1194_s29 + $0x1c0] sm:$0xff]  ;;  %v357_v29 = vld [vmem:[%s1194_s29 + $0x1d0] sm:$0xff]  ;;  %354 = vst [vmem:[%s1199_s30 + $0xd8] sm:$0xff] %v353_v27 }
  0x1e   : > { %356 = vst [vmem:[%s1199_s30 + $0xe0] sm:$0xff] %v355_v28  ;;  %358 = vst [vmem:[%s1199_s30 + $0xe8] sm:$0xff] %v357_v29  ;;  %v359_v30 = vld [vmem:[%s1194_s29 + $0x1e0] sm:$0xff]  ;;  %v361_v31 = vld [vmem:[%s1194_s29 + $0x1f0] sm:$0xff] }
  0x1f   : > { %360 = vst [vmem:[%s1199_s30 + $0xf0] sm:$0xff] %v359_v30  ;;  %362 = vst [vmem:[%s1199_s30 + $0xf8] sm:$0xff] %v361_v31 }
  0x20 PF: > { %p949_p6 = scmp.ge.s32.totalorder %s1121_s19, 1  ;;  %p383_p7 = scmp.lt.s32.totalorder %s1121_s19, 3 }
  0x22   : > { %p384_p8 = pnand %p949_p6, %p383_p7 }
  0x23   : > { %s390_s5 = sand.u32 (!%p384_p8), 1, %s1105_s15   ;;  %s951_s10 = sshll.u32 (!%p384_p8), %s1113_s17, 1 }
  0x24   : > { %387 = sbr.rel (%p384_p8) target bundleno = 329 (0x149), region = 70  ;;  %s950_s8 = sshll.u32 (!%p384_p8), %s390_s5, 8 }
  0x25   : > { %s1272_s9 = scalar_lea.vmem (!%p384_p8), [#allocation3], %s950_s8  ;;  %p446_p9 = scmp.lt.s32.totalorder (!%p384_p8), %s951_s10, 3 }
  0x29   : > { %v1268_v32 = vld.sshfl [vmem:[%s1348_s0] sm:$0x11 pattern:$0x75316420]  ;;  %v515_v33 = vlaneseq  ;;  %v1123_v34 = vmov 1966171168  }
  0x2a   : > { %v513_v35 = vunpack.c.l.s4 %v1123_v34  ;;  %v1035_v37 = vld [vmem:[%s1272_s9 + $0x74] ss:$8 sps:$4 sm:$0xff]   ;;  %v1037_v38 = vld [vmem:[%s1272_s9 + $0x70] ss:$8 sps:$4 sm:$0xff]   ;;  %v511_v39 = vcombine.high %v1268_v32, %v1268_v32  ;;  %v1038_v41 = vld [vmem:[%s1272_s9 + $0x64] ss:$8 sps:$4 sm:$0xff]  }
  0x2b   : > { %v1270_v36 = vshrl.u32 %v515_v33, 7  ;;  %688 = vmatprep.subr.bf16.mxu0 %v1035_v37  ;;  %v1040_v42 = vld [vmem:[%s1272_s9 + $0x60] ss:$8 sps:$4 sm:$0xff]   ;;  %v1041_v44 = vld [vmem:[%s1272_s9 + $0x54] ss:$8 sps:$4 sm:$0xff]   ;;  %v1124_v10 = vmov 0.0  }
  0x2c   : > { %v514_v40 = vunpack.c.0.s8 %v513_v35  ;;  %689 = vmatpush1.bf16.msra.mxu0 %v1037_v38  ;;  %v1043_v46 = vld [vmem:[%s1272_s9 + $0x50] ss:$8 sps:$4 sm:$0xff]   ;;  %v1044_v47 = vld [vmem:[%s1272_s9 + $0x44] ss:$8 sps:$4 sm:$0xff]   ;;  %v1046_v48 = vld [vmem:[%s1272_s9 + $0x40] ss:$8 sps:$4 sm:$0xff]  }
  0x2d   : > { %690 = vmatprep.subr.bf16.mxu0 %v1038_v41  ;;  %v1047_v49 = vld [vmem:[%s1272_s9 + $0x34] ss:$8 sps:$4 sm:$0xff]   ;;  %v1049_v50 = vld [vmem:[%s1272_s9 + $0x30] ss:$8 sps:$4 sm:$0xff]   ;;  %v1050_v51 = vld [vmem:[%s1272_s9 + $0x24] ss:$8 sps:$4 sm:$0xff]  }
  0x2e   : > { %v1281_v43 = vsub.s32 %v514_v40, %v1270_v36  ;;  %v1052_v52 = vld [vmem:[%s1272_s9 + $0x20] ss:$8 sps:$4 sm:$0xff]   ;;  %v1053_v53 = vld [vmem:[%s1272_s9 + $0x14] ss:$8 sps:$4 sm:$0xff]   ;;  %v1055_v54 = vld [vmem:[%s1272_s9 + $0x10] ss:$8 sps:$4 sm:$0xff]  }
  0x2f   : > { %v1056_v55 = vld [vmem:[%s1272_s9 + $0x4] ss:$8 sps:$4 sm:$0xff]   ;;  %v1058_v56 = vld [vmem:[%s1272_s9] ss:$8 sps:$4 sm:$0xff]   ;;  %v1059_v57 = vld [vmem:[%s1272_s9 + $0xf4] ss:$8 sps:$4 sm:$0xff]  }
  0x30   : > { %v525_v45 = vrot.slane %v511_v39, %v1281_v43  ;;  %691 = vmatpush1.bf16.msra.mxu0 %v1040_v42  ;;  %v1061_v58 = vld [vmem:[%s1272_s9 + $0xf0] ss:$8 sps:$4 sm:$0xff]   ;;  %v1062_v59 = vld [vmem:[%s1272_s9 + $0xe4] ss:$8 sps:$4 sm:$0xff]   ;;  %v1064_v60 = vld [vmem:[%s1272_s9 + $0xe0] ss:$8 sps:$4 sm:$0xff]   ;;  %v518_v9 = vrot.slane %v1268_v32, %v1281_v43 }
  0x31   : > { %692 = vmatprep.subr.bf16.mxu0 %v1041_v44  ;;  %v1065_v61 = vld [vmem:[%s1272_s9 + $0xd4] ss:$8 sps:$4 sm:$0xff]   ;;  %v1067_v62 = vld [vmem:[%s1272_s9 + $0xd0] ss:$8 sps:$4 sm:$0xff]   ;;  %v1068_v63 = vld [vmem:[%s1272_s9 + $0xc4] ss:$8 sps:$4 sm:$0xff]  }
  0x32   : > { %720 = vmatprep.mubr.bf16.mxu0 %v525_v45  ;;  %v1070_v0 = vld [vmem:[%s1272_s9 + $0xc0] ss:$8 sps:$4 sm:$0xff]   ;;  %v1071_v1 = vld [vmem:[%s1272_s9 + $0xb4] ss:$8 sps:$4 sm:$0xff]   ;;  %v1073_v2 = vld [vmem:[%s1272_s9 + $0xb0] ss:$8 sps:$4 sm:$0xff]  }
  0x33   : > { %v1074_v3 = vld [vmem:[%s1272_s9 + $0xa4] ss:$8 sps:$4 sm:$0xff]   ;;  %v1076_v4 = vld [vmem:[%s1272_s9 + $0xa0] ss:$8 sps:$4 sm:$0xff]   ;;  %v1077_v5 = vld [vmem:[%s1272_s9 + $0x94] ss:$8 sps:$4 sm:$0xff]  }
  0x34   : > { %693 = vmatpush1.bf16.msra.mxu0 %v1043_v46  ;;  %v1079_v6 = vld [vmem:[%s1272_s9 + $0x90] ss:$8 sps:$4 sm:$0xff]   ;;  %v1080_v7 = vld [vmem:[%s1272_s9 + $0x84] ss:$8 sps:$4 sm:$0xff]   ;;  %v1082_v8 = vld [vmem:[%s1272_s9 + $0x80] ss:$8 sps:$4 sm:$0xff]  }
  0x35   : > { %694 = vmatprep.subr.bf16.mxu0 %v1044_v47  ;;  %468 = vst [vmem:[#allocation2] sm:$0xf] %v1124_v10  ;;  %v1125_v11 = vmov 1983009808   ;;  %s1360_s10 = smov (!%p446_p9, %s951_s10), 3  ;;  %v750_v15 = vsub.s32 0, %v1270_v36 }
  0x36   : > { %v733_v12 = vunpack.c.l.s4 %v1125_v11  ;;  %s448_s13 = scalar_lea.vmem %s1350_s2, %s1360_s10  ;;  %v754_v16 = vsub.s32 1, %v1270_v36  ;;  %s453_s17 = scalar_lea.vmem %s1351_s3, %s1360_s10 }
  0x37   : > { %v746_v19 = vld [vmem:[%s448_s13] sm:$0x3]  ;;  %s462_s24 = scalar_lea.vmem %s1352_s4, %s1360_s10 }
  0x38   : > { %695 = vmatpush1.bf16.msra.mxu0 %v1046_v48  ;;  %v734_v13 = vunpack.c.0.s8 %v733_v12  ;;  %v766_v22 = vld [vmem:[%s453_s17] sm:$0x3]  ;;  %v751_v25 = vrot.slane %v746_v19, %v750_v15  ;;  %v755_v26 = vrot.slane %v746_v19, %v754_v16 }
  0x39   : > { %696 = vmatprep.subr.bf16.mxu0 %v1047_v49  ;;  %v771_v29 = vrot.slane %v766_v22, %v750_v15  ;;  %v775_v30 = vrot.slane %v766_v22, %v754_v16 }
  0x3a   : > { %v737_v17 = vsub.s32 %v734_v13, %v1270_v36  ;;  %v756_v31 = vcombine.low %v751_v25, %v755_v26 }
  0x3b   : > { %v776_v32 = vcombine.low %v771_v29, %v775_v30 }
  0x3c   : > { %697 = vmatpush1.bf16.msra.mxu0 %v1049_v50  ;;  %v469_v21 = vld [vmem:[#allocation2] sm:$0xf]  ;;  %v763_v33 = vrot.slane %v756_v31, %v737_v17 }
  0x3d   : > { %698 = vmatprep.subr.bf16.mxu0 %v1050_v51  ;;  %v783_v34 = vrot.slane %v776_v32, %v737_v17 }
  0x40   : > { %699 = vmatpush1.bf16.msra.mxu0 %v1052_v52 }
  0x41   : > { %700 = vmatprep.subr.bf16.mxu0 %v1053_v53 }
  0x44   : > { %701 = vmatpush1.bf16.msra.mxu0 %v1055_v54 }
  0x45   : > { %702 = vmatprep.subr.bf16.mxu0 %v1056_v55 }
  0x48   : > { %703 = vmatpush1.bf16.msra.mxu0 %v1058_v56 }
  0x49   : > { %704 = vmatprep.subr.bf16.mxu0 %v1059_v57 }
  0x4c   : > { %705 = vmatpush2.bf16.msra.mxu0 %v1061_v58 }
  0x4d   : > { %706 = vmatprep.subr.bf16.mxu0 %v1062_v59 }
  0x50   : > { %707 = vmatpush2.bf16.msra.mxu0 %v1064_v60 }
  0x51   : > { %708 = vmatprep.subr.bf16.mxu0 %v1065_v61 }
  0x54   : > { %709 = vmatpush2.bf16.msra.mxu0 %v1067_v62 }
  0x55   : > { %710 = vmatprep.subr.bf16.mxu0 %v1068_v63 }
  0x58   : > { %711 = vmatpush2.bf16.msra.mxu0 %v1070_v0 }
  0x59   : > { %712 = vmatprep.subr.bf16.mxu0 %v1071_v1 }
  0x5c   : > { %713 = vmatpush2.bf16.msra.mxu0 %v1073_v2 }
  0x5d   : > { %714 = vmatprep.subr.bf16.mxu0 %v1074_v3 }
  0x60   : > { %715 = vmatpush2.bf16.msra.mxu0 %v1076_v4 }
  0x61   : > { %716 = vmatprep.subr.bf16.mxu0 %v1077_v5 }
  0x64   : > { %717 = vmatpush2.bf16.msra.mxu0 %v1079_v6 }
  0x65   : > { %718 = vmatprep.subr.bf16.mxu0 %v1080_v7 }
  0x68   : > { %719 = vmatpush2.bf16.msra.mxu0 %v1082_v8 }
  0x6b   : > { %721 = vmatmul.mubr.bf16.vlgmr.msra.gmra.mxu0 %v518_v9 }
 0x12b   : > { %v722_v14 = vpop.f32.mrf.mxu0 }
 0x12d   : > { %v724_v18 = vpop.f32.mrf.mxu0 }
 0x12e   : > { %v731_v20 = vcombine.low %v722_v14, %v724_v18 }
 0x12f   : > { %v726_v23 = vpop.f32.mrf.mxu0 }
 0x130   : > { %v738_v24 = vrot.slane %v731_v20, %v737_v17 }
 0x131   : > { %v727_v27 = vpop.f32.mrf.mxu0 }
 0x132   : > { %v740_v28 = vadd.f32 %v738_v24, %v469_v21 }
 0x134   : > { %741 = vst [vmem:[#allocation2] sm:$0xf] %v740_v28 }
 0x13b   : > { %v745_v35 = vld [vmem:[#allocation2] sm:$0xf] }
 0x13c   : > { %v765_v36 = vmul.f32 %v763_v33, %v745_v35 }
 0x13e   : > { %v785_v37 = vadd.f32 %v783_v34, %v765_v36 }
 0x140   : > { %v793_v38 = vrot.slane %v785_v37, %v737_v17 }
 0x142   : > { %v794_v39 = vcombine.high %v793_v38, %v793_v38 }
 0x144   : > { %v987_v40 = vpack.c.bf16 %v794_v39, %v793_v38 }
 0x146   : > { %v808_v41 = vrot.slane %v987_v40, %v1281_v43 }
 0x148   : > { %988 = vst.sshfl [vmem:[%s462_s24] sm:$0x5 pattern:$0x73625140] %v808_v41 }
 0x149 PF: > { %s14_s19 = sadd.s32 1, %s1121_s19   ;;  %s1353_s15 = smov %s1109_s16 }
 0x14a   : > { %p11_p10 = scmp.ge.s32.totalorder %s14_s19, 4   ;;  %s1354_s16 = smov %s1186_s23 }
 0x14b   : > { %s1355_s17 = smov %s1117_s18  ;;  %s1356_s18 = smov %s1358_s20 }
 0x14c   :  { %13 = sbr.rel (!%p11_p10) target bundleno = 3 (0x3), region = 126 }

// kernel: _forward.42
= control target key start
LH: loop header
LB: loop body
LE: loop exit
PB: predicated region body
PF: predicated region fallthrough
CT: control target
= control target key end

     0   :  { %s1718_s18 = smov 0   ;;  %s1720_s19 = smov 0   ;;  %s2064_s0 = inlined_call_operand.vmem [shape: bf16[2,4608], index: 0, kind: input, shape index: {}]   ;;  %s2065_s1 = inlined_call_operand.vmem [shape: bf16[4608,512], index: 1, kind: input, shape index: {}]   ;;  %s2066_s2 = inlined_call_operand.vmem [shape: f32[1,512], index: 2, kind: input, shape index: {}]   ;;  %s2067_s3 = inlined_call_operand.vmem [shape: f32[1,512], index: 3, kind: input, shape index: {}]   ;;  %s2068_s4 = inlined_call_operand.vmem [shape: bf16[2,512], index: 4, kind: input, shape index: {}]   ;;  %s2069_s5 = inlined_call_operand.vmem [shape: bf16[2,512], index: 5, kind: output, shape index: {}]  }
   0x1   :  { %s1722_s20 = smov 0   ;;  %s1724_s21 = smov 0  }
   0x2   :  { %s1726_s22 = smov 0   ;;  %s1728_s23 = smov 0  }
   0x3   :  { %s1730_s24 = smov 0  }
   0x4 LB: > { %s27_s25 = sadd.s32 1, %s1675_s22  ;;  %s30_s26 = sadd.s32 1, %s1679_s23  ;;  %s1683_s24 = sphi %s1730_s24, %s15_s24   ;;  %s1679_s23 = sphi %s1728_s23, %s2075_s23   ;;  %s1675_s22 = sphi %s1726_s22, %s2074_s22   ;;  %s1671_s21 = sphi %s1724_s21, %s2073_s21   ;;  %s1667_s20 = sphi %s1722_s20, %s2072_s20   ;;  %s1663_s19 = sphi %s1720_s19, %s2071_s19   ;;  %s1659_s18 = sphi %s1718_s18, %s2070_s18  }
   0x5   : > { %p28_p0 = scmp.ge.s32.totalorder %s27_s25, 9  ;;  %p78_p1 = scmp.ne.s32.totalorder %s1663_s19, %s1659_s18 }
   0x6   : > { %p79_p2 = scmp.eq.s32.totalorder %s1683_s24, 0  ;;  %s71_s30 = sadd.s32 1, %s1663_s19 }
   0x7   : > { %s2077_s25 = smov (%p28_p0, %s27_s25), 0  ;;  %s2079_s26 = smov (!%p28_p0, %s30_s26), %s1679_s23 }
   0x8   : > { %p80_p3 = por %p79_p2, %p78_p1  ;;  %p32_p4 = scmp.ge.s32.totalorder %s2079_s26, 2 }
   0x9   : > { %s66_s27 = ssub.s32 %s1675_s22, %s2077_s25  ;;  %p1389_p6 = scmp.ge.s32.totalorder %s1683_s24, 18 }
   0xa   : > { %s2081_s26 = smov (%p32_p4, %s2079_s26), 0 }
   0xb   : > { %s67_s28 = ssub.s32 %s1679_s23, %s2081_s26  ;;  %212 = sbr.rel (%p1389_p6) target bundleno = 55 (0x37), region = 16 }
   0xc   : > { %s68_s29 = sor.u32 %s67_s28, %s66_s27 }
   0xd   : > { %p69_p5 = scmp.eq.s32.totalorder %s68_s29, 0 }
   0xf   : > { %s1769_s6 = scalar_select %p69_p5, %s1663_s19, %s71_s30  }
  0x10   : > { %227 = sbr.rel (!%p80_p3) target bundleno = 55 (0x37), region = 24  ;;  %s229_s7 = sand.u32 (%p80_p3), 1, %s1663_s19  }
  0x11   : > { %s1392_s8 = sshll.u32 (%p80_p3), %s1679_s23, 1  ;;  %s1390_s9 = sshll.u32 (%p80_p3), %s229_s7, 9 }
  0x12   : > { %s1473_s10 = sshll.u32 (%p80_p3), %s1675_s22, 8  ;;  %s1783_s16 = scalar_lea.vmem (%p80_p3), [#allocation3], %s1390_s9 }
  0x13   : > { %s235_s11 = sadd.s32 (%p80_p3), %s1473_s10, %s1392_s8 }
  0x14   : > { %s1394_s12 = sshll.u32 (%p80_p3), %s235_s11, 2 }
  0x15   : > { %s1778_s15 = scalar_lea.vmem %s2065_s1, %s1394_s12 }
  0x16   : > { %v392_v0 = vld [vmem:[%s1778_s15] sm:$0xff]  ;;  %v394_v1 = vld [vmem:[%s1778_s15 + $0x10] sm:$0xff] }
  0x17   : > { %v396_v2 = vld [vmem:[%s1778_s15 + $0x20] sm:$0xff]  ;;  %393 = vst [vmem:[%s1783_s16] sm:$0xff] %v392_v0  ;;  %395 = vst [vmem:[%s1783_s16 + $0x8] sm:$0xff] %v394_v1  ;;  %v398_v3 = vld [vmem:[%s1778_s15 + $0x30] sm:$0xff] }
  0x18   : > { %397 = vst [vmem:[%s1783_s16 + $0x10] sm:$0xff] %v396_v2  ;;  %v400_v4 = vld [vmem:[%s1778_s15 + $0x40] sm:$0xff]  ;;  %v402_v5 = vld [vmem:[%s1778_s15 + $0x50] sm:$0xff]  ;;  %399 = vst [vmem:[%s1783_s16 + $0x18] sm:$0xff] %v398_v3 }
  0x19   : > { %401 = vst [vmem:[%s1783_s16 + $0x20] sm:$0xff] %v400_v4  ;;  %403 = vst [vmem:[%s1783_s16 + $0x28] sm:$0xff] %v402_v5  ;;  %v404_v6 = vld [vmem:[%s1778_s15 + $0x60] sm:$0xff]  ;;  %v406_v7 = vld [vmem:[%s1778_s15 + $0x70] sm:$0xff] }
  0x1a   : > { %v408_v8 = vld [vmem:[%s1778_s15 + $0x80] sm:$0xff]  ;;  %405 = vst [vmem:[%s1783_s16 + $0x30] sm:$0xff] %v404_v6  ;;  %407 = vst [vmem:[%s1783_s16 + $0x38] sm:$0xff] %v406_v7  ;;  %v410_v9 = vld [vmem:[%s1778_s15 + $0x90] sm:$0xff] }
  0x1b   : > { %409 = vst [vmem:[%s1783_s16 + $0x40] sm:$0xff] %v408_v8  ;;  %v412_v10 = vld [vmem:[%s1778_s15 + $0xa0] sm:$0xff]  ;;  %v414_v11 = vld [vmem:[%s1778_s15 + $0xb0] sm:$0xff]  ;;  %411 = vst [vmem:[%s1783_s16 + $0x48] sm:$0xff] %v410_v9 }
  0x1c   : > { %413 = vst [vmem:[%s1783_s16 + $0x50] sm:$0xff] %v412_v10  ;;  %415 = vst [vmem:[%s1783_s16 + $0x58] sm:$0xff] %v414_v11  ;;  %v416_v12 = vld [vmem:[%s1778_s15 + $0xc0] sm:$0xff]  ;;  %v418_v13 = vld [vmem:[%s1778_s15 + $0xd0] sm:$0xff] }
  0x1d   : > { %v420_v14 = vld [vmem:[%s1778_s15 + $0xe0] sm:$0xff]  ;;  %417 = vst [vmem:[%s1783_s16 + $0x60] sm:$0xff] %v416_v12  ;;  %419 = vst [vmem:[%s1783_s16 + $0x68] sm:$0xff] %v418_v13  ;;  %v422_v15 = vld [vmem:[%s1778_s15 + $0xf0] sm:$0xff] }
  0x1e   : > { %421 = vst [vmem:[%s1783_s16 + $0x70] sm:$0xff] %v420_v14  ;;  %v424_v16 = vld [vmem:[%s1778_s15 + $0x100] sm:$0xff]  ;;  %v426_v17 = vld [vmem:[%s1778_s15 + $0x110] sm:$0xff]  ;;  %423 = vst [vmem:[%s1783_s16 + $0x78] sm:$0xff] %v422_v15 }
  0x1f   : > { %425 = vst [vmem:[%s1783_s16 + $0x80] sm:$0xff] %v424_v16  ;;  %427 = vst [vmem:[%s1783_s16 + $0x88] sm:$0xff] %v426_v17  ;;  %v428_v18 = vld [vmem:[%s1778_s15 + $0x120] sm:$0xff]  ;;  %v430_v19 = vld [vmem:[%s1778_s15 + $0x130] sm:$0xff] }
  0x20   : > { %v432_v20 = vld [vmem:[%s1778_s15 + $0x140] sm:$0xff]  ;;  %429 = vst [vmem:[%s1783_s16 + $0x90] sm:$0xff] %v428_v18  ;;  %431 = vst [vmem:[%s1783_s16 + $0x98] sm:$0xff] %v430_v19  ;;  %v434_v21 = vld [vmem:[%s1778_s15 + $0x150] sm:$0xff] }
  0x21   : > { %433 = vst [vmem:[%s1783_s16 + $0xa0] sm:$0xff] %v432_v20  ;;  %v436_v22 = vld [vmem:[%s1778_s15 + $0x160] sm:$0xff]  ;;  %v438_v23 = vld [vmem:[%s1778_s15 + $0x170] sm:$0xff]  ;;  %435 = vst [vmem:[%s1783_s16 + $0xa8] sm:$0xff] %v434_v21 }
  0x22   : > { %437 = vst [vmem:[%s1783_s16 + $0xb0] sm:$0xff] %v436_v22  ;;  %439 = vst [vmem:[%s1783_s16 + $0xb8] sm:$0xff] %v438_v23  ;;  %v440_v24 = vld [vmem:[%s1778_s15 + $0x180] sm:$0xff]  ;;  %v442_v25 = vld [vmem:[%s1778_s15 + $0x190] sm:$0xff] }
  0x23   : > { %v444_v26 = vld [vmem:[%s1778_s15 + $0x1a0] sm:$0xff]  ;;  %441 = vst [vmem:[%s1783_s16 + $0xc0] sm:$0xff] %v440_v24  ;;  %443 = vst [vmem:[%s1783_s16 + $0xc8] sm:$0xff] %v442_v25  ;;  %v446_v27 = vld [vmem:[%s1778_s15 + $0x1b0] sm:$0xff] }
  0x24   : > { %445 = vst [vmem:[%s1783_s16 + $0xd0] sm:$0xff] %v444_v26  ;;  %v448_v28 = vld [vmem:[%s1778_s15 + $0x1c0] sm:$0xff]  ;;  %v450_v29 = vld [vmem:[%s1778_s15 + $0x1d0] sm:$0xff]  ;;  %447 = vst [vmem:[%s1783_s16 + $0xd8] sm:$0xff] %v446_v27 }
  0x25   : > { %449 = vst [vmem:[%s1783_s16 + $0xe0] sm:$0xff] %v448_v28  ;;  %451 = vst [vmem:[%s1783_s16 + $0xe8] sm:$0xff] %v450_v29  ;;  %v452_v30 = vld [vmem:[%s1778_s15 + $0x1e0] sm:$0xff]  ;;  %v454_v31 = vld [vmem:[%s1778_s15 + $0x1f0] sm:$0xff] }
  0x26   : > { %v456_v32 = vld [vmem:[%s1778_s15 + $0x200] sm:$0xff]  ;;  %453 = vst [vmem:[%s1783_s16 + $0xf0] sm:$0xff] %v452_v30  ;;  %455 = vst [vmem:[%s1783_s16 + $0xf8] sm:$0xff] %v454_v31  ;;  %v458_v33 = vld [vmem:[%s1778_s15 + $0x210] sm:$0xff] }
  0x27   : > { %457 = vst [vmem:[%s1783_s16 + $0x100] sm:$0xff] %v456_v32  ;;  %v460_v34 = vld [vmem:[%s1778_s15 + $0x220] sm:$0xff]  ;;  %v462_v35 = vld [vmem:[%s1778_s15 + $0x230] sm:$0xff]  ;;  %459 = vst [vmem:[%s1783_s16 + $0x108] sm:$0xff] %v458_v33 }
  0x28   : > { %461 = vst [vmem:[%s1783_s16 + $0x110] sm:$0xff] %v460_v34  ;;  %463 = vst [vmem:[%s1783_s16 + $0x118] sm:$0xff] %v462_v35  ;;  %v464_v36 = vld [vmem:[%s1778_s15 + $0x240] sm:$0xff]  ;;  %v466_v37 = vld [vmem:[%s1778_s15 + $0x250] sm:$0xff] }
  0x29   : > { %v468_v38 = vld [vmem:[%s1778_s15 + $0x260] sm:$0xff]  ;;  %465 = vst [vmem:[%s1783_s16 + $0x120] sm:$0xff] %v464_v36  ;;  %467 = vst [vmem:[%s1783_s16 + $0x128] sm:$0xff] %v466_v37  ;;  %v470_v39 = vld [vmem:[%s1778_s15 + $0x270] sm:$0xff] }
  0x2a   : > { %469 = vst [vmem:[%s1783_s16 + $0x130] sm:$0xff] %v468_v38  ;;  %v472_v40 = vld [vmem:[%s1778_s15 + $0x280] sm:$0xff]  ;;  %v474_v41 = vld [vmem:[%s1778_s15 + $0x290] sm:$0xff]  ;;  %471 = vst [vmem:[%s1783_s16 + $0x138] sm:$0xff] %v470_v39 }
  0x2b   : > { %473 = vst [vmem:[%s1783_s16 + $0x140] sm:$0xff] %v472_v40  ;;  %475 = vst [vmem:[%s1783_s16 + $0x148] sm:$0xff] %v474_v41  ;;  %v476_v42 = vld [vmem:[%s1778_s15 + $0x2a0] sm:$0xff]  ;;  %v478_v43 = vld [vmem:[%s1778_s15 + $0x2b0] sm:$0xff] }
  0x2c   : > { %v480_v44 = vld [vmem:[%s1778_s15 + $0x2c0] sm:$0xff]  ;;  %477 = vst [vmem:[%s1783_s16 + $0x150] sm:$0xff] %v476_v42  ;;  %479 = vst [vmem:[%s1783_s16 + $0x158] sm:$0xff] %v478_v43  ;;  %v482_v45 = vld [vmem:[%s1778_s15 + $0x2d0] sm:$0xff] }
  0x2d   : > { %481 = vst [vmem:[%s1783_s16 + $0x160] sm:$0xff] %v480_v44  ;;  %v484_v46 = vld [vmem:[%s1778_s15 + $0x2e0] sm:$0xff]  ;;  %v486_v47 = vld [vmem:[%s1778_s15 + $0x2f0] sm:$0xff]  ;;  %483 = vst [vmem:[%s1783_s16 + $0x168] sm:$0xff] %v482_v45 }
  0x2e   : > { %485 = vst [vmem:[%s1783_s16 + $0x170] sm:$0xff] %v484_v46  ;;  %487 = vst [vmem:[%s1783_s16 + $0x178] sm:$0xff] %v486_v47  ;;  %v488_v48 = vld [vmem:[%s1778_s15 + $0x300] sm:$0xff]  ;;  %v490_v49 = vld [vmem:[%s1778_s15 + $0x310] sm:$0xff] }
  0x2f   : > { %v492_v50 = vld [vmem:[%s1778_s15 + $0x320] sm:$0xff]  ;;  %489 = vst [vmem:[%s1783_s16 + $0x180] sm:$0xff] %v488_v48  ;;  %491 = vst [vmem:[%s1783_s16 + $0x188] sm:$0xff] %v490_v49  ;;  %v494_v51 = vld [vmem:[%s1778_s15 + $0x330] sm:$0xff] }
  0x30   : > { %493 = vst [vmem:[%s1783_s16 + $0x190] sm:$0xff] %v492_v50  ;;  %v496_v52 = vld [vmem:[%s1778_s15 + $0x340] sm:$0xff]  ;;  %v498_v53 = vld [vmem:[%s1778_s15 + $0x350] sm:$0xff]  ;;  %495 = vst [vmem:[%s1783_s16 + $0x198] sm:$0xff] %v494_v51 }
  0x31   : > { %497 = vst [vmem:[%s1783_s16 + $0x1a0] sm:$0xff] %v496_v52  ;;  %499 = vst [vmem:[%s1783_s16 + $0x1a8] sm:$0xff] %v498_v53  ;;  %v500_v54 = vld [vmem:[%s1778_s15 + $0x360] sm:$0xff]  ;;  %v502_v55 = vld [vmem:[%s1778_s15 + $0x370] sm:$0xff] }
  0x32   : > { %v504_v56 = vld [vmem:[%s1778_s15 + $0x380] sm:$0xff]  ;;  %501 = vst [vmem:[%s1783_s16 + $0x1b0] sm:$0xff] %v500_v54  ;;  %503 = vst [vmem:[%s1783_s16 + $0x1b8] sm:$0xff] %v502_v55  ;;  %v506_v57 = vld [vmem:[%s1778_s15 + $0x390] sm:$0xff] }
  0x33   : > { %505 = vst [vmem:[%s1783_s16 + $0x1c0] sm:$0xff] %v504_v56  ;;  %v508_v58 = vld [vmem:[%s1778_s15 + $0x3a0] sm:$0xff]  ;;  %v510_v59 = vld [vmem:[%s1778_s15 + $0x3b0] sm:$0xff]  ;;  %507 = vst [vmem:[%s1783_s16 + $0x1c8] sm:$0xff] %v506_v57 }
  0x34   : > { %509 = vst [vmem:[%s1783_s16 + $0x1d0] sm:$0xff] %v508_v58  ;;  %511 = vst [vmem:[%s1783_s16 + $0x1d8] sm:$0xff] %v510_v59  ;;  %v512_v60 = vld [vmem:[%s1778_s15 + $0x3c0] sm:$0xff]  ;;  %v514_v61 = vld [vmem:[%s1778_s15 + $0x3d0] sm:$0xff] }
  0x35   : > { %v516_v62 = vld [vmem:[%s1778_s15 + $0x3e0] sm:$0xff]  ;;  %513 = vst [vmem:[%s1783_s16 + $0x1e0] sm:$0xff] %v512_v60  ;;  %515 = vst [vmem:[%s1783_s16 + $0x1e8] sm:$0xff] %v514_v61  ;;  %v518_v63 = vld [vmem:[%s1778_s15 + $0x3f0] sm:$0xff] }
  0x36   : > { %517 = vst [vmem:[%s1783_s16 + $0x1f0] sm:$0xff] %v516_v62  ;;  %519 = vst [vmem:[%s1783_s16 + $0x1f8] sm:$0xff] %v518_v63 }
  0x37 PF: > { %p1395_p7 = scmp.ge.s32.totalorder %s1683_s24, 1  ;;  %p552_p8 = scmp.lt.s32.totalorder %s1683_s24, 19 }
  0x39   : > { %p553_p9 = pnand %p1395_p7, %p552_p8 }
  0x3a   : > { %s559_s17 = sand.u32 (!%p553_p9), 1, %s1659_s18   ;;  %s1397_s27 = sshll.u32 (!%p553_p9), %s1667_s20, 2 }
  0x3b   : > { %556 = sbr.rel (%p553_p9) target bundleno = 369 (0x171), region = 74  ;;  %s1396_s28 = sshll.u32 (!%p553_p9), %s559_s17, 9 }
  0x3c   : > { %p616_p10 = scmp.lt.s32.totalorder (!%p553_p9), %s1397_s27, 35  ;;  %s1398_s29 = sshll.u32 (!%p553_p9), %s1671_s21, 1 }
  0x3d   : > { %p625_p11 = scmp.lt.s32.totalorder (!%p553_p9), %s1398_s29, 3  ;;  %s1939_s7 = scalar_lea.vmem (!%p553_p9), [#allocation3], %s1396_s28 }
  0x3e   : > { %p1402_p12 = scmp.ne.s32.totalorder (!%p553_p9), %s1667_s20, 0 }
  0x40   : > { %s2083_s27 = smov (!%p616_p10, %s1397_s27), 35  ;;  %s2085_s29 = smov (!%p625_p11, %s1398_s29), 3 }
  0x41   : > { %s620_s8 = scalar_lea.vmem %s2064_s0, %s2083_s27  ;;  %s627_s18 = scalar_lea.vmem %s2066_s2, %s2085_s29 }
  0x42   : > { %s632_s12 = scalar_lea.vmem %s2067_s3, %s2085_s29  ;;  %s641_s15 = scalar_lea.vmem %s2068_s4, %s2085_s29 }
  0x43   : > { %s650_s30 = scalar_lea.vmem %s2069_s5, %s2085_s29  ;;  %655 = sbr.rel (%p1402_p12) target bundleno = 74 (0x4a), region = 82 }
  0x48   : > { %v1685_v0 = vmov 0.0  }
  0x49   : > { %656 = vst [vmem:[#allocation2] sm:$0xf] %v1685_v0 }
  0x4a PF: > { %v1533_v1 = vld [vmem:[%s1939_s7 + $0x74] ss:$8 sps:$4 sm:$0xff]   ;;  %v1537_v3 = vld [vmem:[%s1939_s7 + $0x70] ss:$8 sps:$4 sm:$0xff]   ;;  %v1539_v5 = vld [vmem:[%s1939_s7 + $0x64] ss:$8 sps:$4 sm:$0xff]   ;;  %v735_v41 = vlaneseq }
  0x4b   : > { %v1535_v2 = vld [vmem:[%s1939_s7 + $0x174] ss:$8 sps:$4 sm:$0xff]   ;;  %1072 = vmatprep.subr.bf16.mxu0 %v1533_v1  ;;  %v1538_v4 = vld [vmem:[%s1939_s7 + $0x170] ss:$8 sps:$4 sm:$0xff]   ;;  %v1541_v6 = vld [vmem:[%s1939_s7 + $0x164] ss:$8 sps:$4 sm:$0xff]  }
  0x4c   : > { %1113 = vmatprep.subr.bf16.mxu1 %v1535_v2  ;;  %1073 = vmatpush1.bf16.msra.mxu0 %v1537_v3  ;;  %v1543_v7 = vld [vmem:[%s1939_s7 + $0x60] ss:$8 sps:$4 sm:$0xff]   ;;  %v1545_v9 = vld [vmem:[%s1939_s7 + $0x54] ss:$8 sps:$4 sm:$0xff]   ;;  %v1549_v11 = vld [vmem:[%s1939_s7 + $0x50] ss:$8 sps:$4 sm:$0xff]  }
  0x4d   : > { %1114 = vmatpush1.bf16.msra.mxu1 %v1538_v4  ;;  %1074 = vmatprep.subr.bf16.mxu0 %v1539_v5  ;;  %v1544_v8 = vld [vmem:[%s1939_s7 + $0x160] ss:$8 sps:$4 sm:$0xff]   ;;  %v1547_v10 = vld [vmem:[%s1939_s7 + $0x154] ss:$8 sps:$4 sm:$0xff]   ;;  %v1550_v12 = vld [vmem:[%s1939_s7 + $0x150] ss:$8 sps:$4 sm:$0xff]  }
  0x4e   : > { %1115 = vmatprep.subr.bf16.mxu1 %v1541_v6  ;;  %v1551_v13 = vld [vmem:[%s1939_s7 + $0x44] ss:$8 sps:$4 sm:$0xff]   ;;  %v1555_v15 = vld [vmem:[%s1939_s7 + $0x40] ss:$8 sps:$4 sm:$0xff]   ;;  %v1557_v17 = vld [vmem:[%s1939_s7 + $0x34] ss:$8 sps:$4 sm:$0xff]  }
  0x4f   : > { %v1553_v14 = vld [vmem:[%s1939_s7 + $0x144] ss:$8 sps:$4 sm:$0xff]   ;;  %v1556_v16 = vld [vmem:[%s1939_s7 + $0x140] ss:$8 sps:$4 sm:$0xff]   ;;  %v1559_v18 = vld [vmem:[%s1939_s7 + $0x134] ss:$8 sps:$4 sm:$0xff]  }
  0x50   : > { %1075 = vmatpush1.bf16.msra.mxu0 %v1543_v7  ;;  %v1561_v19 = vld [vmem:[%s1939_s7 + $0x30] ss:$8 sps:$4 sm:$0xff]   ;;  %v1563_v21 = vld [vmem:[%s1939_s7 + $0x24] ss:$8 sps:$4 sm:$0xff]   ;;  %v1567_v23 = vld [vmem:[%s1939_s7 + $0x20] ss:$8 sps:$4 sm:$0xff]  }
  0x51   : > { %1116 = vmatpush1.bf16.msra.mxu1 %v1544_v8  ;;  %1076 = vmatprep.subr.bf16.mxu0 %v1545_v9  ;;  %v1562_v20 = vld [vmem:[%s1939_s7 + $0x130] ss:$8 sps:$4 sm:$0xff]   ;;  %v1565_v22 = vld [vmem:[%s1939_s7 + $0x124] ss:$8 sps:$4 sm:$0xff]   ;;  %v1568_v24 = vld [vmem:[%s1939_s7 + $0x120] ss:$8 sps:$4 sm:$0xff]  }
  0x52   : > { %1117 = vmatprep.subr.bf16.mxu1 %v1547_v10  ;;  %v1569_v25 = vld [vmem:[%s1939_s7 + $0x14] ss:$8 sps:$4 sm:$0xff]   ;;  %v1573_v27 = vld [vmem:[%s1939_s7 + $0x10] ss:$8 sps:$4 sm:$0xff]   ;;  %v1575_v29 = vld [vmem:[%s1939_s7 + $0x4] ss:$8 sps:$4 sm:$0xff]  }
  0x53   : > { %v1571_v26 = vld [vmem:[%s1939_s7 + $0x114] ss:$8 sps:$4 sm:$0xff]   ;;  %v1574_v28 = vld [vmem:[%s1939_s7 + $0x110] ss:$8 sps:$4 sm:$0xff]   ;;  %v1577_v30 = vld [vmem:[%s1939_s7 + $0x104] ss:$8 sps:$4 sm:$0xff]  }
  0x54   : > { %1077 = vmatpush1.bf16.msra.mxu0 %v1549_v11  ;;  %v1579_v31 = vld [vmem:[%s1939_s7] ss:$8 sps:$4 sm:$0xff]   ;;  %v1581_v33 = vld [vmem:[%s1939_s7 + $0xf4] ss:$8 sps:$4 sm:$0xff]   ;;  %v1585_v35 = vld [vmem:[%s1939_s7 + $0xf0] ss:$8 sps:$4 sm:$0xff]  }
  0x55   : > { %1118 = vmatpush1.bf16.msra.mxu1 %v1550_v12  ;;  %1078 = vmatprep.subr.bf16.mxu0 %v1551_v13  ;;  %v1580_v32 = vld [vmem:[%s1939_s7 + $0x100] ss:$8 sps:$4 sm:$0xff]   ;;  %v1583_v34 = vld [vmem:[%s1939_s7 + $0x1f4] ss:$8 sps:$4 sm:$0xff]   ;;  %v1586_v36 = vld [vmem:[%s1939_s7 + $0x1f0] ss:$8 sps:$4 sm:$0xff]  }
  0x56   : > { %1119 = vmatprep.subr.bf16.mxu1 %v1553_v14  ;;  %v1587_v37 = vld [vmem:[%s1939_s7 + $0xe4] ss:$8 sps:$4 sm:$0xff]   ;;  %v1686_v39 = vmov 1966171168   ;;  %v1591_v42 = vld [vmem:[%s1939_s7 + $0xe0] ss:$8 sps:$4 sm:$0xff]  }
  0x57   : > { %v1589_v38 = vld [vmem:[%s1939_s7 + $0x1e4] ss:$8 sps:$4 sm:$0xff]   ;;  %v733_v40 = vunpack.c.l.s4 %v1686_v39  ;;  %v1592_v43 = vld [vmem:[%s1939_s7 + $0x1e0] ss:$8 sps:$4 sm:$0xff]   ;;  %v1593_v44 = vld [vmem:[%s1939_s7 + $0xd4] ss:$8 sps:$4 sm:$0xff]  }
  0x58   : > { %1079 = vmatpush1.bf16.msra.mxu0 %v1555_v15  ;;  %v1595_v45 = vld [vmem:[%s1939_s7 + $0x1d4] ss:$8 sps:$4 sm:$0xff]   ;;  %v1984_v47 = vshrl.u32 %v735_v41, 7  ;;  %v1597_v48 = vld [vmem:[%s1939_s7 + $0xd0] ss:$8 sps:$4 sm:$0xff]   ;;  %p1468_p13 = scmp.ne.s32.totalorder %s1667_s20, 8 }
  0x59   : > { %1120 = vmatpush1.bf16.msra.mxu1 %v1556_v16  ;;  %1080 = vmatprep.subr.bf16.mxu0 %v1557_v17  ;;  %v734_v46 = vunpack.c.0.s8 %v733_v40  ;;  %v1598_v49 = vld [vmem:[%s1939_s7 + $0x1d0] ss:$8 sps:$4 sm:$0xff]   ;;  %v1599_v50 = vld [vmem:[%s1939_s7 + $0xc4] ss:$8 sps:$4 sm:$0xff]   ;;  %v1603_v54 = vld [vmem:[%s1939_s7 + $0xc0] ss:$8 sps:$4 sm:$0xff]  }
  0x5a   : > { %1121 = vmatprep.subr.bf16.mxu1 %v1559_v18  ;;  %v1601_v51 = vld [vmem:[%s1939_s7 + $0x1c4] ss:$8 sps:$4 sm:$0xff]   ;;  %v1403_v53 = vld.sshfl [vmem:[%s620_s8] sm:$0x33 pattern:$0x75316420] }
  0x5b   : > { %v1991_v52 = vsub.s32 %v734_v46, %v1984_v47  ;;  %v1604_v55 = vld [vmem:[%s1939_s7 + $0x1c0] ss:$8 sps:$4 sm:$0xff]   ;;  %v731_v56 = vcombine.high %v1403_v53, %v1403_v53  ;;  %v1605_v57 = vld [vmem:[%s1939_s7 + $0xb4] ss:$8 sps:$4 sm:$0xff]   ;;  %v1609_v60 = vld [vmem:[%s1939_s7 + $0xb0] ss:$8 sps:$4 sm:$0xff]  }
  0x5c   : > { %1081 = vmatpush1.bf16.msra.mxu0 %v1561_v19  ;;  %v1607_v58 = vld [vmem:[%s1939_s7 + $0x1b4] ss:$8 sps:$4 sm:$0xff]   ;;  %v1610_v61 = vld [vmem:[%s1939_s7 + $0x1b0] ss:$8 sps:$4 sm:$0xff]   ;;  %v1611_v63 = vld [vmem:[%s1939_s7 + $0xa4] ss:$8 sps:$4 sm:$0xff]  }
  0x5d   : > { %1122 = vmatpush1.bf16.msra.mxu1 %v1562_v20  ;;  %1082 = vmatprep.subr.bf16.mxu0 %v1563_v21  ;;  %v745_v59 = vrot.slane %v731_v56, %v1991_v52  ;;  %v1613_v0 = vld [vmem:[%s1939_s7 + $0x1a4] ss:$8 sps:$4 sm:$0xff]   ;;  %v1615_v1 = vld [vmem:[%s1939_s7 + $0xa0] ss:$8 sps:$4 sm:$0xff]   ;;  %v1617_v3 = vld [vmem:[%s1939_s7 + $0x94] ss:$8 sps:$4 sm:$0xff]   ;;  %v738_v9 = vrot.slane %v1403_v53, %v1991_v52 }
  0x5e   : > { %1123 = vmatprep.subr.bf16.mxu1 %v1565_v22  ;;  %v1616_v2 = vld [vmem:[%s1939_s7 + $0x1a0] ss:$8 sps:$4 sm:$0xff]   ;;  %v1619_v4 = vld [vmem:[%s1939_s7 + $0x194] ss:$8 sps:$4 sm:$0xff]   ;;  %v1621_v5 = vld [vmem:[%s1939_s7 + $0x90] ss:$8 sps:$4 sm:$0xff]  }
  0x5f   : > { %v747_v62 = vcombine.high %v745_v59, %v745_v59  ;;  %1104 = vmatprep.mubr.bf16.mxu0 %v745_v59  ;;  %v1622_v6 = vld [vmem:[%s1939_s7 + $0x190] ss:$8 sps:$4 sm:$0xff]   ;;  %v1623_v7 = vld [vmem:[%s1939_s7 + $0x84] ss:$8 sps:$4 sm:$0xff]   ;;  %v1627_v10 = vld [vmem:[%s1939_s7 + $0x80] ss:$8 sps:$4 sm:$0xff]   ;;  %v746_v12 = vcombine.high %v738_v9, %v738_v9 }
  0x60   : > { %1083 = vmatpush1.bf16.msra.mxu0 %v1567_v23  ;;  %v1625_v8 = vld [vmem:[%s1939_s7 + $0x184] ss:$8 sps:$4 sm:$0xff]   ;;  %v1628_v11 = vld [vmem:[%s1939_s7 + $0x180] ss:$8 sps:$4 sm:$0xff]   ;;  %v1687_v13 = vmov 1983009808  }
  0x61   : > { %1124 = vmatpush1.bf16.msra.mxu1 %v1568_v24  ;;  %1084 = vmatprep.subr.bf16.mxu0 %v1569_v25  ;;  %v1158_v14 = vunpack.c.l.s4 %v1687_v13 }
  0x62   : > { %1125 = vmatprep.subr.bf16.mxu1 %v1571_v26  ;;  %1145 = vmatprep.mubr.bf16.mxu1 %v747_v62  ;;  %v657_v26 = vld [vmem:[#allocation2] sm:$0xf] }
  0x63   : > { %v1159_v15 = vunpack.c.0.s8 %v1158_v14 }
  0x64   : > { %1085 = vmatpush1.bf16.msra.mxu0 %v1573_v27 }
  0x65   : > { %1126 = vmatpush1.bf16.msra.mxu1 %v1574_v28  ;;  %1086 = vmatprep.subr.bf16.mxu0 %v1575_v29  ;;  %v1162_v22 = vsub.s32 %v1159_v15, %v1984_v47 }
  0x66   : > { %1127 = vmatprep.subr.bf16.mxu1 %v1577_v30 }
  0x68   : > { %1087 = vmatpush1.bf16.msra.mxu0 %v1579_v31 }
  0x69   : > { %1128 = vmatpush1.bf16.msra.mxu1 %v1580_v32  ;;  %1088 = vmatprep.subr.bf16.mxu0 %v1581_v33 }
  0x6a   : > { %1129 = vmatprep.subr.bf16.mxu1 %v1583_v34 }
  0x6c   : > { %1089 = vmatpush2.bf16.msra.mxu0 %v1585_v35 }
  0x6d   : > { %1130 = vmatpush2.bf16.msra.mxu1 %v1586_v36  ;;  %1090 = vmatprep.subr.bf16.mxu0 %v1587_v37 }
  0x6e   : > { %1131 = vmatprep.subr.bf16.mxu1 %v1589_v38 }
  0x70   : > { %1091 = vmatpush2.bf16.msra.mxu0 %v1591_v42 }
  0x71   : > { %1132 = vmatpush2.bf16.msra.mxu1 %v1592_v43  ;;  %1092 = vmatprep.subr.bf16.mxu0 %v1593_v44 }
  0x72   : > { %1133 = vmatprep.subr.bf16.mxu1 %v1595_v45 }
  0x74   : > { %1093 = vmatpush2.bf16.msra.mxu0 %v1597_v48 }
  0x75   : > { %1134 = vmatpush2.bf16.msra.mxu1 %v1598_v49  ;;  %1094 = vmatprep.subr.bf16.mxu0 %v1599_v50 }
  0x76   : > { %1135 = vmatprep.subr.bf16.mxu1 %v1601_v51 }
  0x78   : > { %1095 = vmatpush2.bf16.msra.mxu0 %v1603_v54 }
  0x79   : > { %1136 = vmatpush2.bf16.msra.mxu1 %v1604_v55  ;;  %1096 = vmatprep.subr.bf16.mxu0 %v1605_v57 }
  0x7a   : > { %1137 = vmatprep.subr.bf16.mxu1 %v1607_v58 }
  0x7c   : > { %1097 = vmatpush2.bf16.msra.mxu0 %v1609_v60 }
  0x7d   : > { %1138 = vmatpush2.bf16.msra.mxu1 %v1610_v61  ;;  %1098 = vmatprep.subr.bf16.mxu0 %v1611_v63 }
  0x7e   : > { %1139 = vmatprep.subr.bf16.mxu1 %v1613_v0 }
  0x80   : > { %1099 = vmatpush2.bf16.msra.mxu0 %v1615_v1 }
  0x81   : > { %1140 = vmatpush2.bf16.msra.mxu1 %v1616_v2  ;;  %1100 = vmatprep.subr.bf16.mxu0 %v1617_v3 }
  0x82   : > { %1141 = vmatprep.subr.bf16.mxu1 %v1619_v4 }
  0x84   : > { %1101 = vmatpush2.bf16.msra.mxu0 %v1621_v5 }
  0x85   : > { %1142 = vmatpush2.bf16.msra.mxu1 %v1622_v6  ;;  %1102 = vmatprep.subr.bf16.mxu0 %v1623_v7 }
  0x86   : > { %1143 = vmatprep.subr.bf16.mxu1 %v1625_v8 }
  0x88   : > { %1103 = vmatpush2.bf16.msra.mxu0 %v1627_v10 }
  0x89   : > { %1144 = vmatpush2.bf16.msra.mxu1 %v1628_v11 }
  0x8b   : > { %1105 = vmatmul.mubr.bf16.vlgmr.msra.gmra.mxu0 %v738_v9 }
  0x8c   : > { %1146 = vmatmul.mubr.bf16.vlgmr.msra.gmra.mxu1 %v746_v12 }
 0x14b   : > { %v1106_v16 = vpop.f32.mrf.mxu0 }
 0x14c   : > { %v1147_v17 = vpop.f32.mrf.mxu1 }
 0x14d   : > { %v1108_v18 = vpop.f32.mrf.mxu0  ;;  %v1148_v20 = vadd.f32 %v1147_v17, %v1106_v16 }
 0x14e   : > { %v1149_v19 = vpop.f32.mrf.mxu1 }
 0x14f   : > { %v1150_v21 = vadd.f32 %v1149_v19, %v1108_v18  ;;  %v1110_v23 = vpop.f32.mrf.mxu0 }
 0x150   : > { %v1151_v24 = vpop.f32.mrf.mxu1 }
 0x151   : > { %v1156_v25 = vcombine.low %v1148_v20, %v1150_v21  ;;  %v1111_v27 = vpop.f32.mrf.mxu0 }
 0x152   : > { %v1152_v28 = vpop.f32.mrf.mxu1 }
 0x153   : > { %v1163_v29 = vrot.slane %v1156_v25, %v1162_v22  ;;  %1170 = sbr.rel (%p1468_p13) target bundleno = 369 (0x171), region = 86 }
 0x155   : > { %v1165_v30 = vadd.f32 %v1163_v29, %v657_v26 }
 0x157   : > { %1166 = vst [vmem:[#allocation2] sm:$0xf] %v1165_v30 }
 0x158   : > { %v1172_v31 = vld [vmem:[%s627_s18] sm:$0x3]  ;;  %v1176_v32 = vsub.s32 0, %v1984_v47  ;;  %v1180_v33 = vsub.s32 1, %v1984_v47 }
 0x159   : > { %v1192_v34 = vld [vmem:[%s632_s12] sm:$0x3] }
 0x15a   : > { %v1177_v35 = vrot.slane %v1172_v31, %v1176_v32  ;;  %v1181_v36 = vrot.slane %v1172_v31, %v1180_v33  ;;  %v1197_v37 = vrot.slane %v1192_v34, %v1176_v32  ;;  %v1201_v38 = vrot.slane %v1192_v34, %v1180_v33  ;;  %v1212_v42 = vld [vmem:[%s641_s15] sm:$0x3] }
 0x15b   : > { %v1213_v46 = vunpack.c.l.bf16 %v1212_v42 }
 0x15c   : > { %v1182_v39 = vcombine.low %v1177_v35, %v1181_v36  ;;  %v1202_v40 = vcombine.low %v1197_v37, %v1201_v38 }
 0x15e   : > { %v1171_v41 = vld [vmem:[#allocation2] sm:$0xf]  ;;  %v1189_v43 = vrot.slane %v1182_v39, %v1162_v22  ;;  %v1209_v44 = vrot.slane %v1202_v40, %v1162_v22 }
 0x160   : > { %v1191_v45 = vmul.f32 %v1189_v43, %v1171_v41 }
 0x162   : > { %v1211_v47 = vadd.f32 %v1209_v44, %v1191_v45 }
 0x164   : > { %v1214_v48 = vadd.f32 %v1213_v46, %v1211_v47 }
 0x166   : > { %v1215_v49 = vmax.f32 %v1214_v48, 0.0 }
 0x168   : > { %v1223_v50 = vrot.slane %v1215_v49, %v1162_v22 }
 0x16a   : > { %v1224_v51 = vcombine.high %v1223_v50, %v1223_v50 }
 0x16c   : > { %v1469_v53 = vpack.c.bf16 %v1224_v51, %v1223_v50 }
 0x16e   : > { %v1238_v54 = vrot.slane %v1469_v53, %v1991_v52 }
 0x170   : > { %1470 = vst.sshfl [vmem:[%s650_s30] sm:$0x5 pattern:$0x73625140] %v1238_v54 }
 0x171 PF: > { %s15_s24 = sadd.s32 1, %s1683_s24   ;;  %s2070_s18 = smov %s1663_s19 }
 0x172   : > { %p12_p0 = scmp.ge.s32.totalorder %s15_s24, 20   ;;  %s2071_s19 = smov %s1769_s6 }
 0x173   : > { %s2072_s20 = smov %s1675_s22  ;;  %s2073_s21 = smov %s1679_s23 }
 0x174   : > { %s2074_s22 = smov %s2077_s25  ;;  %s2075_s23 = smov %s2081_s26 }
 0x175   :  { %14 = sbr.rel (!%p12_p0) target bundleno = 4 (0x4), region = 133 }

// kernel: _forward.47
= control target key start
LH: loop header
LB: loop body
LE: loop exit
PB: predicated region body
PF: predicated region fallthrough
CT: control target
= control target key end

     0   :  { %s2074_s0 = inlined_call_operand.vmem [shape: bf16[2,1,1,9,512], index: 0, kind: input, shape index: {}, may-alias: {0,5}]   ;;  %s2075_s1 = inlined_call_operand.vmem [shape: bf16[2,4608], index: 1, kind: input, shape index: {}]   ;;  %s2076_s2 = inlined_call_operand.vmem [shape: bf16[4608,512], index: 2, kind: input, shape index: {}]   ;;  %s2077_s3 = inlined_call_operand.vmem [shape: f32[1,512], index: 3, kind: input, shape index: {}]   ;;  %s2078_s4 = inlined_call_operand.vmem [shape: f32[1,512], index: 4, kind: input, shape index: {}]   ;;  %s2079_s5 = inlined_call_operand.vmem [shape: bf16[2,1,1,9,512], index: 5, kind: output, shape index: {}, may-alias: {0,5}]  }
   0x1   :  { %2080 = sst [smem:[#allocation5_spill]] %s2076_s2 }
   0x2   :  { %s1695_s18 = smov 0   ;;  %s1697_s19 = smov 0  }
   0x3   :  { %s1699_s0 = smov 0   ;;  %s1701_s20 = smov 0  }
   0x4   :  { %s1703_s21 = smov 0   ;;  %s1705_s22 = smov 0  }
   0x5   :  { %s1707_s23 = smov 0   ;;  %s1709_s24 = smov 0  }
   0x6   :  { %s1711_s25 = smov 0  }
   0x7 LB: > { %s28_s26 = sadd.s32 1, %s1652_s23  ;;  %s31_s27 = sadd.s32 1, %s1656_s24  ;;  %s1660_s25 = sphi %s1711_s25, %s16_s25   ;;  %s1656_s24 = sphi %s1709_s24, %s2091_s24   ;;  %s1652_s23 = sphi %s1707_s23, %s2090_s23   ;;  %s1648_s22 = sphi %s1705_s22, %s2089_s22   ;;  %s1644_s21 = sphi %s1703_s21, %s2088_s21   ;;  %s1640_s20 = sphi %s1701_s20, %s2087_s20   ;;  %s1636_s0 = sphi %s1699_s0, %s2086_s0   ;;  %s1632_s19 = sphi %s1697_s19, %s2085_s19   ;;  %s1628_s18 = sphi %s1695_s18, %s2084_s18  }
   0x8   : > { %p29_p0 = scmp.ge.s32.totalorder %s28_s26, 9  ;;  %p79_p1 = scmp.ne.s32.totalorder %s1640_s20, %s1636_s0 }
   0x9   : > { %s1329_s28 = sadd.s32 4294967295, %s1660_s25   ;;  %p80_p2 = scmp.eq.s32.totalorder %s1660_s25, 0 }
   0xa   : > { %s2093_s26 = smov (%p29_p0, %s28_s26), 0  ;;  %s2095_s27 = smov (!%p29_p0, %s31_s27), %s1656_s24 }
   0xb   : > { %p33_p3 = scmp.ge.s32.totalorder %s2095_s27, 2  ;;  %s67_s29 = ssub.s32 %s1652_s23, %s2093_s26 }
   0xc   : > { %p1751_p4 = por %p80_p2, %p79_p1  ;;  %p162_p5 = scmp.ne.s32.totalorder %s1632_s19, %s1628_s18 }
   0xd   : > { %s2097_s27 = smov (%p33_p3, %s2095_s27), 0  ;;  %s72_s6 = sadd.s32 1, %s1640_s20 }
   0xe   : > { %p163_p6 = scmp.eq.s32.totalorder %s1329_s28, 17  ;;  %s68_s7 = ssub.s32 %s1656_s24, %s2097_s27 }
   0xf   : > { %s152_s8 = sadd.s32 1, %s1632_s19  ;;  %s69_s9 = sor.u32 %s68_s7, %s67_s29 }
  0x10   : > { %p150_p7 = scmp.eq.s32.totalorder %s68_s7, 0  ;;  %p70_p8 = scmp.eq.s32.totalorder %s69_s9, 0 }
  0x11   : > { %p1763_p9 = por %p163_p6, %p162_p5  ;;  %p1332_p10 = scmp.ge.s32.totalorder %s1660_s25, 18 }
  0x12   : > { %s1768_s11 = scalar_select %p150_p7, %s1632_s19, %s152_s8  }
  0x13   : > { %s1771_s12 = scalar_select %p70_p8, %s1640_s20, %s72_s6  }
  0x14   : > { %185 = sbr.rel (%p1332_p10) target bundleno = 67 (0x43), region = 16 }
  0x19   : > { %200 = sbr.rel (!%p1751_p4) target bundleno = 67 (0x43), region = 24  ;;  %s202_s13 = sand.u32 (%p1751_p4), 1, %s1640_s20  }
  0x1a   : > { %s1335_s14 = sshll.u32 (%p1751_p4), %s1656_s24, 1  ;;  %s1333_s15 = sshll.u32 (%p1751_p4), %s202_s13, 9 }
  0x1b   : > { %s1418_s16 = sshll.u32 (%p1751_p4), %s1652_s23, 8  ;;  %s2083_s2 = sld [smem:[#allocation5_spill]] (%p1751_p4) }
  0x1c   : > { %s208_s17 = sadd.s32 (%p1751_p4), %s1418_s16, %s1335_s14  ;;  %s1787_s30 = scalar_lea.vmem (%p1751_p4), [#allocation3], %s1333_s15 }
  0x1d   : > { %s1337_s28 = sshll.u32 (%p1751_p4), %s208_s17, 2 }
  0x21   : > { %s1782_s6 = scalar_lea.vmem %s2083_s2, %s1337_s28 }
  0x22   : > { %v365_v0 = vld [vmem:[%s1782_s6] sm:$0xff]  ;;  %v367_v1 = vld [vmem:[%s1782_s6 + $0x10] sm:$0xff] }
  0x23   : > { %v369_v2 = vld [vmem:[%s1782_s6 + $0x20] sm:$0xff]  ;;  %366 = vst [vmem:[%s1787_s30] sm:$0xff] %v365_v0  ;;  %368 = vst [vmem:[%s1787_s30 + $0x8] sm:$0xff] %v367_v1  ;;  %v371_v3 = vld [vmem:[%s1782_s6 + $0x30] sm:$0xff] }
  0x24   : > { %370 = vst [vmem:[%s1787_s30 + $0x10] sm:$0xff] %v369_v2  ;;  %v373_v4 = vld [vmem:[%s1782_s6 + $0x40] sm:$0xff]  ;;  %v375_v5 = vld [vmem:[%s1782_s6 + $0x50] sm:$0xff]  ;;  %372 = vst [vmem:[%s1787_s30 + $0x18] sm:$0xff] %v371_v3 }
  0x25   : > { %374 = vst [vmem:[%s1787_s30 + $0x20] sm:$0xff] %v373_v4  ;;  %376 = vst [vmem:[%s1787_s30 + $0x28] sm:$0xff] %v375_v5  ;;  %v377_v6 = vld [vmem:[%s1782_s6 + $0x60] sm:$0xff]  ;;  %v379_v7 = vld [vmem:[%s1782_s6 + $0x70] sm:$0xff] }
  0x26   : > { %v381_v8 = vld [vmem:[%s1782_s6 + $0x80] sm:$0xff]  ;;  %378 = vst [vmem:[%s1787_s30 + $0x30] sm:$0xff] %v377_v6  ;;  %380 = vst [vmem:[%s1787_s30 + $0x38] sm:$0xff] %v379_v7  ;;  %v383_v9 = vld [vmem:[%s1782_s6 + $0x90] sm:$0xff] }
  0x27   : > { %382 = vst [vmem:[%s1787_s30 + $0x40] sm:$0xff] %v381_v8  ;;  %v385_v10 = vld [vmem:[%s1782_s6 + $0xa0] sm:$0xff]  ;;  %v387_v11 = vld [vmem:[%s1782_s6 + $0xb0] sm:$0xff]  ;;  %384 = vst [vmem:[%s1787_s30 + $0x48] sm:$0xff] %v383_v9 }
  0x28   : > { %386 = vst [vmem:[%s1787_s30 + $0x50] sm:$0xff] %v385_v10  ;;  %388 = vst [vmem:[%s1787_s30 + $0x58] sm:$0xff] %v387_v11  ;;  %v389_v12 = vld [vmem:[%s1782_s6 + $0xc0] sm:$0xff]  ;;  %v391_v13 = vld [vmem:[%s1782_s6 + $0xd0] sm:$0xff] }
  0x29   : > { %v393_v14 = vld [vmem:[%s1782_s6 + $0xe0] sm:$0xff]  ;;  %390 = vst [vmem:[%s1787_s30 + $0x60] sm:$0xff] %v389_v12  ;;  %392 = vst [vmem:[%s1787_s30 + $0x68] sm:$0xff] %v391_v13  ;;  %v395_v15 = vld [vmem:[%s1782_s6 + $0xf0] sm:$0xff] }
  0x2a   : > { %394 = vst [vmem:[%s1787_s30 + $0x70] sm:$0xff] %v393_v14  ;;  %v397_v16 = vld [vmem:[%s1782_s6 + $0x100] sm:$0xff]  ;;  %v399_v17 = vld [vmem:[%s1782_s6 + $0x110] sm:$0xff]  ;;  %396 = vst [vmem:[%s1787_s30 + $0x78] sm:$0xff] %v395_v15 }
  0x2b   : > { %398 = vst [vmem:[%s1787_s30 + $0x80] sm:$0xff] %v397_v16  ;;  %400 = vst [vmem:[%s1787_s30 + $0x88] sm:$0xff] %v399_v17  ;;  %v401_v18 = vld [vmem:[%s1782_s6 + $0x120] sm:$0xff]  ;;  %v403_v19 = vld [vmem:[%s1782_s6 + $0x130] sm:$0xff] }
  0x2c   : > { %v405_v20 = vld [vmem:[%s1782_s6 + $0x140] sm:$0xff]  ;;  %402 = vst [vmem:[%s1787_s30 + $0x90] sm:$0xff] %v401_v18  ;;  %404 = vst [vmem:[%s1787_s30 + $0x98] sm:$0xff] %v403_v19  ;;  %v407_v21 = vld [vmem:[%s1782_s6 + $0x150] sm:$0xff] }
  0x2d   : > { %406 = vst [vmem:[%s1787_s30 + $0xa0] sm:$0xff] %v405_v20  ;;  %v409_v22 = vld [vmem:[%s1782_s6 + $0x160] sm:$0xff]  ;;  %v411_v23 = vld [vmem:[%s1782_s6 + $0x170] sm:$0xff]  ;;  %408 = vst [vmem:[%s1787_s30 + $0xa8] sm:$0xff] %v407_v21 }
  0x2e   : > { %410 = vst [vmem:[%s1787_s30 + $0xb0] sm:$0xff] %v409_v22  ;;  %412 = vst [vmem:[%s1787_s30 + $0xb8] sm:$0xff] %v411_v23  ;;  %v413_v24 = vld [vmem:[%s1782_s6 + $0x180] sm:$0xff]  ;;  %v415_v25 = vld [vmem:[%s1782_s6 + $0x190] sm:$0xff] }
  0x2f   : > { %v417_v26 = vld [vmem:[%s1782_s6 + $0x1a0] sm:$0xff]  ;;  %414 = vst [vmem:[%s1787_s30 + $0xc0] sm:$0xff] %v413_v24  ;;  %416 = vst [vmem:[%s1787_s30 + $0xc8] sm:$0xff] %v415_v25  ;;  %v419_v27 = vld [vmem:[%s1782_s6 + $0x1b0] sm:$0xff] }
  0x30   : > { %418 = vst [vmem:[%s1787_s30 + $0xd0] sm:$0xff] %v417_v26  ;;  %v421_v28 = vld [vmem:[%s1782_s6 + $0x1c0] sm:$0xff]  ;;  %v423_v29 = vld [vmem:[%s1782_s6 + $0x1d0] sm:$0xff]  ;;  %420 = vst [vmem:[%s1787_s30 + $0xd8] sm:$0xff] %v419_v27 }
  0x31   : > { %422 = vst [vmem:[%s1787_s30 + $0xe0] sm:$0xff] %v421_v28  ;;  %424 = vst [vmem:[%s1787_s30 + $0xe8] sm:$0xff] %v423_v29  ;;  %v425_v30 = vld [vmem:[%s1782_s6 + $0x1e0] sm:$0xff]  ;;  %v427_v31 = vld [vmem:[%s1782_s6 + $0x1f0] sm:$0xff] }
  0x32   : > { %v429_v32 = vld [vmem:[%s1782_s6 + $0x200] sm:$0xff]  ;;  %426 = vst [vmem:[%s1787_s30 + $0xf0] sm:$0xff] %v425_v30  ;;  %428 = vst [vmem:[%s1787_s30 + $0xf8] sm:$0xff] %v427_v31  ;;  %v431_v33 = vld [vmem:[%s1782_s6 + $0x210] sm:$0xff] }
  0x33   : > { %430 = vst [vmem:[%s1787_s30 + $0x100] sm:$0xff] %v429_v32  ;;  %v433_v34 = vld [vmem:[%s1782_s6 + $0x220] sm:$0xff]  ;;  %v435_v35 = vld [vmem:[%s1782_s6 + $0x230] sm:$0xff]  ;;  %432 = vst [vmem:[%s1787_s30 + $0x108] sm:$0xff] %v431_v33 }
  0x34   : > { %434 = vst [vmem:[%s1787_s30 + $0x110] sm:$0xff] %v433_v34  ;;  %436 = vst [vmem:[%s1787_s30 + $0x118] sm:$0xff] %v435_v35  ;;  %v437_v36 = vld [vmem:[%s1782_s6 + $0x240] sm:$0xff]  ;;  %v439_v37 = vld [vmem:[%s1782_s6 + $0x250] sm:$0xff] }
  0x35   : > { %v441_v38 = vld [vmem:[%s1782_s6 + $0x260] sm:$0xff]  ;;  %438 = vst [vmem:[%s1787_s30 + $0x120] sm:$0xff] %v437_v36  ;;  %440 = vst [vmem:[%s1787_s30 + $0x128] sm:$0xff] %v439_v37  ;;  %v443_v39 = vld [vmem:[%s1782_s6 + $0x270] sm:$0xff] }
  0x36   : > { %442 = vst [vmem:[%s1787_s30 + $0x130] sm:$0xff] %v441_v38  ;;  %v445_v40 = vld [vmem:[%s1782_s6 + $0x280] sm:$0xff]  ;;  %v447_v41 = vld [vmem:[%s1782_s6 + $0x290] sm:$0xff]  ;;  %444 = vst [vmem:[%s1787_s30 + $0x138] sm:$0xff] %v443_v39 }
  0x37   : > { %446 = vst [vmem:[%s1787_s30 + $0x140] sm:$0xff] %v445_v40  ;;  %448 = vst [vmem:[%s1787_s30 + $0x148] sm:$0xff] %v447_v41  ;;  %v449_v42 = vld [vmem:[%s1782_s6 + $0x2a0] sm:$0xff]  ;;  %v451_v43 = vld [vmem:[%s1782_s6 + $0x2b0] sm:$0xff] }
  0x38   : > { %v453_v44 = vld [vmem:[%s1782_s6 + $0x2c0] sm:$0xff]  ;;  %450 = vst [vmem:[%s1787_s30 + $0x150] sm:$0xff] %v449_v42  ;;  %452 = vst [vmem:[%s1787_s30 + $0x158] sm:$0xff] %v451_v43  ;;  %v455_v45 = vld [vmem:[%s1782_s6 + $0x2d0] sm:$0xff] }
  0x39   : > { %454 = vst [vmem:[%s1787_s30 + $0x160] sm:$0xff] %v453_v44  ;;  %v457_v46 = vld [vmem:[%s1782_s6 + $0x2e0] sm:$0xff]  ;;  %v459_v47 = vld [vmem:[%s1782_s6 + $0x2f0] sm:$0xff]  ;;  %456 = vst [vmem:[%s1787_s30 + $0x168] sm:$0xff] %v455_v45 }
  0x3a   : > { %458 = vst [vmem:[%s1787_s30 + $0x170] sm:$0xff] %v457_v46  ;;  %460 = vst [vmem:[%s1787_s30 + $0x178] sm:$0xff] %v459_v47  ;;  %v461_v48 = vld [vmem:[%s1782_s6 + $0x300] sm:$0xff]  ;;  %v463_v49 = vld [vmem:[%s1782_s6 + $0x310] sm:$0xff] }
  0x3b   : > { %v465_v50 = vld [vmem:[%s1782_s6 + $0x320] sm:$0xff]  ;;  %462 = vst [vmem:[%s1787_s30 + $0x180] sm:$0xff] %v461_v48  ;;  %464 = vst [vmem:[%s1787_s30 + $0x188] sm:$0xff] %v463_v49  ;;  %v467_v51 = vld [vmem:[%s1782_s6 + $0x330] sm:$0xff] }
  0x3c   : > { %466 = vst [vmem:[%s1787_s30 + $0x190] sm:$0xff] %v465_v50  ;;  %v469_v52 = vld [vmem:[%s1782_s6 + $0x340] sm:$0xff]  ;;  %v471_v53 = vld [vmem:[%s1782_s6 + $0x350] sm:$0xff]  ;;  %468 = vst [vmem:[%s1787_s30 + $0x198] sm:$0xff] %v467_v51 }
  0x3d   : > { %470 = vst [vmem:[%s1787_s30 + $0x1a0] sm:$0xff] %v469_v52  ;;  %472 = vst [vmem:[%s1787_s30 + $0x1a8] sm:$0xff] %v471_v53  ;;  %v473_v54 = vld [vmem:[%s1782_s6 + $0x360] sm:$0xff]  ;;  %v475_v55 = vld [vmem:[%s1782_s6 + $0x370] sm:$0xff] }
  0x3e   : > { %v477_v56 = vld [vmem:[%s1782_s6 + $0x380] sm:$0xff]  ;;  %474 = vst [vmem:[%s1787_s30 + $0x1b0] sm:$0xff] %v473_v54  ;;  %476 = vst [vmem:[%s1787_s30 + $0x1b8] sm:$0xff] %v475_v55  ;;  %v479_v57 = vld [vmem:[%s1782_s6 + $0x390] sm:$0xff] }
  0x3f   : > { %478 = vst [vmem:[%s1787_s30 + $0x1c0] sm:$0xff] %v477_v56  ;;  %v481_v58 = vld [vmem:[%s1782_s6 + $0x3a0] sm:$0xff]  ;;  %v483_v59 = vld [vmem:[%s1782_s6 + $0x3b0] sm:$0xff]  ;;  %480 = vst [vmem:[%s1787_s30 + $0x1c8] sm:$0xff] %v479_v57 }
  0x40   : > { %482 = vst [vmem:[%s1787_s30 + $0x1d0] sm:$0xff] %v481_v58  ;;  %484 = vst [vmem:[%s1787_s30 + $0x1d8] sm:$0xff] %v483_v59  ;;  %v485_v60 = vld [vmem:[%s1782_s6 + $0x3c0] sm:$0xff]  ;;  %v487_v61 = vld [vmem:[%s1782_s6 + $0x3d0] sm:$0xff] }
  0x41   : > { %v489_v62 = vld [vmem:[%s1782_s6 + $0x3e0] sm:$0xff]  ;;  %486 = vst [vmem:[%s1787_s30 + $0x1e0] sm:$0xff] %v485_v60  ;;  %488 = vst [vmem:[%s1787_s30 + $0x1e8] sm:$0xff] %v487_v61  ;;  %v491_v63 = vld [vmem:[%s1782_s6 + $0x3f0] sm:$0xff] }
  0x42   : > { %490 = vst [vmem:[%s1787_s30 + $0x1f0] sm:$0xff] %v489_v62  ;;  %492 = vst [vmem:[%s1787_s30 + $0x1f8] sm:$0xff] %v491_v63 }
  0x43 PF: > { %p1338_p11 = scmp.ge.s32.totalorder %s1660_s25, 1  ;;  %p513_p12 = scmp.lt.s32.totalorder %s1660_s25, 19 }
  0x45   : > { %p514_p13 = pnand %p1338_p11, %p513_p12 }
  0x46   : > { %s520_s8 = sand.u32 (!%p514_p13), 1, %s1636_s0   ;;  %s557_s9 = sand.u32 (!%p514_p13), 1, %s1628_s18  }
  0x47   : > { %517 = sbr.rel (%p514_p13) target bundleno = 386 (0x182), region = 70  ;;  %s1339_s13 = sshll.u32 (!%p514_p13), %s520_s8, 9 }
  0x48   : > { %s1918_s14 = sshll.u32 (!%p514_p13), %s557_s9, 1  ;;  %s1341_s15 = sshll.u32 (!%p514_p13), %s1644_s21, 2 }
  0x49   : > { %s1922_s16 = sshll.u32 (!%p514_p13), %s1648_s22, 1  ;;  %p563_p0 = scmp.lt.s32.totalorder (!%p514_p13), %s1341_s15, 35 }
  0x4a   : > { %p572_p1 = scmp.lt.s32.totalorder (!%p514_p13), %s1922_s16, 3  ;;  %s1942_s9 = scalar_lea.vmem (!%p514_p13), [#allocation3], %s1339_s13 }
  0x4b   : > { %s559_s2 = scalar_lea.vmem (!%p514_p13), [#allocation4], %s1918_s14  ;;  %p1344_p2 = scmp.ne.s32.totalorder (!%p514_p13), %s1644_s21, 0 }
  0x4c   : > { %s2099_s15 = smov (!%p563_p0, %s1341_s15), 35 }
  0x4d   : > { %s1928_s17 = scalar_select %p572_p1, %s1922_s16, 3 }
  0x4e   : > { %s567_s18 = scalar_lea.vmem %s2075_s1, %s2099_s15  ;;  %585 = sbr.rel (%p1344_p2) target bundleno = 85 (0x55), region = 78 }
  0x4f   : > { %s574_s22 = scalar_lea.vmem %s2077_s3, %s1928_s17  ;;  %s579_s8 = scalar_lea.vmem %s2078_s4, %s1928_s17 }
  0x53   : > { %v1662_v0 = vmov 0.0  }
  0x54   : > { %586 = vst [vmem:[#allocation2] sm:$0xf] %v1662_v0 }
  0x55 PF: > { %v1494_v1 = vld [vmem:[%s1942_s9 + $0x74] ss:$8 sps:$4 sm:$0xff]   ;;  %v1498_v3 = vld [vmem:[%s1942_s9 + $0x70] ss:$8 sps:$4 sm:$0xff]   ;;  %v1500_v5 = vld [vmem:[%s1942_s9 + $0x64] ss:$8 sps:$4 sm:$0xff]   ;;  %v665_v41 = vlaneseq }
  0x56   : > { %v1496_v2 = vld [vmem:[%s1942_s9 + $0x174] ss:$8 sps:$4 sm:$0xff]   ;;  %1002 = vmatprep.subr.bf16.mxu0 %v1494_v1  ;;  %v1499_v4 = vld [vmem:[%s1942_s9 + $0x170] ss:$8 sps:$4 sm:$0xff]   ;;  %v1502_v6 = vld [vmem:[%s1942_s9 + $0x164] ss:$8 sps:$4 sm:$0xff]  }
  0x57   : > { %1043 = vmatprep.subr.bf16.mxu1 %v1496_v2  ;;  %1003 = vmatpush1.bf16.msra.mxu0 %v1498_v3  ;;  %v1504_v7 = vld [vmem:[%s1942_s9 + $0x60] ss:$8 sps:$4 sm:$0xff]   ;;  %v1506_v9 = vld [vmem:[%s1942_s9 + $0x54] ss:$8 sps:$4 sm:$0xff]   ;;  %v1510_v11 = vld [vmem:[%s1942_s9 + $0x50] ss:$8 sps:$4 sm:$0xff]  }
  0x58   : > { %1044 = vmatpush1.bf16.msra.mxu1 %v1499_v4  ;;  %1004 = vmatprep.subr.bf16.mxu0 %v1500_v5  ;;  %v1505_v8 = vld [vmem:[%s1942_s9 + $0x160] ss:$8 sps:$4 sm:$0xff]   ;;  %v1508_v10 = vld [vmem:[%s1942_s9 + $0x154] ss:$8 sps:$4 sm:$0xff]   ;;  %v1511_v12 = vld [vmem:[%s1942_s9 + $0x150] ss:$8 sps:$4 sm:$0xff]  }
  0x59   : > { %1045 = vmatprep.subr.bf16.mxu1 %v1502_v6  ;;  %v1512_v13 = vld [vmem:[%s1942_s9 + $0x44] ss:$8 sps:$4 sm:$0xff]   ;;  %v1516_v15 = vld [vmem:[%s1942_s9 + $0x40] ss:$8 sps:$4 sm:$0xff]   ;;  %v1518_v17 = vld [vmem:[%s1942_s9 + $0x34] ss:$8 sps:$4 sm:$0xff]  }
  0x5a   : > { %v1514_v14 = vld [vmem:[%s1942_s9 + $0x144] ss:$8 sps:$4 sm:$0xff]   ;;  %v1517_v16 = vld [vmem:[%s1942_s9 + $0x140] ss:$8 sps:$4 sm:$0xff]   ;;  %v1520_v18 = vld [vmem:[%s1942_s9 + $0x134] ss:$8 sps:$4 sm:$0xff]  }
  0x5b   : > { %1005 = vmatpush1.bf16.msra.mxu0 %v1504_v7  ;;  %v1522_v19 = vld [vmem:[%s1942_s9 + $0x30] ss:$8 sps:$4 sm:$0xff]   ;;  %v1524_v21 = vld [vmem:[%s1942_s9 + $0x24] ss:$8 sps:$4 sm:$0xff]   ;;  %v1528_v23 = vld [vmem:[%s1942_s9 + $0x20] ss:$8 sps:$4 sm:$0xff]  }
  0x5c   : > { %1046 = vmatpush1.bf16.msra.mxu1 %v1505_v8  ;;  %1006 = vmatprep.subr.bf16.mxu0 %v1506_v9  ;;  %v1523_v20 = vld [vmem:[%s1942_s9 + $0x130] ss:$8 sps:$4 sm:$0xff]   ;;  %v1526_v22 = vld [vmem:[%s1942_s9 + $0x124] ss:$8 sps:$4 sm:$0xff]   ;;  %v1529_v24 = vld [vmem:[%s1942_s9 + $0x120] ss:$8 sps:$4 sm:$0xff]  }
  0x5d   : > { %1047 = vmatprep.subr.bf16.mxu1 %v1508_v10  ;;  %v1530_v25 = vld [vmem:[%s1942_s9 + $0x14] ss:$8 sps:$4 sm:$0xff]   ;;  %v1534_v27 = vld [vmem:[%s1942_s9 + $0x10] ss:$8 sps:$4 sm:$0xff]   ;;  %v1536_v29 = vld [vmem:[%s1942_s9 + $0x4] ss:$8 sps:$4 sm:$0xff]  }
  0x5e   : > { %v1532_v26 = vld [vmem:[%s1942_s9 + $0x114] ss:$8 sps:$4 sm:$0xff]   ;;  %v1535_v28 = vld [vmem:[%s1942_s9 + $0x110] ss:$8 sps:$4 sm:$0xff]   ;;  %v1538_v30 = vld [vmem:[%s1942_s9 + $0x104] ss:$8 sps:$4 sm:$0xff]  }
  0x5f   : > { %1007 = vmatpush1.bf16.msra.mxu0 %v1510_v11  ;;  %v1540_v31 = vld [vmem:[%s1942_s9] ss:$8 sps:$4 sm:$0xff]   ;;  %v1542_v33 = vld [vmem:[%s1942_s9 + $0xf4] ss:$8 sps:$4 sm:$0xff]   ;;  %v1546_v35 = vld [vmem:[%s1942_s9 + $0xf0] ss:$8 sps:$4 sm:$0xff]  }
  0x60   : > { %1048 = vmatpush1.bf16.msra.mxu1 %v1511_v12  ;;  %1008 = vmatprep.subr.bf16.mxu0 %v1512_v13  ;;  %v1541_v32 = vld [vmem:[%s1942_s9 + $0x100] ss:$8 sps:$4 sm:$0xff]   ;;  %v1544_v34 = vld [vmem:[%s1942_s9 + $0x1f4] ss:$8 sps:$4 sm:$0xff]   ;;  %v1547_v36 = vld [vmem:[%s1942_s9 + $0x1f0] ss:$8 sps:$4 sm:$0xff]  }
  0x61   : > { %1049 = vmatprep.subr.bf16.mxu1 %v1514_v14  ;;  %v1548_v37 = vld [vmem:[%s1942_s9 + $0xe4] ss:$8 sps:$4 sm:$0xff]   ;;  %v1663_v39 = vmov 1966171168   ;;  %v1552_v42 = vld [vmem:[%s1942_s9 + $0xe0] ss:$8 sps:$4 sm:$0xff]  }
  0x62   : > { %v1550_v38 = vld [vmem:[%s1942_s9 + $0x1e4] ss:$8 sps:$4 sm:$0xff]   ;;  %v663_v40 = vunpack.c.l.s4 %v1663_v39  ;;  %v1553_v43 = vld [vmem:[%s1942_s9 + $0x1e0] ss:$8 sps:$4 sm:$0xff]   ;;  %v1554_v44 = vld [vmem:[%s1942_s9 + $0xd4] ss:$8 sps:$4 sm:$0xff]  }
  0x63   : > { %1009 = vmatpush1.bf16.msra.mxu0 %v1516_v15  ;;  %v1556_v45 = vld [vmem:[%s1942_s9 + $0x1d4] ss:$8 sps:$4 sm:$0xff]   ;;  %v1988_v47 = vshrl.u32 %v665_v41, 7  ;;  %v1558_v48 = vld [vmem:[%s1942_s9 + $0xd0] ss:$8 sps:$4 sm:$0xff]   ;;  %p1410_p3 = scmp.ne.s32.totalorder %s1644_s21, 8 }
  0x64   : > { %1050 = vmatpush1.bf16.msra.mxu1 %v1517_v16  ;;  %1010 = vmatprep.subr.bf16.mxu0 %v1518_v17  ;;  %v664_v46 = vunpack.c.0.s8 %v663_v40  ;;  %v1559_v49 = vld [vmem:[%s1942_s9 + $0x1d0] ss:$8 sps:$4 sm:$0xff]   ;;  %v1560_v50 = vld [vmem:[%s1942_s9 + $0xc4] ss:$8 sps:$4 sm:$0xff]   ;;  %v1564_v54 = vld [vmem:[%s1942_s9 + $0xc0] ss:$8 sps:$4 sm:$0xff]  }
  0x65   : > { %1051 = vmatprep.subr.bf16.mxu1 %v1520_v18  ;;  %v1562_v51 = vld [vmem:[%s1942_s9 + $0x1c4] ss:$8 sps:$4 sm:$0xff]   ;;  %v1345_v53 = vld.sshfl [vmem:[%s567_s18] sm:$0x33 pattern:$0x75316420] }
  0x66   : > { %v1995_v52 = vsub.s32 %v664_v46, %v1988_v47  ;;  %v1565_v55 = vld [vmem:[%s1942_s9 + $0x1c0] ss:$8 sps:$4 sm:$0xff]   ;;  %v661_v56 = vcombine.high %v1345_v53, %v1345_v53  ;;  %v1566_v57 = vld [vmem:[%s1942_s9 + $0xb4] ss:$8 sps:$4 sm:$0xff]   ;;  %v1570_v60 = vld [vmem:[%s1942_s9 + $0xb0] ss:$8 sps:$4 sm:$0xff]  }
  0x67   : > { %1011 = vmatpush1.bf16.msra.mxu0 %v1522_v19  ;;  %v1568_v58 = vld [vmem:[%s1942_s9 + $0x1b4] ss:$8 sps:$4 sm:$0xff]   ;;  %v1571_v61 = vld [vmem:[%s1942_s9 + $0x1b0] ss:$8 sps:$4 sm:$0xff]   ;;  %v1572_v63 = vld [vmem:[%s1942_s9 + $0xa4] ss:$8 sps:$4 sm:$0xff]  }
  0x68   : > { %1052 = vmatpush1.bf16.msra.mxu1 %v1523_v20  ;;  %1012 = vmatprep.subr.bf16.mxu0 %v1524_v21  ;;  %v675_v59 = vrot.slane %v661_v56, %v1995_v52  ;;  %v1574_v0 = vld [vmem:[%s1942_s9 + $0x1a4] ss:$8 sps:$4 sm:$0xff]   ;;  %v1576_v1 = vld [vmem:[%s1942_s9 + $0xa0] ss:$8 sps:$4 sm:$0xff]   ;;  %v1578_v3 = vld [vmem:[%s1942_s9 + $0x94] ss:$8 sps:$4 sm:$0xff]   ;;  %v668_v9 = vrot.slane %v1345_v53, %v1995_v52 }
  0x69   : > { %1053 = vmatprep.subr.bf16.mxu1 %v1526_v22  ;;  %v1577_v2 = vld [vmem:[%s1942_s9 + $0x1a0] ss:$8 sps:$4 sm:$0xff]   ;;  %v1580_v4 = vld [vmem:[%s1942_s9 + $0x194] ss:$8 sps:$4 sm:$0xff]   ;;  %v1582_v5 = vld [vmem:[%s1942_s9 + $0x90] ss:$8 sps:$4 sm:$0xff]  }
  0x6a   : > { %v677_v62 = vcombine.high %v675_v59, %v675_v59  ;;  %1034 = vmatprep.mubr.bf16.mxu0 %v675_v59  ;;  %v1583_v6 = vld [vmem:[%s1942_s9 + $0x190] ss:$8 sps:$4 sm:$0xff]   ;;  %v1584_v7 = vld [vmem:[%s1942_s9 + $0x84] ss:$8 sps:$4 sm:$0xff]   ;;  %v1588_v10 = vld [vmem:[%s1942_s9 + $0x80] ss:$8 sps:$4 sm:$0xff]   ;;  %v676_v12 = vcombine.high %v668_v9, %v668_v9 }
  0x6b   : > { %1013 = vmatpush1.bf16.msra.mxu0 %v1528_v23  ;;  %v1586_v8 = vld [vmem:[%s1942_s9 + $0x184] ss:$8 sps:$4 sm:$0xff]   ;;  %v1589_v11 = vld [vmem:[%s1942_s9 + $0x180] ss:$8 sps:$4 sm:$0xff]   ;;  %v1664_v13 = vmov 1983009808  }
  0x6c   : > { %1054 = vmatpush1.bf16.msra.mxu1 %v1529_v24  ;;  %1014 = vmatprep.subr.bf16.mxu0 %v1530_v25  ;;  %v1088_v14 = vunpack.c.l.s4 %v1664_v13 }
  0x6d   : > { %1055 = vmatprep.subr.bf16.mxu1 %v1532_v26  ;;  %1075 = vmatprep.mubr.bf16.mxu1 %v677_v62  ;;  %v587_v26 = vld [vmem:[#allocation2] sm:$0xf] }
  0x6e   : > { %v1089_v15 = vunpack.c.0.s8 %v1088_v14 }
  0x6f   : > { %1015 = vmatpush1.bf16.msra.mxu0 %v1534_v27 }
  0x70   : > { %1056 = vmatpush1.bf16.msra.mxu1 %v1535_v28  ;;  %1016 = vmatprep.subr.bf16.mxu0 %v1536_v29  ;;  %v1092_v22 = vsub.s32 %v1089_v15, %v1988_v47 }
  0x71   : > { %1057 = vmatprep.subr.bf16.mxu1 %v1538_v30 }
  0x73   : > { %1017 = vmatpush1.bf16.msra.mxu0 %v1540_v31 }
  0x74   : > { %1058 = vmatpush1.bf16.msra.mxu1 %v1541_v32  ;;  %1018 = vmatprep.subr.bf16.mxu0 %v1542_v33 }
  0x75   : > { %1059 = vmatprep.subr.bf16.mxu1 %v1544_v34 }
  0x77   : > { %1019 = vmatpush2.bf16.msra.mxu0 %v1546_v35 }
  0x78   : > { %1060 = vmatpush2.bf16.msra.mxu1 %v1547_v36  ;;  %1020 = vmatprep.subr.bf16.mxu0 %v1548_v37 }
  0x79   : > { %1061 = vmatprep.subr.bf16.mxu1 %v1550_v38 }
  0x7b   : > { %1021 = vmatpush2.bf16.msra.mxu0 %v1552_v42 }
  0x7c   : > { %1062 = vmatpush2.bf16.msra.mxu1 %v1553_v43  ;;  %1022 = vmatprep.subr.bf16.mxu0 %v1554_v44 }
  0x7d   : > { %1063 = vmatprep.subr.bf16.mxu1 %v1556_v45 }
  0x7f   : > { %1023 = vmatpush2.bf16.msra.mxu0 %v1558_v48 }
  0x80   : > { %1064 = vmatpush2.bf16.msra.mxu1 %v1559_v49  ;;  %1024 = vmatprep.subr.bf16.mxu0 %v1560_v50 }
  0x81   : > { %1065 = vmatprep.subr.bf16.mxu1 %v1562_v51 }
  0x83   : > { %1025 = vmatpush2.bf16.msra.mxu0 %v1564_v54 }
  0x84   : > { %1066 = vmatpush2.bf16.msra.mxu1 %v1565_v55  ;;  %1026 = vmatprep.subr.bf16.mxu0 %v1566_v57 }
  0x85   : > { %1067 = vmatprep.subr.bf16.mxu1 %v1568_v58 }
  0x87   : > { %1027 = vmatpush2.bf16.msra.mxu0 %v1570_v60 }
  0x88   : > { %1068 = vmatpush2.bf16.msra.mxu1 %v1571_v61  ;;  %1028 = vmatprep.subr.bf16.mxu0 %v1572_v63 }
  0x89   : > { %1069 = vmatprep.subr.bf16.mxu1 %v1574_v0 }
  0x8b   : > { %1029 = vmatpush2.bf16.msra.mxu0 %v1576_v1 }
  0x8c   : > { %1070 = vmatpush2.bf16.msra.mxu1 %v1577_v2  ;;  %1030 = vmatprep.subr.bf16.mxu0 %v1578_v3 }
  0x8d   : > { %1071 = vmatprep.subr.bf16.mxu1 %v1580_v4 }
  0x8f   : > { %1031 = vmatpush2.bf16.msra.mxu0 %v1582_v5 }
  0x90   : > { %1072 = vmatpush2.bf16.msra.mxu1 %v1583_v6  ;;  %1032 = vmatprep.subr.bf16.mxu0 %v1584_v7 }
  0x91   : > { %1073 = vmatprep.subr.bf16.mxu1 %v1586_v8 }
  0x93   : > { %1033 = vmatpush2.bf16.msra.mxu0 %v1588_v10 }
  0x94   : > { %1074 = vmatpush2.bf16.msra.mxu1 %v1589_v11 }
  0x96   : > { %1035 = vmatmul.mubr.bf16.vlgmr.msra.gmra.mxu0 %v668_v9 }
  0x97   : > { %1076 = vmatmul.mubr.bf16.vlgmr.msra.gmra.mxu1 %v676_v12 }
 0x156   : > { %v1036_v16 = vpop.f32.mrf.mxu0 }
 0x157   : > { %v1077_v17 = vpop.f32.mrf.mxu1 }
 0x158   : > { %v1038_v18 = vpop.f32.mrf.mxu0  ;;  %v1078_v20 = vadd.f32 %v1077_v17, %v1036_v16 }
 0x159   : > { %v1079_v19 = vpop.f32.mrf.mxu1 }
 0x15a   : > { %v1080_v21 = vadd.f32 %v1079_v19, %v1038_v18  ;;  %v1040_v23 = vpop.f32.mrf.mxu0 }
 0x15b   : > { %v1081_v24 = vpop.f32.mrf.mxu1 }
 0x15c   : > { %v1086_v25 = vcombine.low %v1078_v20, %v1080_v21  ;;  %v1041_v27 = vpop.f32.mrf.mxu0 }
 0x15d   : > { %v1082_v28 = vpop.f32.mrf.mxu1 }
 0x15e   : > { %v1093_v29 = vrot.slane %v1086_v25, %v1092_v22  ;;  %1100 = sbr.rel (%p1410_p3) target bundleno = 378 (0x17a), region = 82 }
 0x160   : > { %v1095_v30 = vadd.f32 %v1093_v29, %v587_v26 }
 0x162   : > { %1096 = vst [vmem:[#allocation2] sm:$0xf] %v1095_v30 }
 0x163   : > { %v1102_v31 = vld [vmem:[%s574_s22] sm:$0x3]  ;;  %v1106_v32 = vsub.s32 0, %v1988_v47  ;;  %v1110_v33 = vsub.s32 1, %v1988_v47 }
 0x164   : > { %v1122_v34 = vld [vmem:[%s579_s8] sm:$0x3] }
 0x165   : > { %v1107_v35 = vrot.slane %v1102_v31, %v1106_v32  ;;  %v1111_v36 = vrot.slane %v1102_v31, %v1110_v33  ;;  %v1127_v37 = vrot.slane %v1122_v34, %v1106_v32  ;;  %v1131_v38 = vrot.slane %v1122_v34, %v1110_v33 }
 0x167   : > { %v1112_v39 = vcombine.low %v1107_v35, %v1111_v36  ;;  %v1132_v40 = vcombine.low %v1127_v37, %v1131_v38 }
 0x169   : > { %v1101_v41 = vld [vmem:[#allocation2] sm:$0xf]  ;;  %v1119_v42 = vrot.slane %v1112_v39, %v1092_v22  ;;  %v1139_v43 = vrot.slane %v1132_v40, %v1092_v22 }
 0x16b   : > { %v1121_v44 = vmul.f32 %v1119_v42, %v1101_v41 }
 0x16d   : > { %v1141_v45 = vadd.f32 %v1139_v43, %v1121_v44 }
 0x16f   : > { %v1142_v46 = vmax.f32 %v1141_v45, 0.0 }
 0x171   : > { %v1150_v48 = vrot.slane %v1142_v46, %v1092_v22 }
 0x173   : > { %v1151_v47 = vcombine.high %v1150_v48, %v1150_v48 }
 0x175   : > { %v1411_v49 = vpack.c.bf16 %v1151_v47, %v1150_v48 }
 0x177   : > { %v1165_v50 = vrot.slane %v1411_v49, %v1995_v52 }
 0x179   : > { %1412 = vst.sshfl [vmem:[%s559_s2] sm:$0x5 pattern:$0x73625140] %v1165_v50 }
 0x17a PF: > { %1181 = sbr.rel (!%p1763_p9) target bundleno = 386 (0x182), region = 86  ;;  %s1264_s7 = scalar_lea.vmem (%p1763_p9), %s2079_s5, %s1922_s16 }
 0x180   : > { %v1202_v51 = vld [vmem:[%s559_s2] sm:$0x3] }
 0x181   : > { %1415 = vst [vmem:[%s1264_s7 + $0x10] sm:$0x3] %v1202_v51 }
 0x182 PF: > { %s16_s25 = sadd.s32 1, %s1660_s25   ;;  %s2084_s18 = smov %s1632_s19 }
 0x183   : > { %p13_p4 = scmp.ge.s32.totalorder %s16_s25, 20   ;;  %s2085_s19 = smov %s1768_s11 }
 0x184   : > { %s2086_s0 = smov %s1640_s20  ;;  %s2087_s20 = smov %s1771_s12 }
 0x185   : > { %s2088_s21 = smov %s1652_s23  ;;  %s2089_s22 = smov %s1656_s24 }
 0x186   : > { %s2090_s23 = smov %s2093_s26  ;;  %s2091_s24 = smov %s2097_s27 }
 0x187   :  { %15 = sbr.rel (!%p13_p4) target bundleno = 7 (0x7), region = 161 }

// kernel: _forward.44
= control target key start
LH: loop header
LB: loop body
LE: loop exit
PB: predicated region body
PF: predicated region fallthrough
CT: control target
= control target key end

     0   :  { %vm21_vm0 = vcmask 1041409   ;;  %vm23_vm1 = vcmask 1043459   ;;  %vm25_vm2 = vcmask 1045509   ;;  %vm27_vm3 = vcmask 1047559   ;;  %s55_s0 = inlined_call_operand.vmem [shape: bf16[2,1,512], index: 0, kind: input, shape index: {}]   ;;  %s56_s1 = inlined_call_operand.vmem [shape: f32[2,512], index: 1, kind: output, shape index: {}]  }
   0x1   :  { %v36_v0 = vld [vmem:[%s55_s0] sm:$0xff]  }
   0x2   :  { %v37_v1 = vunpack.c.l.bf16 %v36_v0  ;;  %v38_v2 = vunpack.c.h.bf16 %v36_v0 }
   0x4   :  { %v20_v3 = vrot.slane %v38_v2, 7 }
   0x6   :  { %v22_v4 = vsel %vm21_vm0, %v20_v3, %v37_v1 }
   0x7   :  { %v24_v5 = vsel %vm23_vm1, %v20_v3, %v22_v4 }
   0x8   :  { %v26_v6 = vsel %vm25_vm2, %v20_v3, %v24_v5 }
   0x9   :  { %v28_v7 = vsel %vm27_vm3, %v20_v3, %v26_v6 }
   0xa   :  { %30 = vst [vmem:[%s56_s1] sm:$0xff] %v28_v7 }

// kernel: _forward.45
= control target key start
LH: loop header
LB: loop body
LE: loop exit
PB: predicated region body
PF: predicated region fallthrough
CT: control target
= control target key end

     0   :  { %s1418_s27 = smov 0   ;;  %s1552_s0 = inlined_call_operand.vmem [shape: f32[2,512], index: 0, kind: input, shape index: {}]   ;;  %s1553_s1 = inlined_call_operand.vmem [shape: bf16[2,512,128], index: 1, kind: input, shape index: {}]   ;;  %s1554_s2 = inlined_call_operand.vmem [shape: f32[2,1,128], index: 2, kind: input, shape index: {}]   ;;  %s1555_s3 = inlined_call_operand.vmem [shape: bf16[2,128,128], index: 3, kind: input, shape index: {}]   ;;  %s1556_s4 = inlined_call_operand.vmem [shape: f32[2,1,128], index: 4, kind: input, shape index: {}]   ;;  %s1557_s5 = inlined_call_operand.vmem [shape: bf16[2,128,128], index: 5, kind: input, shape index: {}]   ;;  %s1558_s6 = inlined_call_operand.vmem [shape: f32[2,1,128], index: 6, kind: input, shape index: {}]   ;;  %s1559_s7 = inlined_call_operand.vmem [shape: f32[2,2,128], index: 7, kind: output, shape index: {0}]   ;;  %s1560_s8 = inlined_call_operand.vmem [shape: f32[2,2,128], index: 8, kind: output, shape index: {1}]  }
   0x1 LB: > { %s1131_s28 = sadd.s32 4294967295, %s1368_s27   ;;  %p1135_p0 = scmp.ge.s32.totalorder %s1368_s27, 1  ;;  %s1368_s27 = sphi %s1418_s27, %s19_s27  }
   0x2   : > { %p309_p1 = scmp.lt.s32.totalorder %s1368_s27, 3 }
   0x4   : > { %p310_p2 = pnand %p1135_p0, %p309_p1 }
   0x5   : > { %p365_p3 = scmp.lt.s32.totalorder (!%p310_p2), %s1131_s28, 1 }
   0x6   : > { %313 = sbr.rel (%p310_p2) target bundleno = 651 (0x28b), region = 48 }
   0xb   : > { %v398_v0 = vld [vmem:[%s1552_s0] sm:$0xff]  ;;  %v404_v1 = vlaneseq  ;;  %v1370_v2 = vmov 1983009808   ;;  %s1562_s28 = smov (!%p365_p3, %s1131_s28), 1  ;;  %v1371_v49 = vmov 0.0   ;;  %vm1372_vm0 = vmmov 0  }
   0xc   : > { %v402_v3 = vunpack.c.l.s4 %v1370_v2  ;;  %v400_v6 = vcombine.high %v398_v0, %v398_v0  ;;  %s1197_s9 = sshll.u32 %s1562_s28, 8  ;;  %s1198_s13 = sshll.u32 %s1562_s28, 6 }
   0xd   : > { %v405_v4 = vshrl.u32 %v404_v1, 7  ;;  %s1435_s12 = scalar_lea.vmem %s1553_s1, %s1197_s9  ;;  %s1481_s16 = scalar_lea.vmem %s1555_s3, %s1198_s13 }
   0xe   : > { %v403_v5 = vunpack.c.0.s8 %v402_v3  ;;  %v1313_v8 = vld [vmem:[%s1435_s12 + $0x78] sm:$0xff]   ;;  %v1317_v16 = vld [vmem:[%s1435_s12 + $0x70] sm:$0xff]   ;;  %v1321_v22 = vld [vmem:[%s1435_s12 + $0x68] sm:$0xff]   ;;  %s1513_s19 = scalar_lea.vmem %s1557_s5, %s1198_s13  ;;  %s372_s22 = scalar_lea.vmem %s1554_s2, %s1562_s28 }
   0xf   : > { %v1314_v9 = vld [vmem:[%s1435_s12 + $0xf8] sm:$0xff]   ;;  %1200 = vmatprep.subr.bf16.mxu0 %v1313_v8  ;;  %v1318_v17 = vld [vmem:[%s1435_s12 + $0xf0] sm:$0xff]   ;;  %v1322_v23 = vld [vmem:[%s1435_s12 + $0xe8] sm:$0xff]   ;;  %s380_s25 = scalar_lea.vmem %s1556_s4, %s1562_s28  ;;  %s1142_s26 = sshll.u32 %s1562_s28, 1 }
  0x10   : > { %v406_v7 = vsub.s32 %v403_v5, %v405_v4  ;;  %v1315_v12 = vld [vmem:[%s1435_s12 + $0x38] sm:$0xff]   ;;  %1222 = vmatprep.subr.bf16.mxu1 %v1314_v9  ;;  %v1319_v20 = vld [vmem:[%s1435_s12 + $0x30] sm:$0xff]   ;;  %v1323_v24 = vld [vmem:[%s1435_s12 + $0x28] sm:$0xff]   ;;  %s392_s9 = scalar_lea.vmem %s1559_s7, %s1142_s26  ;;  %s396_s15 = scalar_lea.vmem %s1560_s8, %s1142_s26 }
  0x11   : > { %v1316_v13 = vld [vmem:[%s1435_s12 + $0xb8] sm:$0xff]   ;;  %1201 = vmatpush3.bf16.msra.mxu0 %v1315_v12  ;;  %v1320_v21 = vld [vmem:[%s1435_s12 + $0xb0] sm:$0xff]   ;;  %v1324_v25 = vld [vmem:[%s1435_s12 + $0xa8] sm:$0xff]  }
  0x12   : > { %v1439_v10 = vrot.slane %v398_v0, %v406_v7  ;;  %v1441_v11 = vrot.slane %v400_v6, %v406_v7  ;;  %1223 = vmatpush3.bf16.msra.mxu1 %v1316_v13  ;;  %1202 = vmatprep.subr.bf16.mxu0 %v1317_v16  ;;  %v1325_v26 = vld [vmem:[%s1435_s12 + $0x60] sm:$0xff]   ;;  %v1329_v30 = vld [vmem:[%s1435_s12 + $0x58] sm:$0xff]   ;;  %v1333_v34 = vld [vmem:[%s1435_s12 + $0x50] sm:$0xff]  }
  0x13   : > { %1224 = vmatprep.subr.bf16.mxu1 %v1318_v17  ;;  %v1326_v27 = vld [vmem:[%s1435_s12 + $0xe0] sm:$0xff]   ;;  %v1330_v31 = vld [vmem:[%s1435_s12 + $0xd8] sm:$0xff]   ;;  %v1334_v35 = vld [vmem:[%s1435_s12 + $0xd0] sm:$0xff]  }
  0x14   : > { %v415_v14 = vcombine.high %v1439_v10, %v1439_v10  ;;  %v416_v15 = vcombine.high %v1441_v11, %v1441_v11  ;;  %v1327_v28 = vld [vmem:[%s1435_s12 + $0x20] sm:$0xff]   ;;  %v1331_v32 = vld [vmem:[%s1435_s12 + $0x18] sm:$0xff]   ;;  %v1335_v36 = vld [vmem:[%s1435_s12 + $0x10] sm:$0xff]   ;;  %v421_v46 = vpack.c.bf16 %v1439_v10, %v1439_v10  ;;  %v423_v47 = vpack.c.bf16 %v1441_v11, %v1441_v11 }
  0x15   : > { %1203 = vmatpush3.bf16.msra.mxu0 %v1319_v20  ;;  %v1328_v29 = vld [vmem:[%s1435_s12 + $0xa0] sm:$0xff]   ;;  %v1332_v33 = vld [vmem:[%s1435_s12 + $0x98] sm:$0xff]   ;;  %v1336_v37 = vld [vmem:[%s1435_s12 + $0x90] sm:$0xff]  }
  0x16   : > { %v422_v18 = vpack.c.bf16 %v415_v14, %v415_v14  ;;  %v424_v19 = vpack.c.bf16 %v416_v15, %v416_v15  ;;  %1225 = vmatpush3.bf16.msra.mxu1 %v1320_v21  ;;  %1204 = vmatprep.subr.bf16.mxu0 %v1321_v22  ;;  %v1337_v38 = vld [vmem:[%s1435_s12 + $0x48] sm:$0xff]   ;;  %v1341_v42 = vld [vmem:[%s1435_s12 + $0x40] sm:$0xff]   ;;  %v1346_v48 = vld [vmem:[%s1481_s16 + $0x38] sm:$0xff]  }
  0x17   : > { %1226 = vmatprep.subr.bf16.mxu1 %v1322_v23  ;;  %v1338_v39 = vld [vmem:[%s1435_s12 + $0xc8] sm:$0xff]   ;;  %v1342_v43 = vld [vmem:[%s1435_s12 + $0xc0] sm:$0xff]   ;;  %v1347_v50 = vld [vmem:[%s1481_s16 + $0x30] sm:$0xff]  }
  0x18   : > { %720 = vmatprep.mubr.bf16.mxu0 %v422_v18  ;;  %760 = vmatprep.mubr.bf16.mxu1 %v424_v19  ;;  %v1339_v40 = vld [vmem:[%s1435_s12 + $0x8] sm:$0xff]   ;;  %v1343_v44 = vld [vmem:[%s1435_s12] sm:$0xff]   ;;  %v1350_v53 = vld [vmem:[%s1481_s16 + $0x18] sm:$0xff]  }
  0x19   : > { %1205 = vmatpush3.bf16.msra.mxu0 %v1323_v24  ;;  %v1340_v41 = vld [vmem:[%s1435_s12 + $0x88] sm:$0xff]   ;;  %v1344_v45 = vld [vmem:[%s1435_s12 + $0x80] sm:$0xff]   ;;  %v1351_v54 = vld [vmem:[%s1481_s16 + $0x10] sm:$0xff]   ;;  %s388_s12 = scalar_lea.vmem %s1558_s6, %s1562_s28 }
  0x1a   : > { %1227 = vmatpush3.bf16.msra.mxu1 %v1324_v25  ;;  %1206 = vmatprep.subr.bf16.mxu0 %v1325_v26  ;;  %v1348_v51 = vld [vmem:[%s1481_s16 + $0x28] sm:$0xff]   ;;  %v1349_v52 = vld [vmem:[%s1481_s16 + $0x20] sm:$0xff]   ;;  %v1354_v57 = vld [vmem:[%s1513_s19 + $0x38] sm:$0xff]  }
  0x1b   : > { %1228 = vmatprep.subr.bf16.mxu1 %v1326_v27  ;;  %v1352_v55 = vld [vmem:[%s1481_s16 + $0x8] sm:$0xff]   ;;  %v1353_v56 = vld [vmem:[%s1481_s16] sm:$0xff]   ;;  %v1355_v58 = vld [vmem:[%s1513_s19 + $0x30] sm:$0xff]  }
  0x1c   : > { %v1356_v59 = vld [vmem:[%s1513_s19 + $0x28] sm:$0xff]   ;;  %v1357_v60 = vld [vmem:[%s1513_s19 + $0x20] sm:$0xff]   ;;  %v1358_v61 = vld [vmem:[%s1513_s19 + $0x18] sm:$0xff]  }
  0x1d   : > { %1207 = vmatpush3.bf16.msra.mxu0 %v1327_v28  ;;  %v1359_v62 = vld [vmem:[%s1513_s19 + $0x10] sm:$0xff]   ;;  %v1144_v1 = vld [vmem:[%s372_s22] ss:$0 sm:$0xff]  ;;  %v1360_v14 = vld [vmem:[%s1513_s19 + $0x8] sm:$0xff]  }
  0x1e   : > { %1229 = vmatpush3.bf16.msra.mxu1 %v1328_v29  ;;  %1208 = vmatprep.subr.bf16.mxu0 %v1329_v30  ;;  %v1361_v15 = vld [vmem:[%s1513_s19] sm:$0xff]  }
  0x1f   : > { %1230 = vmatprep.subr.bf16.mxu1 %v1330_v31  ;;  %v1177_v16 = vld [vmem:[%s380_s25] ss:$0 sm:$0xff] }
  0x20   : > { %v1186_v24 = vld [vmem:[%s388_s12] ss:$0 sm:$0xff] }
  0x21   : > { %1209 = vmatpush3.bf16.msra.mxu0 %v1331_v32 }
  0x22   : > { %1231 = vmatpush3.bf16.msra.mxu1 %v1332_v33  ;;  %1210 = vmatprep.subr.bf16.mxu0 %v1333_v34 }
  0x23   : > { %1232 = vmatprep.subr.bf16.mxu1 %v1334_v35 }
  0x25   : > { %1211 = vmatpush3.bf16.msra.mxu0 %v1335_v36 }
  0x26   : > { %1233 = vmatpush3.bf16.msra.mxu1 %v1336_v37  ;;  %1212 = vmatprep.subr.bf16.mxu0 %v1337_v38 }
  0x27   : > { %1234 = vmatprep.subr.bf16.mxu1 %v1338_v39 }
  0x29   : > { %1213 = vmatpush3.bf16.msra.mxu0 %v1339_v40 }
  0x2a   : > { %1235 = vmatpush3.bf16.msra.mxu1 %v1340_v41  ;;  %1214 = vmatprep.subr.bf16.mxu0 %v1341_v42 }
  0x2b   : > { %1236 = vmatprep.subr.bf16.mxu1 %v1342_v43 }
  0x2d   : > { %1215 = vmatpush3.bf16.msra.mxu0 %v1343_v44 }
  0x2e   : > { %1237 = vmatpush3.bf16.msra.mxu1 %v1344_v45  ;;  %1262 = vmatprep.subr.bf16.mxu0 %v1371_v49 }
  0x2f   : > { %1282 = vmatprep.subr.bf16.mxu1 %v1371_v49 }
  0x30   : > { %721 = vmatmul.mubr.bf16.vlgmr.msra.gmra.mxu0 %v421_v46 }
  0x31   : > { %761 = vmatmul.mubr.bf16.vlgmr.msra.gmra.mxu1 %v423_v47  ;;  %1263 = vmatpush3.bf16.msra.mxu0 %v1346_v48 }
  0x32   : > { %1264 = vmatprep.subr.bf16.mxu0 %v1371_v49  ;;  %1278 = vmatprep.mubr.msk.bf16.mxu0 %vm1372_vm0, %v1371_v49 }
  0x33   : > { %1298 = vmatprep.mubr.msk.bf16.mxu1 %vm1372_vm0, %v1371_v49  ;;  %1283 = vmatpush3.bf16.msra.mxu1 %v1354_v57 }
  0x34   : > { %1284 = vmatprep.subr.bf16.mxu1 %v1371_v49 }
  0x35   : > { %1265 = vmatpush3.bf16.msra.mxu0 %v1347_v50 }
  0x36   : > { %1266 = vmatprep.subr.bf16.mxu0 %v1371_v49 }
  0x37   : > { %1285 = vmatpush3.bf16.msra.mxu1 %v1355_v58 }
  0x38   : > { %1286 = vmatprep.subr.bf16.mxu1 %v1371_v49 }
  0x39   : > { %1267 = vmatpush3.bf16.msra.mxu0 %v1348_v51 }
  0x3a   : > { %1268 = vmatprep.subr.bf16.mxu0 %v1371_v49 }
  0x3b   : > { %1287 = vmatpush3.bf16.msra.mxu1 %v1356_v59 }
  0x3c   : > { %1288 = vmatprep.subr.bf16.mxu1 %v1371_v49 }
  0x3d   : > { %1269 = vmatpush3.bf16.msra.mxu0 %v1349_v52 }
  0x3e   : > { %1270 = vmatprep.subr.bf16.mxu0 %v1371_v49 }
  0x3f   : > { %1289 = vmatpush3.bf16.msra.mxu1 %v1357_v60 }
  0x40   : > { %1290 = vmatprep.subr.bf16.mxu1 %v1371_v49 }
  0x41   : > { %1271 = vmatpush3.bf16.msra.mxu0 %v1350_v53 }
  0x42   : > { %1272 = vmatprep.subr.bf16.mxu0 %v1371_v49 }
  0x43   : > { %1291 = vmatpush3.bf16.msra.mxu1 %v1358_v61 }
  0x44   : > { %1292 = vmatprep.subr.bf16.mxu1 %v1371_v49 }
  0x45   : > { %1273 = vmatpush3.bf16.msra.mxu0 %v1351_v54 }
  0x46   : > { %1274 = vmatprep.subr.bf16.mxu0 %v1371_v49 }
  0x47   : > { %1293 = vmatpush3.bf16.msra.mxu1 %v1359_v62 }
  0x48   : > { %1294 = vmatprep.subr.bf16.mxu1 %v1371_v49 }
  0x49   : > { %1275 = vmatpush3.bf16.msra.mxu0 %v1352_v55 }
  0x4a   : > { %1276 = vmatprep.subr.bf16.mxu0 %v1371_v49 }
  0x4b   : > { %1295 = vmatpush3.bf16.msra.mxu1 %v1360_v14 }
  0x4c   : > { %1296 = vmatprep.subr.bf16.mxu1 %v1371_v49 }
  0x4d   : > { %1277 = vmatpush3.bf16.msra.mxu0 %v1353_v56 }
  0x4f   : > { %1297 = vmatpush3.bf16.msra.mxu1 %v1361_v15 }
  0xf0   : > { %v1216_v63 = vpop.f32.mrf.mxu0 }
  0xf1   : > { %v1238_v0 = vpop.f32.mrf.mxu1 }
  0xf2   : > { %v1217_v2 = vpop.f32.mrf.mxu0 }
  0xf3   : > { %v1218_v3 = vadd.f32 %v1217_v2, %v1216_v63  ;;  %v1239_v4 = vpop.f32.mrf.mxu1 }
  0xf4   : > { %v1219_v5 = vpop.f32.mrf.mxu0  ;;  %v1240_v7 = vadd.f32 %v1239_v4, %v1238_v0 }
  0xf5   : > { %v723_v6 = vadd.f32 %v1218_v3, %v1144_v1  ;;  %v1241_v8 = vpop.f32.mrf.mxu1 }
  0xf6   : > { %v1220_v9 = vpop.f32.mrf.mxu0 }
  0xf7   : > { %v763_v10 = vadd.f32 %v1240_v7, %v723_v6  ;;  %v1242_v11 = vpop.f32.mrf.mxu1 }
  0xf9   : > { %v768_v12 = vmax.f32 %v763_v10, 0.0 }
  0xfb   : > { %v769_v13 = vpack.c.bf16 %v768_v12, %v768_v12 }
  0xfd   : > { %1279 = vmatmul.mubr.bf16.vlgmr.msra.gmra.mxu0 %v769_v13 }
 0x1bd   : > { %v875_v17 = vpop.f32.mrf.mxu0 }
 0x1be   : > { %v876_v18 = vadd.f32 %v1177_v16, %v875_v17 }
 0x1bf   : > { %v1280_v19 = vpop.f32.mrf.mxu0 }
 0x1c0   : > { %v881_v20 = vmax.f32 %v876_v18, 0.0 }
 0x1c1   : > { %v878_v21 = vpop.f32.mrf.mxu0 }
 0x1c2   : > { %882 = vst [vmem:[%s392_s9] sm:$0x3] %v881_v20  ;;  %v883_v22 = vpack.c.bf16 %v881_v20, %v881_v20 }
 0x1c3   : > { %v1281_v23 = vpop.f32.mrf.mxu0 }
 0x1c4   : > { %1299 = vmatmul.mubr.bf16.vlgmr.msra.gmra.mxu1 %v883_v22 }
 0x284   : > { %v989_v25 = vpop.f32.mrf.mxu1 }
 0x285   : > { %v990_v26 = vadd.f32 %v1186_v24, %v989_v25 }
 0x286   : > { %v1300_v27 = vpop.f32.mrf.mxu1 }
 0x287   : > { %995 = vst [vmem:[%s396_s15] sm:$0x3] %v990_v26 }
 0x288   : > { %v992_v28 = vpop.f32.mrf.mxu1 }
 0x28a   : > { %v1301_v29 = vpop.f32.mrf.mxu1 }
 0x28b PF: > { %s19_s27 = sadd.s32 1, %s1368_s27  }
 0x28c   : > { %p16_p4 = scmp.ge.s32.totalorder %s19_s27, 4  }
 0x28e   :  { %18 = sbr.rel (!%p16_p4) target bundleno = 1 (0x1), region = 105 }

</bundles_post_ra>
